<compile_context>
chip_gen: v7x
topology: tpu7x:2x2x1
jax: 0.10.0
libtpu: 0.0.40
codegen_flags: <defaults>
</compile_context>

<pallas_src>
import functools

import jax
import jax.numpy as jnp
import numpy as np
from jax.experimental import pallas as pl
from jax.experimental.pallas import tpu as pltpu

LANE = 128
_VMEM_LIMIT = 48 * 1024 * 1024  # headroom below v7x's 64 MiB physical VMEM


def _round_up(x, m):
    return (x + m - 1) // m * m


def conv_bn_stats_kernel(x_ref, w_ref, sc_ref, sh_ref, y_ref, stats_ref, xs_ref,
                         *, H, W, apply_bn_relu):
    """One image per grid step.

    x_ref    : (1, H+2, W+2, Cin_p)  spatially padded input (bf16)
    w_ref    : (3, 3, Cin_p, Cout_p) conv weights (bf16)
    sc_ref   : (1, Cin_p)            BN scale applied to the *input* (f32)
    sh_ref   : (1, Cin_p)            BN shift applied to the *input* (f32)
    y_ref    : (1, H, W, Cout_p)     pre-BN conv output (bf16)
    stats_ref: (1, 2, Cout_p)        per-image [sum, sum_sq] of conv out (f32)
    xs_ref   : (H+2, W+2, Cin_p)     bf16 scratch for the BN+ReLU'd input
    """
    cin_p = w_ref.shape[2]
    cout_p = w_ref.shape[3]

    if apply_bn_relu:
        # Fused BN-apply + ReLU on the padded input, then zero the 1-px border
        # so it matches PyTorch's zero padding of the *post*-BN activation.
        xin = x_ref[0].astype(jnp.float32)                      # (H+2, W+2, C)
        h = jnp.maximum(xin * sc_ref[0] + sh_ref[0], 0.0)
        row = jax.lax.broadcasted_iota(jnp.int32, h.shape, 0)
        col = jax.lax.broadcasted_iota(jnp.int32, h.shape, 1)
        interior = (row >= 1) & (row <= H) & (col >= 1) & (col <= W)
        xs_ref[...] = jnp.where(interior, h, 0.0).astype(jnp.bfloat16)

        def tap(dy, dx):
            return xs_ref[dy:dy + H, dx:dx + W, :]
    else:
        def tap(dy, dx):
            return x_ref[0, dy:dy + H, dx:dx + W, :]

    # 3x3 conv as 9 shifted (H*W, Cin_p) x (Cin_p, Cout_p) bf16 MXU matmuls,
    # accumulated in f32.
    acc = jnp.zeros((H * W, cout_p), jnp.float32)
    for dy in range(3):
        for dx in range(3):
            patch = tap(dy, dx).reshape(H * W, cin_p)
            acc = acc + jnp.dot(patch, w_ref[dy, dx],
                                preferred_element_type=jnp.float32)

    y_ref[...] = acc.reshape(1, H, W, cout_p).astype(y_ref.dtype)

    # One-pass per-step BN statistics (combined across the grid in the wrapper).
    stats_ref[0, 0:1, :] = jnp.sum(acc, axis=0, keepdims=True)
    stats_ref[0, 1:2, :] = jnp.sum(acc * acc, axis=0, keepdims=True)


def bn_relu_kernel(y_ref, sc_ref, sh_ref, o_ref):
    y = y_ref[...].astype(jnp.float32)
    o_ref[...] = jnp.maximum(y * sc_ref[0] + sh_ref[0], 0.0).astype(o_ref.dtype)


def _conv_bn_stats(x_pad, w, scale, shift, *, apply_bn_relu):
    N, hp2, wp2, cin_p = x_pad.shape
    H, W = hp2 - 2, wp2 - 2
    cout_p = w.shape[-1]
    kernel = functools.partial(conv_bn_stats_kernel, H=H, W=W,
                               apply_bn_relu=apply_bn_relu)
    vmem_full = pl.BlockSpec(memory_space=pltpu.MemorySpace.VMEM)
    y, stats = pl.pallas_call(
        kernel,
        grid=(N,),
        in_specs=[
            pl.BlockSpec((1, hp2, wp2, cin_p), lambda n: (n, 0, 0, 0)),
            vmem_full,   # weights (resident)
            vmem_full,   # input-BN scale
            vmem_full,   # input-BN shift
        ],
        out_specs=[
            pl.BlockSpec((1, H, W, cout_p), lambda n: (n, 0, 0, 0)),
            pl.BlockSpec((1, 2, cout_p), lambda n: (n, 0, 0)),
        ],
        out_shape=[
            jax.ShapeDtypeStruct((N, H, W, cout_p), jnp.bfloat16),
            jax.ShapeDtypeStruct((N, 2, cout_p), jnp.float32),
        ],
        scratch_shapes=[pltpu.VMEM((hp2, wp2, cin_p), jnp.bfloat16)],
        compiler_params=pltpu.CompilerParams(
            dimension_semantics=("parallel",),
            vmem_limit_bytes=_VMEM_LIMIT),
    )(x_pad, w, scale, shift)
    return y, stats


def _bn_relu(y, scale, shift):
    N, H, W, C = y.shape
    return pl.pallas_call(
        bn_relu_kernel,
        grid=(N,),
        in_specs=[
            pl.BlockSpec((1, H, W, C), lambda n: (n, 0, 0, 0)),
            pl.BlockSpec(memory_space=pltpu.MemorySpace.VMEM),
            pl.BlockSpec(memory_space=pltpu.MemorySpace.VMEM),
        ],
        out_specs=pl.BlockSpec((1, H, W, C), lambda n: (n, 0, 0, 0)),
        out_shape=jax.ShapeDtypeStruct((N, H, W, C), jnp.float32),
        compiler_params=pltpu.CompilerParams(
            dimension_semantics=("parallel",),
            vmem_limit_bytes=_VMEM_LIMIT),
    )(y, scale, shift)


def _finalize_bn(stats, gamma_p, beta_p, count, eps):
    """Combine per-grid-step partial sums into per-channel scale/shift (f32)."""
    s = jnp.sum(stats[:, 0, :], axis=0)
    ss = jnp.sum(stats[:, 1, :], axis=0)
    mean = s / count
    var = jnp.maximum(ss / count - mean * mean, 0.0)   # guard cancellation
    scale = gamma_p * jax.lax.rsqrt(var + eps)
    shift = beta_p - mean * scale
    return scale[None, :], shift[None, :]


@functools.partial(jax.jit, static_argnames=("eps",))
def double_conv(x_nchw, w1, g1, b1, w2, g2, b2, *, eps=1e-5):
    """x_nchw: (N, Cin, H, W); w1: (Cout, Cin, 3, 3); w2: (Cout, Cout, 3, 3)."""
    N, Cin, H, W = x_nchw.shape
    Cout = w1.shape[0]
    cin_p = max(LANE, _round_up(Cin, LANE))
    cout_p = max(LANE, _round_up(Cout, LANE))
    count = float(N * H * W)

    # ---- layout glue: NCHW -> NHWC, zero-pad channels to lane width,
    #      spatial pad=1, bf16 activations/weights, f32 BN params.
    x = jnp.transpose(x_nchw, (0, 2, 3, 1)).astype(jnp.float32)
    x = jnp.pad(x, ((0, 0), (1, 1), (1, 1), (0, cin_p - Cin))).astype(jnp.bfloat16)

    def prep_w(w, ci, ci_p):
        wk = jnp.transpose(w, (2, 3, 1, 0)).astype(jnp.float32)      # (3,3,Ci,Co)
        wk = jnp.pad(wk, ((0, 0), (0, 0), (0, ci_p - ci), (0, cout_p - Cout)))
        return wk.astype(jnp.bfloat16)

    w1_k = prep_w(w1, Cin, cin_p)
    w2_k = prep_w(w2, Cout, cout_p)

    def prep_v(v):
        return jnp.pad(v.astype(jnp.float32), (0, cout_p - Cout))

    g1p, b1p, g2p, b2p = prep_v(g1), prep_v(b1), prep_v(g2), prep_v(b2)

    ones = jnp.ones((1, cin_p), jnp.float32)
    zeros = jnp.zeros((1, cin_p), jnp.float32)

    # ---- conv1 + partial BN1 stats (accumulate)
    y1, stats1 = _conv_bn_stats(x, w1_k, ones, zeros, apply_bn_relu=False)
    scale1, shift1 = _finalize_bn(stats1, g1p, b1p, count, eps)      # finalize

    # ---- BN1+ReLU fused in-kernel, conv2 + partial BN2 stats
    y1_pad = jnp.pad(y1, ((0, 0), (1, 1), (1, 1), (0, 0)))
    y2, stats2 = _conv_bn_stats(y1_pad, w2_k, scale1, shift1, apply_bn_relu=True)
    scale2, shift2 = _finalize_bn(stats2, g2p, b2p, count, eps)

    # ---- BN2 + ReLU epilogue (lane-dense elementwise kernel)
    out_nhwc = _bn_relu(y2, scale2, shift2)

    out = out_nhwc[:, :, :, :Cout]
    return jnp.transpose(out, (0, 3, 1, 2))


def double_conv_ref(x, w1, g1, b1, w2, g2, b2, *, eps=1e-5):
    """Pure-JAX f32 reference (PyTorch module semantics in train mode)."""
    def conv(h, w):
        return jax.lax.conv_general_dilated(
            h, w, window_strides=(1, 1), padding=((1, 1), (1, 1)),
            dimension_numbers=('NCHW', 'OIHW', 'NCHW'))

    def bn_relu(h, g, b):
        mean = jnp.mean(h, axis=(0, 2, 3), keepdims=True)
        var = jnp.mean((h - mean) ** 2, axis=(0, 2, 3), keepdims=True)
        h = (h - mean) * jax.lax.rsqrt(var + eps)
        h = h * g.reshape(1, -1, 1, 1) + b.reshape(1, -1, 1, 1)
        return jnp.maximum(h, 0.0)

    h = bn_relu(conv(x, w1), g1, b1)
    return bn_relu(conv(h, w2), g2, b2)


if __name__ == "__main__":
    N, Cin, Cout, H, W = 2, 4, 8, 16, 16

    key = jax.random.PRNGKey(0)
    kx, kw1, kw2 = jax.random.split(key, 3)

    x = jax.random.normal(kx, (N, Cin, H, W), jnp.float32)
    w1 = jax.random.normal(kw1, (Cout, Cin, 3, 3), jnp.float32) * (1.0 / np.sqrt(Cin * 9))
    w2 = jax.random.normal(kw2, (Cout, Cout, 3, 3), jnp.float32) * (1.0 / np.sqrt(Cout * 9))
    # PyTorch BatchNorm2d default affine init: gamma=1, beta=0
    g1 = jnp.ones((Cout,), jnp.float32)
    b1 = jnp.zeros((Cout,), jnp.float32)
    g2 = jnp.ones((Cout,), jnp.float32)
    b2 = jnp.zeros((Cout,), jnp.float32)

    out = jax.block_until_ready(double_conv(x, w1, g1, b1, w2, g2, b2))
    ref = jax.block_until_ready(double_conv_ref(x, w1, g1, b1, w2, g2, b2))

    # bf16 MXU matmuls (f32 accumulation / f32 BN stats) -> loosened tolerance.
    np.testing.assert_allclose(np.asarray(out), np.asarray(ref),
                               rtol=5e-2, atol=5e-2)
    print("KERNEL_OK")
</pallas_src>

<mosaic_0001>
module attributes {stable_mosaic.version = 11 : i64} {
  func.func @conv_bn_stats_kernel(%arg0: i32, %arg1: memref<1x18x18x128xbf16, #tpu.memory_space<vmem>>, %arg2: memref<3x3x128x128xbf16, #tpu.memory_space<vmem>>, %arg3: memref<1x128xf32, #tpu.memory_space<vmem>>, %arg4: memref<1x128xf32, #tpu.memory_space<vmem>>, %arg5: memref<1x16x16x128xbf16, #tpu.memory_space<vmem>>, %arg6: memref<1x2x128xf32, #tpu.memory_space<vmem>>, %arg7: memref<18x18x128xbf16, #tpu.memory_space<vmem>>) attributes {dimension_semantics = [#tpu.dimension_semantics<parallel>], iteration_bounds = array<i64: 2>, scalar_prefetch = 0 : i64, scratch_operands = 1 : i64, tpu.core_type = #tpu.core_type<tc>, window_params = [{transform_indices = @transform_0, window_bounds = array<i64: 1, 18, 18, 128>}, {pipeline_mode = #tpu.pipeline_mode<synchronous>, transform_indices = @transform_1, window_bounds = array<i64: 3, 3, 128, 128>}, {pipeline_mode = #tpu.pipeline_mode<synchronous>, transform_indices = @transform_2, window_bounds = array<i64: 1, 128>}, {pipeline_mode = #tpu.pipeline_mode<synchronous>, transform_indices = @transform_3, window_bounds = array<i64: 1, 128>}, {transform_indices = @transform_4, window_bounds = array<i64: 1, 16, 16, 128>}, {transform_indices = @transform_5, window_bounds = array<i64: 1, 2, 128>}]} {
    %cst = arith.constant 0.000000e+00 : f32
    %0 = vector.broadcast %cst : f32 to vector<256x128xf32>
    %c0 = arith.constant 0 : index
    %c0_0 = arith.constant 0 : index
    %c0_1 = arith.constant 0 : index
    %c0_2 = arith.constant 0 : index
    %1 = vector.load %arg1[%c0, %c0_0, %c0_1, %c0_2] : memref<1x18x18x128xbf16, #tpu.memory_space<vmem>>, vector<1x16x16x128xbf16>
    %2 = vector.shape_cast %1 : vector<1x16x16x128xbf16> to vector<16x16x128xbf16>
    %3 = vector.shape_cast %2 : vector<16x16x128xbf16> to vector<256x128xbf16>
    %c0_3 = arith.constant 0 : index
    %c0_4 = arith.constant 0 : index
    %c0_5 = arith.constant 0 : index
    %c0_6 = arith.constant 0 : index
    %4 = vector.load %arg2[%c0_3, %c0_4, %c0_5, %c0_6] : memref<3x3x128x128xbf16, #tpu.memory_space<vmem>>, vector<1x1x128x128xbf16>
    %5 = vector.shape_cast %4 : vector<1x1x128x128xbf16> to vector<128x128xbf16>
    %cst_7 = arith.constant dense<0.000000e+00> : vector<256x128xf32>
    %6 = tpu.matmul %3, %5, %cst_7 {dimension_numbers = #tpu.dot_dimension_numbers<[1], [0], [0], [1], [0, 0, 1, 1], [], []>} : vector<256x128xbf16>, vector<128x128xbf16>, vector<256x128xf32> -> vector<256x128xf32>
    %7 = arith.addf %0, %6 : vector<256x128xf32>
    %c0_8 = arith.constant 0 : index
    %c0_9 = arith.constant 0 : index
    %c1 = arith.constant 1 : index
    %c0_10 = arith.constant 0 : index
    %8 = vector.load %arg1[%c0_8, %c0_9, %c1, %c0_10] : memref<1x18x18x128xbf16, #tpu.memory_space<vmem>>, vector<1x16x16x128xbf16>
    %9 = vector.shape_cast %8 : vector<1x16x16x128xbf16> to vector<16x16x128xbf16>
    %10 = vector.shape_cast %9 : vector<16x16x128xbf16> to vector<256x128xbf16>
    %c0_11 = arith.constant 0 : index
    %c1_12 = arith.constant 1 : index
    %c0_13 = arith.constant 0 : index
    %c0_14 = arith.constant 0 : index
    %11 = vector.load %arg2[%c0_11, %c1_12, %c0_13, %c0_14] : memref<3x3x128x128xbf16, #tpu.memory_space<vmem>>, vector<1x1x128x128xbf16>
    %12 = vector.shape_cast %11 : vector<1x1x128x128xbf16> to vector<128x128xbf16>
    %cst_15 = arith.constant dense<0.000000e+00> : vector<256x128xf32>
    %13 = tpu.matmul %10, %12, %cst_15 {dimension_numbers = #tpu.dot_dimension_numbers<[1], [0], [0], [1], [0, 0, 1, 1], [], []>} : vector<256x128xbf16>, vector<128x128xbf16>, vector<256x128xf32> -> vector<256x128xf32>
    %14 = arith.addf %7, %13 : vector<256x128xf32>
    %c0_16 = arith.constant 0 : index
    %c0_17 = arith.constant 0 : index
    %c2 = arith.constant 2 : index
    %c0_18 = arith.constant 0 : index
    %15 = vector.load %arg1[%c0_16, %c0_17, %c2, %c0_18] : memref<1x18x18x128xbf16, #tpu.memory_space<vmem>>, vector<1x16x16x128xbf16>
    %16 = vector.shape_cast %15 : vector<1x16x16x128xbf16> to vector<16x16x128xbf16>
    %17 = vector.shape_cast %16 : vector<16x16x128xbf16> to vector<256x128xbf16>
    %c0_19 = arith.constant 0 : index
    %c2_20 = arith.constant 2 : index
    %c0_21 = arith.constant 0 : index
    %c0_22 = arith.constant 0 : index
    %18 = vector.load %arg2[%c0_19, %c2_20, %c0_21, %c0_22] : memref<3x3x128x128xbf16, #tpu.memory_space<vmem>>, vector<1x1x128x128xbf16>
    %19 = vector.shape_cast %18 : vector<1x1x128x128xbf16> to vector<128x128xbf16>
    %cst_23 = arith.constant dense<0.000000e+00> : vector<256x128xf32>
    %20 = tpu.matmul %17, %19, %cst_23 {dimension_numbers = #tpu.dot_dimension_numbers<[1], [0], [0], [1], [0, 0, 1, 1], [], []>} : vector<256x128xbf16>, vector<128x128xbf16>, vector<256x128xf32> -> vector<256x128xf32>
    %21 = arith.addf %14, %20 : vector<256x128xf32>
    %c0_24 = arith.constant 0 : index
    %c1_25 = arith.constant 1 : index
    %c0_26 = arith.constant 0 : index
    %c0_27 = arith.constant 0 : index
    %22 = vector.load %arg1[%c0_24, %c1_25, %c0_26, %c0_27] : memref<1x18x18x128xbf16, #tpu.memory_space<vmem>>, vector<1x16x16x128xbf16>
    %23 = vector.shape_cast %22 : vector<1x16x16x128xbf16> to vector<16x16x128xbf16>
    %24 = vector.shape_cast %23 : vector<16x16x128xbf16> to vector<256x128xbf16>
    %c1_28 = arith.constant 1 : index
    %c0_29 = arith.constant 0 : index
    %c0_30 = arith.constant 0 : index
    %c0_31 = arith.constant 0 : index
    %25 = vector.load %arg2[%c1_28, %c0_29, %c0_30, %c0_31] : memref<3x3x128x128xbf16, #tpu.memory_space<vmem>>, vector<1x1x128x128xbf16>
    %26 = vector.shape_cast %25 : vector<1x1x128x128xbf16> to vector<128x128xbf16>
    %cst_32 = arith.constant dense<0.000000e+00> : vector<256x128xf32>
    %27 = tpu.matmul %24, %26, %cst_32 {dimension_numbers = #tpu.dot_dimension_numbers<[1], [0], [0], [1], [0, 0, 1, 1], [], []>} : vector<256x128xbf16>, vector<128x128xbf16>, vector<256x128xf32> -> vector<256x128xf32>
    %28 = arith.addf %21, %27 : vector<256x128xf32>
    %c0_33 = arith.constant 0 : index
    %c1_34 = arith.constant 1 : index
    %c1_35 = arith.constant 1 : index
    %c0_36 = arith.constant 0 : index
    %29 = vector.load %arg1[%c0_33, %c1_34, %c1_35, %c0_36] : memref<1x18x18x128xbf16, #tpu.memory_space<vmem>>, vector<1x16x16x128xbf16>
    %30 = vector.shape_cast %29 : vector<1x16x16x128xbf16> to vector<16x16x128xbf16>
    %31 = vector.shape_cast %30 : vector<16x16x128xbf16> to vector<256x128xbf16>
    %c1_37 = arith.constant 1 : index
    %c1_38 = arith.constant 1 : index
    %c0_39 = arith.constant 0 : index
    %c0_40 = arith.constant 0 : index
    %32 = vector.load %arg2[%c1_37, %c1_38, %c0_39, %c0_40] : memref<3x3x128x128xbf16, #tpu.memory_space<vmem>>, vector<1x1x128x128xbf16>
    %33 = vector.shape_cast %32 : vector<1x1x128x128xbf16> to vector<128x128xbf16>
    %cst_41 = arith.constant dense<0.000000e+00> : vector<256x128xf32>
    %34 = tpu.matmul %31, %33, %cst_41 {dimension_numbers = #tpu.dot_dimension_numbers<[1], [0], [0], [1], [0, 0, 1, 1], [], []>} : vector<256x128xbf16>, vector<128x128xbf16>, vector<256x128xf32> -> vector<256x128xf32>
    %35 = arith.addf %28, %34 : vector<256x128xf32>
    %c0_42 = arith.constant 0 : index
    %c1_43 = arith.constant 1 : index
    %c2_44 = arith.constant 2 : index
    %c0_45 = arith.constant 0 : index
    %36 = vector.load %arg1[%c0_42, %c1_43, %c2_44, %c0_45] : memref<1x18x18x128xbf16, #tpu.memory_space<vmem>>, vector<1x16x16x128xbf16>
    %37 = vector.shape_cast %36 : vector<1x16x16x128xbf16> to vector<16x16x128xbf16>
    %38 = vector.shape_cast %37 : vector<16x16x128xbf16> to vector<256x128xbf16>
    %c1_46 = arith.constant 1 : index
    %c2_47 = arith.constant 2 : index
    %c0_48 = arith.constant 0 : index
    %c0_49 = arith.constant 0 : index
    %39 = vector.load %arg2[%c1_46, %c2_47, %c0_48, %c0_49] : memref<3x3x128x128xbf16, #tpu.memory_space<vmem>>, vector<1x1x128x128xbf16>
    %40 = vector.shape_cast %39 : vector<1x1x128x128xbf16> to vector<128x128xbf16>
    %cst_50 = arith.constant dense<0.000000e+00> : vector<256x128xf32>
    %41 = tpu.matmul %38, %40, %cst_50 {dimension_numbers = #tpu.dot_dimension_numbers<[1], [0], [0], [1], [0, 0, 1, 1], [], []>} : vector<256x128xbf16>, vector<128x128xbf16>, vector<256x128xf32> -> vector<256x128xf32>
    %42 = arith.addf %35, %41 : vector<256x128xf32>
    %c0_51 = arith.constant 0 : index
    %c2_52 = arith.constant 2 : index
    %c0_53 = arith.constant 0 : index
    %c0_54 = arith.constant 0 : index
    %43 = vector.load %arg1[%c0_51, %c2_52, %c0_53, %c0_54] : memref<1x18x18x128xbf16, #tpu.memory_space<vmem>>, vector<1x16x16x128xbf16>
    %44 = vector.shape_cast %43 : vector<1x16x16x128xbf16> to vector<16x16x128xbf16>
    %45 = vector.shape_cast %44 : vector<16x16x128xbf16> to vector<256x128xbf16>
    %c2_55 = arith.constant 2 : index
    %c0_56 = arith.constant 0 : index
    %c0_57 = arith.constant 0 : index
    %c0_58 = arith.constant 0 : index
    %46 = vector.load %arg2[%c2_55, %c0_56, %c0_57, %c0_58] : memref<3x3x128x128xbf16, #tpu.memory_space<vmem>>, vector<1x1x128x128xbf16>
    %47 = vector.shape_cast %46 : vector<1x1x128x128xbf16> to vector<128x128xbf16>
    %cst_59 = arith.constant dense<0.000000e+00> : vector<256x128xf32>
    %48 = tpu.matmul %45, %47, %cst_59 {dimension_numbers = #tpu.dot_dimension_numbers<[1], [0], [0], [1], [0, 0, 1, 1], [], []>} : vector<256x128xbf16>, vector<128x128xbf16>, vector<256x128xf32> -> vector<256x128xf32>
    %49 = arith.addf %42, %48 : vector<256x128xf32>
    %c0_60 = arith.constant 0 : index
    %c2_61 = arith.constant 2 : index
    %c1_62 = arith.constant 1 : index
    %c0_63 = arith.constant 0 : index
    %50 = vector.load %arg1[%c0_60, %c2_61, %c1_62, %c0_63] : memref<1x18x18x128xbf16, #tpu.memory_space<vmem>>, vector<1x16x16x128xbf16>
    %51 = vector.shape_cast %50 : vector<1x16x16x128xbf16> to vector<16x16x128xbf16>
    %52 = vector.shape_cast %51 : vector<16x16x128xbf16> to vector<256x128xbf16>
    %c2_64 = arith.constant 2 : index
    %c1_65 = arith.constant 1 : index
    %c0_66 = arith.constant 0 : index
    %c0_67 = arith.constant 0 : index
    %53 = vector.load %arg2[%c2_64, %c1_65, %c0_66, %c0_67] : memref<3x3x128x128xbf16, #tpu.memory_space<vmem>>, vector<1x1x128x128xbf16>
    %54 = vector.shape_cast %53 : vector<1x1x128x128xbf16> to vector<128x128xbf16>
    %cst_68 = arith.constant dense<0.000000e+00> : vector<256x128xf32>
    %55 = tpu.matmul %52, %54, %cst_68 {dimension_numbers = #tpu.dot_dimension_numbers<[1], [0], [0], [1], [0, 0, 1, 1], [], []>} : vector<256x128xbf16>, vector<128x128xbf16>, vector<256x128xf32> -> vector<256x128xf32>
    %56 = arith.addf %49, %55 : vector<256x128xf32>
    %c0_69 = arith.constant 0 : index
    %c2_70 = arith.constant 2 : index
    %c2_71 = arith.constant 2 : index
    %c0_72 = arith.constant 0 : index
    %57 = vector.load %arg1[%c0_69, %c2_70, %c2_71, %c0_72] : memref<1x18x18x128xbf16, #tpu.memory_space<vmem>>, vector<1x16x16x128xbf16>
    %58 = vector.shape_cast %57 : vector<1x16x16x128xbf16> to vector<16x16x128xbf16>
    %59 = vector.shape_cast %58 : vector<16x16x128xbf16> to vector<256x128xbf16>
    %c2_73 = arith.constant 2 : index
    %c2_74 = arith.constant 2 : index
    %c0_75 = arith.constant 0 : index
    %c0_76 = arith.constant 0 : index
    %60 = vector.load %arg2[%c2_73, %c2_74, %c0_75, %c0_76] : memref<3x3x128x128xbf16, #tpu.memory_space<vmem>>, vector<1x1x128x128xbf16>
    %61 = vector.shape_cast %60 : vector<1x1x128x128xbf16> to vector<128x128xbf16>
    %cst_77 = arith.constant dense<0.000000e+00> : vector<256x128xf32>
    %62 = tpu.matmul %59, %61, %cst_77 {dimension_numbers = #tpu.dot_dimension_numbers<[1], [0], [0], [1], [0, 0, 1, 1], [], []>} : vector<256x128xbf16>, vector<128x128xbf16>, vector<256x128xf32> -> vector<256x128xf32>
    %63 = arith.addf %56, %62 : vector<256x128xf32>
    %64 = vector.shape_cast %63 : vector<256x128xf32> to vector<1x16x16x128xf32>
    %65 = arith.truncf %64 : vector<1x16x16x128xf32> to vector<1x16x16x128xbf16>
    %c0_78 = arith.constant 0 : index
    %c0_79 = arith.constant 0 : index
    %c0_80 = arith.constant 0 : index
    %c0_81 = arith.constant 0 : index
    %66 = vector.load %arg5[%c0_78, %c0_79, %c0_80, %c0_81] : memref<1x16x16x128xbf16, #tpu.memory_space<vmem>>, vector<1x16x16x128xbf16>
    tpu.vector_store %arg5[%c0_78, %c0_79, %c0_80, %c0_81], %65 {strides = array<i32>} : memref<1x16x16x128xbf16, #tpu.memory_space<vmem>>, vector<1x16x16x128xbf16>,
    %cst_82 = arith.constant dense<0.000000e+00> : vector<128xf32>
    %67 = vector.multi_reduction <add>, %63, %cst_82 [0] : vector<256x128xf32> to vector<128xf32>
    %68 = vector.shape_cast %67 : vector<128xf32> to vector<1x128xf32>
    %c0_83 = arith.constant 0 : index
    %c0_84 = arith.constant 0 : index
    %c0_85 = arith.constant 0 : index
    %69 = vector.load %arg6[%c0_83, %c0_84, %c0_85] : memref<1x2x128xf32, #tpu.memory_space<vmem>>, vector<1x1x128xf32>
    %70 = vector.shape_cast %69 : vector<1x1x128xf32> to vector<1x128xf32>
    %71 = vector.shape_cast %68 : vector<1x128xf32> to vector<1x1x128xf32>
    tpu.vector_store %arg6[%c0_83, %c0_84, %c0_85], %71 {strides = array<i32>} : memref<1x2x128xf32, #tpu.memory_space<vmem>>, vector<1x1x128xf32>,
    %72 = arith.mulf %63, %63 : vector<256x128xf32>
    %cst_86 = arith.constant dense<0.000000e+00> : vector<128xf32>
    %73 = vector.multi_reduction <add>, %72, %cst_86 [0] : vector<256x128xf32> to vector<128xf32>
    %74 = vector.shape_cast %73 : vector<128xf32> to vector<1x128xf32>
    %c0_87 = arith.constant 0 : index
    %c1_88 = arith.constant 1 : index
    %c0_89 = arith.constant 0 : index
    %75 = vector.load %arg6[%c0_87, %c1_88, %c0_89] : memref<1x2x128xf32, #tpu.memory_space<vmem>>, vector<1x1x128xf32>
    %76 = vector.shape_cast %75 : vector<1x1x128xf32> to vector<1x128xf32>
    %77 = vector.shape_cast %74 : vector<1x128xf32> to vector<1x1x128xf32>
    tpu.vector_store %arg6[%c0_87, %c1_88, %c0_89], %77 {strides = array<i32>} : memref<1x2x128xf32, #tpu.memory_space<vmem>>, vector<1x1x128xf32>,
    return
  }
  func.func @transform_0(%arg0: i32) -> (i32, i32, i32, i32) {
    %c0_i32 = arith.constant 0 : i32
    %c0_i32_0 = arith.constant 0 : i32
    %c0_i32_1 = arith.constant 0 : i32
    %c0_i32_2 = arith.constant 0 : i32
    return %arg0, %c0_i32, %c0_i32_0, %c0_i32_1 : i32, i32, i32, i32
  }
  func.func @transform_1(%arg0: i32) -> (i32, i32, i32, i32) {
    %c0_i32 = arith.constant 0 : i32
    %c0_i32_0 = arith.constant 0 : i32
    %c0_i32_1 = arith.constant 0 : i32
    %c0_i32_2 = arith.constant 0 : i32
    %c0_i32_3 = arith.constant 0 : i32
    return %c0_i32, %c0_i32_0, %c0_i32_1, %c0_i32_2 : i32, i32, i32, i32
  }
  func.func @transform_2(%arg0: i32) -> (i32, i32) {
    %c0_i32 = arith.constant 0 : i32
    %c0_i32_0 = arith.constant 0 : i32
    %c0_i32_1 = arith.constant 0 : i32
    return %c0_i32, %c0_i32_0 : i32, i32
  }
  func.func @transform_3(%arg0: i32) -> (i32, i32) {
    %c0_i32 = arith.constant 0 : i32
    %c0_i32_0 = arith.constant 0 : i32
    %c0_i32_1 = arith.constant 0 : i32
    return %c0_i32, %c0_i32_0 : i32, i32
  }
  func.func @transform_4(%arg0: i32) -> (i32, i32, i32, i32) {
    %c0_i32 = arith.constant 0 : i32
    %c0_i32_0 = arith.constant 0 : i32
    %c0_i32_1 = arith.constant 0 : i32
    %c0_i32_2 = arith.constant 0 : i32
    return %arg0, %c0_i32, %c0_i32_0, %c0_i32_1 : i32, i32, i32, i32
  }
  func.func @transform_5(%arg0: i32) -> (i32, i32, i32) {
    %c0_i32 = arith.constant 0 : i32
    %c0_i32_0 = arith.constant 0 : i32
    %c0_i32_1 = arith.constant 0 : i32
    return %arg0, %c0_i32, %c0_i32_0 : i32, i32, i32
  }
}

module attributes {stable_mosaic.version = 11 : i64} {
  func.func @bn_relu_kernel(%arg0: i32, %arg1: memref<1x16x16x128xbf16, #tpu.memory_space<vmem>>, %arg2: memref<1x128xf32, #tpu.memory_space<vmem>>, %arg3: memref<1x128xf32, #tpu.memory_space<vmem>>, %arg4: memref<1x16x16x128xf32, #tpu.memory_space<vmem>>) attributes {dimension_semantics = [#tpu.dimension_semantics<parallel>], iteration_bounds = array<i64: 2>, scalar_prefetch = 0 : i64, scratch_operands = 0 : i64, tpu.core_type = #tpu.core_type<tc>, window_params = [{transform_indices = @transform_0, window_bounds = array<i64: 1, 16, 16, 128>}, {pipeline_mode = #tpu.pipeline_mode<synchronous>, transform_indices = @transform_1, window_bounds = array<i64: 1, 128>}, {pipeline_mode = #tpu.pipeline_mode<synchronous>, transform_indices = @transform_2, window_bounds = array<i64: 1, 128>}, {transform_indices = @transform_3, window_bounds = array<i64: 1, 16, 16, 128>}]} {
    %c0 = arith.constant 0 : index
    %c0_0 = arith.constant 0 : index
    %c0_1 = arith.constant 0 : index
    %c0_2 = arith.constant 0 : index
    %0 = vector.load %arg1[%c0, %c0_0, %c0_1, %c0_2] : memref<1x16x16x128xbf16, #tpu.memory_space<vmem>>, vector<1x16x16x128xbf16>
    %1 = arith.extf %0 : vector<1x16x16x128xbf16> to vector<1x16x16x128xf32>
    %c0_3 = arith.constant 0 : index
    %c0_4 = arith.constant 0 : index
    %2 = vector.load %arg2[%c0_3, %c0_4] : memref<1x128xf32, #tpu.memory_space<vmem>>, vector<1x128xf32>
    %3 = vector.shape_cast %2 : vector<1x128xf32> to vector<128xf32>
    %4 = vector.shape_cast %3 : vector<128xf32> to vector<1x1x1x128xf32>
    %5 = vector.broadcast %4 : vector<1x1x1x128xf32> to vector<1x16x16x128xf32>
    %6 = arith.mulf %1, %5 : vector<1x16x16x128xf32>
    %c0_5 = arith.constant 0 : index
    %c0_6 = arith.constant 0 : index
    %7 = vector.load %arg3[%c0_5, %c0_6] : memref<1x128xf32, #tpu.memory_space<vmem>>, vector<1x128xf32>
    %8 = vector.shape_cast %7 : vector<1x128xf32> to vector<128xf32>
    %9 = vector.shape_cast %8 : vector<128xf32> to vector<1x1x1x128xf32>
    %10 = vector.broadcast %9 : vector<1x1x1x128xf32> to vector<1x16x16x128xf32>
    %11 = arith.addf %6, %10 : vector<1x16x16x128xf32>
    %cst = arith.constant 0.000000e+00 : f32
    %12 = vector.broadcast %cst : f32 to vector<1x16x16x128xf32>
    %13 = arith.maximumf %11, %12 : vector<1x16x16x128xf32>
    %c0_7 = arith.constant 0 : index
    %c0_8 = arith.constant 0 : index
    %c0_9 = arith.constant 0 : index
    %c0_10 = arith.constant 0 : index
    %14 = vector.load %arg4[%c0_7, %c0_8, %c0_9, %c0_10] : memref<1x16x16x128xf32, #tpu.memory_space<vmem>>, vector<1x16x16x128xf32>
    tpu.vector_store %arg4[%c0_7, %c0_8, %c0_9, %c0_10], %13 {strides = array<i32>} : memref<1x16x16x128xf32, #tpu.memory_space<vmem>>, vector<1x16x16x128xf32>,
    return
  }
  func.func @transform_0(%arg0: i32) -> (i32, i32, i32, i32) {
    %c0_i32 = arith.constant 0 : i32
    %c0_i32_0 = arith.constant 0 : i32
    %c0_i32_1 = arith.constant 0 : i32
    %c0_i32_2 = arith.constant 0 : i32
    return %arg0, %c0_i32, %c0_i32_0, %c0_i32_1 : i32, i32, i32, i32
  }
  func.func @transform_1(%arg0: i32) -> (i32, i32) {
    %c0_i32 = arith.constant 0 : i32
    %c0_i32_0 = arith.constant 0 : i32
    %c0_i32_1 = arith.constant 0 : i32
    return %c0_i32, %c0_i32_0 : i32, i32
  }
  func.func @transform_2(%arg0: i32) -> (i32, i32) {
    %c0_i32 = arith.constant 0 : i32
    %c0_i32_0 = arith.constant 0 : i32
    %c0_i32_1 = arith.constant 0 : i32
    return %c0_i32, %c0_i32_0 : i32, i32
  }
  func.func @transform_3(%arg0: i32) -> (i32, i32, i32, i32) {
    %c0_i32 = arith.constant 0 : i32
    %c0_i32_0 = arith.constant 0 : i32
    %c0_i32_1 = arith.constant 0 : i32
    %c0_i32_2 = arith.constant 0 : i32
    return %arg0, %c0_i32, %c0_i32_0, %c0_i32_1 : i32, i32, i32, i32
  }
}

module attributes {stable_mosaic.version = 11 : i64} {
  func.func @conv_bn_stats_kernel(%arg0: i32, %arg1: memref<1x18x18x128xbf16, #tpu.memory_space<vmem>>, %arg2: memref<3x3x128x128xbf16, #tpu.memory_space<vmem>>, %arg3: memref<1x128xf32, #tpu.memory_space<vmem>>, %arg4: memref<1x128xf32, #tpu.memory_space<vmem>>, %arg5: memref<1x16x16x128xbf16, #tpu.memory_space<vmem>>, %arg6: memref<1x2x128xf32, #tpu.memory_space<vmem>>, %arg7: memref<18x18x128xbf16, #tpu.memory_space<vmem>>) attributes {dimension_semantics = [#tpu.dimension_semantics<parallel>], iteration_bounds = array<i64: 2>, scalar_prefetch = 0 : i64, scratch_operands = 1 : i64, tpu.core_type = #tpu.core_type<tc>, window_params = [{transform_indices = @transform_0, window_bounds = array<i64: 1, 18, 18, 128>}, {pipeline_mode = #tpu.pipeline_mode<synchronous>, transform_indices = @transform_1, window_bounds = array<i64: 3, 3, 128, 128>}, {pipeline_mode = #tpu.pipeline_mode<synchronous>, transform_indices = @transform_2, window_bounds = array<i64: 1, 128>}, {pipeline_mode = #tpu.pipeline_mode<synchronous>, transform_indices = @transform_3, window_bounds = array<i64: 1, 128>}, {transform_indices = @transform_4, window_bounds = array<i64: 1, 16, 16, 128>}, {transform_indices = @transform_5, window_bounds = array<i64: 1, 2, 128>}]} {
    %c0 = arith.constant 0 : index
    %c0_0 = arith.constant 0 : index
    %c0_1 = arith.constant 0 : index
    %c0_2 = arith.constant 0 : index
    %0 = vector.load %arg1[%c0, %c0_0, %c0_1, %c0_2] : memref<1x18x18x128xbf16, #tpu.memory_space<vmem>>, vector<1x18x18x128xbf16>
    %1 = vector.shape_cast %0 : vector<1x18x18x128xbf16> to vector<18x18x128xbf16>
    %2 = arith.extf %1 : vector<18x18x128xbf16> to vector<18x18x128xf32>
    %c0_3 = arith.constant 0 : index
    %c0_4 = arith.constant 0 : index
    %3 = vector.load %arg3[%c0_3, %c0_4] : memref<1x128xf32, #tpu.memory_space<vmem>>, vector<1x128xf32>
    %4 = vector.shape_cast %3 : vector<1x128xf32> to vector<128xf32>
    %5 = vector.shape_cast %4 : vector<128xf32> to vector<1x1x128xf32>
    %6 = vector.broadcast %5 : vector<1x1x128xf32> to vector<18x18x128xf32>
    %7 = arith.mulf %2, %6 : vector<18x18x128xf32>
    %c0_5 = arith.constant 0 : index
    %c0_6 = arith.constant 0 : index
    %8 = vector.load %arg4[%c0_5, %c0_6] : memref<1x128xf32, #tpu.memory_space<vmem>>, vector<1x128xf32>
    %9 = vector.shape_cast %8 : vector<1x128xf32> to vector<128xf32>
    %10 = vector.shape_cast %9 : vector<128xf32> to vector<1x1x128xf32>
    %11 = vector.broadcast %10 : vector<1x1x128xf32> to vector<18x18x128xf32>
    %12 = arith.addf %7, %11 : vector<18x18x128xf32>
    %cst = arith.constant 0.000000e+00 : f32
    %13 = vector.broadcast %cst : f32 to vector<18x18x128xf32>
    %14 = arith.maximumf %12, %13 : vector<18x18x128xf32>
    %15 = tpu.iota {dimensions = array<i32: 0>} : vector<18x18x128xi32>
    %16 = tpu.iota {dimensions = array<i32: 1>} : vector<18x18x128xi32>
    %c1_i32 = arith.constant 1 : i32
    %17 = vector.broadcast %c1_i32 : i32 to vector<18x18x128xi32>
    %18 = arith.cmpi sge, %15, %17 : vector<18x18x128xi32>
    %c16_i32 = arith.constant 16 : i32
    %19 = vector.broadcast %c16_i32 : i32 to vector<18x18x128xi32>
    %20 = arith.cmpi sle, %15, %19 : vector<18x18x128xi32>
    %21 = arith.andi %18, %20 : vector<18x18x128xi1>
    %c1_i32_7 = arith.constant 1 : i32
    %22 = vector.broadcast %c1_i32_7 : i32 to vector<18x18x128xi32>
    %23 = arith.cmpi sge, %16, %22 : vector<18x18x128xi32>
    %24 = arith.andi %21, %23 : vector<18x18x128xi1>
    %c16_i32_8 = arith.constant 16 : i32
    %25 = vector.broadcast %c16_i32_8 : i32 to vector<18x18x128xi32>
    %26 = arith.cmpi sle, %16, %25 : vector<18x18x128xi32>
    %27 = arith.andi %24, %26 : vector<18x18x128xi1>
    %cst_9 = arith.constant 0.000000e+00 : f32
    %28 = vector.broadcast %cst_9 : f32 to vector<18x18x128xf32>
    %29 = arith.select %27, %14, %28 : vector<18x18x128xi1>, vector<18x18x128xf32>
    %30 = arith.truncf %29 : vector<18x18x128xf32> to vector<18x18x128xbf16>
    %c0_10 = arith.constant 0 : index
    %c0_11 = arith.constant 0 : index
    %c0_12 = arith.constant 0 : index
    %31 = vector.load %arg7[%c0_10, %c0_11, %c0_12] : memref<18x18x128xbf16, #tpu.memory_space<vmem>>, vector<18x18x128xbf16>
    tpu.vector_store %arg7[%c0_10, %c0_11, %c0_12], %30 {strides = array<i32>} : memref<18x18x128xbf16, #tpu.memory_space<vmem>>, vector<18x18x128xbf16>,
    %cst_13 = arith.constant 0.000000e+00 : f32
    %32 = vector.broadcast %cst_13 : f32 to vector<256x128xf32>
    %c0_14 = arith.constant 0 : index
    %c0_15 = arith.constant 0 : index
    %c0_16 = arith.constant 0 : index
    %33 = vector.load %arg7[%c0_14, %c0_15, %c0_16] : memref<18x18x128xbf16, #tpu.memory_space<vmem>>, vector<16x16x128xbf16>
    %34 = vector.shape_cast %33 : vector<16x16x128xbf16> to vector<256x128xbf16>
    %c0_17 = arith.constant 0 : index
    %c0_18 = arith.constant 0 : index
    %c0_19 = arith.constant 0 : index
    %c0_20 = arith.constant 0 : index
    %35 = vector.load %arg2[%c0_17, %c0_18, %c0_19, %c0_20] : memref<3x3x128x128xbf16, #tpu.memory_space<vmem>>, vector<1x1x128x128xbf16>
    %36 = vector.shape_cast %35 : vector<1x1x128x128xbf16> to vector<128x128xbf16>
    %cst_21 = arith.constant dense<0.000000e+00> : vector<256x128xf32>
    %37 = tpu.matmul %34, %36, %cst_21 {dimension_numbers = #tpu.dot_dimension_numbers<[1], [0], [0], [1], [0, 0, 1, 1], [], []>} : vector<256x128xbf16>, vector<128x128xbf16>, vector<256x128xf32> -> vector<256x128xf32>
    %38 = arith.addf %32, %37 : vector<256x128xf32>
    %c0_22 = arith.constant 0 : index
    %c1 = arith.constant 1 : index
    %c0_23 = arith.constant 0 : index
    %39 = vector.load %arg7[%c0_22, %c1, %c0_23] : memref<18x18x128xbf16, #tpu.memory_space<vmem>>, vector<16x16x128xbf16>
    %40 = vector.shape_cast %39 : vector<16x16x128xbf16> to vector<256x128xbf16>
    %c0_24 = arith.constant 0 : index
    %c1_25 = arith.constant 1 : index
    %c0_26 = arith.constant 0 : index
    %c0_27 = arith.constant 0 : index
    %41 = vector.load %arg2[%c0_24, %c1_25, %c0_26, %c0_27] : memref<3x3x128x128xbf16, #tpu.memory_space<vmem>>, vector<1x1x128x128xbf16>
    %42 = vector.shape_cast %41 : vector<1x1x128x128xbf16> to vector<128x128xbf16>
    %cst_28 = arith.constant dense<0.000000e+00> : vector<256x128xf32>
    %43 = tpu.matmul %40, %42, %cst_28 {dimension_numbers = #tpu.dot_dimension_numbers<[1], [0], [0], [1], [0, 0, 1, 1], [], []>} : vector<256x128xbf16>, vector<128x128xbf16>, vector<256x128xf32> -> vector<256x128xf32>
    %44 = arith.addf %38, %43 : vector<256x128xf32>
    %c0_29 = arith.constant 0 : index
    %c2 = arith.constant 2 : index
    %c0_30 = arith.constant 0 : index
    %45 = vector.load %arg7[%c0_29, %c2, %c0_30] : memref<18x18x128xbf16, #tpu.memory_space<vmem>>, vector<16x16x128xbf16>
    %46 = vector.shape_cast %45 : vector<16x16x128xbf16> to vector<256x128xbf16>
    %c0_31 = arith.constant 0 : index
    %c2_32 = arith.constant 2 : index
    %c0_33 = arith.constant 0 : index
    %c0_34 = arith.constant 0 : index
    %47 = vector.load %arg2[%c0_31, %c2_32, %c0_33, %c0_34] : memref<3x3x128x128xbf16, #tpu.memory_space<vmem>>, vector<1x1x128x128xbf16>
    %48 = vector.shape_cast %47 : vector<1x1x128x128xbf16> to vector<128x128xbf16>
    %cst_35 = arith.constant dense<0.000000e+00> : vector<256x128xf32>
    %49 = tpu.matmul %46, %48, %cst_35 {dimension_numbers = #tpu.dot_dimension_numbers<[1], [0], [0], [1], [0, 0, 1, 1], [], []>} : vector<256x128xbf16>, vector<128x128xbf16>, vector<256x128xf32> -> vector<256x128xf32>
    %50 = arith.addf %44, %49 : vector<256x128xf32>
    %c1_36 = arith.constant 1 : index
    %c0_37 = arith.constant 0 : index
    %c0_38 = arith.constant 0 : index
    %51 = vector.load %arg7[%c1_36, %c0_37, %c0_38] : memref<18x18x128xbf16, #tpu.memory_space<vmem>>, vector<16x16x128xbf16>
    %52 = vector.shape_cast %51 : vector<16x16x128xbf16> to vector<256x128xbf16>
    %c1_39 = arith.constant 1 : index
    %c0_40 = arith.constant 0 : index
    %c0_41 = arith.constant 0 : index
    %c0_42 = arith.constant 0 : index
    %53 = vector.load %arg2[%c1_39, %c0_40, %c0_41, %c0_42] : memref<3x3x128x128xbf16, #tpu.memory_space<vmem>>, vector<1x1x128x128xbf16>
    %54 = vector.shape_cast %53 : vector<1x1x128x128xbf16> to vector<128x128xbf16>
    %cst_43 = arith.constant dense<0.000000e+00> : vector<256x128xf32>
    %55 = tpu.matmul %52, %54, %cst_43 {dimension_numbers = #tpu.dot_dimension_numbers<[1], [0], [0], [1], [0, 0, 1, 1], [], []>} : vector<256x128xbf16>, vector<128x128xbf16>, vector<256x128xf32> -> vector<256x128xf32>
    %56 = arith.addf %50, %55 : vector<256x128xf32>
    %c1_44 = arith.constant 1 : index
    %c1_45 = arith.constant 1 : index
    %c0_46 = arith.constant 0 : index
    %57 = vector.load %arg7[%c1_44, %c1_45, %c0_46] : memref<18x18x128xbf16, #tpu.memory_space<vmem>>, vector<16x16x128xbf16>
    %58 = vector.shape_cast %57 : vector<16x16x128xbf16> to vector<256x128xbf16>
    %c1_47 = arith.constant 1 : index
    %c1_48 = arith.constant 1 : index
    %c0_49 = arith.constant 0 : index
    %c0_50 = arith.constant 0 : index
    %59 = vector.load %arg2[%c1_47, %c1_48, %c0_49, %c0_50] : memref<3x3x128x128xbf16, #tpu.memory_space<vmem>>, vector<1x1x128x128xbf16>
    %60 = vector.shape_cast %59 : vector<1x1x128x128xbf16> to vector<128x128xbf16>
    %cst_51 = arith.constant dense<0.000000e+00> : vector<256x128xf32>
    %61 = tpu.matmul %58, %60, %cst_51 {dimension_numbers = #tpu.dot_dimension_numbers<[1], [0], [0], [1], [0, 0, 1, 1], [], []>} : vector<256x128xbf16>, vector<128x128xbf16>, vector<256x128xf32> -> vector<256x128xf32>
    %62 = arith.addf %56, %61 : vector<256x128xf32>
    %c1_52 = arith.constant 1 : index
    %c2_53 = arith.constant 2 : index
    %c0_54 = arith.constant 0 : index
    %63 = vector.load %arg7[%c1_52, %c2_53, %c0_54] : memref<18x18x128xbf16, #tpu.memory_space<vmem>>, vector<16x16x128xbf16>
    %64 = vector.shape_cast %63 : vector<16x16x128xbf16> to vector<256x128xbf16>
    %c1_55 = arith.constant 1 : index
    %c2_56 = arith.constant 2 : index
    %c0_57 = arith.constant 0 : index
    %c0_58 = arith.constant 0 : index
    %65 = vector.load %arg2[%c1_55, %c2_56, %c0_57, %c0_58] : memref<3x3x128x128xbf16, #tpu.memory_space<vmem>>, vector<1x1x128x128xbf16>
    %66 = vector.shape_cast %65 : vector<1x1x128x128xbf16> to vector<128x128xbf16>
    %cst_59 = arith.constant dense<0.000000e+00> : vector<256x128xf32>
    %67 = tpu.matmul %64, %66, %cst_59 {dimension_numbers = #tpu.dot_dimension_numbers<[1], [0], [0], [1], [0, 0, 1, 1], [], []>} : vector<256x128xbf16>, vector<128x128xbf16>, vector<256x128xf32> -> vector<256x128xf32>
    %68 = arith.addf %62, %67 : vector<256x128xf32>
    %c2_60 = arith.constant 2 : index
    %c0_61 = arith.constant 0 : index
    %c0_62 = arith.constant 0 : index
    %69 = vector.load %arg7[%c2_60, %c0_61, %c0_62] : memref<18x18x128xbf16, #tpu.memory_space<vmem>>, vector<16x16x128xbf16>
    %70 = vector.shape_cast %69 : vector<16x16x128xbf16> to vector<256x128xbf16>
    %c2_63 = arith.constant 2 : index
    %c0_64 = arith.constant 0 : index
    %c0_65 = arith.constant 0 : index
    %c0_66 = arith.constant 0 : index
    %71 = vector.load %arg2[%c2_63, %c0_64, %c0_65, %c0_66] : memref<3x3x128x128xbf16, #tpu.memory_space<vmem>>, vector<1x1x128x128xbf16>
    %72 = vector.shape_cast %71 : vector<1x1x128x128xbf16> to vector<128x128xbf16>
    %cst_67 = arith.constant dense<0.000000e+00> : vector<256x128xf32>
    %73 = tpu.matmul %70, %72, %cst_67 {dimension_numbers = #tpu.dot_dimension_numbers<[1], [0], [0], [1], [0, 0, 1, 1], [], []>} : vector<256x128xbf16>, vector<128x128xbf16>, vector<256x128xf32> -> vector<256x128xf32>
    %74 = arith.addf %68, %73 : vector<256x128xf32>
    %c2_68 = arith.constant 2 : index
    %c1_69 = arith.constant 1 : index
    %c0_70 = arith.constant 0 : index
    %75 = vector.load %arg7[%c2_68, %c1_69, %c0_70] : memref<18x18x128xbf16, #tpu.memory_space<vmem>>, vector<16x16x128xbf16>
    %76 = vector.shape_cast %75 : vector<16x16x128xbf16> to vector<256x128xbf16>
    %c2_71 = arith.constant 2 : index
    %c1_72 = arith.constant 1 : index
    %c0_73 = arith.constant 0 : index
    %c0_74 = arith.constant 0 : index
    %77 = vector.load %arg2[%c2_71, %c1_72, %c0_73, %c0_74] : memref<3x3x128x128xbf16, #tpu.memory_space<vmem>>, vector<1x1x128x128xbf16>
    %78 = vector.shape_cast %77 : vector<1x1x128x128xbf16> to vector<128x128xbf16>
    %cst_75 = arith.constant dense<0.000000e+00> : vector<256x128xf32>
    %79 = tpu.matmul %76, %78, %cst_75 {dimension_numbers = #tpu.dot_dimension_numbers<[1], [0], [0], [1], [0, 0, 1, 1], [], []>} : vector<256x128xbf16>, vector<128x128xbf16>, vector<256x128xf32> -> vector<256x128xf32>
    %80 = arith.addf %74, %79 : vector<256x128xf32>
    %c2_76 = arith.constant 2 : index
    %c2_77 = arith.constant 2 : index
    %c0_78 = arith.constant 0 : index
    %81 = vector.load %arg7[%c2_76, %c2_77, %c0_78] : memref<18x18x128xbf16, #tpu.memory_space<vmem>>, vector<16x16x128xbf16>
    %82 = vector.shape_cast %81 : vector<16x16x128xbf16> to vector<256x128xbf16>
    %c2_79 = arith.constant 2 : index
    %c2_80 = arith.constant 2 : index
    %c0_81 = arith.constant 0 : index
    %c0_82 = arith.constant 0 : index
    %83 = vector.load %arg2[%c2_79, %c2_80, %c0_81, %c0_82] : memref<3x3x128x128xbf16, #tpu.memory_space<vmem>>, vector<1x1x128x128xbf16>
    %84 = vector.shape_cast %83 : vector<1x1x128x128xbf16> to vector<128x128xbf16>
    %cst_83 = arith.constant dense<0.000000e+00> : vector<256x128xf32>
    %85 = tpu.matmul %82, %84, %cst_83 {dimension_numbers = #tpu.dot_dimension_numbers<[1], [0], [0], [1], [0, 0, 1, 1], [], []>} : vector<256x128xbf16>, vector<128x128xbf16>, vector<256x128xf32> -> vector<256x128xf32>
    %86 = arith.addf %80, %85 : vector<256x128xf32>
    %87 = vector.shape_cast %86 : vector<256x128xf32> to vector<1x16x16x128xf32>
    %88 = arith.truncf %87 : vector<1x16x16x128xf32> to vector<1x16x16x128xbf16>
    %c0_84 = arith.constant 0 : index
    %c0_85 = arith.constant 0 : index
    %c0_86 = arith.constant 0 : index
    %c0_87 = arith.constant 0 : index
    %89 = vector.load %arg5[%c0_84, %c0_85, %c0_86, %c0_87] : memref<1x16x16x128xbf16, #tpu.memory_space<vmem>>, vector<1x16x16x128xbf16>
    tpu.vector_store %arg5[%c0_84, %c0_85, %c0_86, %c0_87], %88 {strides = array<i32>} : memref<1x16x16x128xbf16, #tpu.memory_space<vmem>>, vector<1x16x16x128xbf16>,
    %cst_88 = arith.constant dense<0.000000e+00> : vector<128xf32>
    %90 = vector.multi_reduction <add>, %86, %cst_88 [0] : vector<256x128xf32> to vector<128xf32>
    %91 = vector.shape_cast %90 : vector<128xf32> to vector<1x128xf32>
    %c0_89 = arith.constant 0 : index
    %c0_90 = arith.constant 0 : index
    %c0_91 = arith.constant 0 : index
    %92 = vector.load %arg6[%c0_89, %c0_90, %c0_91] : memref<1x2x128xf32, #tpu.memory_space<vmem>>, vector<1x1x128xf32>
    %93 = vector.shape_cast %92 : vector<1x1x128xf32> to vector<1x128xf32>
    %94 = vector.shape_cast %91 : vector<1x128xf32> to vector<1x1x128xf32>
    tpu.vector_store %arg6[%c0_89, %c0_90, %c0_91], %94 {strides = array<i32>} : memref<1x2x128xf32, #tpu.memory_space<vmem>>, vector<1x1x128xf32>,
    %95 = arith.mulf %86, %86 : vector<256x128xf32>
    %cst_92 = arith.constant dense<0.000000e+00> : vector<128xf32>
    %96 = vector.multi_reduction <add>, %95, %cst_92 [0] : vector<256x128xf32> to vector<128xf32>
    %97 = vector.shape_cast %96 : vector<128xf32> to vector<1x128xf32>
    %c0_93 = arith.constant 0 : index
    %c1_94 = arith.constant 1 : index
    %c0_95 = arith.constant 0 : index
    %98 = vector.load %arg6[%c0_93, %c1_94, %c0_95] : memref<1x2x128xf32, #tpu.memory_space<vmem>>, vector<1x1x128xf32>
    %99 = vector.shape_cast %98 : vector<1x1x128xf32> to vector<1x128xf32>
    %100 = vector.shape_cast %97 : vector<1x128xf32> to vector<1x1x128xf32>
    tpu.vector_store %arg6[%c0_93, %c1_94, %c0_95], %100 {strides = array<i32>} : memref<1x2x128xf32, #tpu.memory_space<vmem>>, vector<1x1x128xf32>,
    return
  }
  func.func @transform_0(%arg0: i32) -> (i32, i32, i32, i32) {
    %c0_i32 = arith.constant 0 : i32
    %c0_i32_0 = arith.constant 0 : i32
    %c0_i32_1 = arith.constant 0 : i32
    %c0_i32_2 = arith.constant 0 : i32
    return %arg0, %c0_i32, %c0_i32_0, %c0_i32_1 : i32, i32, i32, i32
  }
  func.func @transform_1(%arg0: i32) -> (i32, i32, i32, i32) {
    %c0_i32 = arith.constant 0 : i32
    %c0_i32_0 = arith.constant 0 : i32
    %c0_i32_1 = arith.constant 0 : i32
    %c0_i32_2 = arith.constant 0 : i32
    %c0_i32_3 = arith.constant 0 : i32
    return %c0_i32, %c0_i32_0, %c0_i32_1, %c0_i32_2 : i32, i32, i32, i32
  }
  func.func @transform_2(%arg0: i32) -> (i32, i32) {
    %c0_i32 = arith.constant 0 : i32
    %c0_i32_0 = arith.constant 0 : i32
    %c0_i32_1 = arith.constant 0 : i32
    return %c0_i32, %c0_i32_0 : i32, i32
  }
  func.func @transform_3(%arg0: i32) -> (i32, i32) {
    %c0_i32 = arith.constant 0 : i32
    %c0_i32_0 = arith.constant 0 : i32
    %c0_i32_1 = arith.constant 0 : i32
    return %c0_i32, %c0_i32_0 : i32, i32
  }
  func.func @transform_4(%arg0: i32) -> (i32, i32, i32, i32) {
    %c0_i32 = arith.constant 0 : i32
    %c0_i32_0 = arith.constant 0 : i32
    %c0_i32_1 = arith.constant 0 : i32
    %c0_i32_2 = arith.constant 0 : i32
    return %arg0, %c0_i32, %c0_i32_0, %c0_i32_1 : i32, i32, i32, i32
  }
  func.func @transform_5(%arg0: i32) -> (i32, i32, i32) {
    %c0_i32 = arith.constant 0 : i32
    %c0_i32_0 = arith.constant 0 : i32
    %c0_i32_1 = arith.constant 0 : i32
    return %arg0, %c0_i32, %c0_i32_0 : i32, i32, i32
  }
}

</mosaic_0001>

<bundles_post_ra>
// kernel: double_conv.5
= control target key start
LH: loop header
LB: loop body
LE: loop exit
PB: predicated region body
PF: predicated region fallthrough
CT: control target
= control target key end

     0   :  { %s562_s12 = smov 0   ;;  %s709_s0 = inlined_call_operand.vmem [shape: bf16[2,16,16,128], index: 0, kind: input, shape index: {}]   ;;  %s710_s1 = inlined_call_operand.vmem [shape: f32[1,128], index: 1, kind: input, shape index: {}]   ;;  %s711_s2 = inlined_call_operand.vmem [shape: f32[1,128], index: 2, kind: input, shape index: {}]   ;;  %s712_s3 = inlined_call_operand.vmem [shape: f32[2,16,16,128], index: 3, kind: output, shape index: {}]  }
   0x1 LB: > { %s432_s13 = sadd.s32 4294967295, %s540_s12   ;;  %p436_p0 = scmp.ge.s32.totalorder %s540_s12, 1  ;;  %s540_s12 = sphi %s562_s12, %s13_s12  }
   0x2   : > { %p137_p1 = scmp.lt.s32.totalorder %s540_s12, 3 }
   0x4   : > { %p138_p2 = pnand %p436_p0, %p137_p1 }
   0x5   : > { %p161_p3 = scmp.lt.s32.totalorder (!%p138_p2), %s432_s13, 1  ;;  %v581_v0 = vld [vmem:[%s710_s1] ss:$0 sm:$0xff] (!%p138_p2) }
   0x6   : > { %141 = sbr.rel (%p138_p2) target bundleno = 53 (0x35), region = 32  ;;  %v590_v9 = vld [vmem:[%s711_s2] ss:$0 sm:$0xff] (!%p138_p2) }
   0xd   : > { %s714_s13 = smov (!%p161_p3, %s432_s13), 1 }
   0xe   : > { %s445_s14 = sshll.u32 %s714_s13, 7  ;;  %s446_s22 = sshll.u32 %s714_s13, 8 }
   0xf   : > { %s576_s17 = scalar_lea.vmem %s709_s0, %s445_s14  ;;  %s608_s25 = scalar_lea.vmem %s712_s3, %s446_s22 }
  0x10   : > { %v448_v1 = vld [vmem:[%s576_s17] sm:$0xff]   ;;  %v511_v2 = vld [vmem:[%s576_s17 + $0x8] sm:$0xff]   ;;  %v512_v3 = vld [vmem:[%s576_s17 + $0x10] sm:$0xff]  }
  0x11   : > { %v449_v4 = vunpack.c.l.bf16 %v448_v1  ;;  %v450_v5 = vunpack.c.h.bf16 %v448_v1  ;;  %v453_v6 = vunpack.c.l.bf16 %v511_v2  ;;  %v454_v7 = vunpack.c.h.bf16 %v511_v2  ;;  %v513_v8 = vld [vmem:[%s576_s17 + $0x18] sm:$0xff]   ;;  %v514_v30 = vld [vmem:[%s576_s17 + $0x20] sm:$0xff]   ;;  %v515_v31 = vld [vmem:[%s576_s17 + $0x28] sm:$0xff]  }
  0x12   : > { %v457_v10 = vunpack.c.l.bf16 %v512_v3  ;;  %v458_v11 = vunpack.c.h.bf16 %v512_v3  ;;  %v461_v12 = vunpack.c.l.bf16 %v513_v8  ;;  %v462_v13 = vunpack.c.h.bf16 %v513_v8  ;;  %v516_v36 = vld [vmem:[%s576_s17 + $0x30] sm:$0xff]   ;;  %v517_v37 = vld [vmem:[%s576_s17 + $0x38] sm:$0xff]   ;;  %v518_v3 = vld [vmem:[%s576_s17 + $0x40] sm:$0xff]  }
  0x13   : > { %v242_v14 = vmul.f32 %v449_v4, %v581_v0  ;;  %v243_v15 = vmul.f32 %v450_v5, %v581_v0  ;;  %v244_v16 = vmul.f32 %v453_v6, %v581_v0  ;;  %v245_v17 = vmul.f32 %v454_v7, %v581_v0  ;;  %v519_v4 = vld [vmem:[%s576_s17 + $0x48] sm:$0xff]  }
  0x14   : > { %v246_v18 = vmul.f32 %v457_v10, %v581_v0  ;;  %v247_v19 = vmul.f32 %v458_v11, %v581_v0  ;;  %v248_v20 = vmul.f32 %v461_v12, %v581_v0  ;;  %v249_v21 = vmul.f32 %v462_v13, %v581_v0  ;;  %v520_v10 = vld [vmem:[%s576_s17 + $0x50] sm:$0xff]   ;;  %v521_v11 = vld [vmem:[%s576_s17 + $0x58] sm:$0xff]  }
  0x15   : > { %v281_v22 = vadd.f32 %v590_v9, %v242_v14  ;;  %v282_v23 = vadd.f32 %v590_v9, %v243_v15  ;;  %v283_v24 = vadd.f32 %v590_v9, %v244_v16  ;;  %v284_v25 = vadd.f32 %v590_v9, %v245_v17 }
  0x16   : > { %v285_v26 = vadd.f32 %v590_v9, %v246_v18  ;;  %v286_v27 = vadd.f32 %v590_v9, %v247_v19  ;;  %v287_v28 = vadd.f32 %v590_v9, %v248_v20  ;;  %v288_v29 = vadd.f32 %v590_v9, %v249_v21 }
  0x17   : > { %v313_v32 = vmax.f32 %v281_v22, 0.0  ;;  %v314_v33 = vmax.f32 %v282_v23, 0.0  ;;  %v315_v34 = vmax.f32 %v283_v24, 0.0  ;;  %v316_v35 = vmax.f32 %v284_v25, 0.0 }
  0x18   : > { %v317_v38 = vmax.f32 %v285_v26, 0.0  ;;  %v318_v39 = vmax.f32 %v286_v27, 0.0  ;;  %v319_v40 = vmax.f32 %v287_v28, 0.0  ;;  %v320_v41 = vmax.f32 %v288_v29, 0.0 }
  0x19   : > { %345 = vst [vmem:[%s608_s25] sm:$0xff] %v313_v32  ;;  %346 = vst [vmem:[%s608_s25 + $0x8] sm:$0xff] %v314_v33  ;;  %v465_v42 = vunpack.c.l.bf16 %v514_v30  ;;  %v466_v43 = vunpack.c.h.bf16 %v514_v30  ;;  %v469_v44 = vunpack.c.l.bf16 %v515_v31  ;;  %v470_v45 = vunpack.c.h.bf16 %v515_v31 }
  0x1a   : > { %347 = vst [vmem:[%s608_s25 + $0x10] sm:$0xff] %v315_v34  ;;  %348 = vst [vmem:[%s608_s25 + $0x18] sm:$0xff] %v316_v35  ;;  %v473_v46 = vunpack.c.l.bf16 %v516_v36  ;;  %v474_v47 = vunpack.c.h.bf16 %v516_v36  ;;  %v477_v48 = vunpack.c.l.bf16 %v517_v37  ;;  %v478_v49 = vunpack.c.h.bf16 %v517_v37 }
  0x1b   : > { %349 = vst [vmem:[%s608_s25 + $0x20] sm:$0xff] %v317_v38  ;;  %350 = vst [vmem:[%s608_s25 + $0x28] sm:$0xff] %v318_v39  ;;  %v250_v50 = vmul.f32 %v465_v42, %v581_v0  ;;  %v251_v51 = vmul.f32 %v466_v43, %v581_v0  ;;  %v252_v52 = vmul.f32 %v469_v44, %v581_v0  ;;  %v481_v16 = vunpack.c.l.bf16 %v518_v3 }
  0x1c   : > { %351 = vst [vmem:[%s608_s25 + $0x30] sm:$0xff] %v319_v40  ;;  %352 = vst [vmem:[%s608_s25 + $0x38] sm:$0xff] %v320_v41  ;;  %v253_v53 = vmul.f32 %v470_v45, %v581_v0  ;;  %v254_v54 = vmul.f32 %v473_v46, %v581_v0  ;;  %v255_v55 = vmul.f32 %v474_v47, %v581_v0  ;;  %v482_v17 = vunpack.c.h.bf16 %v518_v3  ;;  %v522_v40 = vld [vmem:[%s576_s17 + $0x60] sm:$0xff]   ;;  %v523_v41 = vld [vmem:[%s576_s17 + $0x68] sm:$0xff]  }
  0x1d   : > { %v256_v56 = vmul.f32 %v477_v48, %v581_v0  ;;  %v257_v57 = vmul.f32 %v478_v49, %v581_v0  ;;  %v289_v58 = vadd.f32 %v590_v9, %v250_v50  ;;  %v290_v59 = vadd.f32 %v590_v9, %v251_v51  ;;  %v524_v46 = vld [vmem:[%s576_s17 + $0x70] sm:$0xff]   ;;  %v525_v47 = vld [vmem:[%s576_s17 + $0x78] sm:$0xff]  }
  0x1e   : > { %v291_v60 = vadd.f32 %v590_v9, %v252_v52  ;;  %v292_v61 = vadd.f32 %v590_v9, %v253_v53  ;;  %v293_v62 = vadd.f32 %v590_v9, %v254_v54  ;;  %v294_v63 = vadd.f32 %v590_v9, %v255_v55 }
  0x1f   : > { %v295_v1 = vadd.f32 %v590_v9, %v256_v56  ;;  %v296_v2 = vadd.f32 %v590_v9, %v257_v57  ;;  %v321_v5 = vmax.f32 %v289_v58, 0.0  ;;  %v322_v6 = vmax.f32 %v290_v59, 0.0 }
  0x20   : > { %v323_v7 = vmax.f32 %v291_v60, 0.0  ;;  %v324_v8 = vmax.f32 %v292_v61, 0.0  ;;  %v325_v12 = vmax.f32 %v293_v62, 0.0  ;;  %v326_v13 = vmax.f32 %v294_v63, 0.0 }
  0x21   : > { %v327_v14 = vmax.f32 %v295_v1, 0.0  ;;  %v328_v15 = vmax.f32 %v296_v2, 0.0  ;;  %353 = vst [vmem:[%s608_s25 + $0x40] sm:$0xff] %v321_v5  ;;  %354 = vst [vmem:[%s608_s25 + $0x48] sm:$0xff] %v322_v6  ;;  %v485_v18 = vunpack.c.l.bf16 %v519_v4  ;;  %v486_v19 = vunpack.c.h.bf16 %v519_v4 }
  0x22   : > { %355 = vst [vmem:[%s608_s25 + $0x50] sm:$0xff] %v323_v7  ;;  %356 = vst [vmem:[%s608_s25 + $0x58] sm:$0xff] %v324_v8  ;;  %v489_v20 = vunpack.c.l.bf16 %v520_v10  ;;  %v490_v21 = vunpack.c.h.bf16 %v520_v10  ;;  %v493_v22 = vunpack.c.l.bf16 %v521_v11  ;;  %v494_v23 = vunpack.c.h.bf16 %v521_v11 }
  0x23   : > { %357 = vst [vmem:[%s608_s25 + $0x60] sm:$0xff] %v325_v12  ;;  %358 = vst [vmem:[%s608_s25 + $0x68] sm:$0xff] %v326_v13  ;;  %v258_v24 = vmul.f32 %v481_v16, %v581_v0  ;;  %v259_v25 = vmul.f32 %v482_v17, %v581_v0  ;;  %v260_v26 = vmul.f32 %v485_v18, %v581_v0  ;;  %v497_v52 = vunpack.c.l.bf16 %v522_v40 }
  0x24   : > { %359 = vst [vmem:[%s608_s25 + $0x70] sm:$0xff] %v327_v14  ;;  %360 = vst [vmem:[%s608_s25 + $0x78] sm:$0xff] %v328_v15  ;;  %v261_v27 = vmul.f32 %v486_v19, %v581_v0  ;;  %v262_v28 = vmul.f32 %v489_v20, %v581_v0  ;;  %v263_v29 = vmul.f32 %v490_v21, %v581_v0  ;;  %v498_v53 = vunpack.c.h.bf16 %v522_v40 }
  0x25   : > { %v264_v30 = vmul.f32 %v493_v22, %v581_v0  ;;  %v265_v31 = vmul.f32 %v494_v23, %v581_v0  ;;  %v297_v32 = vadd.f32 %v590_v9, %v258_v24  ;;  %v298_v33 = vadd.f32 %v590_v9, %v259_v25 }
  0x26   : > { %v299_v34 = vadd.f32 %v590_v9, %v260_v26  ;;  %v300_v35 = vadd.f32 %v590_v9, %v261_v27  ;;  %v301_v36 = vadd.f32 %v590_v9, %v262_v28  ;;  %v302_v37 = vadd.f32 %v590_v9, %v263_v29 }
  0x27   : > { %v303_v38 = vadd.f32 %v590_v9, %v264_v30  ;;  %v304_v39 = vadd.f32 %v590_v9, %v265_v31  ;;  %v329_v42 = vmax.f32 %v297_v32, 0.0  ;;  %v330_v43 = vmax.f32 %v298_v33, 0.0 }
  0x28   : > { %v331_v44 = vmax.f32 %v299_v34, 0.0  ;;  %v332_v45 = vmax.f32 %v300_v35, 0.0  ;;  %v333_v48 = vmax.f32 %v301_v36, 0.0  ;;  %v334_v49 = vmax.f32 %v302_v37, 0.0 }
  0x29   : > { %v335_v50 = vmax.f32 %v303_v38, 0.0  ;;  %v336_v51 = vmax.f32 %v304_v39, 0.0  ;;  %361 = vst [vmem:[%s608_s25 + $0x80] sm:$0xff] %v329_v42  ;;  %362 = vst [vmem:[%s608_s25 + $0x88] sm:$0xff] %v330_v43  ;;  %v501_v54 = vunpack.c.l.bf16 %v523_v41  ;;  %v502_v55 = vunpack.c.h.bf16 %v523_v41 }
  0x2a   : > { %363 = vst [vmem:[%s608_s25 + $0x90] sm:$0xff] %v331_v44  ;;  %364 = vst [vmem:[%s608_s25 + $0x98] sm:$0xff] %v332_v45  ;;  %v505_v56 = vunpack.c.l.bf16 %v524_v46  ;;  %v506_v57 = vunpack.c.h.bf16 %v524_v46  ;;  %v509_v58 = vunpack.c.l.bf16 %v525_v47  ;;  %v510_v59 = vunpack.c.h.bf16 %v525_v47 }
  0x2b   : > { %365 = vst [vmem:[%s608_s25 + $0xa0] sm:$0xff] %v333_v48  ;;  %366 = vst [vmem:[%s608_s25 + $0xa8] sm:$0xff] %v334_v49  ;;  %v266_v60 = vmul.f32 %v497_v52, %v581_v0  ;;  %v267_v61 = vmul.f32 %v498_v53, %v581_v0  ;;  %v268_v62 = vmul.f32 %v501_v54, %v581_v0 }
  0x2c   : > { %367 = vst [vmem:[%s608_s25 + $0xb0] sm:$0xff] %v335_v50  ;;  %368 = vst [vmem:[%s608_s25 + $0xb8] sm:$0xff] %v336_v51  ;;  %v269_v63 = vmul.f32 %v502_v55, %v581_v0  ;;  %v270_v1 = vmul.f32 %v505_v56, %v581_v0  ;;  %v271_v2 = vmul.f32 %v506_v57, %v581_v0 }
  0x2d   : > { %v272_v3 = vmul.f32 %v509_v58, %v581_v0  ;;  %v273_v4 = vmul.f32 %v510_v59, %v581_v0  ;;  %v305_v5 = vadd.f32 %v590_v9, %v266_v60  ;;  %v306_v6 = vadd.f32 %v590_v9, %v267_v61 }
  0x2e   : > { %v307_v7 = vadd.f32 %v590_v9, %v268_v62  ;;  %v308_v8 = vadd.f32 %v590_v9, %v269_v63  ;;  %v309_v10 = vadd.f32 %v590_v9, %v270_v1  ;;  %v310_v11 = vadd.f32 %v590_v9, %v271_v2 }
  0x2f   : > { %v311_v0 = vadd.f32 %v590_v9, %v272_v3  ;;  %v312_v12 = vadd.f32 %v590_v9, %v273_v4  ;;  %v337_v13 = vmax.f32 %v305_v5, 0.0  ;;  %v338_v14 = vmax.f32 %v306_v6, 0.0 }
  0x30   : > { %v339_v15 = vmax.f32 %v307_v7, 0.0  ;;  %v340_v16 = vmax.f32 %v308_v8, 0.0  ;;  %v341_v17 = vmax.f32 %v309_v10, 0.0  ;;  %v342_v18 = vmax.f32 %v310_v11, 0.0 }
  0x31   : > { %v343_v19 = vmax.f32 %v311_v0, 0.0  ;;  %v344_v20 = vmax.f32 %v312_v12, 0.0  ;;  %369 = vst [vmem:[%s608_s25 + $0xc0] sm:$0xff] %v337_v13  ;;  %370 = vst [vmem:[%s608_s25 + $0xc8] sm:$0xff] %v338_v14 }
  0x32   : > { %371 = vst [vmem:[%s608_s25 + $0xd0] sm:$0xff] %v339_v15  ;;  %372 = vst [vmem:[%s608_s25 + $0xd8] sm:$0xff] %v340_v16 }
  0x33   : > { %373 = vst [vmem:[%s608_s25 + $0xe0] sm:$0xff] %v341_v17  ;;  %374 = vst [vmem:[%s608_s25 + $0xe8] sm:$0xff] %v342_v18 }
  0x34   : > { %375 = vst [vmem:[%s608_s25 + $0xf0] sm:$0xff] %v343_v19  ;;  %376 = vst [vmem:[%s608_s25 + $0xf8] sm:$0xff] %v344_v20 }
  0x35 PF: > { %s13_s12 = sadd.s32 1, %s540_s12  }
  0x36   : > { %p10_p4 = scmp.ge.s32.totalorder %s13_s12, 4  }
  0x38   :  { %12 = sbr.rel (!%p10_p4) target bundleno = 1 (0x1), region = 62 }

// kernel: double_conv.3
= control target key start
LH: loop header
LB: loop body
LE: loop exit
PB: predicated region body
PF: predicated region fallthrough
CT: control target
= control target key end

     0   :  { %s7312_s18 = smov 0   ;;  %s9125_s0 = inlined_call_operand.vmem [shape: bf16[2,18,18,128], index: 0, kind: input, shape index: {}]   ;;  %s9126_s1 = inlined_call_operand.vmem [shape: bf16[3,3,128,128], index: 1, kind: input, shape index: {}]   ;;  %s9127_s2 = inlined_call_operand.vmem [shape: f32[1,128], index: 2, kind: input, shape index: {}]   ;;  %s9128_s3 = inlined_call_operand.vmem [shape: f32[1,128], index: 3, kind: input, shape index: {}]   ;;  %s9129_s4 = inlined_call_operand.vmem [shape: bf16[2,16,16,128], index: 4, kind: output, shape index: {0}]   ;;  %s9130_s5 = inlined_call_operand.vmem [shape: f32[2,2,128], index: 5, kind: output, shape index: {1}]  }
   0x1 LB: > { %s5400_s2 = sadd.s32 4294967295, %s7280_s18   ;;  %p5404_p0 = scmp.ge.s32.totalorder %s7280_s18, 1  ;;  %s7280_s18 = sphi %s7312_s18, %s16_s18  }
   0x2   : > { %p190_p1 = scmp.lt.s32.totalorder %s7280_s18, 3 }
   0x4   : > { %p191_p2 = pnand %p5404_p0, %p190_p1 }
   0x6   : > { %194 = sbr.rel (%p191_p2) target bundleno = 603 (0x25b), region = 36 }
   0xd   : > { %v7084_v0 = vld [vmem:[%s9126_s1 + $0x40] sm:$0xff]   ;;  %p222_p3 = scmp.lt.s32.totalorder %s5400_s2, 1  ;;  %v7086_v2 = vld [vmem:[%s9126_s1 + $0x48] sm:$0xff]   ;;  %v7088_v4 = vld [vmem:[%s9126_s1 + $0x50] sm:$0xff]   ;;  %vm301_vm0 = vsmask.f32 3328 }
   0xe   : > { %v7085_v1 = vld [vmem:[%s9126_s1 + $0x100] sm:$0xff]   ;;  %6371 = vmatprep.subr.bf16.mxu1 %v7084_v0  ;;  %v7087_v3 = vld [vmem:[%s9126_s1 + $0x108] sm:$0xff]   ;;  %v7089_v5 = vld [vmem:[%s9126_s1 + $0x110] sm:$0xff]   ;;  %vm302_vm1 = vsmask.f32 7440  ;;  %vm1331_vm3 = vcmask 1042432  }
   0xf   : > { %6563 = vmatprep.subr.bf16.mxu0 %v7085_v1  ;;  %6372 = vmatpush3.bf16.msra.mxu1 %v7084_v0  ;;  %s9198_s2 = smov (!%p222_p3, %s5400_s2), 1  ;;  %v7090_v6 = vld [vmem:[%s9126_s1 + $0x58] sm:$0xff]   ;;  %v7092_v8 = vld [vmem:[%s9126_s1 + $0x60] sm:$0xff]   ;;  %v7094_v10 = vld [vmem:[%s9126_s1 + $0x68] sm:$0xff]   ;;  %vm1332_vm4 = vcmask 1046532  }
  0x10   : > { %6564 = vmatpush3.bf16.msra.mxu0 %v7085_v1  ;;  %6373 = vmatprep.subr.bf16.mxu1 %v7086_v2  ;;  %v7091_v7 = vld [vmem:[%s9126_s1 + $0x118] sm:$0xff]   ;;  %s7075_s9 = smul.u32 216, %s9198_s2  ;;  %v7093_v9 = vld [vmem:[%s9126_s1 + $0x120] sm:$0xff]   ;;  %v7095_v11 = vld [vmem:[%s9126_s1 + $0x128] sm:$0xff]   ;;  %s5408_s15 = sshll.u32 %s9198_s2, 1 }
  0x11   : > { %6565 = vmatprep.subr.bf16.mxu0 %v7087_v3  ;;  %v7096_v25 = vld [vmem:[%s9126_s1 + $0x70] sm:$0xff]   ;;  %v7098_v36 = vld [vmem:[%s9126_s1 + $0x78] sm:$0xff]   ;;  %vm7388_vm2 = vmor %vm301_vm0, %vm302_vm1  ;;  %s235_s19 = scalar_lea.vmem %s9130_s5, %s5408_s15 }
  0x12   : > { %s7356_s16 = scalar_lea.vmem %s9125_s0, %s7075_s9  ;;  %v7097_v30 = vld [vmem:[%s9126_s1 + $0x130] sm:$0xff]   ;;  %v7099_v51 = vld [vmem:[%s9126_s1 + $0x138] sm:$0xff]   ;;  %vm7634_vm5 = vmor %vm1331_vm3, %vm1332_vm4 }
  0x13   : > { %6374 = vmatpush3.bf16.msra.mxu1 %v7086_v2  ;;  %v237_v12 = vld [vmem:[%s7356_s16] sm:$0xf]  ;;  %v238_v13 = vld [vmem:[%s7356_s16 + $0x4] sm:$0xf]  ;;  %v285_v14 = vld [vmem:[%s7356_s16 + $0x8] sm:$0x1] }
  0x14   : > { %6566 = vmatpush3.bf16.msra.mxu0 %v7087_v3  ;;  %6375 = vmatprep.subr.bf16.mxu1 %v7088_v4  ;;  %v305_v15 = vshrl.u32 %v237_v12, 16  ;;  %v308_v16 = vshll.u32 %v237_v12, 16  ;;  %v314_v17 = vshll.u32 %v238_v13, 16  ;;  %v318_v18 = vshrl.u32 %v238_v13, 16  ;;  %v5601_v20 = vld [vmem:[%s7356_s16 + $0xc] sm:$0xf] }
  0x15   : > { %6567 = vmatprep.subr.bf16.mxu0 %v7089_v5  ;;  %v324_v19 = vshll.u32 %v285_v14, 16  ;;  %v7369_v23 = vld [vmem:[%s7356_s16 + $0x10] sm:$0xf]  ;;  %v7372_v24 = vld [vmem:[%s7356_s16 + $0x14] sm:$0x1]  ;;  %v2204_v29 = vshrl.u32 %v5601_v20, 16 }
  0x16   : > { %v307_v21 = vrot.slane %v305_v15, 4  ;;  %v310_v22 = vrot.slane %v308_v16, 5  ;;  %v316_v26 = vrot.slane %v314_v17, 5  ;;  %v320_v27 = vrot.slane %v318_v18, 4  ;;  %v239_v35 = vld [vmem:[%s7356_s16 + $0xc] sm:$0xf] }
  0x17   : > { %6376 = vmatpush3.bf16.msra.mxu1 %v7088_v4  ;;  %v326_v28 = vrot.slane %v324_v19, 5  ;;  %v2207_v32 = vshll.u32 %v5601_v20, 16  ;;  %v2213_v33 = vshll.u32 %v7369_v23, 16  ;;  %v2217_v34 = vshrl.u32 %v7369_v23, 16  ;;  %v240_v42 = vld [vmem:[%s7356_s16 + $0x10] sm:$0xf] }
  0x18   : > { %6568 = vmatpush3.bf16.msra.mxu0 %v7089_v5  ;;  %6377 = vmatprep.subr.bf16.mxu1 %v7090_v6  ;;  %v311_v31 = vor.u32 %v310_v22, %v307_v21  ;;  %v321_v38 = vor.u32 %v320_v27, %v316_v26  ;;  %v2206_v39 = vrot.slane %v2204_v29, 4  ;;  %v2223_v40 = vshll.u32 %v7372_v24, 16  ;;  %v286_v55 = vld [vmem:[%s7356_s16 + $0x14] sm:$0x1]  ;;  %v5604_v57 = vld [vmem:[%s7356_s16 + $0x18] sm:$0xf] }
  0x19   : > { %6569 = vmatprep.subr.bf16.mxu0 %v7091_v7  ;;  %v2978_v41 = vrot.slane %v7372_v24, 5  ;;  %v2209_v44 = vrot.slane %v2207_v32, 5  ;;  %v2215_v45 = vrot.slane %v2213_v33, 5  ;;  %v2219_v46 = vrot.slane %v2217_v34, 4  ;;  %v7405_v62 = vld [vmem:[%s7356_s16 + $0x1c] sm:$0xf] }
  0x1a   : > { %v312_v43 = vrot.slane %v311_v31, 4  ;;  %v322_v47 = vrot.slane %v321_v38, 4  ;;  %v2225_v48 = vrot.slane %v2223_v40, 5  ;;  %v329_v49 = vshrl.u32 %v239_v35, 16  ;;  %v7100_v3 = vld [vmem:[%s9126_s1] sm:$0xff]  }
  0x1b   : > { %6378 = vmatpush3.bf16.msra.mxu1 %v7090_v6  ;;  %v332_v50 = vshll.u32 %v239_v35, 16  ;;  %v2210_v53 = vor.u32 %v2209_v44, %v2206_v39  ;;  %v2220_v54 = vor.u32 %v2219_v46, %v2215_v45  ;;  %v338_v56 = vshll.u32 %v240_v42, 16  ;;  %v7413_v4 = vld [vmem:[%s9126_s1 + $0x140] sm:$0xff]   ;;  %v241_v21 = vld [vmem:[%s7356_s16 + $0x18] sm:$0xf]  ;;  %v7103_v46 = vld [vmem:[%s9126_s1 + $0x8] sm:$0xff]  }
  0x1c   : > { %6570 = vmatpush3.bf16.msra.mxu0 %v7091_v7  ;;  %6379 = vmatprep.subr.bf16.mxu1 %v7092_v8  ;;  %v317_v52 = vsel %vm7388_vm2, %v312_v43, %v316_v26  ;;  %v327_v58 = vsel %vm7388_vm2, %v322_v47, %v326_v28  ;;  %v331_v59 = vrot.slane %v329_v49, 4  ;;  %v342_v61 = vshrl.u32 %v240_v42, 16  ;;  %v242_v28 = vld [vmem:[%s7356_s16 + $0x1c] sm:$0xf]  ;;  %v287_v33 = vld [vmem:[%s7356_s16 + $0x20] sm:$0x1] }
  0x1d   : > { %6571 = vmatprep.subr.bf16.mxu0 %v7093_v9  ;;  %v334_v60 = vrot.slane %v332_v50, 5  ;;  %v5425_v63 = vcombine.low %v317_v52, %v327_v58  ;;  %v2211_v0 = vrot.slane %v2210_v53, 4  ;;  %v2221_v1 = vrot.slane %v2220_v54, 4  ;;  %v5607_v39 = vld [vmem:[%s7356_s16 + $0x24] sm:$0xf] }
  0x1e   : > { %v340_v2 = vrot.slane %v338_v56, 5  ;;  %v344_v6 = vrot.slane %v342_v61, 4  ;;  %v348_v7 = vshll.u32 %v286_v55, 16  ;;  %v2231_v12 = vshll.u32 %v5604_v57, 16  ;;  %v243_v52 = vld [vmem:[%s7356_s16 + $0x24] sm:$0xf] }
  0x1f   : > { %6380 = vmatpush3.bf16.msra.mxu1 %v7092_v8  ;;  %v335_v5 = vor.u32 %v334_v60, %v331_v59  ;;  %v7416_v8 = vld [vmem:[%s7356_s16 + $0x20] sm:$0x1]  ;;  %6387 = vmatprep.mubr.bf16.mxu1 %v5425_v63  ;;  %v2237_v19 = vshll.u32 %v7405_v62, 16  ;;  %v2241_v20 = vshrl.u32 %v7405_v62, 16  ;;  %v2982_v27 = vrot.slane %v7405_v62, 5  ;;  %v7102_v63 = vld [vmem:[%s9126_s1 + $0x148] sm:$0xff]  }
  0x20   : > { %6572 = vmatpush3.bf16.msra.mxu0 %v7093_v9  ;;  %6381 = vmatprep.subr.bf16.mxu1 %v7094_v10  ;;  %v2216_v9 = vsel %vm7388_vm2, %v2211_v0, %v2215_v45  ;;  %v345_v15 = vor.u32 %v344_v6, %v340_v2  ;;  %v350_v16 = vrot.slane %v348_v7, 5  ;;  %v2233_v18 = vrot.slane %v2231_v12, 5  ;;  %v7441_v45 = vld [vmem:[%s7356_s16 + $0x28] sm:$0xf] }
  0x21   : > { %6573 = vmatprep.subr.bf16.mxu0 %v7095_v11  ;;  %v336_v14 = vrot.slane %v335_v5, 4  ;;  %v2247_v26 = vshll.u32 %v7416_v8, 16  ;;  %v2243_v31 = vrot.slane %v2241_v20, 4  ;;  %v2985_v32 = vrot.slane %v7416_v8, 5  ;;  %v244_v5 = vld [vmem:[%s7356_s16 + $0x28] sm:$0xf] }
  0x22   : > { %v353_v38 = vshrl.u32 %v241_v21, 16  ;;  %v356_v44 = vshll.u32 %v241_v21, 16  ;;  %v366_v49 = vshrl.u32 %v242_v28, 16  ;;  %v372_v50 = vshll.u32 %v287_v33, 16  ;;  %v7472_v33 = vld [vmem:[%s7356_s16 + $0x34] sm:$0xf] }
  0x23   : > { %6382 = vmatpush3.bf16.msra.mxu1 %v7094_v10  ;;  %v2226_v10 = vsel %vm7388_vm2, %v2221_v1, %v2225_v48  ;;  %v341_v22 = vsel %vm7388_vm2, %v336_v14, %v340_v2  ;;  %v2249_v35 = vrot.slane %v2247_v26, 5  ;;  %v362_v48 = vshll.u32 %v242_v28, 16 }
  0x24   : > { %6574 = vmatpush3.bf16.msra.mxu0 %v7095_v11  ;;  %6383 = vmatprep.subr.bf16.mxu1 %v7096_v25  ;;  %v2228_v11 = vshrl.u32 %v5604_v57, 16  ;;  %v5665_v13 = vcombine.low %v2216_v9, %v2226_v10  ;;  %v355_v47 = vrot.slane %v353_v38, 4  ;;  %v358_v55 = vrot.slane %v356_v44, 5 }
  0x25   : > { %6575 = vmatprep.subr.bf16.mxu0 %v7097_v30  ;;  %v2252_v56 = vshrl.u32 %v5607_v39, 16  ;;  %v364_v57 = vrot.slane %v362_v48, 5  ;;  %v368_v58 = vrot.slane %v366_v49, 4  ;;  %v374_v59 = vrot.slane %v372_v50, 5  ;;  %v7105_v48 = vld [vmem:[%s9126_s1 + $0x158] sm:$0xff]  }
  0x26   : > { %v2230_v17 = vrot.slane %v2228_v11, 4  ;;  %6579 = vmatprep.mubr.bf16.mxu0 %v5665_v13  ;;  %v2255_v60 = vshll.u32 %v5607_v39, 16  ;;  %v359_v0 = vor.u32 %v358_v55, %v355_v47  ;;  %v2261_v2 = vshll.u32 %v7441_v45, 16  ;;  %v288_v11 = vld [vmem:[%s7356_s16 + $0x2c] sm:$0x1] }
  0x27   : > { %6384 = vmatpush3.bf16.msra.mxu1 %v7096_v25  ;;  %v346_v25 = vrot.slane %v345_v15, 4  ;;  %v2254_v1 = vrot.slane %v2252_v56, 4  ;;  %v369_v7 = vor.u32 %v368_v58, %v364_v57  ;;  %v2265_v10 = vshrl.u32 %v7441_v45, 16 }
  0x28   : > { %6576 = vmatpush3.bf16.msra.mxu0 %v7097_v30  ;;  %6385 = vmatprep.subr.bf16.mxu1 %v7098_v36  ;;  %v2234_v29 = vor.u32 %v2233_v18, %v2230_v17  ;;  %v2239_v30 = vrot.slane %v2237_v19, 5  ;;  %v2257_v9 = vrot.slane %v2255_v60, 5  ;;  %v360_v12 = vrot.slane %v359_v0, 4  ;;  %v7112_v60 = vld [vmem:[%s9126_s1 + $0x20] sm:$0xff]  }
  0x29   : > { %6577 = vmatprep.subr.bf16.mxu0 %v7099_v51  ;;  %v351_v34 = vsel %vm7388_vm2, %v346_v25, %v350_v16  ;;  %v2263_v13 = vrot.slane %v2261_v2, 5  ;;  %v377_v15 = vshrl.u32 %v243_v52, 16  ;;  %v5610_v16 = vld [vmem:[%s7356_s16 + $0x30] sm:$0xf]  ;;  %v370_v17 = vrot.slane %v369_v7, 4 }
  0x2a   : > { %v5426_v40 = vcombine.low %v341_v22, %v351_v34  ;;  %v2235_v42 = vrot.slane %v2234_v29, 4  ;;  %v2244_v43 = vor.u32 %v2243_v31, %v2239_v30  ;;  %v2258_v18 = vor.u32 %v2257_v9, %v2254_v1  ;;  %v7109_v34 = vld [vmem:[%s9126_s1 + $0x18] sm:$0xff]  }
  0x2b   : > { %6386 = vmatpush3.bf16.msra.mxu1 %v7098_v36  ;;  %v7437_v36 = vrot.slane %v2982_v27, 4  ;;  %v2267_v19 = vrot.slane %v2265_v10, 4  ;;  %v380_v20 = vshll.u32 %v243_v52, 16  ;;  %v365_v21 = vsel %vm7388_vm2, %v360_v12, %v364_v57  ;;  %v289_v2 = vld [vmem:[%s7356_s16 + $0x38] sm:$0x1] }
  0x2c   : > { %6578 = vmatpush3.bf16.msra.mxu0 %v7099_v51  ;;  %6419 = vmatprep.subr.bf16.mxu1 %v7100_v3  ;;  %v7447_v51 = vld [vmem:[%s7356_s16 + $0x2c] sm:$0x1]  ;;  %v2240_v53 = vsel %vm7388_vm2, %v2235_v42, %v2239_v30  ;;  %v2245_v54 = vrot.slane %v2244_v43, 4  ;;  %v379_v25 = vrot.slane %v377_v15, 4  ;;  %v386_v26 = vshll.u32 %v244_v5, 16 }
  0x2d   : > { %6611 = vmatprep.subr.bf16.mxu0 %v7413_v4  ;;  %v2271_v14 = vshll.u32 %v7447_v51, 16  ;;  %v375_v28 = vsel %vm7388_vm2, %v370_v17, %v374_v59  ;;  %v2259_v29 = vrot.slane %v2258_v18, 4  ;;  %v2268_v30 = vor.u32 %v2267_v19, %v2263_v13  ;;  %v246_v59 = vld [vmem:[%s7356_s16 + $0x34] sm:$0xf]  ;;  %v5613_v9 = vld [vmem:[%s7356_s16 + $0x3c] sm:$0xf] }
  0x2e   : > { %6388 = vmatmul.mubr.bf16.vlgmr.msra.gmra.mrb[0].mxu1 %v5426_v40  ;;  %v2250_v61 = vsel %vm7388_vm2, %v2245_v54, %v2249_v35  ;;  %v382_v31 = vrot.slane %v380_v20, 5  ;;  %v5427_v35 = vcombine.low %v365_v21, %v375_v28  ;;  %v388_v38 = vrot.slane %v386_v26, 5  ;;  %v245_v54 = vld [vmem:[%s7356_s16 + $0x30] sm:$0xf]  ;;  %v7506_v19 = vld [vmem:[%s7356_s16 + $0x40] sm:$0xf] }
  0x2f   : > { %6420 = vmatpush3.bf16.msra.mxu1 %v7100_v3  ;;  %v7106_v3 = vld [vmem:[%s9126_s1 + $0x10] sm:$0xff]   ;;  %v5666_v6 = vcombine.low %v2240_v53, %v2250_v61  ;;  %v2273_v22 = vrot.slane %v2271_v14, 5  ;;  %v390_v39 = vshrl.u32 %v244_v5, 16  ;;  %v396_v40 = vshll.u32 %v288_v11, 16  ;;  %v7114_v14 = vld [vmem:[%s9126_s1 + $0x28] sm:$0xff]   ;;  %v7107_v20 = vld [vmem:[%s9126_s1 + $0x160] sm:$0xff]  }
  0x30   : > { %6421 = vmatprep.subr.bf16.mxu1 %v7103_v46  ;;  %v2264_v42 = vsel %vm7388_vm2, %v2259_v29, %v2263_v13  ;;  %v2269_v43 = vrot.slane %v2268_v30, 4  ;;  %v383_v44 = vor.u32 %v382_v31, %v379_v25  ;;  %v2276_v47 = vshrl.u32 %v5610_v16, 16  ;;  %6391 = vmatprep.mubr.bf16.mxu1 %v5427_v35  ;;  %v7514_v28 = vld [vmem:[%s7356_s16 + $0x44] sm:$0x1]  ;;  %v7116_v35 = vld [vmem:[%s9126_s1 + $0x30] sm:$0xff]  }
  0x31   : > { %6580 = vmatmul.mubr.bf16.vlgmr.msra.gmra.mrb[0].mxu0 %v5666_v6  ;;  %v392_v49 = vrot.slane %v390_v39, 4  ;;  %v398_v50 = vrot.slane %v396_v40, 5  ;;  %v2279_v52 = vshll.u32 %v5610_v16, 16  ;;  %v2285_v53 = vshll.u32 %v7472_v33, 16 }
  0x32   : > { %6612 = vmatpush3.bf16.msra.mxu0 %v7413_v4  ;;  %v7104_v4 = vld [vmem:[%s9126_s1 + $0x150] sm:$0xff]   ;;  %v2274_v55 = vsel %vm7388_vm2, %v2269_v43, %v2273_v22  ;;  %v384_v56 = vrot.slane %v383_v44, 4  ;;  %v2278_v57 = vrot.slane %v2276_v47, 4  ;;  %v2289_v58 = vshrl.u32 %v7472_v33, 16 }
  0x33   : > { %6422 = vmatpush3.bf16.msra.mxu1 %v7103_v46  ;;  %6613 = vmatprep.subr.bf16.mxu0 %v7102_v63  ;;  %v7483_v46 = vld [vmem:[%s7356_s16 + $0x38] sm:$0x1]  ;;  %v5667_v61 = vcombine.low %v2264_v42, %v2274_v55  ;;  %v2281_v0 = vrot.slane %v2279_v52, 5  ;;  %v2287_v1 = vrot.slane %v2285_v53, 5  ;;  %v401_v7 = vshrl.u32 %v245_v54, 16 }
  0x34   : > { %6423 = vmatprep.subr.bf16.mxu1 %v7106_v3  ;;  %v389_v5 = vsel %vm7388_vm2, %v384_v56, %v388_v38  ;;  %v2295_v6 = vshll.u32 %v7483_v46, 16  ;;  %v404_v12 = vshll.u32 %v245_v54, 16  ;;  %v410_v13 = vshll.u32 %v246_v59, 16  ;;  %v248_v55 = vld [vmem:[%s7356_s16 + $0x40] sm:$0xf] }
  0x35   : > { %6583 = vmatprep.mubr.bf16.mxu0 %v5667_v61  ;;  %v2282_v11 = vor.u32 %v2281_v0, %v2278_v57  ;;  %v403_v17 = vrot.slane %v401_v7, 4  ;;  %v414_v18 = vshrl.u32 %v246_v59, 16  ;;  %v2300_v40 = vshrl.u32 %v5613_v9, 16 }
  0x36   : > { %6614 = vmatpush3.bf16.msra.mxu0 %v7102_v63  ;;  %v393_v63 = vor.u32 %v392_v49, %v388_v38  ;;  %v2297_v16 = vrot.slane %v2295_v6, 5  ;;  %v406_v25 = vrot.slane %v404_v12, 5  ;;  %v412_v26 = vrot.slane %v410_v13, 5 }
  0x37   : > { %6424 = vmatpush3.bf16.msra.mxu1 %v7106_v3  ;;  %6615 = vmatprep.subr.bf16.mxu0 %v7104_v4  ;;  %v2291_v3 = vrot.slane %v2289_v58, 4  ;;  %v2283_v22 = vrot.slane %v2282_v11, 4  ;;  %v416_v31 = vrot.slane %v414_v18, 4  ;;  %v2303_v42 = vshll.u32 %v5613_v9, 16  ;;  %v5616_v9 = vld [vmem:[%s7356_s16 + $0x48] sm:$0xf] }
  0x38   : > { %6425 = vmatprep.subr.bf16.mxu1 %v7109_v34  ;;  %v394_v10 = vrot.slane %v393_v63, 4  ;;  %v407_v39 = vor.u32 %v406_v25, %v403_v17  ;;  %v2309_v49 = vshll.u32 %v7506_v19, 16  ;;  %v2302_v53 = vrot.slane %v2300_v40, 4  ;;  %v290_v63 = vld [vmem:[%s7356_s16 + $0x44] sm:$0x1] }
  0x39   : > { %v2292_v15 = vor.u32 %v2291_v3, %v2287_v1  ;;  %v2288_v38 = vsel %vm7388_vm2, %v2283_v22, %v2287_v1  ;;  %v417_v44 = vor.u32 %v416_v31, %v412_v26  ;;  %v2305_v54 = vrot.slane %v2303_v42, 5  ;;  %v7547_v22 = vld [vmem:[%s7356_s16 + $0x50] sm:$0x1]  ;;  %v7111_v31 = vld [vmem:[%s9126_s1 + $0x178] sm:$0xff]  }
  0x3a   : > { %6616 = vmatpush3.bf16.msra.mxu0 %v7104_v4  ;;  %v399_v21 = vsel %vm7388_vm2, %v394_v10, %v398_v50  ;;  %v420_v4 = vshll.u32 %v289_v2, 16  ;;  %v408_v52 = vrot.slane %v407_v39, 4  ;;  %v2311_v57 = vrot.slane %v2309_v49, 5  ;;  %v7118_v2 = vld [vmem:[%s9126_s1 + $0x38] sm:$0xff]  }
  0x3b   : > { %6426 = vmatpush3.bf16.msra.mxu1 %v7109_v34  ;;  %6617 = vmatprep.subr.bf16.mxu0 %v7105_v48  ;;  %v5428_v29 = vcombine.low %v389_v5, %v399_v21  ;;  %v2293_v30 = vrot.slane %v2292_v15, 4  ;;  %v247_v34 = vld [vmem:[%s7356_s16 + $0x3c] sm:$0xf]  ;;  %v418_v56 = vrot.slane %v417_v44, 4  ;;  %v2313_v58 = vshrl.u32 %v7506_v19, 16  ;;  %v7110_v15 = vld [vmem:[%s9126_s1 + $0x170] sm:$0xff]  }
  0x3c   : > { %6427 = vmatprep.subr.bf16.mxu1 %v7112_v60  ;;  %v422_v47 = vrot.slane %v420_v4, 5  ;;  %v2319_v59 = vshll.u32 %v7514_v28, 16  ;;  %v2306_v61 = vor.u32 %v2305_v54, %v2302_v53  ;;  %v425_v0 = vshrl.u32 %v247_v34, 16  ;;  %v7558_v4 = vld [vmem:[%s9126_s1 + $0x80] sm:$0xff]   ;;  %v250_v53 = vld [vmem:[%s7356_s16 + $0x4c] sm:$0xf] }
  0x3d   : > { %6392 = vmatmul.mubr.bf16.gmra.mrb[4].mxu1 %v5428_v29  ;;  %v2298_v43 = vsel %vm7388_vm2, %v2293_v30, %v2297_v16  ;;  %v428_v1 = vshll.u32 %v247_v34, 16  ;;  %v2315_v3 = vrot.slane %v2313_v58, 4  ;;  %v434_v7 = vshll.u32 %v248_v55, 16  ;;  %v249_v30 = vld [vmem:[%s7356_s16 + $0x48] sm:$0xf] }
  0x3e   : > { %6618 = vmatpush3.bf16.msra.mxu0 %v7105_v48  ;;  %v5668_v50 = vcombine.low %v2288_v38, %v2298_v43  ;;  %v7108_v48 = vld [vmem:[%s9126_s1 + $0x168] sm:$0xff]   ;;  %v423_v5 = vsel %vm7388_vm2, %v418_v56, %v422_v47  ;;  %v2321_v6 = vrot.slane %v2319_v59, 5  ;;  %v2307_v11 = vrot.slane %v2306_v61, 4  ;;  %v291_v54 = vld [vmem:[%s7356_s16 + $0x50] sm:$0x1] }
  0x3f   : > { %6428 = vmatpush3.bf16.msra.mxu1 %v7112_v60  ;;  %6619 = vmatprep.subr.bf16.mxu0 %v7107_v20  ;;  %v413_v60 = vsel %vm7388_vm2, %v408_v52, %v412_v26  ;;  %v427_v12 = vrot.slane %v425_v0, 4  ;;  %v430_v13 = vrot.slane %v428_v1, 5  ;;  %v2316_v16 = vor.u32 %v2315_v3, %v2311_v57  ;;  %v5619_v58 = vld [vmem:[%s7356_s16 + $0x54] sm:$0xf]  ;;  %v7572_v0 = vld [vmem:[%s7356_s16 + $0x58] sm:$0xf] }
  0x40   : > { %6429 = vmatprep.subr.bf16.mxu1 %v7114_v14  ;;  %6584 = vmatmul.mubr.bf16.gmra.mrb[4].mxu0 %v5668_v50  ;;  %v5429_v10 = vcombine.low %v413_v60, %v423_v5  ;;  %v436_v17 = vrot.slane %v434_v7, 5  ;;  %v438_v18 = vshrl.u32 %v248_v55, 16  ;;  %v444_v21 = vshll.u32 %v290_v63, 16 }
  0x41   : > { %v431_v25 = vor.u32 %v430_v13, %v427_v12  ;;  %v2324_v26 = vshrl.u32 %v5616_v9, 16  ;;  %v2327_v29 = vshll.u32 %v5616_v9, 16  ;;  %v2317_v34 = vrot.slane %v2316_v16, 4 }
  0x42   : > { %6620 = vmatpush3.bf16.msra.mxu0 %v7107_v20  ;;  %6395 = vmatprep.mubr.bf16.mxu1 %v5429_v10  ;;  %v2312_v20 = vsel %vm7388_vm2, %v2307_v11, %v2311_v57  ;;  %v446_v38 = vrot.slane %v444_v21, 5  ;;  %v2343_v52 = vshll.u32 %v7547_v22, 16  ;;  %v449_v61 = vshrl.u32 %v249_v30, 16 }
  0x43   : > { %6430 = vmatpush3.bf16.msra.mxu1 %v7114_v14  ;;  %v7541_v14 = vld [vmem:[%s7356_s16 + $0x4c] sm:$0xf]  ;;  %6621 = vmatprep.subr.bf16.mxu0 %v7108_v48  ;;  %v432_v40 = vrot.slane %v431_v25, 4  ;;  %v2326_v42 = vrot.slane %v2324_v26, 4  ;;  %v2329_v43 = vrot.slane %v2327_v29, 5  ;;  %v2322_v47 = vsel %vm7388_vm2, %v2317_v34, %v2321_v6  ;;  %v7577_v6 = vld [vmem:[%s9126_s1 + $0x180] sm:$0xff]  }
  0x44   : > { %6431 = vmatprep.subr.bf16.mxu1 %v7116_v35  ;;  %v2333_v39 = vshll.u32 %v7541_v14, 16  ;;  %v2337_v44 = vshrl.u32 %v7541_v14, 16  ;;  %v5669_v55 = vcombine.low %v2312_v20, %v2322_v47  ;;  %v2345_v60 = vrot.slane %v2343_v52, 5  ;;  %v7584_v20 = vld [vmem:[%s7356_s16 + $0x5c] sm:$0x1] }
  0x45   : > { %v2330_v56 = vor.u32 %v2329_v43, %v2326_v42  ;;  %v452_v63 = vshll.u32 %v249_v30, 16  ;;  %v462_v3 = vshrl.u32 %v250_v53, 16  ;;  %v451_v9 = vrot.slane %v449_v61, 4  ;;  %v252_v43 = vld [vmem:[%s7356_s16 + $0x58] sm:$0xf] }
  0x46   : > { %6622 = vmatpush3.bf16.msra.mxu0 %v7108_v48  ;;  %v2335_v50 = vrot.slane %v2333_v39, 5  ;;  %v437_v48 = vsel %vm7388_vm2, %v432_v40, %v436_v17  ;;  %v2339_v57 = vrot.slane %v2337_v44, 4  ;;  %6587 = vmatprep.mubr.bf16.mxu0 %v5669_v55  ;;  %v468_v11 = vshll.u32 %v291_v54, 16  ;;  %v5622_v52 = vld [vmem:[%s7356_s16 + $0x60] sm:$0xf] }
  0x47   : > { %6432 = vmatpush3.bf16.msra.mxu1 %v7116_v35  ;;  %v440_v35 = vrot.slane %v438_v18, 4  ;;  %6623 = vmatprep.subr.bf16.mxu0 %v7110_v15  ;;  %v2331_v1 = vrot.slane %v2330_v56, 4  ;;  %v454_v10 = vrot.slane %v452_v63, 5  ;;  %v464_v18 = vrot.slane %v462_v3, 4 }
  0x48   : > { %6433 = vmatprep.subr.bf16.mxu1 %v7118_v2  ;;  %v2340_v5 = vor.u32 %v2339_v57, %v2335_v50  ;;  %v470_v21 = vrot.slane %v468_v11, 5  ;;  %v2348_v25 = vshrl.u32 %v5619_v58, 16  ;;  %v2351_v29 = vshll.u32 %v5619_v58, 16 }
  0x49   : > { %v441_v49 = vor.u32 %v440_v35, %v436_v17  ;;  %v2336_v13 = vsel %vm7388_vm2, %v2331_v1, %v2335_v50  ;;  %v455_v17 = vor.u32 %v454_v10, %v451_v9  ;;  %v2357_v30 = vshll.u32 %v7572_v0, 16  ;;  %v251_v35 = vld [vmem:[%s7356_s16 + $0x54] sm:$0xf]  ;;  %v292_v50 = vld [vmem:[%s7356_s16 + $0x5c] sm:$0x1] }
  0x4a   : > { %6624 = vmatpush3.bf16.msra.mxu0 %v7110_v15  ;;  %v2341_v15 = vrot.slane %v2340_v5, 4  ;;  %v2361_v34 = vshrl.u32 %v7572_v0, 16  ;;  %v2350_v42 = vrot.slane %v2348_v25, 4  ;;  %v473_v55 = vshrl.u32 %v251_v35, 16  ;;  %v7612_v25 = vld [vmem:[%s7356_s16 + $0x60] sm:$0xf] }
  0x4b   : > { %6434 = vmatpush3.bf16.msra.mxu1 %v7118_v2  ;;  %v442_v59 = vrot.slane %v441_v49, 4  ;;  %v458_v2 = vshll.u32 %v250_v53, 16  ;;  %6625 = vmatprep.subr.bf16.mxu0 %v7111_v31  ;;  %v456_v39 = vrot.slane %v455_v17, 4  ;;  %v2359_v44 = vrot.slane %v2357_v30, 5  ;;  %v7608_v17 = vld [vmem:[%s7356_s16 + $0x68] sm:$0x1] }
  0x4c   : > { %6467 = vmatprep.subr.bf16.mxu1 %v7558_v4  ;;  %v2346_v26 = vsel %vm7388_vm2, %v2341_v15, %v2345_v60  ;;  %v2363_v47 = vrot.slane %v2361_v34, 4  ;;  %v2367_v49 = vshll.u32 %v7584_v20, 16  ;;  %v7599_v60 = vld [vmem:[%s7356_s16 + $0x64] sm:$0xf]  ;;  %v475_v63 = vrot.slane %v473_v55, 4 }
  0x4d   : > { %v447_v7 = vsel %vm7388_vm2, %v442_v59, %v446_v38  ;;  %v460_v16 = vrot.slane %v458_v2, 5  ;;  %v5670_v38 = vcombine.low %v2336_v13, %v2346_v26  ;;  %v482_v59 = vshll.u32 %v252_v43, 16 }
  0x4e   : > { %v5430_v12 = vcombine.low %v437_v48, %v447_v7  ;;  %6626 = vmatpush3.bf16.msra.mxu0 %v7111_v31  ;;  %v2353_v31 = vrot.slane %v2351_v29, 5  ;;  %v476_v48 = vshll.u32 %v251_v35, 16  ;;  %v2364_v57 = vor.u32 %v2363_v47, %v2359_v44  ;;  %v7615_v35 = vld [vmem:[%s7356_s16 + $0x64] sm:$0xf] }
  0x4f   : > { %6659 = vmatprep.subr.bf16.mxu0 %v7577_v6  ;;  %v465_v40 = vor.u32 %v464_v18, %v460_v16  ;;  %6588 = vmatmul.mubr.bf16.gmra.mrb[8].mxu0 %v5670_v38  ;;  %v461_v53 = vsel %vm7388_vm2, %v456_v39, %v460_v16  ;;  %v2369_v58 = vrot.slane %v2367_v49, 5  ;;  %v486_v5 = vshrl.u32 %v252_v43, 16  ;;  %v293_v43 = vld [vmem:[%s7356_s16 + $0x68] sm:$0x1] }
  0x50   : > { %6396 = vmatmul.mubr.bf16.gmra.mrb[8].mxu1 %v5430_v12  ;;  %v2354_v56 = vor.u32 %v2353_v31, %v2350_v42  ;;  %v478_v1 = vrot.slane %v476_v48, 5  ;;  %v2365_v7 = vrot.slane %v2364_v57, 4  ;;  %v484_v9 = vrot.slane %v482_v59, 5 }
  0x51   : > { %v466_v54 = vrot.slane %v465_v40, 4  ;;  %v488_v11 = vrot.slane %v486_v5, 4  ;;  %v492_v12 = vshll.u32 %v292_v50, 16  ;;  %v2372_v13 = vshrl.u32 %v5622_v52, 16  ;;  %v5689_v50 = vld [vmem:[%s7356_s16 + $0xc] sm:$0xe] }
  0x52   : > { %v2355_v3 = vrot.slane %v2354_v56, 4  ;;  %v479_v10 = vor.u32 %v478_v1, %v475_v63  ;;  %v2370_v16 = vsel %vm7388_vm2, %v2365_v7, %v2369_v58  ;;  %v2375_v18 = vshll.u32 %v5622_v52, 16  ;;  %v7630_v5 = vld [vmem:[%s7356_s16 + $0x6c] sm:$0xf] }
  0x53   : > { %v471_v61 = vsel %vm7388_vm2, %v466_v54, %v470_v21  ;;  %v2381_v21 = vshll.u32 %v7599_v60, 16  ;;  %v489_v30 = vor.u32 %v488_v11, %v484_v9  ;;  %v494_v34 = vrot.slane %v492_v12, 5 }
  0x54   : > { %v5431_v2 = vcombine.low %v461_v53, %v471_v61  ;;  %v2360_v15 = vsel %vm7388_vm2, %v2355_v3, %v2359_v44  ;;  %v480_v29 = vrot.slane %v479_v10, 4  ;;  %v2374_v38 = vrot.slane %v2372_v13, 4 }
  0x55   : > { %v5671_v26 = vcombine.low %v2360_v15, %v2370_v16  ;;  %v2377_v39 = vrot.slane %v2375_v18, 5  ;;  %v2383_v40 = vrot.slane %v2381_v21, 5  ;;  %v2385_v42 = vshrl.u32 %v7599_v60, 16  ;;  %v7642_v21 = vld [vmem:[%s7356_s16 + $0x70] sm:$0xf] }
  0x56   : > { %6399 = vmatprep.mubr.bf16.mxu1 %v5431_v2  ;;  %v485_v31 = vsel %vm7388_vm2, %v480_v29, %v484_v9  ;;  %v490_v44 = vrot.slane %v489_v30, 4  ;;  %v2391_v47 = vshll.u32 %v7608_v17, 16  ;;  %v497_v49 = vshrl.u32 %v7612_v25, 16  ;;  %v7202_v9 = vld [vmem:[%s7356_s16 + $0xb4] sm:$0xff]  }
  0x57   : > { %6591 = vmatprep.mubr.bf16.mxu0 %v5671_v26  ;;  %v2378_v52 = vor.u32 %v2377_v39, %v2374_v38  ;;  %v2387_v53 = vrot.slane %v2385_v42, 4  ;;  %v500_v54 = vshll.u32 %v7612_v25, 16  ;;  %v506_v55 = vshll.u32 %v7615_v35, 16 }
  0x58   : > { %v495_v48 = vsel %vm7388_vm2, %v490_v44, %v494_v34  ;;  %v2393_v56 = vrot.slane %v2391_v47, 5  ;;  %v499_v57 = vrot.slane %v497_v49, 4  ;;  %v510_v58 = vshrl.u32 %v7615_v35, 16  ;;  %v7653_v47 = vld [vmem:[%s7356_s16 + $0x78] sm:$0xf] }
  0x59   : > { %v5432_v59 = vcombine.low %v485_v31, %v495_v48  ;;  %v2379_v61 = vrot.slane %v2378_v52, 4  ;;  %v2388_v63 = vor.u32 %v2387_v53, %v2383_v40  ;;  %v502_v1 = vrot.slane %v500_v54, 5  ;;  %v7664_v54 = vld [vmem:[%s7356_s16 + $0x7c] sm:$0xf] }
  0x5a   : > { %v508_v2 = vrot.slane %v506_v55, 5  ;;  %v512_v3 = vrot.slane %v510_v58, 4  ;;  %v516_v7 = vshll.u32 %v293_v43, 16  ;;  %v5705_v10 = vrot.slane %v5689_v50, 9  ;;  %v295_v58 = vld [vmem:[%s7356_s16 + $0x80] sm:$0x1] }
  0x5b   : > { %6400 = vmatmul.mubr.bf16.gmra.mrb[12].mxu1 %v5432_v59  ;;  %v2384_v11 = vsel %vm7388_vm2, %v2379_v61, %v2383_v40  ;;  %v2389_v12 = vrot.slane %v2388_v63, 4  ;;  %v503_v13 = vor.u32 %v502_v1, %v499_v57  ;;  %v2975_v15 = vrot.slane %v7369_v23, 5  ;;  %v294_v40 = vld [vmem:[%s7356_s16 + $0x74] sm:$0x1]  ;;  %v5690_v23 = vld [vmem:[%s7356_s16 + $0x18] sm:$0xe] }
  0x5c   : > { %v513_v16 = vor.u32 %v512_v3, %v508_v2  ;;  %v518_v18 = vrot.slane %v516_v7, 5  ;;  %v521_v26 = vshrl.u32 %v7630_v5, 16  ;;  %v524_v29 = vshll.u32 %v7630_v5, 16 }
  0x5d   : > { %v2394_v30 = vsel %vm7388_vm2, %v2389_v12, %v2393_v56  ;;  %v504_v34 = vrot.slane %v503_v13, 4  ;;  %v2976_v38 = vsel %vm7634_vm5, %v5705_v10, %v2975_v15  ;;  %v2977_v39 = vrot.slane %v2975_v15, 4  ;;  %v5691_v13 = vld [vmem:[%s7356_s16 + $0x24] sm:$0xe] }
  0x5e   : > { %v5672_v42 = vcombine.low %v2384_v11, %v2394_v30  ;;  %v514_v43 = vrot.slane %v513_v16, 4  ;;  %v523_v31 = vrot.slane %v521_v26, 4  ;;  %v526_v44 = vrot.slane %v524_v29, 5  ;;  %v7686_v16 = vld [vmem:[%s7356_s16 + $0x84] sm:$0xf]  ;;  %v7115_v29 = vld [vmem:[%s9126_s1 + $0x188] sm:$0xff]  }
  0x5f   : > { %v509_v49 = vsel %vm7388_vm2, %v504_v34, %v508_v2  ;;  %v2979_v50 = vsel %vm7634_vm5, %v2977_v39, %v2978_v41  ;;  %v530_v52 = vshll.u32 %v7642_v21, 16  ;;  %v534_v53 = vshrl.u32 %v7642_v21, 16 }
  0x60   : > { %6592 = vmatmul.mubr.bf16.gmra.mrb[12].mxu0 %v5672_v42  ;;  %v519_v55 = vsel %vm7388_vm2, %v514_v43, %v518_v18  ;;  %v5737_v48 = vcombine.low %v2976_v38, %v2979_v50  ;;  %v527_v56 = vor.u32 %v526_v44, %v523_v31  ;;  %v540_v57 = vshll.u32 %v294_v40, 16  ;;  %v7694_v40 = vld [vmem:[%s7356_s16 + $0x88] sm:$0xf]  ;;  %v296_v31 = vld [vmem:[%s7356_s16 + $0x8c] sm:$0x1] }
  0x61   : > { %v5433_v59 = vcombine.low %v509_v49, %v519_v55  ;;  %v532_v24 = vrot.slane %v530_v52, 5  ;;  %v536_v61 = vrot.slane %v534_v53, 4  ;;  %v5706_v63 = vrot.slane %v5690_v23, 9 }
  0x62   : > { %6627 = vmatprep.mubr.bf16.mxu0 %v5737_v48  ;;  %v528_v41 = vrot.slane %v527_v56, 4  ;;  %v542_v1 = vrot.slane %v540_v57, 5  ;;  %v2986_v2 = vsel %vm7634_vm5, %v7437_v36, %v2985_v32  ;;  %v545_v3 = vshrl.u32 %v7653_v47, 16 }
  0x63   : > { %6403 = vmatprep.mubr.bf16.mxu1 %v5433_v59  ;;  %v537_v7 = vor.u32 %v536_v61, %v532_v24  ;;  %v2983_v10 = vsel %vm7634_vm5, %v5706_v63, %v2982_v27  ;;  %v548_v11 = vshll.u32 %v7653_v47, 16  ;;  %v554_v12 = vshll.u32 %v7664_v54, 16 }
  0x64   : > { %v533_v8 = vsel %vm7388_vm2, %v528_v41, %v532_v24  ;;  %v5738_v15 = vcombine.low %v2983_v10, %v2986_v2  ;;  %v547_v32 = vrot.slane %v545_v3, 4  ;;  %v558_v36 = vshrl.u32 %v7664_v54, 16  ;;  %v7715_v2 = vld [vmem:[%s7356_s16 + $0x90] sm:$0xf]  ;;  %v7718_v3 = vld [vmem:[%s7356_s16 + $0x94] sm:$0xf] }
  0x65   : > { %v538_v62 = vrot.slane %v537_v7, 4  ;;  %v550_v18 = vrot.slane %v548_v11, 5  ;;  %v556_v26 = vrot.slane %v554_v12, 5  ;;  %v564_v27 = vshll.u32 %v295_v58, 16 }
  0x66   : > { %v560_v30 = vrot.slane %v558_v36, 4  ;;  %v5707_v34 = vrot.slane %v5691_v13, 9  ;;  %v2989_v38 = vrot.slane %v7441_v45, 5  ;;  %v2992_v39 = vrot.slane %v7447_v51, 5  ;;  %v5692_v45 = vld [vmem:[%s7356_s16 + $0x30] sm:$0xe] }
  0x67   : > { %v543_v23 = vsel %vm7388_vm2, %v538_v62, %v542_v1  ;;  %v551_v42 = vor.u32 %v550_v18, %v547_v32  ;;  %v566_v43 = vrot.slane %v564_v27, 5  ;;  %v569_v44 = vshrl.u32 %v7686_v16, 16  ;;  %v297_v62 = vld [vmem:[%s7356_s16 + $0x98] sm:$0x1] }
  0x68   : > { %v5434_v49 = vcombine.low %v533_v8, %v543_v23  ;;  %6628 = vmatmul.mubr.bf16.vlgmr.msra.gmra.mrb[0].mxu0 %v5738_v15  ;;  %v561_v50 = vor.u32 %v560_v30, %v556_v26  ;;  %v2990_v52 = vsel %vm7634_vm5, %v5707_v34, %v2989_v38  ;;  %v2991_v53 = vrot.slane %v2989_v38, 4  ;;  %v7119_v30 = vld [vmem:[%s9126_s1 + $0x198] sm:$0xff]  }
  0x69   : > { %6660 = vmatpush3.bf16.msra.mxu0 %v7577_v6  ;;  %v552_v51 = vrot.slane %v551_v42, 4  ;;  %v571_v55 = vrot.slane %v569_v44, 4  ;;  %v572_v48 = vshll.u32 %v7686_v16, 16  ;;  %v578_v56 = vshll.u32 %v7694_v40, 16  ;;  %v7117_v6 = vld [vmem:[%s9126_s1 + $0x190] sm:$0xff]  }
  0x6a   : > { %6404 = vmatmul.mubr.bf16.gmra.mrb[16].mxu1 %v5434_v49  ;;  %v562_v57 = vrot.slane %v561_v50, 4  ;;  %v2993_v58 = vsel %vm7634_vm5, %v2991_v53, %v2992_v39  ;;  %v582_v59 = vshrl.u32 %v7694_v40, 16  ;;  %v588_v24 = vshll.u32 %v296_v31, 16  ;;  %6661 = vmatprep.subr.bf16.mxu0 %v7115_v29  ;;  %v5693_v38 = vld [vmem:[%s7356_s16 + $0x3c] sm:$0xe] }
  0x6b   : > { %v557_v61 = vsel %vm7388_vm2, %v552_v51, %v556_v26  ;;  %v5739_v63 = vcombine.low %v2990_v52, %v2993_v58  ;;  %v574_v41 = vrot.slane %v572_v48, 5  ;;  %v580_v1 = vrot.slane %v578_v56, 5  ;;  %v7736_v31 = vld [vmem:[%s7356_s16 + $0x9c] sm:$0xf]  ;;  %v7745_v48 = vld [vmem:[%s7356_s16 + $0xa0] sm:$0xf] }
  0x6c   : > { %v567_v7 = vsel %vm7388_vm2, %v562_v57, %v566_v43  ;;  %v584_v10 = vrot.slane %v582_v59, 4  ;;  %v590_v11 = vrot.slane %v588_v24, 5  ;;  %v5708_v12 = vrot.slane %v5692_v45, 9  ;;  %v7123_v56 = vld [vmem:[%s9126_s1 + $0x1a0] sm:$0xff]  }
  0x6d   : > { %v5435_v13 = vcombine.low %v557_v61, %v567_v7  ;;  %6631 = vmatprep.mubr.bf16.mxu0 %v5739_v63  ;;  %v575_v8 = vor.u32 %v574_v41, %v571_v55  ;;  %v2996_v15 = vrot.slane %v7472_v33, 5  ;;  %v2999_v32 = vrot.slane %v7483_v46, 5  ;;  %6662 = vmatpush3.bf16.msra.mxu0 %v7115_v29  ;;  %v298_v61 = vld [vmem:[%s7356_s16 + $0xa4] sm:$0x1] }
  0x6e   : > { %v585_v36 = vor.u32 %v584_v10, %v580_v1  ;;  %v593_v18 = vshrl.u32 %v7715_v2, 16  ;;  %v596_v26 = vshll.u32 %v7715_v2, 16  ;;  %v602_v27 = vshll.u32 %v7718_v3, 16  ;;  %6663 = vmatprep.subr.bf16.mxu0 %v7117_v6 }
  0x6f   : > { %6407 = vmatprep.mubr.bf16.mxu1 %v5435_v13  ;;  %v576_v34 = vrot.slane %v575_v8, 4  ;;  %v2997_v33 = vsel %vm7634_vm5, %v5708_v12, %v2996_v15  ;;  %v2998_v46 = vrot.slane %v2996_v15, 4  ;;  %v606_v29 = vshrl.u32 %v7718_v3, 16  ;;  %v5694_v15 = vld [vmem:[%s7356_s16 + $0x48] sm:$0xe] }
  0x70   : > { %v586_v39 = vrot.slane %v585_v36, 4  ;;  %v595_v23 = vrot.slane %v593_v18, 4  ;;  %v598_v42 = vrot.slane %v596_v26, 5  ;;  %v604_v43 = vrot.slane %v602_v27, 5  ;;  %v7770_v27 = vld [vmem:[%s7356_s16 + $0xa8] sm:$0xf] }
  0x71   : > { %v581_v44 = vsel %vm7388_vm2, %v576_v34, %v580_v1  ;;  %v3000_v49 = vsel %vm7634_vm5, %v2998_v46, %v2999_v32  ;;  %v608_v50 = vrot.slane %v606_v29, 4  ;;  %v612_v52 = vshll.u32 %v297_v62, 16  ;;  %6664 = vmatpush3.bf16.msra.mxu0 %v7117_v6  ;;  %v7127_v32 = vld [vmem:[%s9126_s1 + $0x1a8] sm:$0xff]  }
  0x72   : > { %v591_v53 = vsel %vm7388_vm2, %v586_v39, %v590_v11  ;;  %v5740_v45 = vcombine.low %v2997_v33, %v3000_v49  ;;  %v599_v51 = vor.u32 %v598_v42, %v595_v23  ;;  %v5709_v55 = vrot.slane %v5693_v38, 9  ;;  %6665 = vmatprep.subr.bf16.mxu0 %v7119_v30  ;;  %v7773_v29 = vld [vmem:[%s7356_s16 + $0xac] sm:$0xf] }
  0x73   : > { %v5436_v57 = vcombine.low %v581_v44, %v591_v53  ;;  %v609_v58 = vor.u32 %v608_v50, %v604_v43  ;;  %v614_v59 = vrot.slane %v612_v52, 5  ;;  %v3003_v24 = vrot.slane %v7506_v19, 5  ;;  %v5695_v53 = vld [vmem:[%s7356_s16 + $0x54] sm:$0xe] }
  0x74   : > { %6632 = vmatmul.mubr.bf16.gmra.mrb[4].mxu0 %v5740_v45  ;;  %v600_v6 = vrot.slane %v599_v51, 4  ;;  %v3006_v63 = vrot.slane %v7514_v28, 5  ;;  %v617_v41 = vshrl.u32 %v7736_v31, 16  ;;  %v620_v1 = vshll.u32 %v7736_v31, 16  ;;  %v7131_v45 = vld [vmem:[%s9126_s1 + $0x1b0] sm:$0xff]  }
  0x75   : > { %6408 = vmatmul.mubr.bf16.gmra.mrb[20].mxu1 %v5436_v57  ;;  %v610_v7 = vrot.slane %v609_v58, 4  ;;  %v3004_v10 = vsel %vm7634_vm5, %v5709_v55, %v3003_v24  ;;  %v3005_v11 = vrot.slane %v3003_v24, 4  ;;  %v626_v12 = vshll.u32 %v7745_v48, 16  ;;  %6666 = vmatpush3.bf16.msra.mxu0 %v7119_v30 }
  0x76   : > { %v605_v19 = vsel %vm7388_vm2, %v600_v6, %v604_v43  ;;  %v619_v13 = vrot.slane %v617_v41, 4  ;;  %v622_v28 = vrot.slane %v620_v1, 5  ;;  %v630_v8 = vshrl.u32 %v7745_v48, 16  ;;  %6667 = vmatprep.subr.bf16.mxu0 %v7123_v56  ;;  %v299_v43 = vld [vmem:[%s7356_s16 + $0xb0] sm:$0x1] }
  0x77   : > { %v615_v36 = vsel %vm7388_vm2, %v610_v7, %v614_v59  ;;  %v3007_v62 = vsel %vm7634_vm5, %v3005_v11, %v3006_v63  ;;  %v628_v18 = vrot.slane %v626_v12, 5  ;;  %v636_v26 = vshll.u32 %v298_v61, 16  ;;  %v7793_v41 = vld [vmem:[%s7356_s16 + $0xb4] sm:$0xf]  ;;  %v7798_v12 = vld [vmem:[%s7356_s16 + $0xb8] sm:$0xf] }
  0x78   : > { %v5437_v30 = vcombine.low %v605_v19, %v615_v36  ;;  %v5741_v34 = vcombine.low %v3004_v10, %v3007_v62  ;;  %v623_v33 = vor.u32 %v622_v28, %v619_v13  ;;  %v632_v46 = vrot.slane %v630_v8, 4  ;;  %v300_v19 = vld [vmem:[%s7356_s16 + $0xbc] sm:$0x1] }
  0x79   : > { %v638_v38 = vrot.slane %v636_v26, 5  ;;  %v5710_v39 = vrot.slane %v5694_v15, 9  ;;  %v3010_v23 = vrot.slane %v7541_v14, 5  ;;  %v3013_v42 = vrot.slane %v7547_v22, 5  ;;  %6668 = vmatpush3.bf16.msra.mxu0 %v7123_v56  ;;  %v7135_v13 = vld [vmem:[%s9126_s1 + $0x1b8] sm:$0xff]  }
  0x7a   : > { %6411 = vmatprep.mubr.bf16.mxu1 %v5437_v30  ;;  %6635 = vmatprep.mubr.bf16.mxu0 %v5741_v34  ;;  %v624_v44 = vrot.slane %v623_v33, 4  ;;  %v633_v49 = vor.u32 %v632_v46, %v628_v18  ;;  %v641_v50 = vshrl.u32 %v7770_v27, 16  ;;  %v644_v52 = vshll.u32 %v7770_v27, 16  ;;  %v5696_v30 = vld [vmem:[%s7356_s16 + $0x60] sm:$0xe] }
  0x7b   : > { %v3011_v14 = vsel %vm7634_vm5, %v5710_v39, %v3010_v23  ;;  %v3012_v22 = vrot.slane %v3010_v23, 4  ;;  %v650_v51 = vshll.u32 %v7773_v29, 16  ;;  %v654_v55 = vshrl.u32 %v7773_v29, 16  ;;  %6669 = vmatprep.subr.bf16.mxu0 %v7127_v32  ;;  %v5626_v39 = vld [vmem:[%s7356_s16 + $0x70] sm:$0xf] }
  0x7c   : > { %v629_v56 = vsel %vm7388_vm2, %v624_v44, %v628_v18  ;;  %v634_v57 = vrot.slane %v633_v49, 4  ;;  %v643_v58 = vrot.slane %v641_v50, 4  ;;  %v646_v59 = vrot.slane %v644_v52, 5  ;;  %v7820_v44 = vld [vmem:[%s9126_s1 + $0x1c0] sm:$0xff]  }
  0x7d   : > { %v3014_v24 = vsel %vm7634_vm5, %v3012_v22, %v3013_v42  ;;  %v652_v61 = vrot.slane %v650_v51, 5  ;;  %v656_v6 = vrot.slane %v654_v55, 4  ;;  %v660_v63 = vshll.u32 %v299_v43, 16  ;;  %6670 = vmatpush3.bf16.msra.mxu0 %v7127_v32  ;;  %v5697_v43 = vld [vmem:[%s7356_s16 + $0x6c] sm:$0xe] }
  0x7e   : > { %v639_v1 = vsel %vm7388_vm2, %v634_v57, %v638_v38  ;;  %v5742_v7 = vcombine.low %v3011_v14, %v3014_v24  ;;  %v647_v10 = vor.u32 %v646_v59, %v643_v58  ;;  %v5711_v11 = vrot.slane %v5695_v53, 9  ;;  %6671 = vmatprep.subr.bf16.mxu0 %v7131_v45  ;;  %v5627_v55 = vld [vmem:[%s7356_s16 + $0x74] sm:$0x1]  ;;  %v5698_v24 = vld [vmem:[%s7356_s16 + $0x78] sm:$0xe] }
  0x7f   : > { %v5438_v28 = vcombine.low %v629_v56, %v639_v1  ;;  %v657_v8 = vor.u32 %v656_v6, %v652_v61  ;;  %v662_v15 = vrot.slane %v660_v63, 5  ;;  %v3017_v32 = vrot.slane %v7572_v0, 5 }
  0x80   : > { %6636 = vmatmul.mubr.bf16.gmra.mrb[8].mxu0 %v5742_v7  ;;  %v648_v36 = vrot.slane %v647_v10, 4  ;;  %v3020_v62 = vrot.slane %v7584_v20, 5  ;;  %v665_v18 = vshrl.u32 %v7793_v41, 16  ;;  %v668_v26 = vshll.u32 %v7793_v41, 16 }
  0x81   : > { %6412 = vmatmul.mubr.bf16.gmra.mrb[24].mxu1 %v5438_v28  ;;  %v658_v34 = vrot.slane %v657_v8, 4  ;;  %v3018_v33 = vsel %vm7634_vm5, %v5711_v11, %v3017_v32  ;;  %v3019_v46 = vrot.slane %v3017_v32, 4  ;;  %v674_v38 = vshll.u32 %v7798_v12, 16  ;;  %6672 = vmatpush3.bf16.msra.mxu0 %v7131_v45  ;;  %v7833_v11 = vld [vmem:[%s7356_s16 + $0x7c] sm:$0xf] }
  0x82   : > { %v653_v0 = vsel %vm7388_vm2, %v648_v36, %v652_v61  ;;  %v667_v20 = vrot.slane %v665_v18, 4  ;;  %v670_v23 = vrot.slane %v668_v26, 5  ;;  %v678_v42 = vshrl.u32 %v7798_v12, 16  ;;  %6673 = vmatprep.subr.bf16.mxu0 %v7135_v13  ;;  %v7204_v36 = vld [vmem:[%s7356_s16] sm:$0xf] }
  0x83   : > { %v663_v49 = vsel %vm7388_vm2, %v658_v34, %v662_v15  ;;  %v3021_v50 = vsel %vm7634_vm5, %v3019_v46, %v3020_v62  ;;  %v676_v52 = vrot.slane %v674_v38, 5  ;;  %v684_v53 = vshll.u32 %v300_v19, 16  ;;  %v5632_v15 = vld [vmem:[%s7356_s16 + $0x88] sm:$0xf]  ;;  %v7848_v62 = vld [vmem:[%s7356_s16 + $0x4] sm:$0xf] }
  0x84   : > { %v5439_v45 = vcombine.low %v653_v0, %v663_v49  ;;  %v5743_v14 = vcombine.low %v3018_v33, %v3021_v50  ;;  %v671_v22 = vor.u32 %v670_v23, %v667_v20  ;;  %v680_v51 = vrot.slane %v678_v42, 4  ;;  %v5633_v26 = vld [vmem:[%s7356_s16 + $0x8c] sm:$0x1]  ;;  %v5636_v23 = vld [vmem:[%s7356_s16 + $0x98] sm:$0x1] }
  0x85   : > { %v686_v56 = vrot.slane %v684_v53, 5  ;;  %v5712_v57 = vrot.slane %v5696_v30, 9  ;;  %v3024_v58 = vrot.slane %v7599_v60, 5  ;;  %v3027_v59 = vrot.slane %v7608_v17, 5  ;;  %6674 = vmatpush3.bf16.msra.mxu0 %v7135_v13  ;;  %v7836_v17 = vld [vmem:[%s7356_s16 + $0x80] sm:$0x1] }
  0x86   : > { %6415 = vmatprep.mubr.bf16.mxu1 %v5439_v45  ;;  %6639 = vmatprep.mubr.bf16.mxu0 %v5743_v14  ;;  %v672_v61 = vrot.slane %v671_v22, 4  ;;  %v681_v6 = vor.u32 %v680_v51, %v676_v52  ;;  %v5713_v63 = vrot.slane %v5697_v43, 9  ;;  %v3031_v1 = vrot.slane %v5626_v39, 5  ;;  %v5699_v30 = vld [vmem:[%s7356_s16 + $0x84] sm:$0xe] }
  0x87   : > { %v3025_v7 = vsel %vm7634_vm5, %v5712_v57, %v3024_v58  ;;  %v3026_v10 = vrot.slane %v3024_v58, 4  ;;  %v3034_v60 = vrot.slane %v5627_v55, 5  ;;  %6707 = vmatprep.subr.bf16.mxu0 %v7820_v44  ;;  %v5449_v18 = vcombine.low %v7204_v36, %v7848_v62  ;;  %v5635_v39 = vld [vmem:[%s7356_s16 + $0x94] sm:$0xf]  ;;  %v5700_v42 = vld [vmem:[%s7356_s16 + $0x90] sm:$0xe] }
  0x88   : > { %v677_v19 = vsel %vm7388_vm2, %v672_v61, %v676_v52  ;;  %v682_v13 = vrot.slane %v681_v6, 4  ;;  %v3032_v28 = vsel %vm7634_vm5, %v5713_v63, %v3031_v1  ;;  %v3033_v8 = vrot.slane %v3031_v1, 4  ;;  %v5701_v50 = vld [vmem:[%s7356_s16 + $0x9c] sm:$0xe]  ;;  %v5638_v14 = vld [vmem:[%s7356_s16 + $0xa0] sm:$0xf] }
  0x89   : > { %v3028_v32 = vsel %vm7634_vm5, %v3026_v10, %v3027_v59  ;;  %v5714_v38 = vrot.slane %v5698_v24, 9  ;;  %v3038_v43 = vrot.slane %v7833_v11, 5  ;;  %v3041_v49 = vrot.slane %v7836_v17, 5  ;;  %v5639_v22 = vld [vmem:[%s7356_s16 + $0xa4] sm:$0x1] }
  0x8a   : > { %v687_v34 = vsel %vm7388_vm2, %v682_v13, %v686_v56  ;;  %v5744_v33 = vcombine.low %v3025_v7, %v3028_v32  ;;  %v3035_v46 = vsel %vm7634_vm5, %v3033_v8, %v3034_v60  ;;  %v5715_v52 = vrot.slane %v5699_v30, 9  ;;  %v5641_v59 = vld [vmem:[%s7356_s16 + $0xac] sm:$0xf]  ;;  %v7872_v61 = vld [vmem:[%s7356_s16 + $0x10] sm:$0xf] }
  0x8b   : > { %v5440_v0 = vcombine.low %v677_v19, %v687_v34  ;;  %v5745_v20 = vcombine.low %v3032_v28, %v3035_v46  ;;  %v3045_v53 = vrot.slane %v5632_v15, 5  ;;  %v3048_v45 = vrot.slane %v5633_v26, 5  ;;  %v7206_v24 = vld [vmem:[%s7356_s16 + $0xc] sm:$0xf]  ;;  %v7208_v8 = vld [vmem:[%s7356_s16 + $0x18] sm:$0xf] }
  0x8c   : > { %6640 = vmatmul.mubr.bf16.gmra.mrb[12].mxu0 %v5744_v33  ;;  %v3039_v51 = vsel %vm7634_vm5, %v5714_v38, %v3038_v43  ;;  %v3040_v55 = vrot.slane %v3038_v43, 4  ;;  %v3052_v58 = vrot.slane %v5635_v39, 5  ;;  %v5450_v6 = vcombine.low %v7206_v24, %v7872_v61  ;;  %v7126_v19 = vld [vmem:[%s9126_s1 + $0x88] sm:$0xff]   ;;  %v7884_v15 = vld [vmem:[%s7356_s16 + $0x1c] sm:$0xf] }
  0x8d   : > { %6416 = vmatmul.mubr.bf16.gmra.mrb[28].mxu1 %v5440_v0  ;;  %6643 = vmatprep.mubr.bf16.mxu0 %v5745_v20  ;;  %v3046_v56 = vsel %vm7634_vm5, %v5715_v52, %v3045_v53  ;;  %v3047_v57 = vrot.slane %v3045_v53, 4  ;;  %v5716_v1 = vrot.slane %v5700_v42, 9  ;;  %v3055_v7 = vrot.slane %v5636_v23, 5  ;;  %v5642_v30 = vld [vmem:[%s7356_s16 + $0xb0] sm:$0x1] }
  0x8e   : > { %6435 = vmatprep.mubr.bf16.mxu1 %v5449_v18  ;;  %v3042_v63 = vsel %vm7634_vm5, %v3040_v55, %v3041_v49  ;;  %v3054_v13 = vrot.slane %v3052_v58, 4  ;;  %v5717_v28 = vrot.slane %v5701_v50, 9  ;;  %v5451_v32 = vcombine.low %v7208_v8, %v7884_v15  ;;  %v5702_v34 = vld [vmem:[%s7356_s16 + $0xa8] sm:$0xe]  ;;  %v5644_v33 = vld [vmem:[%s7356_s16 + $0xb8] sm:$0xf] }
  0x8f   : > { %v5746_v10 = vcombine.low %v3039_v51, %v3042_v63  ;;  %v3049_v60 = vsel %vm7634_vm5, %v3047_v57, %v3048_v45  ;;  %v3059_v18 = vrot.slane %v5638_v14, 5  ;;  %v3062_v26 = vrot.slane %v5639_v22, 5  ;;  %v5645_v20 = vld [vmem:[%s7356_s16 + $0xbc] sm:$0x1]  ;;  %v5703_v23 = vld [vmem:[%s7356_s16 + $0xb4] sm:$0xe] }
  0x90   : > { %v5747_v36 = vcombine.low %v3046_v56, %v3049_v60  ;;  %v3066_v38 = vrot.slane %v5641_v59, 5  ;;  %v3053_v39 = vsel %vm7634_vm5, %v5716_v1, %v3052_v58  ;;  %v3056_v0 = vsel %vm7634_vm5, %v3054_v13, %v3055_v7  ;;  %v7130_v50 = vld [vmem:[%s9126_s1 + $0x90] sm:$0xff]   ;;  %v5647_v53 = vld [vmem:[%s7356_s16 + $0xc4] sm:$0xf]  ;;  %v7907_v51 = vld [vmem:[%s7356_s16 + $0x28] sm:$0xf] }
  0x91   : > { %v3061_v46 = vrot.slane %v3059_v18, 4  ;;  %v3060_v42 = vsel %vm7634_vm5, %v5717_v28, %v3059_v18  ;;  %v3073_v49 = vrot.slane %v5644_v33, 5  ;;  %v5718_v52 = vrot.slane %v5702_v34, 9  ;;  %v7210_v22 = vld [vmem:[%s7356_s16 + $0x24] sm:$0xf]  ;;  %v7134_v1 = vld [vmem:[%s9126_s1 + $0x98] sm:$0xff]  }
  0x92   : > { %v5748_v45 = vcombine.low %v3053_v39, %v3056_v0  ;;  %v3068_v14 = vrot.slane %v3066_v38, 4  ;;  %v5452_v55 = vcombine.low %v7210_v22, %v7907_v51  ;;  %v7212_v57 = vld [vmem:[%s7356_s16 + $0x30] sm:$0xf]  ;;  %v7912_v58 = vld [vmem:[%s7356_s16 + $0x34] sm:$0xf]  ;;  %v5719_v24 = vrot.slane %v5703_v23, 9 }
  0x93   : > { %v3063_v43 = vsel %vm7634_vm5, %v3061_v46, %v3062_v26  ;;  %v5453_v59 = vcombine.low %v7212_v57, %v7912_v58  ;;  %v3076_v63 = vrot.slane %v5645_v20, 5  ;;  %v5704_v7 = vld [vmem:[%s7356_s16 + $0xc0] sm:$0xe]  ;;  %v3067_v60 = vsel %vm7634_vm5, %v5718_v52, %v3066_v38  ;;  %v5648_v8 = vld [vmem:[%s7356_s16 + $0xc8] sm:$0x1]  ;;  %v7137_v22 = vld [vmem:[%s7356_s16 + $0x18] sm:$0xff]  }
  0x94   : > { %6644 = vmatmul.mubr.bf16.gmra.mrb[16].mxu0 %v5746_v10  ;;  %v5749_v56 = vcombine.low %v3060_v42, %v3063_v43  ;;  %v3080_v10 = vrot.slane %v5647_v53, 5  ;;  %v3074_v13 = vsel %vm7634_vm5, %v5719_v24, %v3073_v49  ;;  %v5720_v18 = vrot.slane %v5704_v7, 9  ;;  %v7214_v26 = vld [vmem:[%s7356_s16 + $0x3c] sm:$0xf]  ;;  %v7216_v39 = vld [vmem:[%s7356_s16 + $0x48] sm:$0xf] }
  0x95   : > { %6436 = vmatmul.mubr.bf16.vlgmr.msra.gmra.mrb[0].mxu1 %v5450_v6  ;;  %6647 = vmatprep.mubr.bf16.mxu0 %v5747_v36  ;;  %v3075_v6 = vrot.slane %v3073_v49, 4  ;;  %v3083_v38 = vrot.slane %v5648_v8, 5  ;;  %v7938_v0 = vld [vmem:[%s7356_s16 + $0x4c] sm:$0xf]  ;;  %v7151_v49 = vld [vmem:[%s9126_s1 + $0xb0] sm:$0xff]   ;;  %v2433_v52 = vshrl.u32 %v7833_v11, 16 }
  0x96   : > { %6468 = vmatpush3.bf16.msra.mxu1 %v7558_v4  ;;  %6439 = vmatprep.mubr.bf16.mxu1 %v5451_v32  ;;  %v3069_v4 = vrot.slane %v5642_v30, 5  ;;  %v7139_v32 = vld [vmem:[%s9126_s1 + $0xa0] sm:$0xff]   ;;  %v3082_v46 = vrot.slane %v3080_v10, 4  ;;  %v5455_v20 = vcombine.low %v7216_v39, %v7938_v0  ;;  %v7145_v23 = vld [vmem:[%s9126_s1 + $0xa8] sm:$0xff]   ;;  %v3081_v42 = vsel %vm7634_vm5, %v5720_v18, %v3080_v10  ;;  %v7143_v18 = vld [vmem:[%s7356_s16 + $0x30] sm:$0xff]  }
  0x97   : > { %6469 = vmatprep.subr.bf16.mxu1 %v7126_v19  ;;  %v3077_v28 = vsel %vm7634_vm5, %v3075_v6, %v3076_v63  ;;  %v7933_v30 = vld [vmem:[%s7356_s16 + $0x40] sm:$0xf]  ;;  %v7966_v57 = vrot.slane %v2433_v52, 4  ;;  %v7140_v6 = vld [vmem:[%s7356_s16 + $0x24] sm:$0xff]   ;;  %v1343_v7 = vrot.slane %v7872_v61, 5  ;;  %v2439_v8 = vshll.u32 %v7836_v17, 16 }
  0x98   : > { %v5454_v34 = vcombine.low %v7214_v26, %v7933_v30  ;;  %v5751_v33 = vcombine.low %v3074_v13, %v3077_v28  ;;  %v3084_v43 = vsel %vm7634_vm5, %v3082_v46, %v3083_v38  ;;  %v1283_v63 = vld [vmem:[%s7356_s16] sm:$0xe]  ;;  %v1284_v10 = vld [vmem:[%s7356_s16 + $0xc] sm:$0xe]  ;;  %v1350_v13 = vrot.slane %v7884_v15, 5 }
  0x99   : > { %v5752_v53 = vcombine.low %v3081_v42, %v3084_v43  ;;  %v1286_v61 = vld [vmem:[%s7356_s16 + $0x24] sm:$0xe]  ;;  %v5460_v15 = vcombine.low %v7686_v16, %v7694_v40  ;;  %v5461_v26 = vcombine.low %v7715_v2, %v7718_v3  ;;  %v5473_v17 = vrot.slane %v1283_v63, 9  ;;  %v7222_v38 = vld [vmem:[%s7356_s16 + $0x20] sm:$0x1]  ;;  %v7152_v2 = vld [vmem:[%s7356_s16 + $0x54] sm:$0xff]  }
  0x9a   : > { %6470 = vmatpush3.bf16.msra.mxu1 %v7126_v19  ;;  %v3070_v19 = vsel %vm7634_vm5, %v3068_v14, %v3069_v4  ;;  %v7955_v14 = vld [vmem:[%s7356_s16 + $0x58] sm:$0xf]  ;;  %v1352_v46 = vrot.slane %v1350_v13, 4  ;;  %v1353_v39 = vrot.slane %v7222_v38, 5  ;;  %v7223_v43 = vld [vmem:[%s7356_s16 + $0x2c] sm:$0x1] }
  0x9b   : > { %6471 = vmatprep.subr.bf16.mxu1 %v7130_v50  ;;  %v5750_v36 = vcombine.low %v3067_v60, %v3070_v19  ;;  %v7981_v60 = vld [vmem:[%s9126_s1 + $0xc0] sm:$0xff]   ;;  %v1285_v19 = vld [vmem:[%s7356_s16 + $0x18] sm:$0xe]  ;;  %v7226_v38 = vld [vmem:[%s7356_s16 + $0x50] sm:$0x1]  ;;  %v1385_v16 = vrot.slane %v7955_v14, 5 }
  0x9c   : > { %6648 = vmatmul.mubr.bf16.gmra.mrb[20].mxu0 %v5748_v45  ;;  %v7218_v45 = vld [vmem:[%s7356_s16 + $0x54] sm:$0xf]  ;;  %v8104_v40 = vld [vmem:[%s7356_s16 + $0x64] sm:$0xf] }
  0x9d   : > { %6440 = vmatmul.mubr.bf16.gmra.mrb[4].mxu1 %v5452_v55  ;;  %6651 = vmatprep.mubr.bf16.mxu0 %v5749_v56  ;;  %v5456_v4 = vcombine.low %v7218_v45, %v7955_v14  ;;  %v5457_v55 = vcombine.low %v7612_v25, %v7615_v35  ;;  %v7157_v56 = vld [vmem:[%s9126_s1 + $0xb8] sm:$0xff]   ;;  %v7221_v25 = vld [vmem:[%s7356_s16 + $0x14] sm:$0x1]  ;;  %v7155_v3 = vld [vmem:[%s7356_s16 + $0x60] sm:$0xff]  }
  0x9e   : > { %6443 = vmatprep.mubr.bf16.mxu1 %v5453_v59  ;;  %6472 = vmatpush3.bf16.msra.mxu1 %v7130_v50  ;;  %v2429_v50 = vshll.u32 %v7833_v11, 16  ;;  %v7969_v59 = vld [vmem:[%s7356_s16 + $0x8] sm:$0x1]  ;;  %v1346_v35 = vrot.slane %v7221_v25, 5 }
  0x9f   : > { %6473 = vmatprep.subr.bf16.mxu1 %v7134_v1  ;;  %v1339_v24 = vrot.slane %v7969_v59, 5 }
  0xa0   : > { %v7964_v11 = vrot.slane %v2429_v50, 5 }
  0xa2   : > { %6474 = vmatpush3.bf16.msra.mxu1 %v7134_v1  ;;  %v1336_v1 = vrot.slane %v7848_v62, 5  ;;  %v5458_v62 = vcombine.low %v7630_v5, %v7642_v21  ;;  %v5474_v21 = vrot.slane %v1284_v10, 9  ;;  %v5833_v10 = vld [vmem:[%s7356_s16 + $0x18] sm:$0xf] }
  0xa3   : > { %6475 = vmatprep.subr.bf16.mxu1 %v7139_v32 }
  0xa4   : > { %6652 = vmatmul.mubr.bf16.gmra.mrb[24].mxu0 %v5750_v36  ;;  %v5459_v36 = vcombine.low %v7653_v47, %v7664_v54  ;;  %v1338_v5 = vrot.slane %v1336_v1, 4  ;;  %v7147_v47 = vld [vmem:[%s9126_s1 + $0x1c8] sm:$0xff]   ;;  %v5475_v54 = vrot.slane %v1285_v19, 9  ;;  %v8024_v59 = vsel %vm7634_vm5, %v5473_v17, %v1336_v1  ;;  %v5834_v19 = vld [vmem:[%s7356_s16 + $0x1c] sm:$0xf] }
  0xa5   : > { %6444 = vmatmul.mubr.bf16.gmra.mrb[8].mxu1 %v5454_v34  ;;  %6655 = vmatprep.mubr.bf16.mxu0 %v5751_v33  ;;  %v1364_v34 = vrot.slane %v7912_v58, 5  ;;  %v1345_v33 = vrot.slane %v1343_v7, 4  ;;  %v5476_v58 = vrot.slane %v1286_v61, 9  ;;  %v1378_v1 = vrot.slane %v7938_v0, 5  ;;  %v7149_v0 = vld [vmem:[%s7356_s16 + $0x48] sm:$0xff]  }
  0xa6   : > { %6447 = vmatprep.mubr.bf16.mxu1 %v5455_v20  ;;  %6476 = vmatpush3.bf16.msra.mxu1 %v7139_v32  ;;  %v1357_v32 = vrot.slane %v7907_v51, 5  ;;  %v1287_v51 = vld [vmem:[%s7356_s16 + $0x30] sm:$0xe]  ;;  %v5462_v20 = vcombine.low %v7736_v31, %v7745_v48  ;;  %v8032_v25 = vsel %vm7634_vm5, %v1338_v5, %v1339_v24  ;;  %v8040_v63 = vsel %vm7634_vm5, %v5475_v54, %v1350_v13  ;;  %v1289_v13 = vld [vmem:[%s7356_s16 + $0x48] sm:$0xe] }
  0xa7   : > { %6477 = vmatprep.subr.bf16.mxu1 %v7145_v23  ;;  %v5477_v50 = vrot.slane %v1287_v51, 9  ;;  %v1366_v52 = vrot.slane %v1364_v34, 4  ;;  %v3843_v5 = vshrl.u32 %v5833_v10, 16  ;;  %v3856_v51 = vshrl.u32 %v5834_v19, 16  ;;  %v7158_v48 = vld [vmem:[%s7356_s16 + $0x6c] sm:$0xff]  }
  0xa8   : > { %v1359_v42 = vrot.slane %v1357_v32, 4  ;;  %v8052_v24 = vsel %vm7634_vm5, %v5476_v58, %v1357_v32  ;;  %v7225_v32 = vld [vmem:[%s7356_s16 + $0x44] sm:$0x1]  ;;  %v5479_v54 = vrot.slane %v1289_v13, 9  ;;  %v5837_v13 = vld [vmem:[%s7356_s16 + $0x28] sm:$0xf] }
  0xa9   : > { %v8062_v61 = vsel %vm7634_vm5, %v5477_v50, %v1364_v34  ;;  %v1374_v17 = vrot.slane %v7225_v32, 5  ;;  %v5835_v50 = vld [vmem:[%s7356_s16 + $0x20] sm:$0x1]  ;;  %v1291_v32 = vld [vmem:[%s7356_s16 + $0x60] sm:$0xe] }
  0xaa   : > { %6478 = vmatpush3.bf16.msra.mxu1 %v7145_v23  ;;  %v5463_v23 = vcombine.low %v7770_v27, %v7773_v29 }
  0xab   : > { %6479 = vmatprep.subr.bf16.mxu1 %v7151_v49 }
  0xac   : > { %6656 = vmatmul.mubr.bf16.gmra.mrb[28].mxu0 %v5752_v53  ;;  %v7224_v53 = vld [vmem:[%s7356_s16 + $0x38] sm:$0x1] }
  0xad   : > { %6448 = vmatmul.mubr.bf16.gmra.mrb[12].mxu1 %v5456_v4  ;;  %6675 = vmatprep.mubr.bf16.mxu0 %v7137_v22  ;;  %v1367_v45 = vrot.slane %v7224_v53, 5  ;;  %v1288_v4 = vld [vmem:[%s7356_s16 + $0x3c] sm:$0xe]  ;;  %v1371_v22 = vrot.slane %v7933_v30, 5  ;;  %v8028_v30 = vsel %vm7634_vm5, %v5474_v21, %v1343_v7  ;;  %v3846_v21 = vshll.u32 %v5833_v10, 16  ;;  %v7163_v53 = vld [vmem:[%s9126_s1 + $0x1e0] sm:$0xff]  }
  0xae   : > { %6451 = vmatprep.mubr.bf16.mxu1 %v5457_v55  ;;  %6480 = vmatpush3.bf16.msra.mxu1 %v7151_v49  ;;  %v1360_v49 = vrot.slane %v7223_v43, 5  ;;  %v8015_v55 = vrot.slane %v2439_v8, 5  ;;  %v7146_v7 = vld [vmem:[%s7356_s16 + $0x3c] sm:$0xff]   ;;  %v8048_v8 = vsel %vm7634_vm5, %v1352_v46, %v1353_v39  ;;  %v1380_v46 = vrot.slane %v1378_v1, 4  ;;  %v5839_v43 = vld [vmem:[%s7356_s16 + $0x30] sm:$0xf] }
  0xaf   : > { %6481 = vmatprep.subr.bf16.mxu1 %v7157_v56  ;;  %v1381_v39 = vrot.slane %v7226_v38, 5  ;;  %v3845_v10 = vrot.slane %v3843_v5, 4 }
  0xb0   : > { %9149 = vst [vmem:[#allocation3_spill] sm:$0xff] %v8015_v55 }
  0xb2   : > { %6482 = vmatpush3.bf16.msra.mxu1 %v7157_v56  ;;  %v7153_v56 = vld [vmem:[%s9126_s1 + $0x1d0] sm:$0xff]  }
  0xb3   : > { %6515 = vmatprep.subr.bf16.mxu1 %v7981_v60 }
  0xb4   : > { %6676 = vmatmul.mubr.bf16.vlgmr.msra.gmra.mrb[0].mxu0 %v7140_v6  ;;  %v8036_v6 = vsel %vm7634_vm5, %v1345_v33, %v1346_v35  ;;  %v8056_v35 = vsel %vm7634_vm5, %v1359_v42, %v1360_v49  ;;  %v3852_v33 = vshll.u32 %v5834_v19, 16  ;;  %v3848_v19 = vrot.slane %v3846_v21, 5  ;;  %v1292_v21 = vld [vmem:[%s7356_s16 + $0x6c] sm:$0xe] }
  0xb5   : > { %6452 = vmatmul.mubr.bf16.gmra.mrb[16].mxu1 %v5458_v62  ;;  %6708 = vmatpush3.bf16.msra.mxu0 %v7820_v44  ;;  %v5478_v62 = vrot.slane %v1288_v4, 9  ;;  %v5482_v58 = vrot.slane %v1292_v21, 9 }
  0xb6   : > { %6455 = vmatprep.mubr.bf16.mxu1 %v5459_v36  ;;  %6679 = vmatprep.mubr.bf16.mxu0 %v7143_v18  ;;  %v8066_v36 = vsel %vm7634_vm5, %v1366_v52, %v1367_v45  ;;  %v1373_v18 = vrot.slane %v1371_v22, 4  ;;  %v5836_v52 = vld [vmem:[%s7356_s16 + $0x24] sm:$0xf]  ;;  %v3880_v45 = vshrl.u32 %v5837_v13, 16 }
  0xb7   : > { %6709 = vmatprep.subr.bf16.mxu0 %v7147_v47  ;;  %v8083_v49 = vsel %vm7634_vm5, %v5478_v62, %v1371_v22  ;;  %v8100_v22 = vld [vmem:[%s7356_s16 + $0x54] sm:$0xe]  ;;  %v3858_v62 = vrot.slane %v3856_v51, 4  ;;  %v3867_v38 = vshrl.u32 %v5836_v52, 16  ;;  %v3870_v28 = vshll.u32 %v5836_v52, 16 }
  0xb8   : > { %v8097_v4 = vsel %vm7634_vm5, %v1373_v18, %v1374_v17  ;;  %v3862_v17 = vshll.u32 %v5835_v50, 16  ;;  %v5480_v5 = vrot.slane %v8100_v22, 9  ;;  %v7167_v50 = vld [vmem:[%s9126_s1 + $0x1e8] sm:$0xff]   ;;  %v1387_v52 = vrot.slane %v1385_v16, 4 }
  0xb9   : > { %6710 = vmatpush3.bf16.msra.mxu0 %v7147_v47  ;;  %v7159_v47 = vld [vmem:[%s9126_s1 + $0x1d8] sm:$0xff]   ;;  %v3849_v22 = vor.u32 %v3848_v19, %v3845_v10  ;;  %v3869_v34 = vrot.slane %v3867_v38, 4  ;;  %v3872_v44 = vrot.slane %v3870_v28, 5  ;;  %v7231_v10 = vld [vmem:[%s7356_s16 + $0x74] sm:$0x1]  ;;  %v3882_v28 = vrot.slane %v3880_v45, 4 }
  0xba   : > { %6711 = vmatprep.subr.bf16.mxu0 %v7153_v56  ;;  %v8138_v42 = vrot.slane %v3862_v17, 5  ;;  %v1402_v19 = vrot.slane %v7231_v10, 5  ;;  %v3891_v38 = vshrl.u32 %v5839_v43, 16  ;;  %v8163_v27 = vsel %vm7634_vm5, %v5480_v5, %v1385_v16 }
  0xbb   : > { %v3850_v21 = vrot.slane %v3849_v22, 4 }
  0xbc   : > { %6680 = vmatmul.mubr.bf16.gmra.mrb[4].mxu0 %v7146_v7  ;;  %v8110_v7 = vrot.slane %v3852_v33, 5  ;;  %v7229_v33 = vld [vmem:[%s7356_s16 + $0x70] sm:$0xf] }
  0xbd   : > { %6456 = vmatmul.mubr.bf16.gmra.mrb[20].mxu1 %v5460_v15  ;;  %6683 = vmatprep.mubr.bf16.mxu0 %v7149_v0  ;;  %v1392_v15 = vrot.slane %v8104_v40, 5  ;;  %v7228_v0 = vld [vmem:[%s7356_s16 + $0x5c] sm:$0x1]  ;;  %v1399_v51 = vrot.slane %v7229_v33, 5 }
  0xbe   : > { %6459 = vmatprep.mubr.bf16.mxu1 %v5461_v26  ;;  %6712 = vmatpush3.bf16.msra.mxu0 %v7153_v56  ;;  %v1388_v18 = vrot.slane %v7228_v0, 5  ;;  %v8119_v26 = vsel %vm7634_vm5, %v5479_v54, %v1378_v1  ;;  %v8123_v56 = vsel %vm7634_vm5, %v1380_v46, %v1381_v39  ;;  %v7230_v1 = vld [vmem:[%s7356_s16 + $0x68] sm:$0x1]  ;;  %v3876_v0 = vshll.u32 %v5837_v13, 16  ;;  %v7175_v40 = vld [vmem:[%s9126_s1 + $0x1f8] sm:$0xff]  }
  0xbf   : > { %6713 = vmatprep.subr.bf16.mxu0 %v7159_v47  ;;  %v1395_v54 = vrot.slane %v7230_v1, 5  ;;  %v5481_v46 = vrot.slane %v1291_v32, 9  ;;  %v1394_v39 = vrot.slane %v1392_v15, 4  ;;  %v3859_v33 = vor.u32 %v3858_v62, %v8110_v7  ;;  %v5840_v1 = vld [vmem:[%s7356_s16 + $0x34] sm:$0xf] }
  0xc0   : > { %v1401_v32 = vrot.slane %v1399_v51, 4  ;;  %v5838_v62 = vld [vmem:[%s7356_s16 + $0x2c] sm:$0x1]  ;;  %v8150_v17 = vrot.slane %v3876_v0, 5  ;;  %v3900_v13 = vshll.u32 %v5840_v1, 16  ;;  %v3904_v31 = vshrl.u32 %v5840_v1, 16 }
  0xc1   : > { %v3860_v10 = vrot.slane %v3859_v33, 4  ;;  %v8167_v29 = vsel %vm7634_vm5, %v1387_v52, %v1388_v18  ;;  %v8174_v45 = vsel %vm7634_vm5, %v5481_v46, %v1392_v15  ;;  %v8178_v14 = vsel %vm7634_vm5, %v1394_v39, %v1395_v54  ;;  %v1293_v18 = vld [vmem:[%s7356_s16 + $0x78] sm:$0xe] }
  0xc2   : > { %6714 = vmatpush3.bf16.msra.mxu0 %v7159_v47  ;;  %v8182_v16 = vsel %vm7634_vm5, %v5482_v58, %v1399_v51  ;;  %v8192_v15 = vsel %vm7634_vm5, %v1401_v32, %v1402_v19  ;;  %v3883_v5 = vor.u32 %v3882_v28, %v8150_v17  ;;  %v3893_v52 = vrot.slane %v3891_v38, 4  ;;  %v5842_v58 = vld [vmem:[%s7356_s16 + $0x3c] sm:$0xf]  ;;  %v5843_v51 = vld [vmem:[%s7356_s16 + $0x40] sm:$0xf] }
  0xc3   : > { %6715 = vmatprep.subr.bf16.mxu0 %v7163_v53  ;;  %v3855_v0 = vsel %vm7388_vm2, %v3850_v21, %v8110_v7  ;;  %v3865_v46 = vsel %vm7388_vm2, %v3860_v10, %v8138_v42  ;;  %v8203_v39 = vrot.slane %v3900_v13, 5  ;;  %v3906_v22 = vrot.slane %v3904_v31, 4  ;;  %v7233_v19 = vld [vmem:[%s7356_s16 + $0x80] sm:$0x1]  ;;  %v8362_v47 = vld [vmem:[%s7356_s16 + $0x68] sm:$0x1] }
  0xc4   : > { %6684 = vmatmul.mubr.bf16.gmra.mrb[8].mxu0 %v7152_v2  ;;  %v3894_v2 = vshll.u32 %v5839_v43, 16  ;;  %v3886_v43 = vshll.u32 %v5838_v62, 16  ;;  %v5483_v32 = vrot.slane %v1293_v18, 9  ;;  %v1294_v62 = vld [vmem:[%s7356_s16 + $0x84] sm:$0xe]  ;;  %v3915_v28 = vshrl.u32 %v5842_v58, 16 }
  0xc5   : > { %6460 = vmatmul.mubr.bf16.gmra.mrb[24].mxu1 %v5462_v20  ;;  %6687 = vmatprep.mubr.bf16.mxu0 %v7155_v3  ;;  %v7171_v20 = vld [vmem:[%s9126_s1 + $0x1f0] sm:$0xff]   ;;  %v7232_v3 = vld [vmem:[%s7356_s16 + $0x7c] sm:$0xf]  ;;  %v3918_v7 = vshll.u32 %v5842_v58, 16  ;;  %v3924_v38 = vshll.u32 %v5843_v51, 16  ;;  %v9150_v42 = vcombine.low %v7793_v41, %v7798_v12  ;;  %v8214_v13 = vrot.slane %v3883_v5, 4 }
  0xc6   : > { %6463 = vmatprep.mubr.bf16.mxu1 %v5463_v23  ;;  %6716 = vmatpush3.bf16.msra.mxu0 %v7163_v53  ;;  %v3873_v23 = vor.u32 %v3872_v44, %v3869_v34  ;;  %v7160_v53 = vld [vmem:[%s7356_s16 + $0x78] sm:$0xff]   ;;  %v1406_v44 = vrot.slane %v7232_v3, 5  ;;  %v3896_v54 = vrot.slane %v3894_v2, 5  ;;  %v8207_v1 = vrot.slane %v3886_v43, 5  ;;  %v8219_v21 = vld [vmem:[%s9126_s1 + $0x200] sm:$0xff]   ;;  %9158 = vst [vmem:[#allocation6_spill] sm:$0xff] %v8362_v47 }
  0xc7   : > { %6717 = vmatprep.subr.bf16.mxu0 %v7167_v50  ;;  %v5841_v34 = vld [vmem:[%s7356_s16 + $0x38] sm:$0x1]  ;;  %v3928_v2 = vshrl.u32 %v5843_v51, 16  ;;  %v7162_v43 = vld [vmem:[%s7356_s16 + $0x84] sm:$0xff]   ;;  %v3907_v12 = vor.u32 %v3906_v22, %v8203_v39  ;;  %v3920_v58 = vrot.slane %v3918_v7, 5  ;;  %v8241_v51 = vrot.slane %v3924_v38, 5 }
  0xc8   : > { %v8205_v33 = vrot.slane %v3873_v23, 4  ;;  %v1408_v10 = vrot.slane %v1406_v44, 4  ;;  %v3897_v31 = vor.u32 %v3896_v54, %v3893_v52  ;;  %v9151_v23 = vcombine.low %v8024_v59, %v8032_v25  ;;  %v7234_v18 = vld [vmem:[%s7356_s16 + $0x88] sm:$0xf]  ;;  %v5844_v5 = vld [vmem:[%s7356_s16 + $0x44] sm:$0x1] }
  0xc9   : > { %v1413_v3 = vrot.slane %v7234_v18, 5  ;;  %v8232_v59 = vcombine.low %v3855_v0, %v3865_v46  ;;  %v5845_v52 = vld [vmem:[%s7356_s16 + $0x48] sm:$0xf]  ;;  %v3917_v54 = vrot.slane %v3915_v28, 4  ;;  %v3930_v22 = vrot.slane %v3928_v2, 4 }
  0xca   : > { %6718 = vmatpush3.bf16.msra.mxu0 %v7167_v50  ;;  %v1409_v50 = vrot.slane %v7233_v19, 5  ;;  %v7164_v19 = vld [vmem:[%s7356_s16 + $0x90] sm:$0xff]   ;;  %v3879_v0 = vsel %vm7388_vm2, %v8205_v33, %v8150_v17  ;;  %v3898_v46 = vrot.slane %v3897_v31, 4  ;;  %v3889_v28 = vsel %vm7388_vm2, %v8214_v13, %v8207_v1  ;;  %v8263_v33 = vld [vmem:[%s7356_s16 + $0x58] sm:$0xf]  ;;  %v7165_v31 = vld [vmem:[%s9126_s1 + $0xc8] sm:$0xff]  }
  0xcb   : > { %6719 = vmatprep.subr.bf16.mxu0 %v7171_v20  ;;  %v3908_v38 = vrot.slane %v3907_v12, 4  ;;  %v1415_v2 = vrot.slane %v1413_v3, 4  ;;  %v5848_v17 = vld [vmem:[%s7356_s16 + $0x54] sm:$0xf]  ;;  %v3934_v1 = vshll.u32 %v5844_v5, 16  ;;  %v3939_v13 = vshrl.u32 %v5845_v52, 16 }
  0xcc   : > { %6688 = vmatmul.mubr.bf16.gmra.mrb[12].mxu0 %v7158_v48  ;;  %v3910_v48 = vshll.u32 %v5841_v34, 16  ;;  %v8259_v7 = vsel %vm7634_vm5, %v1408_v10, %v1409_v50  ;;  %v3942_v50 = vshll.u32 %v5845_v52, 16  ;;  %v3921_v10 = vor.u32 %v3920_v58, %v3917_v54  ;;  %v7166_v54 = vld [vmem:[%s7356_s16 + $0x9c] sm:$0xff]   ;;  %v7240_v41 = vld [vmem:[%s7356_s16 + $0xac] sm:$0xf] }
  0xcd   : > { %6464 = vmatmul.mubr.bf16.gmra.mrb[28].mxu1 %v9150_v42  ;;  %6691 = vmatprep.mubr.bf16.mxu0 %v7160_v53  ;;  %v5484_v53 = vrot.slane %v1294_v62, 9  ;;  %v7235_v42 = vld [vmem:[%s7356_s16 + $0x8c] sm:$0x1]  ;;  %v3972_v5 = vshll.u32 %v8263_v33, 16  ;;  %v9153_v52 = vcombine.low %v8040_v63, %v8048_v8  ;;  %v8299_v63 = vld [vmem:[%s7356_s16 + $0x50] sm:$0x1] }
  0xce   : > { %6483 = vmatprep.mubr.bf16.mxu1 %v9151_v23  ;;  %6720 = vmatpush3.bf16.msra.mxu0 %v7171_v20  ;;  %v8238_v20 = vsel %vm7634_vm5, %v5483_v32, %v1406_v44  ;;  %v3912_v62 = vrot.slane %v3910_v48, 5  ;;  %v1416_v23 = vrot.slane %v7235_v42, 5  ;;  %v1295_v44 = vld [vmem:[%s7356_s16 + $0x90] sm:$0xe]  ;;  %v8251_v32 = vld [vmem:[%s7356_s16 + $0x4c] sm:$0xf]  ;;  %v3931_v48 = vor.u32 %v3930_v22, %v8241_v51 }
  0xcf   : > { %6721 = vmatprep.subr.bf16.mxu0 %v7175_v40  ;;  %v3948_v12 = vshll.u32 %v8251_v32, 16  ;;  %v3952_v18 = vshrl.u32 %v8251_v32, 16  ;;  %v9152_v42 = vcombine.low %v8028_v30, %v8036_v6  ;;  %v7169_v30 = vld [vmem:[%s9126_s1 + $0xd0] sm:$0xff]   ;;  %v3903_v6 = vsel %vm7388_vm2, %v3898_v46, %v8203_v39  ;;  %v7168_v8 = vld [vmem:[%s7356_s16 + $0xa8] sm:$0xff]   ;;  %v8306_v39 = vld [vmem:[%s7356_s16 + $0x5c] sm:$0x1] }
  0xd0   : > { %v3913_v58 = vsel %vm7388_vm2, %v3908_v38, %v3912_v62  ;;  %v5485_v22 = vrot.slane %v1295_v44, 9  ;;  %v3944_v25 = vrot.slane %v3942_v50, 5  ;;  %9154 = vst [vmem:[#allocation4_spill] sm:$0xff] %v8306_v39  ;;  %v3922_v46 = vrot.slane %v3921_v10, 4 }
  0xd1   : > { %v3932_v62 = vrot.slane %v3931_v48, 4  ;;  %v8308_v38 = vrot.slane %v3948_v12, 5  ;;  %v8310_v34 = vrot.slane %v3972_v5, 5  ;;  %v8315_v50 = vcombine.low %v3879_v0, %v3889_v28  ;;  %v5851_v28 = vld [vmem:[%s7356_s16 + $0x60] sm:$0xf] }
  0xd2   : > { %6722 = vmatpush3.bf16.msra.mxu0 %v7175_v40  ;;  %v8271_v40 = vsel %vm7634_vm5, %v5484_v53, %v1413_v3  ;;  %v3963_v53 = vshrl.u32 %v5848_v17, 16  ;;  %v3966_v3 = vshll.u32 %v5848_v17, 16  ;;  %v7236_v17 = vld [vmem:[%s7356_s16 + $0x94] sm:$0xf]  ;;  %v8319_v48 = vcombine.low %v3903_v6, %v3913_v58 }
  0xd3   : > { %6755 = vmatprep.subr.bf16.mxu0 %v8219_v21  ;;  %v3958_v0 = vshll.u32 %v8299_v63, 16  ;;  %v3927_v6 = vsel %vm7388_vm2, %v3922_v46, %v8241_v51  ;;  %v9157_v46 = vcombine.low %v8062_v61, %v8066_v36 }
  0xd4   : > { %6692 = vmatmul.mubr.bf16.gmra.mrb[16].mxu0 %v7162_v43  ;;  %v3976_v43 = vshrl.u32 %v8263_v33, 16  ;;  %v3965_v44 = vrot.slane %v3963_v53, 4  ;;  %v7237_v53 = vld [vmem:[%s7356_s16 + $0x98] sm:$0x1] }
  0xd5   : > { %6484 = vmatmul.mubr.bf16.vlgmr.msra.gmra.mrb[0].mxu1 %v9152_v42  ;;  %6695 = vmatprep.mubr.bf16.mxu0 %v7164_v19  ;;  %v8302_v19 = vrot.slane %v3934_v1, 5  ;;  %v1420_v42 = vrot.slane %v7236_v17, 5  ;;  %v7238_v17 = vld [vmem:[%s7356_s16 + $0xa0] sm:$0xf]  ;;  %v3960_v36 = vrot.slane %v3958_v0, 5 }
  0xd6   : > { %6516 = vmatpush3.bf16.msra.mxu1 %v7981_v60  ;;  %6487 = vmatprep.mubr.bf16.mxu1 %v9153_v52  ;;  %v8296_v60 = vsel %vm7634_vm5, %v1415_v2, %v1416_v23  ;;  %v3941_v52 = vrot.slane %v3939_v13, 4  ;;  %v3954_v23 = vrot.slane %v3952_v18, 4  ;;  %v3968_v2 = vrot.slane %v3966_v3, 5  ;;  %v7173_v13 = vld [vmem:[%s9126_s1 + $0xd8] sm:$0xff]  }
  0xd7   : > { %6517 = vmatprep.subr.bf16.mxu1 %v7165_v31  ;;  %v3978_v1 = vrot.slane %v3976_v43, 4  ;;  %v1296_v18 = vld [vmem:[%s7356_s16 + $0x9c] sm:$0xe]  ;;  %v1423_v3 = vrot.slane %v7237_v53, 5  ;;  %v8332_v43 = vld [vmem:[%s7356_s16 + $0x64] sm:$0xf] }
  0xd8   : > { %v3945_v5 = vor.u32 %v3944_v25, %v3941_v52  ;;  %9155 = vst [vmem:[#allocation5_spill] sm:$0xff] %v8332_v43  ;;  %v3955_v58 = vor.u32 %v3954_v23, %v8308_v38  ;;  %v1427_v12 = vrot.slane %v7238_v17, 5  ;;  %v9156_v25 = vcombine.low %v8052_v24, %v8056_v35  ;;  %v7170_v23 = vld [vmem:[%s7356_s16 + $0xb4] sm:$0xff]   ;;  %v7176_v24 = vld [vmem:[%s9126_s1 + $0xe0] sm:$0xff]   ;;  %v5854_v17 = vld [vmem:[%s7356_s16 + $0x6c] sm:$0xf] }
  0xd9   : > { %v1422_v52 = vrot.slane %v1420_v42, 4  ;;  %v3969_v53 = vor.u32 %v3968_v2, %v3965_v44  ;;  %v3979_v51 = vor.u32 %v3978_v1, %v8310_v34  ;;  %v3987_v35 = vshrl.u32 %v5851_v28, 16  ;;  %v7239_v2 = vld [vmem:[%s7356_s16 + $0xa4] sm:$0x1] }
  0xda   : > { %6518 = vmatpush3.bf16.msra.mxu1 %v7165_v31  ;;  %v8326_v31 = vsel %vm7634_vm5, %v5485_v22, %v1420_v42  ;;  %v3982_v22 = vshll.u32 %v8306_v39, 16  ;;  %v4000_v42 = vshrl.u32 %v8332_v43, 16  ;;  %v3946_v61 = vrot.slane %v3945_v5, 4  ;;  %v8501_v39 = vld [vmem:[%s7356_s16 + $0x98] sm:$0x1] }
  0xdb   : > { %6519 = vmatprep.subr.bf16.mxu1 %v7169_v30  ;;  %v5486_v44 = vrot.slane %v1296_v18, 9  ;;  %v1430_v1 = vrot.slane %v7239_v2, 5  ;;  %v3970_v5 = vrot.slane %v3969_v53, 4  ;;  %v3980_v18 = vrot.slane %v3979_v51, 4  ;;  %9171 = vst [vmem:[#allocation15_spill] sm:$0xff] %v8501_v39 }
  0xdc   : > { %6696 = vmatmul.mubr.bf16.gmra.mrb[20].mxu0 %v7166_v54  ;;  %v3937_v54 = vsel %vm7388_vm2, %v3932_v62, %v8302_v19  ;;  %v3996_v19 = vshll.u32 %v8332_v43, 16  ;;  %v7172_v62 = vld [vmem:[%s7356_s16 + $0xc0] sm:$0xff]   ;;  %v3984_v10 = vrot.slane %v3982_v22, 5  ;;  %v8368_v43 = vsel %vm7634_vm5, %v1422_v52, %v1423_v3 }
  0xdd   : > { %6488 = vmatmul.mubr.bf16.gmra.mrb[4].mxu1 %v9156_v25  ;;  %6699 = vmatprep.mubr.bf16.mxu0 %v7168_v8  ;;  %v3990_v8 = vshll.u32 %v5851_v28, 16  ;;  %v3956_v25 = vrot.slane %v3955_v58, 4  ;;  %v1434_v28 = vrot.slane %v7240_v41, 5  ;;  %v8364_v55 = vcombine.low %v3927_v6, %v3937_v54  ;;  %v7178_v41 = vld [vmem:[%s9126_s1 + $0xe8] sm:$0xff]  }
  0xde   : > { %6491 = vmatprep.mubr.bf16.mxu1 %v9157_v46  ;;  %6520 = vmatpush3.bf16.msra.mxu1 %v7169_v30  ;;  %v1297_v30 = vld [vmem:[%s7356_s16 + $0xa8] sm:$0xe]  ;;  %v1429_v46 = vrot.slane %v1427_v12, 4  ;;  %v3989_v0 = vrot.slane %v3987_v35, 4  ;;  %v8370_v58 = vrot.slane %v3996_v19, 5  ;;  %v4002_v22 = vrot.slane %v4000_v42, 4 }
  0xdf   : > { %6521 = vmatprep.subr.bf16.mxu1 %v7173_v13  ;;  %v3992_v2 = vrot.slane %v3990_v8, 5  ;;  %v3951_v3 = vsel %vm7388_vm2, %v3946_v61, %v8308_v38  ;;  %v8380_v6 = vsel %vm7634_vm5, %v5486_v44, %v1427_v12  ;;  %v4011_v54 = vshrl.u32 %v5854_v17, 16  ;;  %v7241_v38 = vld [vmem:[%s7356_s16 + $0xb0] sm:$0x1]  ;;  %v1298_v19 = vld [vmem:[%s7356_s16 + $0xb4] sm:$0xe] }
  0xe0   : > { %v4014_v52 = vshll.u32 %v5854_v17, 16  ;;  %v3961_v53 = vsel %vm7388_vm2, %v3956_v25, %v3960_v36  ;;  %v8389_v51 = vsel %vm7634_vm5, %v1429_v46, %v1430_v1  ;;  %v5487_v35 = vrot.slane %v1297_v30, 9  ;;  %v8411_v30 = vld [vmem:[%s7356_s16 + $0x74] sm:$0x1]  ;;  %v7242_v25 = vld [vmem:[%s7356_s16 + $0xb8] sm:$0xf] }
  0xe1   : > { %v1437_v8 = vrot.slane %v7241_v38, 5  ;;  %v9160_v12 = vcombine.low %v8083_v49, %v8097_v4  ;;  %v3975_v42 = vsel %vm7388_vm2, %v3970_v5, %v8310_v34  ;;  %v3985_v61 = vsel %vm7388_vm2, %v3980_v18, %v3984_v10  ;;  %v7174_v4 = vld [vmem:[%s7356_s16 + $0xcc] sm:$0xff]   ;;  %9162 = vst [vmem:[#allocation8_spill] sm:$0xff] %v8411_v30  ;;  %v5860_v38 = vld [vmem:[%s7356_s16 + $0x84] sm:$0xf] }
  0xe2   : > { %6522 = vmatpush3.bf16.msra.mxu1 %v7173_v13  ;;  %v8383_v13 = vld [vmem:[%s7356_s16 + $0x70] sm:$0xf]  ;;  %v1436_v36 = vrot.slane %v1434_v28, 4  ;;  %v4006_v44 = vshll.u32 %v8362_v47, 16  ;;  %v9161_v49 = vcombine.low %v8119_v26, %v8123_v56  ;;  %v4003_v1 = vor.u32 %v4002_v22, %v8370_v58  ;;  %v8428_v22 = vld [vmem:[%s7356_s16 + $0x7c] sm:$0xf] }
  0xe3   : > { %6523 = vmatprep.subr.bf16.mxu1 %v7176_v24  ;;  %9159 = vst [vmem:[#allocation7_spill] sm:$0xff] %v8383_v13  ;;  %v4020_v34 = vshll.u32 %v8383_v13, 16  ;;  %v4024_v10 = vshrl.u32 %v8383_v13, 16  ;;  %v5488_v17 = vrot.slane %v1298_v19, 9  ;;  %v1441_v46 = vrot.slane %v7242_v25, 5  ;;  %9163 = vst [vmem:[#allocation9_spill] sm:$0xff] %v8428_v22 }
  0xe4   : > { %6700 = vmatmul.mubr.bf16.gmra.mrb[24].mxu0 %v7170_v23  ;;  %v7180_v23 = vld [vmem:[%s9126_s1 + $0xf0] sm:$0xff]   ;;  %v4013_v26 = vrot.slane %v4011_v54, 4  ;;  %v4016_v56 = vrot.slane %v4014_v52, 5  ;;  %v8419_v18 = vcombine.low %v3951_v3, %v3961_v53  ;;  %v8431_v19 = vcombine.low %v3975_v42, %v3985_v61  ;;  %v7243_v3 = vld [vmem:[%s7356_s16 + $0xbc] sm:$0x1] }
  0xe5   : > { %6492 = vmatmul.mubr.bf16.gmra.mrb[8].mxu1 %v9160_v12  ;;  %6703 = vmatprep.mubr.bf16.mxu0 %v7172_v62  ;;  %v3993_v62 = vor.u32 %v3992_v2, %v3989_v0  ;;  %v8425_v2 = vsel %vm7634_vm5, %v5487_v35, %v1434_v28  ;;  %v8435_v54 = vsel %vm7634_vm5, %v1436_v36, %v1437_v8  ;;  %v8437_v52 = vrot.slane %v4006_v44, 5  ;;  %v7182_v12 = vld [vmem:[%s9126_s1 + $0xf8] sm:$0xff]   ;;  %v8444_v28 = vld [vmem:[%s7356_s16 + $0x88] sm:$0xf] }
  0xe6   : > { %6495 = vmatprep.mubr.bf16.mxu1 %v9161_v49  ;;  %6524 = vmatpush3.bf16.msra.mxu1 %v7176_v24  ;;  %v5857_v24 = vld [vmem:[%s7356_s16 + $0x78] sm:$0xf]  ;;  %v1444_v53 = vrot.slane %v7243_v3, 5  ;;  %9164 = vst [vmem:[#allocation10_spill] sm:$0xff] %v8444_v28  ;;  %v8448_v42 = vrot.slane %v4003_v1, 4  ;;  %v8450_v61 = vrot.slane %v4020_v34, 5  ;;  %v8454_v36 = vsel %vm7634_vm5, %v5488_v17, %v1441_v46 }
  0xe7   : > { %6525 = vmatprep.subr.bf16.mxu1 %v7178_v41  ;;  %v8446_v35 = vrot.slane %v3993_v62, 4  ;;  %v4026_v8 = vrot.slane %v4024_v10, 4  ;;  %v1443_v44 = vrot.slane %v1441_v46, 4  ;;  %v4017_v49 = vor.u32 %v4016_v56, %v4013_v26  ;;  %v5863_v3 = vld [vmem:[%s7356_s16 + $0x90] sm:$0xf] }
  0xe8   : > { %v4030_v25 = vshll.u32 %v8411_v30, 16  ;;  %v4038_v0 = vshll.u32 %v5857_v24, 16  ;;  %v4044_v62 = vshll.u32 %v8428_v22, 16  ;;  %v4048_v1 = vshrl.u32 %v8428_v22, 16  ;;  %v8461_v34 = vld [vmem:[%s7356_s16 + $0x94] sm:$0xf] }
  0xe9   : > { %9165 = vst [vmem:[#allocation11_spill] sm:$0xff] %v8461_v34  ;;  %v9166_v10 = vcombine.low %v8163_v27, %v8167_v29  ;;  %v4059_v17 = vshrl.u32 %v5860_v38, 16  ;;  %v4062_v46 = vshll.u32 %v5860_v38, 16  ;;  %v4072_v26 = vshrl.u32 %v8444_v28, 16  ;;  %v5866_v38 = vld [vmem:[%s7356_s16 + $0x9c] sm:$0xf] }
  0xea   : > { %6526 = vmatpush3.bf16.msra.mxu1 %v7178_v41  ;;  %v4035_v41 = vshrl.u32 %v5857_v24, 16  ;;  %v9167_v56 = vcombine.low %v8174_v45, %v8178_v14  ;;  %v4027_v29 = vor.u32 %v4026_v8, %v8450_v61  ;;  %v4086_v24 = vshll.u32 %v5863_v3, 16  ;;  %v8483_v45 = vld [vmem:[%s7356_s16 + $0x80] sm:$0x1] }
  0xeb   : > { %6527 = vmatprep.subr.bf16.mxu1 %v7180_v23  ;;  %v8480_v5 = vrot.slane %v4030_v25, 5  ;;  %9168 = vst [vmem:[#allocation12_spill] sm:$0xff] %v8483_v45  ;;  %v4092_v14 = vshll.u32 %v8461_v34, 16  ;;  %v4040_v27 = vrot.slane %v4038_v0, 5  ;;  %v4050_v8 = vrot.slane %v4048_v1, 4 }
  0xec   : > { %6704 = vmatmul.mubr.bf16.gmra.mrb[28].mxu0 %v7174_v4  ;;  %v4068_v4 = vshll.u32 %v8444_v28, 16  ;;  %v8487_v28 = vrot.slane %v4044_v62, 5  ;;  %v8493_v22 = vld [vmem:[%s7356_s16 + $0xa0] sm:$0xf]  ;;  %v4061_v25 = vrot.slane %v4059_v17, 4  ;;  %v4064_v30 = vrot.slane %v4062_v46, 5 }
  0xed   : > { %6496 = vmatmul.mubr.bf16.gmra.mrb[12].mxu1 %v9166_v10  ;;  %6723 = vmatprep.mubr.bf16.mxu0 %v8232_v59  ;;  %v4083_v59 = vshrl.u32 %v5863_v3, 16  ;;  %v8478_v10 = vrot.slane %v4017_v49, 4  ;;  %v8490_v3 = vld [vmem:[%s7356_s16 + $0x8c] sm:$0x1]  ;;  %9170 = vst [vmem:[#allocation14_spill] sm:$0xff] %v8493_v22  ;;  %v4074_v47 = vrot.slane %v4072_v26, 4  ;;  %v8510_v62 = vsel %vm7634_vm5, %v1443_v44, %v1444_v53 }
  0xee   : > { %6499 = vmatprep.mubr.bf16.mxu1 %v9167_v56  ;;  %6528 = vmatpush3.bf16.msra.mxu1 %v7180_v23  ;;  %v4096_v23 = vshrl.u32 %v8461_v34, 16  ;;  %v4037_v56 = vrot.slane %v4035_v41, 4  ;;  %9169 = vst [vmem:[#allocation13_spill] sm:$0xff] %v8490_v3  ;;  %v7179_v49 = vld [vmem:[%s9126_s1 + $0x208] sm:$0xff]   ;;  %v8498_v13 = vrot.slane %v4068_v4, 5  ;;  %v4088_v34 = vrot.slane %v4086_v24, 5 }
  0xef   : > { %6529 = vmatprep.subr.bf16.mxu1 %v7182_v12  ;;  %v5869_v41 = vld [vmem:[%s7356_s16 + $0xa8] sm:$0xf]  ;;  %v4085_v1 = vrot.slane %v4083_v59, 4  ;;  %v8515_v17 = vld [vmem:[%s9126_s1 + $0x100] sm:$0xff]   ;;  %v8518_v46 = vrot.slane %v4092_v14, 5  ;;  %v4107_v26 = vshrl.u32 %v5866_v38, 16  ;;  %v9173_v24 = vcombine.low %v8182_v16, %v8192_v15 }
  0xf0   : > { %9172 = vst [vmem:[#allocation16_spill] sm:$0xff] %v8515_v17  ;;  %v4098_v4 = vrot.slane %v4096_v23, 4  ;;  %v4110_v0 = vshll.u32 %v5866_v38, 16  ;;  %v8521_v53 = vrot.slane %v4027_v29, 4  ;;  %v4116_v44 = vshll.u32 %v8493_v22, 16  ;;  %v7181_v16 = vld [vmem:[%s9126_s1 + $0x210] sm:$0xff]  }
  0xf1   : > { %v4120_v59 = vshrl.u32 %v8493_v22, 16  ;;  %v4041_v14 = vor.u32 %v4040_v27, %v4037_v56  ;;  %v4051_v38 = vor.u32 %v4050_v8, %v8487_v28  ;;  %v4065_v23 = vor.u32 %v4064_v30, %v4061_v25  ;;  %v8533_v29 = vld [vmem:[%s7356_s16 + $0xac] sm:$0xf]  ;;  %v8546_v25 = vld [vmem:[%s7356_s16 + $0xa4] sm:$0x1] }
  0xf2   : > { %6530 = vmatpush3.bf16.msra.mxu1 %v7182_v12  ;;  %v4054_v12 = vshll.u32 %v8483_v45, 16  ;;  %9174 = vst [vmem:[#allocation17_spill] sm:$0xff] %v8533_v29  ;;  %v4075_v15 = vor.u32 %v4074_v47, %v8498_v13  ;;  %v4131_v27 = vshrl.u32 %v5869_v41, 16  ;;  %v4134_v30 = vshll.u32 %v5869_v41, 16 }
  0xf3   : > { %6803 = vmatprep.subr.bf16.mxu1 %v8515_v17  ;;  %v9175_v17 = vcombine.low %v8238_v20, %v8259_v7  ;;  %v4089_v56 = vor.u32 %v4088_v34, %v4085_v1  ;;  %v4099_v8 = vor.u32 %v4098_v4, %v8518_v46  ;;  %v4109_v20 = vrot.slane %v4107_v26, 4 }
  0xf4   : > { %6724 = vmatmul.mubr.bf16.vlgmr.msra.gmra.mrb[0].mxu0 %v8315_v50  ;;  %v4078_v50 = vshll.u32 %v8490_v3, 16  ;;  %v4112_v7 = vrot.slane %v4110_v0, 5  ;;  %v4144_v22 = vshrl.u32 %v8533_v29, 16  ;;  %v4042_v47 = vrot.slane %v4041_v14, 4  ;;  %v7183_v0 = vld [vmem:[%s9126_s1 + $0x218] sm:$0xff]  }
  0xf5   : > { %6500 = vmatmul.mubr.bf16.gmra.mrb[16].mxu1 %v9173_v24  ;;  %6756 = vmatpush3.bf16.msra.mxu0 %v8219_v21  ;;  %v4102_v21 = vshll.u32 %v8501_v39, 16  ;;  %v4140_v24 = vshll.u32 %v8533_v29, 16  ;;  %v4052_v39 = vrot.slane %v4051_v38, 4  ;;  %v4056_v3 = vrot.slane %v4054_v12, 5 }
  0xf6   : > { %6503 = vmatprep.mubr.bf16.mxu1 %v9175_v17  ;;  %6727 = vmatprep.mubr.bf16.mxu0 %v8319_v48  ;;  %v8548_v17 = vrot.slane %v4116_v44, 5  ;;  %v4122_v48 = vrot.slane %v4120_v59, 4  ;;  %v4080_v41 = vrot.slane %v4078_v50, 5  ;;  %v4066_v34 = vrot.slane %v4065_v23, 4 }
  0xf7   : > { %6757 = vmatprep.subr.bf16.mxu0 %v7179_v49  ;;  %v4076_v1 = vrot.slane %v4075_v15, 4  ;;  %v4133_v4 = vrot.slane %v4131_v27, 4  ;;  %v4136_v45 = vrot.slane %v4134_v30, 5  ;;  %v4090_v26 = vrot.slane %v4089_v56, 4  ;;  %v8614_v27 = vld [vmem:[%s7356_s16 + $0xbc] sm:$0x1] }
  0xf8   : > { %v4104_v44 = vrot.slane %v4102_v21, 5  ;;  %v4113_v59 = vor.u32 %v4112_v7, %v4109_v20  ;;  %v4126_v29 = vshll.u32 %v8546_v25, 16  ;;  %v4123_v12 = vor.u32 %v4122_v48, %v8548_v17  ;;  %v8581_v21 = vld [vmem:[%s7356_s16 + $0xb0] sm:$0x1] }
  0xf9   : > { %6758 = vmatpush3.bf16.msra.mxu0 %v7179_v49  ;;  %v4100_v49 = vrot.slane %v4099_v8, 4  ;;  %v8558_v14 = vrot.slane %v4140_v24, 5  ;;  %v4146_v38 = vrot.slane %v4144_v22, 4  ;;  %v9176_v23 = vor.u32 %v7966_v57, %v7964_v11 }
  0xfa   : > { %6759 = vmatprep.subr.bf16.mxu0 %v7181_v16  ;;  %v9177_v15 = vcombine.low %v8271_v40, %v8296_v60  ;;  %v4033_v22 = vsel %vm7388_vm2, %v8521_v53, %v8480_v5  ;;  %v4047_v57 = vsel %vm7388_vm2, %v4042_v47, %v8487_v28  ;;  %v9178_v40 = vcombine.low %v8326_v31, %v8368_v43  ;;  %v7186_v31 = vld [vmem:[%s9126_s1 + $0x220] sm:$0xff]  }
  0xfb   : > { %v8563_v50 = vrot.slane %v9176_v23, 4  ;;  %v4057_v60 = vsel %vm7388_vm2, %v4052_v39, %v4056_v3  ;;  %v4137_v5 = vor.u32 %v4136_v45, %v4133_v4  ;;  %v4081_v28 = vsel %vm7388_vm2, %v4076_v1, %v4080_v41  ;;  %v5925_v41 = vld [vmem:[%s7356_s16 + $0x48] sm:$0xe] }
  0xfc   : > { %6728 = vmatmul.mubr.bf16.gmra.mrb[4].mxu0 %v8364_v55  ;;  %v4023_v55 = vsel %vm7388_vm2, %v8478_v10, %v8450_v61  ;;  %v5872_v61 = vld [vmem:[%s7356_s16 + $0xb4] sm:$0xf]  ;;  %v8593_v10 = vld [vmem:[%s7356_s16 + $0xb8] sm:$0xf]  ;;  %v4095_v39 = vsel %vm7388_vm2, %v4090_v26, %v8518_v46  ;;  %v8603_v43 = vrot.slane %v4113_v59, 4  ;;  %v8605_v3 = vrot.slane %v4126_v29, 5 }
  0xfd   : > { %6504 = vmatmul.mubr.bf16.gmra.mrb[20].mxu1 %v9177_v15  ;;  %6731 = vmatprep.mubr.bf16.mxu0 %v8419_v18  ;;  %v4071_v18 = vsel %vm7388_vm2, %v4066_v34, %v8498_v13  ;;  %v4105_v13 = vsel %vm7388_vm2, %v4100_v49, %v4104_v44  ;;  %v8609_v45 = vrot.slane %v4123_v12, 4  ;;  %v4147_v53 = vor.u32 %v4146_v38, %v8558_v14  ;;  %v5926_v26 = vld [vmem:[%s7356_s16 + $0x54] sm:$0xe] }
  0xfe   : > { %6507 = vmatprep.mubr.bf16.mxu1 %v9178_v40  ;;  %6760 = vmatpush3.bf16.msra.mxu0 %v7181_v16  ;;  %v4150_v16 = vshll.u32 %v8581_v21, 16  ;;  %v9179_v46 = vsel %vm7388_vm2, %v8448_v42, %v8437_v52  ;;  %v9180_v29 = vsel %vm7388_vm2, %v8446_v35, %v8370_v58  ;;  %v4155_v56 = vshrl.u32 %v5872_v61, 16 }
  0xff   : > { %6761 = vmatprep.subr.bf16.mxu0 %v7183_v0  ;;  %v5903_v30 = vcombine.low %v9180_v29, %v9179_v46  ;;  %v4158_v8 = vshll.u32 %v5872_v61, 16  ;;  %v4164_v20 = vshll.u32 %v8593_v10, 16  ;;  %v5519_v7 = vcombine.low %v8425_v2, %v8435_v54  ;;  %v7189_v2 = vld [vmem:[%s9126_s1 + $0x228] sm:$0xff]   ;;  %v5875_v54 = vld [vmem:[%s7356_s16 + $0xc0] sm:$0xf]  ;;  %v9184_v29 = vld [vmem:[#allocation6_spill] sm:$0xff] }
 0x100   : > { %v5520_v48 = vcombine.low %v8454_v36, %v8510_v62  ;;  %v5904_v24 = vcombine.low %v4023_v55, %v4033_v22  ;;  %v8631_v52 = vrot.slane %v4137_v5, 4  ;;  %v5905_v42 = vcombine.low %v4047_v57, %v4057_v60 }
 0x101   : > { %v8633_v58 = vcombine.low %v4071_v18, %v4081_v28  ;;  %v8635_v35 = vcombine.low %v4095_v39, %v4105_v13  ;;  %v4119_v47 = vsel %vm7388_vm2, %v8603_v43, %v8548_v17  ;;  %v4129_v34 = vsel %vm7388_vm2, %v8609_v45, %v8605_v3  ;;  %v5928_v28 = vld [vmem:[%s7356_s16 + $0x6c] sm:$0xe] }
 0x102   : > { %6762 = vmatpush3.bf16.msra.mxu0 %v7183_v0  ;;  %v8651_v1 = vrot.slane %v4147_v53, 4  ;;  %v8653_v4 = vrot.slane %v4150_v16, 5  ;;  %v4168_v0 = vshrl.u32 %v8593_v10, 16  ;;  %v9181_v44 = vcombine.low %v8380_v6, %v8389_v51  ;;  %v7192_v6 = vld [vmem:[%s9126_s1 + $0x230] sm:$0xff]   ;;  %v8675_v51 = vld [vmem:[%s7356_s16 + $0xc4] sm:$0xf] }
 0x103   : > { %6763 = vmatprep.subr.bf16.mxu0 %v7186_v31  ;;  %v8660_v59 = vrot.slane %v4155_v56, 4  ;;  %v8664_v49 = vrot.slane %v4164_v20, 5  ;;  %v4174_v12 = vshll.u32 %v8614_v27, 16  ;;  %v4143_v38 = vsel %vm7388_vm2, %v8631_v52, %v8558_v14  ;;  %v5927_v14 = vld [vmem:[%s7356_s16 + $0x60] sm:$0xe]  ;;  %v9182_v39 = vld [vmem:[#allocation4_spill] sm:$0xff] }
 0x104   : > { %6732 = vmatmul.mubr.bf16.gmra.mrb[8].mxu0 %v8431_v19  ;;  %v8662_v19 = vrot.slane %v4158_v8, 5  ;;  %v4179_v23 = vshrl.u32 %v5875_v54, 16  ;;  %v5941_v15 = vrot.slane %v5925_v41, 9  ;;  %v4642_v55 = vrot.slane %v8251_v32, 5  ;;  %v7184_v13 = vld [vmem:[%s7356_s16 + $0xc] sm:$0xff]   ;;  %v7195_v56 = vld [vmem:[%s9126_s1 + $0x238] sm:$0xff]  }
 0x105   : > { %6508 = vmatmul.mubr.bf16.gmra.mrb[24].mxu1 %v9181_v44  ;;  %6735 = vmatprep.mubr.bf16.mxu0 %v5903_v30  ;;  %v4182_v22 = vshll.u32 %v5875_v54, 16  ;;  %v4645_v57 = vrot.slane %v8299_v63, 5  ;;  %v5942_v40 = vrot.slane %v5926_v26, 9  ;;  %v4649_v60 = vrot.slane %v8263_v33, 5  ;;  %v9183_v16 = vld [vmem:[#allocation5_spill] sm:$0xff]  ;;  %v9185_v52 = vld [vmem:[#allocation7_spill] sm:$0xff] }
 0x106   : > { %6511 = vmatprep.mubr.bf16.mxu1 %v5519_v7  ;;  %6764 = vmatpush3.bf16.msra.mxu0 %v7186_v31  ;;  %v4153_v18 = vsel %vm7388_vm2, %v8651_v1, %v8653_v4  ;;  %v8685_v5 = vrot.slane %v4168_v0, 4  ;;  %v8689_v61 = vsel %vm7634_vm5, %v5941_v15, %v4642_v55  ;;  %v4644_v32 = vrot.slane %v4642_v55, 4  ;;  %v9186_v4 = vld [vmem:[#allocation8_spill] sm:$0xff] }
 0x107   : > { %6765 = vmatprep.subr.bf16.mxu0 %v7189_v2  ;;  %v4188_v31 = vshll.u32 %v8675_v51, 16  ;;  %v8695_v63 = vsel %vm7634_vm5, %v5942_v40, %v4649_v60  ;;  %v4651_v33 = vrot.slane %v4649_v60, 4  ;;  %v4652_v3 = vrot.slane %v9182_v39, 5  ;;  %v8726_v26 = vld [vmem:[%s7356_s16 + $0xc8] sm:$0x1]  ;;  %v7185_v40 = vld [vmem:[%s7356_s16 + $0x18] sm:$0xff]  }
 0x108   : > { %v8701_v45 = vsel %vm7634_vm5, %v4644_v32, %v4645_v57  ;;  %v5943_v53 = vrot.slane %v5927_v14, 9  ;;  %v4656_v46 = vrot.slane %v9183_v16, 5  ;;  %v4659_v30 = vrot.slane %v9184_v29, 5  ;;  %v7187_v39 = vld [vmem:[%s7356_s16 + $0x24] sm:$0xff]  }
 0x109   : > { %v5973_v8 = vcombine.low %v8689_v61, %v8701_v45  ;;  %v8712_v20 = vsel %vm7634_vm5, %v4651_v33, %v4652_v3  ;;  %v5944_v7 = vrot.slane %v5928_v28, 9  ;;  %v4666_v0 = vrot.slane %v9186_v4, 5  ;;  %v9188_v28 = vld [vmem:[#allocation12_spill] sm:$0xff]  ;;  %v5634_v61 = vld [vmem:[%s7356_s16 + $0x90] sm:$0xf] }
 0x10a   : > { %6766 = vmatpush3.bf16.msra.mxu0 %v7189_v2  ;;  %v4663_v2 = vrot.slane %v9185_v52, 5  ;;  %v5974_v54 = vcombine.low %v8695_v63, %v8712_v20  ;;  %v8719_v41 = vsel %vm7634_vm5, %v5943_v53, %v4656_v46  ;;  %v4658_v1 = vrot.slane %v4656_v46, 4  ;;  %v9189_v53 = vld [vmem:[#allocation3_spill] sm:$0xff]  ;;  %v7201_v45 = vld [vmem:[%s7356_s16 + $0xa8] sm:$0xff]  }
 0x10b   : > { %6767 = vmatprep.subr.bf16.mxu0 %v7192_v6  ;;  %v8728_v44 = vrot.slane %v4179_v23, 4  ;;  %v8741_v36 = vcombine.low %v4119_v47, %v4129_v34  ;;  %v4161_v62 = vor.u32 %v8662_v19, %v8660_v59  ;;  %v5929_v23 = vld [vmem:[%s7356_s16 + $0x78] sm:$0xe]  ;;  %v8753_v57 = vrot.slane %v4174_v12, 5  ;;  %v5878_v12 = vld [vmem:[%s7356_s16 + $0xcc] sm:$0xf] }
 0x10c   : > { %6736 = vmatmul.mubr.bf16.gmra.mrb[12].mxu0 %v5904_v24  ;;  %v8730_v24 = vrot.slane %v4182_v22, 5  ;;  %v8734_v15 = vsel %vm7634_vm5, %v5944_v7, %v4663_v2  ;;  %v4665_v55 = vrot.slane %v4663_v2, 4  ;;  %v8751_v22 = vcombine.low %v4143_v38, %v4153_v18  ;;  %v5628_v47 = vld [vmem:[%s7356_s16 + $0x78] sm:$0xf]  ;;  %v9187_v18 = vld [vmem:[#allocation9_spill] sm:$0xff] }
 0x10d   : > { %6512 = vmatmul.mubr.bf16.gmra.mrb[28].mxu1 %v5520_v48  ;;  %6739 = vmatprep.mubr.bf16.mxu0 %v5905_v42  ;;  %v4192_v48 = vshrl.u32 %v8675_v51, 16  ;;  %v8748_v42 = vsel %vm7634_vm5, %v4658_v1, %v4659_v30  ;;  %v4171_v34 = vor.u32 %v8685_v5, %v8664_v49  ;;  %v8764_v59 = vrot.slane %v4188_v31, 5  ;;  %v8778_v31 = vld [vmem:[%s7356_s16 + $0xd0] sm:$0xf]  ;;  %v9190_v1 = vld [vmem:[#allocation10_spill] sm:$0xff] }
 0x10e   : > { %6531 = vmatprep.mubr.bf16.mxu1 %v7184_v13  ;;  %6768 = vmatpush3.bf16.msra.mxu0 %v7192_v6  ;;  %v5975_v17 = vcombine.low %v8719_v41, %v8748_v42  ;;  %v8759_v43 = vsel %vm7634_vm5, %v4665_v55, %v4666_v0  ;;  %v4198_v19 = vshll.u32 %v8726_v26, 16  ;;  %v5930_v6 = vld [vmem:[%s7356_s16 + $0x84] sm:$0xe]  ;;  %v4185_v60 = vor.u32 %v8730_v24, %v8728_v44  ;;  %v9191_v24 = vld [vmem:[#allocation13_spill] sm:$0xff]  ;;  %v7265_v63 = vld [vmem:[%s7356_s16 + $0x8c] sm:$0x1] }
 0x10f   : > { %6769 = vmatprep.subr.bf16.mxu0 %v7195_v56  ;;  %v5976_v38 = vcombine.low %v8734_v15, %v8759_v43  ;;  %v5945_v14 = vrot.slane %v5929_v23, 9  ;;  %v4670_v32 = vrot.slane %v9187_v18, 5  ;;  %v4673_v33 = vrot.slane %v9188_v28, 5 }
 0x110   : > { %v4194_v5 = vrot.slane %v4192_v48, 4  ;;  %v2420_v3 = vshrl.u32 %v5628_v47, 16  ;;  %v2423_v13 = vshll.u32 %v5628_v47, 16  ;;  %v2442_v16 = vsel %vm7388_vm2, %v8563_v50, %v9189_v53 }
 0x111   : > { %v4203_v46 = vshrl.u32 %v5878_v12, 16  ;;  %v8786_v29 = vsel %vm7634_vm5, %v5945_v14, %v4670_v32  ;;  %v4672_v30 = vrot.slane %v4670_v32, 4  ;;  %v5946_v7 = vrot.slane %v5930_v6, 9  ;;  %v7245_v6 = vld [vmem:[%s9126_s1 + $0x108] sm:$0xff]  }
 0x112   : > { %6770 = vmatpush3.bf16.msra.mxu0 %v7195_v56  ;;  %v4206_v52 = vshll.u32 %v5878_v12, 16  ;;  %v2422_v2 = vrot.slane %v2420_v3, 4  ;;  %v2425_v56 = vrot.slane %v2423_v13, 5  ;;  %v4677_v4 = vrot.slane %v9190_v1, 5  ;;  %v5931_v12 = vld [vmem:[%s7356_s16 + $0x90] sm:$0xe] }
 0x113   : > { %v4212_v50 = vshll.u32 %v8778_v31, 16  ;;  %v4216_v0 = vshrl.u32 %v8778_v31, 16  ;;  %v8795_v44 = vsel %vm7634_vm5, %v4672_v30, %v4673_v33  ;;  %v4680_v55 = vrot.slane %v9191_v24, 5  ;;  %v7188_v3 = vld [vmem:[%s7356_s16 + $0x30] sm:$0xff]  }
 0x114   : > { %6740 = vmatmul.mubr.bf16.gmra.mrb[16].mxu0 %v8633_v58  ;;  %v9192_v58 = vld [vmem:[#allocation16_spill] sm:$0xff]  ;;  %v4195_v48 = vor.u32 %v4194_v5, %v8764_v59  ;;  %v2426_v23 = vor.u32 %v2425_v56, %v2422_v2  ;;  %v4679_v47 = vrot.slane %v4677_v4, 4  ;;  %v4172_v14 = vrot.slane %v4171_v34, 4  ;;  %v8816_v13 = vld [vmem:[%s7356_s16 + $0xd4] sm:$0x1]  ;;  %v9193_v2 = vld [vmem:[#allocation11_spill] sm:$0xff] }
 0x115   : > { %6532 = vmatmul.mubr.bf16.vlgmr.msra.gmra.mrb[0].mxu1 %v7185_v40  ;;  %6743 = vmatprep.mubr.bf16.mxu0 %v8635_v35  ;;  %v5977_v35 = vcombine.low %v8786_v29, %v8795_v44  ;;  %v4162_v40 = vrot.slane %v4161_v62, 4  ;;  %v4200_v18 = vrot.slane %v4198_v19, 5  ;;  %v8808_v32 = vsel %vm7634_vm5, %v5946_v7, %v4677_v4  ;;  %v7190_v19 = vld [vmem:[%s7356_s16 + $0x3c] sm:$0xff]   ;;  %v7246_v1 = vld [vmem:[%s9126_s1 + $0x110] sm:$0xff]  }
 0x116   : > { %6811 = vmatpush3.bf16.msra.mxu1 %v9192_v58  ;;  %6535 = vmatprep.mubr.bf16.mxu1 %v7187_v39  ;;  %v4205_v28 = vrot.slane %v4203_v46, 4  ;;  %v4208_v33 = vrot.slane %v4206_v52, 5  ;;  %v2427_v39 = vrot.slane %v2426_v23, 4  ;;  %v8812_v5 = vsel %vm7634_vm5, %v4679_v47, %v4680_v55  ;;  %v7247_v47 = vld [vmem:[%s7356_s16 + $0x1c] sm:$0xf] }
 0x117   : > { %6804 = vmatprep.subr.bf16.mxu1 %v7245_v6  ;;  %v8818_v53 = vrot.slane %v4212_v50, 5  ;;  %v4218_v30 = vrot.slane %v4216_v0, 4  ;;  %v5978_v62 = vcombine.low %v8808_v32, %v8812_v5  ;;  %v5947_v34 = vrot.slane %v5931_v12, 9 }
 0x118   : > { %v4186_v7 = vrot.slane %v4185_v60, 4  ;;  %v4196_v46 = vrot.slane %v4195_v48, 4  ;;  %v2432_v52 = vsel %vm7388_vm2, %v2427_v39, %v7964_v11  ;;  %v4684_v56 = vrot.slane %v9193_v2, 5  ;;  %v9194_v11 = vld [vmem:[#allocation15_spill] sm:$0xff]  ;;  %v7191_v39 = vld [vmem:[%s7356_s16 + $0x48] sm:$0xff]  }
 0x119   : > { %v4167_v4 = vsel %vm7388_vm2, %v4162_v40, %v8664_v49  ;;  %v4177_v60 = vsel %vm7388_vm2, %v4172_v14, %v8753_v57  ;;  %v8836_v50 = vcombine.low %v2432_v52, %v2442_v16  ;;  %v4687_v0 = vrot.slane %v9194_v11, 5  ;;  %v5921_v57 = vld [vmem:[%s7356_s16 + $0x18] sm:$0xe]  ;;  %v5932_v16 = vld [vmem:[%s7356_s16 + $0x9c] sm:$0xe] }
 0x11a   : > { %6812 = vmatpush3.bf16.msra.mxu1 %v7245_v6  ;;  %v4209_v24 = vor.u32 %v4208_v33, %v4205_v28  ;;  %v4222_v55 = vshll.u32 %v8816_v13, 16  ;;  %v8843_v58 = vsel %vm7634_vm5, %v5947_v34, %v4684_v56  ;;  %v4686_v48 = vrot.slane %v4684_v56, 4  ;;  %v7248_v40 = vld [vmem:[%s9126_s1 + $0x118] sm:$0xff]   ;;  %v7249_v2 = vld [vmem:[%s7356_s16 + $0x20] sm:$0x1] }
 0x11b   : > { %6805 = vmatprep.subr.bf16.mxu1 %v7246_v1  ;;  %v4219_v49 = vor.u32 %v4218_v30, %v8818_v53  ;;  %v4201_v23 = vsel %vm7388_vm2, %v4196_v46, %v4200_v18  ;;  %v4614_v12 = vrot.slane %v7247_v47, 5  ;;  %v5910_v6 = vcombine.low %v4167_v4, %v4177_v60  ;;  %v9195_v34 = vld [vmem:[#allocation14_spill] sm:$0xff]  ;;  %v5933_v11 = vld [vmem:[%s7356_s16 + $0xa8] sm:$0xe] }
 0x11c   : > { %6744 = vmatmul.mubr.bf16.gmra.mrb[20].mxu0 %v8741_v36  ;;  %v4191_v36 = vsel %vm7388_vm2, %v4186_v7, %v8764_v59  ;;  %v4210_v14 = vrot.slane %v4209_v24, 4  ;;  %v4224_v28 = vrot.slane %v4222_v55, 5  ;;  %v5937_v18 = vrot.slane %v5921_v57, 9  ;;  %v7193_v46 = vld [vmem:[%s7356_s16 + $0x54] sm:$0xff]   ;;  %v5922_v55 = vld [vmem:[%s7356_s16 + $0x24] sm:$0xe] }
 0x11d   : > { %6536 = vmatmul.mubr.bf16.gmra.mrb[4].mxu1 %v7188_v3  ;;  %6747 = vmatprep.mubr.bf16.mxu0 %v8751_v22  ;;  %v8857_v22 = vsel %vm7634_vm5, %v4686_v48, %v4687_v0  ;;  %v5948_v33 = vrot.slane %v5932_v16, 9  ;;  %v5911_v3 = vcombine.low %v4191_v36, %v4201_v23  ;;  %v4220_v30 = vrot.slane %v4219_v49, 4  ;;  %v7251_v48 = vld [vmem:[%s7356_s16 + $0x28] sm:$0xf]  ;;  %v7252_v36 = vld [vmem:[%s7356_s16 + $0x34] sm:$0xf] }
 0x11e   : > { %6539 = vmatprep.mubr.bf16.mxu1 %v7190_v19  ;;  %6813 = vmatpush3.bf16.msra.mxu1 %v7246_v1  ;;  %v5979_v59 = vcombine.low %v8843_v58, %v8857_v22  ;;  %v4691_v19 = vrot.slane %v9195_v34, 5  ;;  %v4694_v7 = vrot.slane %v8546_v25, 5  ;;  %v4616_v52 = vrot.slane %v4614_v12, 4  ;;  %v7250_v1 = vld [vmem:[%s9126_s1 + $0x120] sm:$0xff]  }
 0x11f   : > { %6806 = vmatprep.subr.bf16.mxu1 %v7248_v40  ;;  %v4617_v56 = vrot.slane %v7249_v2, 5  ;;  %v4615_v25 = vsel %vm7634_vm5, %v5937_v18, %v4614_v12  ;;  %v4215_v0 = vsel %vm7388_vm2, %v4210_v14, %v8818_v53  ;;  %v4225_v24 = vsel %vm7388_vm2, %v4220_v30, %v4224_v28  ;;  %v5923_v12 = vld [vmem:[%s7356_s16 + $0x30] sm:$0xe]  ;;  %v7194_v30 = vld [vmem:[%s7356_s16 + $0x60] sm:$0xff]  }
 0x120   : > { %v8874_v4 = vsel %vm7634_vm5, %v5948_v33, %v4691_v19  ;;  %v4693_v60 = vrot.slane %v4691_v19, 4  ;;  %v4621_v49 = vrot.slane %v7251_v48, 5  ;;  %v4628_v23 = vrot.slane %v7252_v36, 5  ;;  %v7254_v33 = vld [vmem:[%s7356_s16 + $0x2c] sm:$0x1] }
 0x121   : > { %v4618_v16 = vsel %vm7634_vm5, %v4616_v52, %v4617_v56  ;;  %v5949_v47 = vrot.slane %v5933_v11, 9  ;;  %v5912_v28 = vcombine.low %v4215_v0, %v4225_v24  ;;  %v5938_v18 = vrot.slane %v5922_v55, 9  ;;  %v7196_v52 = vld [vmem:[%s7356_s16 + $0x6c] sm:$0xff]   ;;  %v5934_v11 = vld [vmem:[%s7356_s16 + $0xb4] sm:$0xe] }
 0x122   : > { %6814 = vmatpush3.bf16.msra.mxu1 %v7248_v40  ;;  %v8888_v57 = vsel %vm7634_vm5, %v4693_v60, %v4694_v7  ;;  %v9196_v40 = vld [vmem:[#allocation17_spill] sm:$0xff]  ;;  %v5969_v34 = vcombine.low %v4615_v25, %v4618_v16  ;;  %v4623_v19 = vrot.slane %v4621_v49, 4  ;;  %v5939_v2 = vrot.slane %v5923_v12, 9  ;;  %v5924_v0 = vld [vmem:[%s7356_s16 + $0x3c] sm:$0xe] }
 0x123   : > { %6807 = vmatprep.subr.bf16.mxu1 %v7250_v1  ;;  %v5980_v53 = vcombine.low %v8874_v4, %v8888_v57  ;;  %v4698_v14 = vrot.slane %v9196_v40, 5  ;;  %v4630_v56 = vrot.slane %v4628_v23, 4  ;;  %v7256_v24 = vld [vmem:[%s7356_s16 + $0x40] sm:$0xf]  ;;  %v4622_v48 = vsel %vm7634_vm5, %v5938_v18, %v4621_v49  ;;  %v7258_v18 = vld [vmem:[%s7356_s16 + $0x44] sm:$0x1] }
 0x124   : > { %6748 = vmatmul.mubr.bf16.gmra.mrb[24].mxu0 %v5910_v6  ;;  %v7253_v6 = vld [vmem:[%s9126_s1 + $0x128] sm:$0xff]   ;;  %v4635_v55 = vrot.slane %v7256_v24, 5  ;;  %v4705_v12 = vrot.slane %v8593_v10, 5  ;;  %v4629_v49 = vsel %vm7634_vm5, %v5939_v2, %v4628_v23  ;;  %v7259_v10 = vld [vmem:[%s9126_s1 + $0x138] sm:$0xff]   ;;  %v5935_v23 = vld [vmem:[%s7356_s16 + $0xc0] sm:$0xe] }
 0x125   : > { %6540 = vmatmul.mubr.bf16.gmra.mrb[8].mxu1 %v7191_v39  ;;  %6751 = vmatprep.mubr.bf16.mxu0 %v5911_v3  ;;  %v4624_v39 = vrot.slane %v7254_v33, 5  ;;  %v4701_v3 = vrot.slane %v8581_v21, 5  ;;  %v8905_v7 = vsel %vm7634_vm5, %v5949_v47, %v4698_v14  ;;  %v7257_v21 = vld [vmem:[%s9126_s1 + $0x130] sm:$0xff]   ;;  %v5950_v47 = vrot.slane %v5934_v11, 9 }
 0x126   : > { %6543 = vmatprep.mubr.bf16.mxu1 %v7193_v46  ;;  %6815 = vmatpush3.bf16.msra.mxu1 %v7250_v1  ;;  %v4700_v46 = vrot.slane %v4698_v14, 4  ;;  %v7255_v1 = vld [vmem:[%s7356_s16 + $0x38] sm:$0x1]  ;;  %v5940_v14 = vrot.slane %v5924_v0, 9  ;;  %v4638_v33 = vrot.slane %v7258_v18, 5  ;;  %v4712_v11 = vrot.slane %v8675_v51, 5 }
 0x127   : > { %6808 = vmatprep.subr.bf16.mxu1 %v7253_v6  ;;  %v4631_v60 = vrot.slane %v7255_v1, 5  ;;  %v4625_v36 = vsel %vm7634_vm5, %v4623_v19, %v4624_v39  ;;  %v4707_v39 = vrot.slane %v4705_v12, 4  ;;  %v5625_v19 = vld [vmem:[%s7356_s16 + $0x6c] sm:$0xf]  ;;  %v7199_v18 = vld [vmem:[%s7356_s16 + $0x90] sm:$0xff]   ;;  %v2463_v20 = vshll.u32 %v7265_v63, 16 }
 0x128   : > { %v8917_v25 = vsel %vm7634_vm5, %v4700_v46, %v4701_v3  ;;  %v5970_v3 = vcombine.low %v4622_v48, %v4625_v36  ;;  %v4636_v1 = vsel %vm7634_vm5, %v5940_v14, %v4635_v55  ;;  %v2396_v0 = vshrl.u32 %v5625_v19, 16  ;;  %v5936_v51 = vld [vmem:[%s7356_s16 + $0xcc] sm:$0xe] }
 0x129   : > { %v5981_v16 = vcombine.low %v8905_v7, %v8917_v25  ;;  %v4632_v40 = vsel %vm7634_vm5, %v4630_v56, %v4631_v60  ;;  %v5951_v56 = vrot.slane %v5935_v23, 9  ;;  %v2399_v24 = vshll.u32 %v5625_v19, 16 }
 0x12a   : > { %6816 = vmatpush3.bf16.msra.mxu1 %v7253_v6  ;;  %v4708_v6 = vrot.slane %v8614_v27, 5  ;;  %v8937_v27 = vsel %vm7634_vm5, %v5950_v47, %v4705_v12  ;;  %v4715_v36 = vrot.slane %v8726_v26, 5  ;;  %v4714_v12 = vrot.slane %v4712_v11, 4 }
 0x12b   : > { %6809 = vmatprep.subr.bf16.mxu1 %v7257_v21  ;;  %v2401_v26 = vrot.slane %v2399_v24, 5  ;;  %v4722_v23 = vrot.slane %v8816_v13, 5 }
 0x12c   : > { %6752 = vmatmul.mubr.bf16.gmra.mrb[28].mxu0 %v5912_v28  ;;  %v4637_v28 = vrot.slane %v4635_v55, 4  ;;  %v8944_v46 = vsel %vm7634_vm5, %v4707_v39, %v4708_v6  ;;  %v8958_v55 = vsel %vm7634_vm5, %v5951_v56, %v4712_v11  ;;  %v4719_v39 = vrot.slane %v8778_v31, 5  ;;  %v7261_v56 = vld [vmem:[%s7356_s16 + $0x74] sm:$0x1] }
 0x12d   : > { %6544 = vmatmul.mubr.bf16.gmra.mrb[12].mxu1 %v7194_v30  ;;  %6771 = vmatprep.mubr.bf16.mxu0 %v5969_v34  ;;  %v7197_v30 = vld [vmem:[%s7356_s16 + $0x78] sm:$0xff]   ;;  %v5971_v34 = vcombine.low %v4629_v49, %v4632_v40  ;;  %v5982_v2 = vcombine.low %v8937_v27, %v8944_v46  ;;  %v8963_v49 = vsel %vm7634_vm5, %v4714_v12, %v4715_v36  ;;  %v2398_v40 = vrot.slane %v2396_v0, 4  ;;  %v7262_v0 = vld [vmem:[%s7356_s16 + $0x88] sm:$0xf] }
 0x12e   : > { %6547 = vmatprep.mubr.bf16.mxu1 %v7196_v52  ;;  %6817 = vmatpush3.bf16.msra.mxu1 %v7257_v21  ;;  %v7198_v52 = vld [vmem:[%s7356_s16 + $0x84] sm:$0xff]   ;;  %v4639_v60 = vsel %vm7634_vm5, %v4637_v28, %v4638_v33  ;;  %v7260_v21 = vld [vmem:[%s7356_s16 + $0x70] sm:$0xf]  ;;  %v5983_v28 = vcombine.low %v8958_v55, %v8963_v49  ;;  %v4721_v19 = vrot.slane %v4719_v39, 4  ;;  %v2453_v24 = vshll.u32 %v7262_v0, 16 }
 0x12f   : > { %6810 = vmatprep.subr.bf16.mxu1 %v7259_v10  ;;  %v2405_v48 = vshll.u32 %v7260_v21, 16  ;;  %v2409_v47 = vshrl.u32 %v7260_v21, 16  ;;  %v5972_v6 = vcombine.low %v4636_v1, %v4639_v60  ;;  %v2415_v1 = vshll.u32 %v7261_v56, 16 }
 0x130   : > { %v8985_v11 = vsel %vm7634_vm5, %v4721_v19, %v4722_v23  ;;  %v2457_v21 = vshrl.u32 %v7262_v0, 16  ;;  %v7264_v19 = vld [vmem:[%s7356_s16 + $0xa0] sm:$0xf] }
 0x131   : > { %v8965_v14 = vrot.slane %v2405_v48, 5  ;;  %v2411_v33 = vrot.slane %v2409_v47, 4  ;;  %v2505_v56 = vshrl.u32 %v7264_v19, 16 }
 0x132   : > { %6818 = vmatpush3.bf16.msra.mxu1 %v7259_v10  ;;  %v5952_v10 = vrot.slane %v5936_v51, 9 }
 0x133   : > { %v2412_v31 = vor.u32 %v2411_v33, %v8965_v14  ;;  %v2471_v33 = vshll.u32 %v5634_v61, 16 }
 0x134   : > { %6772 = vmatmul.mubr.bf16.vlgmr.msra.gmra.mrb[0].mxu0 %v5970_v3  ;;  %v7200_v3 = vld [vmem:[%s7356_s16 + $0x9c] sm:$0xff]  }
 0x135   : > { %6548 = vmatmul.mubr.bf16.gmra.mrb[16].mxu1 %v7197_v30  ;;  %6775 = vmatprep.mubr.bf16.mxu0 %v5971_v34  ;;  %v5631_v30 = vld [vmem:[%s7356_s16 + $0x84] sm:$0xf]  ;;  %v8976_v34 = vsel %vm7634_vm5, %v5952_v10, %v4719_v39  ;;  %v2413_v47 = vrot.slane %v2412_v31, 4  ;;  %v7263_v10 = vld [vmem:[%s7356_s16 + $0x94] sm:$0xf]  ;;  %v2473_v0 = vrot.slane %v2471_v33, 5 }
 0x136   : > { %6551 = vmatprep.mubr.bf16.mxu1 %v7198_v52  ;;  %v2402_v52 = vor.u32 %v2401_v26, %v2398_v40  ;;  %v2444_v13 = vshrl.u32 %v5631_v30, 16  ;;  %v2447_v60 = vshll.u32 %v5631_v30, 16  ;;  %v5984_v48 = vcombine.low %v8976_v34, %v8985_v11 }
 0x137   : > { %v8994_v40 = vrot.slane %v2453_v24, 5  ;;  %v2459_v26 = vrot.slane %v2457_v21, 4  ;;  %v2477_v39 = vshll.u32 %v7263_v10, 16  ;;  %v2481_v23 = vshrl.u32 %v7263_v10, 16  ;;  %v7267_v10 = vld [vmem:[%s7356_s16 + $0xa4] sm:$0x1] }
 0x138   : > { %v2403_v36 = vrot.slane %v2402_v52, 4  ;;  %v2446_v12 = vrot.slane %v2444_v13, 4  ;;  %v2449_v51 = vrot.slane %v2447_v60, 5  ;;  %v2501_v52 = vshll.u32 %v7264_v19, 16  ;;  %v7268_v19 = vld [vmem:[%s7356_s16 + $0xac] sm:$0xf] }
 0x139   : > { %v2460_v13 = vor.u32 %v2459_v26, %v8994_v40  ;;  %v9011_v41 = vrot.slane %v2477_v39, 5  ;;  %v2483_v42 = vrot.slane %v2481_v23, 4  ;;  %v2507_v21 = vrot.slane %v2505_v56, 4  ;;  %v5643_v23 = vld [vmem:[%s7356_s16 + $0xb4] sm:$0xf] }
 0x13a   : > { %v2511_v39 = vshll.u32 %v7267_v10, 16  ;;  %v2529_v15 = vshrl.u32 %v7268_v19, 16  ;;  %v2543_v63 = vshll.u32 %v5643_v23, 16 }
 0x13b   : > { %v2484_v26 = vor.u32 %v2483_v42, %v9011_v41 }
 0x13c   : > { %6776 = vmatmul.mubr.bf16.gmra.mrb[4].mxu0 %v5972_v6  ;;  %v5637_v6 = vld [vmem:[%s7356_s16 + $0x9c] sm:$0xf] }
 0x13d   : > { %6552 = vmatmul.mubr.bf16.gmra.mrb[20].mxu1 %v7199_v18  ;;  %6779 = vmatprep.mubr.bf16.mxu0 %v5973_v8  ;;  %v2417_v8 = vrot.slane %v2415_v1, 5  ;;  %v2468_v18 = vshrl.u32 %v5634_v61, 16  ;;  %v2495_v30 = vshll.u32 %v5637_v6, 16  ;;  %v2408_v1 = vsel %vm7388_vm2, %v2403_v36, %v8965_v14  ;;  %v7203_v61 = vld [vmem:[%s7356_s16 + $0xc0] sm:$0xff]  }
 0x13e   : > { %6555 = vmatprep.mubr.bf16.mxu1 %v7200_v3  ;;  %v2492_v3 = vshrl.u32 %v5637_v6, 16  ;;  %v9013_v14 = vrot.slane %v2501_v52, 5  ;;  %v2525_v52 = vshll.u32 %v7268_v19, 16 }
 0x13f   : > { %v2418_v31 = vsel %vm7388_vm2, %v2413_v47, %v2417_v8  ;;  %v2470_v60 = vrot.slane %v2468_v18, 4  ;;  %v2497_v24 = vrot.slane %v2495_v30, 5  ;;  %v2465_v8 = vrot.slane %v2463_v20, 5  ;;  %v7269_v20 = vld [vmem:[%s7356_s16 + $0xb8] sm:$0xf] }
 0x140   : > { %v2461_v47 = vrot.slane %v2460_v13, 4  ;;  %v2508_v33 = vor.u32 %v2507_v21, %v9013_v14  ;;  %v2549_v29 = vshll.u32 %v7269_v20, 16  ;;  %v2553_v44 = vshrl.u32 %v7269_v20, 16 }
 0x142   : > { %v2509_v13 = vrot.slane %v2508_v33, 4 }
 0x144   : > { %6780 = vmatmul.mubr.bf16.gmra.mrb[8].mxu0 %v5974_v54  ;;  %v2450_v54 = vor.u32 %v2449_v51, %v2446_v12  ;;  %v2474_v12 = vor.u32 %v2473_v0, %v2470_v60  ;;  %v7266_v51 = vld [vmem:[%s7356_s16 + $0x98] sm:$0x1]  ;;  %v2513_v60 = vrot.slane %v2511_v39, 5 }
 0x145   : > { %6556 = vmatmul.mubr.bf16.gmra.mrb[24].mxu1 %v7201_v45  ;;  %6783 = vmatprep.mubr.bf16.mxu0 %v5975_v17  ;;  %v2494_v17 = vrot.slane %v2492_v3, 4  ;;  %v5673_v45 = vcombine.low %v2408_v1, %v2418_v31  ;;  %v2487_v6 = vshll.u32 %v7266_v51, 16  ;;  %v2540_v31 = vshrl.u32 %v5643_v23, 16 }
 0x146   : > { %6559 = vmatprep.mubr.bf16.mxu1 %v7202_v9  ;;  %v2451_v36 = vrot.slane %v2450_v54, 4  ;;  %v5640_v9 = vld [vmem:[%s7356_s16 + $0xa8] sm:$0xf]  ;;  %v2475_v56 = vrot.slane %v2474_v12, 4  ;;  %v2514_v32 = vsel %vm7388_vm2, %v2509_v13, %v2513_v60 }
 0x147   : > { %v2498_v18 = vor.u32 %v2497_v24, %v2494_v17  ;;  %v2516_v3 = vshrl.u32 %v5640_v9, 16  ;;  %v2519_v30 = vshll.u32 %v5640_v9, 16  ;;  %v2489_v1 = vrot.slane %v2487_v6, 5 }
 0x148   : > { %v2456_v43 = vsel %vm7388_vm2, %v2451_v36, %v8994_v40  ;;  %v2527_v17 = vrot.slane %v2525_v52, 5  ;;  %v2531_v24 = vrot.slane %v2529_v15, 4  ;;  %v2542_v21 = vrot.slane %v2540_v31, 4  ;;  %v5646_v36 = vld [vmem:[%s7356_s16 + $0xc0] sm:$0xf] }
 0x149   : > { %v2499_v54 = vrot.slane %v2498_v18, 4  ;;  %v2518_v0 = vrot.slane %v2516_v3, 4  ;;  %v2521_v42 = vrot.slane %v2519_v30, 5  ;;  %v2564_v9 = vshrl.u32 %v5646_v36, 16  ;;  %v7271_v18 = vld [vmem:[%s7356_s16 + $0xc4] sm:$0xf] }
 0x14a   : > { %v2573_v33 = vshll.u32 %v7271_v18, 16 }
 0x14b   : > { %v2504_v51 = vsel %vm7388_vm2, %v2499_v54, %v9013_v14  ;;  %v2522_v5 = vor.u32 %v2521_v42, %v2518_v0  ;;  %v2577_v14 = vshrl.u32 %v7271_v18, 16  ;;  %v2566_v19 = vrot.slane %v2564_v9, 4 }
 0x14c   : > { %6784 = vmatmul.mubr.bf16.gmra.mrb[12].mxu0 %v5976_v38  ;;  %v2466_v38 = vsel %vm7388_vm2, %v2461_v47, %v2465_v8  ;;  %v2555_v8 = vrot.slane %v2553_v44, 4  ;;  %v2480_v47 = vsel %vm7388_vm2, %v2475_v56, %v9011_v41  ;;  %v7270_v41 = vld [vmem:[%s7356_s16 + $0xb0] sm:$0x1]  ;;  %v5677_v58 = vcombine.low %v2504_v51, %v2514_v32  ;;  %v7273_v44 = vld [vmem:[%s7356_s16 + $0xc8] sm:$0x1] }
 0x14d   : > { %6560 = vmatmul.mubr.bf16.gmra.mrb[28].mxu1 %v7203_v61  ;;  %6787 = vmatprep.mubr.bf16.mxu0 %v5977_v35  ;;  %v2485_v35 = vrot.slane %v2484_v26, 4  ;;  %v5675_v40 = vcombine.low %v2456_v43, %v2466_v38  ;;  %v2545_v61 = vrot.slane %v2543_v63, 5  ;;  %v2535_v6 = vshll.u32 %v7270_v41, 16 }
 0x14e   : > { %6595 = vmatprep.mubr.bf16.mxu1 %v5673_v45  ;;  %v2551_v45 = vrot.slane %v2549_v29, 5  ;;  %v2567_v26 = vshll.u32 %v5646_v36, 16  ;;  %v2523_v22 = vrot.slane %v2522_v5, 4  ;;  %v2575_v15 = vrot.slane %v2573_v33, 5 }
 0x14f   : > { %v2490_v12 = vsel %vm7388_vm2, %v2485_v35, %v2489_v1  ;;  %v2546_v10 = vor.u32 %v2545_v61, %v2542_v21  ;;  %v2537_v30 = vrot.slane %v2535_v6, 5  ;;  %v2579_v43 = vrot.slane %v2577_v14, 4 }
 0x150   : > { %v2556_v39 = vor.u32 %v2555_v8, %v2551_v45  ;;  %v5676_v3 = vcombine.low %v2480_v47, %v2490_v12  ;;  %v2569_v52 = vrot.slane %v2567_v26, 5  ;;  %v2528_v31 = vsel %vm7388_vm2, %v2523_v22, %v2527_v17 }
 0x151   : > { %v2547_v38 = vrot.slane %v2546_v10, 4  ;;  %v2580_v29 = vor.u32 %v2579_v43, %v2575_v15  ;;  %v2583_v35 = vshll.u32 %v7273_v44, 16 }
 0x152   : > { %v2557_v56 = vrot.slane %v2556_v39, 4  ;;  %v2570_v20 = vor.u32 %v2569_v52, %v2566_v19 }
 0x153   : > { %v2552_v4 = vsel %vm7388_vm2, %v2547_v38, %v2551_v45  ;;  %v2585_v54 = vrot.slane %v2583_v35, 5 }
 0x154   : > { %6788 = vmatmul.mubr.bf16.gmra.mrb[16].mxu0 %v5978_v62  ;;  %v2532_v62 = vor.u32 %v2531_v24, %v2527_v17  ;;  %v2571_v25 = vrot.slane %v2570_v20, 4 }
 0x155   : > { %6596 = vmatmul.mubr.bf16.vlgmr.msra.gmra.mrb[16].mxu1 %v8836_v50  ;;  %6791 = vmatprep.mubr.bf16.mxu0 %v5979_v59  ;;  %v7272_v50 = vld [vmem:[%s7356_s16 + $0xbc] sm:$0x1]  ;;  %s6027_s16 = sshll.u32 %s9198_s2, 7 }
 0x156   : > { %6599 = vmatprep.mubr.bf16.mxu1 %v5675_v40  ;;  %v2559_v23 = vshll.u32 %v7272_v50, 16  ;;  %v2533_v59 = vrot.slane %v2532_v62, 4  ;;  %v2576_v13 = vsel %vm7388_vm2, %v2571_v25, %v2575_v15  ;;  %s9096_s14 = scalar_lea.vmem %s9129_s4, %s6027_s16 }
 0x158   : > { %v2561_v1 = vrot.slane %v2559_v23, 5  ;;  %v2538_v63 = vsel %vm7388_vm2, %v2533_v59, %v2537_v30 }
 0x15a   : > { %v2562_v57 = vsel %vm7388_vm2, %v2557_v56, %v2561_v1 }
 0x15b   : > { %v5679_v7 = vcombine.low %v2552_v4, %v2562_v57 }
 0x15c   : > { %6792 = vmatmul.mubr.bf16.gmra.mrb[20].mxu0 %v5980_v53  ;;  %v5678_v53 = vcombine.low %v2528_v31, %v2538_v63 }
 0x15d   : > { %6600 = vmatmul.mubr.bf16.gmra.mrb[20].mxu1 %v5676_v3  ;;  %6795 = vmatprep.mubr.bf16.mxu0 %v5981_v16  ;;  %v2581_v16 = vrot.slane %v2580_v29, 4 }
 0x15e   : > { %6603 = vmatprep.mubr.bf16.mxu1 %v5677_v58 }
 0x15f   : > { %v2586_v60 = vsel %vm7388_vm2, %v2581_v16, %v2585_v54 }
 0x160   : > { %v5680_v0 = vcombine.low %v2576_v13, %v2586_v60 }
 0x164   : > { %6796 = vmatmul.mubr.bf16.gmra.mrb[24].mxu0 %v5982_v2 }
 0x165   : > { %6604 = vmatmul.mubr.bf16.gmra.mrb[24].mxu1 %v5678_v53  ;;  %6799 = vmatprep.mubr.bf16.mxu0 %v5983_v28 }
 0x166   : > { %6607 = vmatprep.mubr.bf16.mxu1 %v5679_v7 }
 0x16c   : > { %6800 = vmatmul.mubr.bf16.gmra.mrb[28].mxu0 %v5984_v48 }
 0x16d   : > { %6608 = vmatmul.mubr.bf16.gmra.mrb[28].mxu1 %v5680_v0 }
 0x1e8   : > { %v6533_v27 = vpop.f32.mrb[0].mxu1 }
 0x1e9   : > { %v1996_v46 = vpop.f32.mrb[1].mxu1 }
 0x1ea   : > { %v6534_v2 = vpop.f32.mrb[2].mxu1 }
 0x1eb   : > { %v1999_v42 = vpop.f32.mrb[3].mxu1 }
 0x1f0   : > { %v6537_v55 = vpop.f32.mrb[4].mxu1 }
 0x1f1   : > { %v2012_v49 = vpop.f32.mrb[5].mxu1 }
 0x1f2   : > { %v6538_v28 = vpop.f32.mrb[6].mxu1 }
 0x1f3   : > { %v2015_v17 = vpop.f32.mrb[7].mxu1 }
 0x1f8   : > { %v6541_v24 = vpop.f32.mrb[8].mxu1 }
 0x1f9   : > { %v2028_v40 = vpop.f32.mrb[9].mxu1 }
 0x1fa   : > { %v6542_v21 = vpop.f32.mrb[10].mxu1 }
 0x1fb   : > { %v2031_v37 = vpop.f32.mrb[11].mxu1 }
 0x200   : > { %v9084_v61 = vpop.f32.mrb[12].mxu1 }
 0x201   : > { %v9086_v45 = vpop.f32.mrb[13].mxu1 }
 0x202   : > { %v9088_v34 = vpop.f32.mrb[14].mxu1 }
 0x203   : > { %v9090_v11 = vpop.f32.mrb[15].mxu1 }
 0x207   : > { %v6773_v48 = vpop.f32.mrb[0].mxu0 }
 0x208   : > { %v6819_v8 = vadd.f32 %v6773_v48, %v6533_v27  ;;  %v4887_v36 = vpop.f32.mrb[1].mxu0 }
 0x209   : > { %v6820_v47 = vadd.f32 %v4887_v36, %v1996_v46  ;;  %v6774_v12 = vpop.f32.mrb[2].mxu0 }
 0x20a   : > { %v6821_v51 = vadd.f32 %v6774_v12, %v6534_v2  ;;  %v4890_v32 = vpop.f32.mrb[3].mxu0  ;;  %v5246_v18 = vmul.f32 %v6819_v8, %v6819_v8 }
 0x20b   : > { %v6822_v5 = vadd.f32 %v4890_v32, %v1999_v42  ;;  %v5244_v41 = vmul.f32 %v6820_v47, %v6820_v47 }
 0x20c   : > { %v6068_v62 = vpack.c.bf16 %v6821_v51, %v6819_v8  ;;  %v5247_v23 = vmul.f32 %v6821_v51, %v6821_v51 }
 0x20d   : > { %v6063_v6 = vpack.c.bf16 %v6822_v5, %v6820_v47  ;;  %v5206_v9 = vadd.f32 %v6822_v5, %v6820_v47  ;;  %v5245_v26 = vmul.f32 %v6822_v5, %v6822_v5 }
 0x20e   : > { %6140 = vst [vmem:[%s9096_s14 + $0x8] sm:$0xff] %v6068_v62  }
 0x20f   : > { %6064 = vst [vmem:[%s9096_s14] sm:$0xff] %v6063_v6   ;;  %v5207_v33 = vadd.f32 %v6819_v8, %v5206_v9  ;;  %v5276_v14 = vadd.f32 %v5245_v26, %v5244_v41  ;;  %v6777_v10 = vpop.f32.mrb[4].mxu0 }
 0x210   : > { %v6823_v39 = vadd.f32 %v6777_v10, %v6537_v55  ;;  %v4903_v50 = vpop.f32.mrb[5].mxu0 }
 0x211   : > { %v5277_v3 = vadd.f32 %v5276_v14, %v5246_v18  ;;  %v6824_v58 = vadd.f32 %v4903_v50, %v2012_v49  ;;  %v5208_v22 = vadd.f32 %v6821_v51, %v5207_v33  ;;  %v6778_v59 = vpop.f32.mrb[6].mxu0 }
 0x212   : > { %v6825_v30 = vadd.f32 %v6778_v59, %v6538_v28  ;;  %v4906_v19 = vpop.f32.mrb[7].mxu0  ;;  %v5250_v29 = vmul.f32 %v6823_v39, %v6823_v39 }
 0x213   : > { %v5209_v52 = vadd.f32 %v6824_v58, %v5208_v22  ;;  %v5248_v15 = vmul.f32 %v6824_v58, %v6824_v58  ;;  %v5278_v43 = vadd.f32 %v5277_v3, %v5247_v23  ;;  %v6826_v38 = vadd.f32 %v4906_v19, %v2015_v17 }
 0x214   : > { %v6078_v56 = vpack.c.bf16 %v6825_v30, %v6823_v39  ;;  %v5251_v7 = vmul.f32 %v6825_v30, %v6825_v30 }
 0x215   : > { %v5279_v1 = vadd.f32 %v5278_v43, %v5248_v15  ;;  %v6073_v31 = vpack.c.bf16 %v6826_v38, %v6824_v58  ;;  %v5210_v63 = vadd.f32 %v6826_v38, %v5209_v52  ;;  %v5249_v20 = vmul.f32 %v6826_v38, %v6826_v38 }
 0x216   : > { %6142 = vst [vmem:[%s9096_s14 + $0x18] sm:$0xff] %v6078_v56  }
 0x217   : > { %6141 = vst [vmem:[%s9096_s14 + $0x10] sm:$0xff] %v6073_v31   ;;  %v5211_v44 = vadd.f32 %v6823_v39, %v5210_v63  ;;  %v5280_v35 = vadd.f32 %v5279_v1, %v5249_v20  ;;  %v6781_v4 = vpop.f32.mrb[8].mxu0 }
 0x218   : > { %v6827_v57 = vadd.f32 %v6781_v4, %v6541_v24  ;;  %v4919_v53 = vpop.f32.mrb[9].mxu0 }
 0x219   : > { %v5281_v25 = vadd.f32 %v5280_v35, %v5250_v29  ;;  %v6828_v16 = vadd.f32 %v4919_v53, %v2028_v40  ;;  %v5212_v54 = vadd.f32 %v6825_v30, %v5211_v44  ;;  %v6782_v13 = vpop.f32.mrb[10].mxu0 }
 0x21a   : > { %v6829_v60 = vadd.f32 %v6782_v13, %v6542_v21  ;;  %v4922_v0 = vpop.f32.mrb[11].mxu0  ;;  %v5254_v24 = vmul.f32 %v6827_v57, %v6827_v57 }
 0x21b   : > { %v5213_v27 = vadd.f32 %v6828_v16, %v5212_v54  ;;  %v5252_v46 = vmul.f32 %v6828_v16, %v6828_v16  ;;  %v5282_v2 = vadd.f32 %v5281_v25, %v5251_v7  ;;  %v6830_v42 = vadd.f32 %v4922_v0, %v2031_v37 }
 0x21c   : > { %v6088_v55 = vpack.c.bf16 %v6829_v60, %v6827_v57  ;;  %v5255_v21 = vmul.f32 %v6829_v60, %v6829_v60 }
 0x21d   : > { %v5283_v49 = vadd.f32 %v5282_v2, %v5252_v46  ;;  %v6083_v28 = vpack.c.bf16 %v6830_v42, %v6828_v16  ;;  %v5214_v17 = vadd.f32 %v6830_v42, %v5213_v27  ;;  %v5253_v48 = vmul.f32 %v6830_v42, %v6830_v42 }
 0x21e   : > { %6144 = vst [vmem:[%s9096_s14 + $0x28] sm:$0xff] %v6088_v55  }
 0x21f   : > { %6143 = vst [vmem:[%s9096_s14 + $0x20] sm:$0xff] %v6083_v28   ;;  %v5215_v8 = vadd.f32 %v6827_v57, %v5214_v17  ;;  %v5284_v36 = vadd.f32 %v5283_v49, %v5253_v48  ;;  %v6785_v40 = vpop.f32.mrb[12].mxu0 }
 0x220   : > { %v6831_v47 = vadd.f32 %v6785_v40, %v9084_v61  ;;  %v4935_v12 = vpop.f32.mrb[13].mxu0 }
 0x221   : > { %v5285_v51 = vadd.f32 %v5284_v36, %v5254_v24  ;;  %v6832_v32 = vadd.f32 %v4935_v12, %v9086_v45  ;;  %v5216_v37 = vadd.f32 %v6829_v60, %v5215_v8  ;;  %v6786_v5 = vpop.f32.mrb[14].mxu0 }
 0x222   : > { %v6833_v62 = vadd.f32 %v6786_v5, %v9088_v34  ;;  %v4938_v41 = vpop.f32.mrb[15].mxu0  ;;  %v5258_v50 = vmul.f32 %v6831_v47, %v6831_v47 }
 0x223   : > { %v5217_v6 = vadd.f32 %v6832_v32, %v5216_v37  ;;  %v5256_v9 = vmul.f32 %v6832_v32, %v6832_v32  ;;  %v5286_v26 = vadd.f32 %v5285_v51, %v5255_v21  ;;  %v6834_v18 = vadd.f32 %v4938_v41, %v9090_v11 }
 0x224   : > { %v6098_v33 = vpack.c.bf16 %v6833_v62, %v6831_v47  ;;  %v5259_v34 = vmul.f32 %v6833_v62, %v6833_v62 }
 0x225   : > { %v5287_v14 = vadd.f32 %v5286_v26, %v5256_v9  ;;  %v6093_v61 = vpack.c.bf16 %v6834_v18, %v6832_v32  ;;  %v5218_v10 = vadd.f32 %v6834_v18, %v5217_v6  ;;  %v5257_v39 = vmul.f32 %v6834_v18, %v6834_v18 }
 0x226   : > { %6146 = vst [vmem:[%s9096_s14 + $0x38] sm:$0xff] %v6098_v33  }
 0x227   : > { %6145 = vst [vmem:[%s9096_s14 + $0x30] sm:$0xff] %v6093_v61   ;;  %v5219_v45 = vadd.f32 %v6831_v47, %v5218_v10  ;;  %v5288_v23 = vadd.f32 %v5287_v14, %v5257_v39  ;;  %v6789_v3 = vpop.f32.mrb[16].mxu0 }
 0x228   : > { %v6597_v58 = vpop.f32.mrb[16].mxu1  ;;  %v4951_v22 = vpop.f32.mrb[17].mxu0 }
 0x229   : > { %v5289_v59 = vadd.f32 %v5288_v23, %v5258_v50  ;;  %v6835_v30 = vadd.f32 %v6789_v3, %v6597_v58  ;;  %v2814_v19 = vpop.f32.mrb[17].mxu1  ;;  %v5220_v52 = vadd.f32 %v6833_v62, %v5219_v45  ;;  %v6790_v11 = vpop.f32.mrb[18].mxu0 }
 0x22a   : > { %v6836_v15 = vadd.f32 %v4951_v22, %v2814_v19  ;;  %v6598_v43 = vpop.f32.mrb[18].mxu1  ;;  %v4954_v38 = vpop.f32.mrb[19].mxu0 }
 0x22b   : > { %v5290_v56 = vadd.f32 %v5289_v59, %v5259_v34  ;;  %v6837_v1 = vadd.f32 %v6790_v11, %v6598_v43  ;;  %v2817_v31 = vpop.f32.mrb[19].mxu1  ;;  %v5262_v25 = vmul.f32 %v6835_v30, %v6835_v30 }
 0x22c   : > { %v5221_v63 = vadd.f32 %v6836_v15, %v5220_v52  ;;  %v5260_v20 = vmul.f32 %v6836_v15, %v6836_v15  ;;  %v6838_v29 = vadd.f32 %v4954_v38, %v2817_v31 }
 0x22d   : > { %v6108_v44 = vpack.c.bf16 %v6837_v1, %v6835_v30  ;;  %v5263_v2 = vmul.f32 %v6837_v1, %v6837_v1 }
 0x22e   : > { %v5291_v35 = vadd.f32 %v5290_v56, %v5260_v20  ;;  %v6103_v4 = vpack.c.bf16 %v6838_v29, %v6836_v15  ;;  %v5222_v57 = vadd.f32 %v6838_v29, %v5221_v63  ;;  %v5261_v53 = vmul.f32 %v6838_v29, %v6838_v29 }
 0x22f   : > { %6148 = vst [vmem:[%s9096_s14 + $0x48] sm:$0xff] %v6108_v44   ;;  %v6793_v7 = vpop.f32.mrb[20].mxu0 }
 0x230   : > { %6147 = vst [vmem:[%s9096_s14 + $0x40] sm:$0xff] %v6103_v4   ;;  %v5223_v16 = vadd.f32 %v6835_v30, %v5222_v57  ;;  %v5292_v54 = vadd.f32 %v5291_v35, %v5261_v53  ;;  %v6601_v13 = vpop.f32.mrb[20].mxu1  ;;  %v4967_v60 = vpop.f32.mrb[21].mxu0 }
 0x231   : > { %v6839_v0 = vadd.f32 %v6793_v7, %v6601_v13  ;;  %v2830_v27 = vpop.f32.mrb[21].mxu1  ;;  %v6794_v46 = vpop.f32.mrb[22].mxu0 }
 0x232   : > { %v5293_v42 = vadd.f32 %v5292_v54, %v5262_v25  ;;  %v6840_v55 = vadd.f32 %v4967_v60, %v2830_v27  ;;  %v5224_v49 = vadd.f32 %v6837_v1, %v5223_v16  ;;  %v6602_v28 = vpop.f32.mrb[22].mxu1  ;;  %v4970_v17 = vpop.f32.mrb[23].mxu0 }
 0x233   : > { %v6841_v48 = vadd.f32 %v6794_v46, %v6602_v28  ;;  %v2833_v24 = vpop.f32.mrb[23].mxu1  ;;  %v5266_v62 = vmul.f32 %v6839_v0, %v6839_v0 }
 0x234   : > { %v5225_v8 = vadd.f32 %v6840_v55, %v5224_v49  ;;  %v5264_v36 = vmul.f32 %v6840_v55, %v6840_v55  ;;  %v5294_v40 = vadd.f32 %v5293_v42, %v5263_v2  ;;  %v6842_v47 = vadd.f32 %v4970_v17, %v2833_v24 }
 0x235   : > { %v6118_v12 = vpack.c.bf16 %v6841_v48, %v6839_v0  ;;  %v5267_v61 = vmul.f32 %v6841_v48, %v6841_v48 }
 0x236   : > { %v5295_v21 = vadd.f32 %v5294_v40, %v5264_v36  ;;  %v6113_v51 = vpack.c.bf16 %v6842_v47, %v6840_v55  ;;  %v5226_v32 = vadd.f32 %v6842_v47, %v5225_v8  ;;  %v5265_v37 = vmul.f32 %v6842_v47, %v6842_v47 }
 0x237   : > { %6150 = vst [vmem:[%s9096_s14 + $0x58] sm:$0xff] %v6118_v12   ;;  %v6797_v5 = vpop.f32.mrb[24].mxu0 }
 0x238   : > { %6149 = vst [vmem:[%s9096_s14 + $0x50] sm:$0xff] %v6113_v51   ;;  %v5227_v41 = vadd.f32 %v6839_v0, %v5226_v32  ;;  %v5296_v6 = vadd.f32 %v5295_v21, %v5265_v37  ;;  %v6605_v9 = vpop.f32.mrb[24].mxu1  ;;  %v4983_v26 = vpop.f32.mrb[25].mxu0 }
 0x239   : > { %v6843_v18 = vadd.f32 %v6797_v5, %v6605_v9  ;;  %v2846_v33 = vpop.f32.mrb[25].mxu1  ;;  %v6798_v14 = vpop.f32.mrb[26].mxu0 }
 0x23a   : > { %v5297_v10 = vadd.f32 %v5296_v6, %v5266_v62  ;;  %v6844_v39 = vadd.f32 %v4983_v26, %v2846_v33  ;;  %v5228_v50 = vadd.f32 %v6841_v48, %v5227_v41  ;;  %v6606_v45 = vpop.f32.mrb[26].mxu1  ;;  %v4986_v23 = vpop.f32.mrb[27].mxu0 }
 0x23b   : > { %v6845_v3 = vadd.f32 %v6798_v14, %v6606_v45  ;;  %v2849_v58 = vpop.f32.mrb[27].mxu1  ;;  %v5270_v56 = vmul.f32 %v6843_v18, %v6843_v18 }
 0x23c   : > { %v5229_v22 = vadd.f32 %v6844_v39, %v5228_v50  ;;  %v5268_v34 = vmul.f32 %v6844_v39, %v6844_v39  ;;  %v5298_v59 = vadd.f32 %v5297_v10, %v5267_v61  ;;  %v6846_v30 = vadd.f32 %v4986_v23, %v2849_v58 }
 0x23d   : > { %v6128_v19 = vpack.c.bf16 %v6845_v3, %v6843_v18  ;;  %v5271_v4 = vmul.f32 %v6845_v3, %v6845_v3 }
 0x23e   : > { %v5299_v52 = vadd.f32 %v5298_v59, %v5268_v34  ;;  %v6123_v11 = vpack.c.bf16 %v6846_v30, %v6844_v39  ;;  %v5230_v15 = vadd.f32 %v6846_v30, %v5229_v22  ;;  %v5269_v43 = vmul.f32 %v6846_v30, %v6846_v30 }
 0x23f   : > { %6152 = vst [vmem:[%s9096_s14 + $0x68] sm:$0xff] %v6128_v19   ;;  %v6801_v38 = vpop.f32.mrb[28].mxu0 }
 0x240   : > { %6151 = vst [vmem:[%s9096_s14 + $0x60] sm:$0xff] %v6123_v11   ;;  %v5231_v1 = vadd.f32 %v6843_v18, %v5230_v15  ;;  %v5300_v31 = vadd.f32 %v5299_v52, %v5269_v43  ;;  %v6609_v63 = vpop.f32.mrb[28].mxu1  ;;  %v4999_v20 = vpop.f32.mrb[29].mxu0 }
 0x241   : > { %v6847_v29 = vadd.f32 %v6801_v38, %v6609_v63  ;;  %v2862_v44 = vpop.f32.mrb[29].mxu1  ;;  %v6802_v35 = vpop.f32.mrb[30].mxu0 }
 0x242   : > { %v5301_v57 = vadd.f32 %v5300_v31, %v5270_v56  ;;  %v6848_v53 = vadd.f32 %v4999_v20, %v2862_v44  ;;  %v5232_v7 = vadd.f32 %v6845_v3, %v5231_v1  ;;  %v6610_v25 = vpop.f32.mrb[30].mxu1  ;;  %v5002_v16 = vpop.f32.mrb[31].mxu0 }
 0x243   : > { %v6849_v54 = vadd.f32 %v6802_v35, %v6610_v25  ;;  %v2865_v13 = vpop.f32.mrb[31].mxu1  ;;  %v5274_v17 = vmul.f32 %v6847_v29, %v6847_v29 }
 0x244   : > { %v5233_v60 = vadd.f32 %v6848_v53, %v5232_v7  ;;  %v5272_v0 = vmul.f32 %v6848_v53, %v6848_v53  ;;  %v5302_v27 = vadd.f32 %v5301_v57, %v5271_v4  ;;  %v6850_v46 = vadd.f32 %v5002_v16, %v2865_v13 }
 0x245   : > { %v6138_v2 = vpack.c.bf16 %v6849_v54, %v6847_v29  ;;  %v5275_v8 = vmul.f32 %v6849_v54, %v6849_v54 }
 0x246   : > { %v5303_v42 = vadd.f32 %v5302_v27, %v5272_v0  ;;  %v6133_v55 = vpack.c.bf16 %v6850_v46, %v6848_v53  ;;  %v5234_v49 = vadd.f32 %v6850_v46, %v5233_v60  ;;  %v5273_v28 = vmul.f32 %v6850_v46, %v6850_v46 }
 0x247   : > { %6154 = vst [vmem:[%s9096_s14 + $0x78] sm:$0xff] %v6138_v2  }
 0x248   : > { %6153 = vst [vmem:[%s9096_s14 + $0x70] sm:$0xff] %v6133_v55   ;;  %v5235_v48 = vadd.f32 %v6847_v29, %v5234_v49  ;;  %v5304_v24 = vadd.f32 %v5303_v42, %v5273_v28 }
 0x24a   : > { %v5236_v36 = vadd.f32 %v6849_v54, %v5235_v48  ;;  %v5305_v40 = vadd.f32 %v5304_v24, %v5274_v17 }
 0x24c   : > { %v5237_v47 = vrot.slane %v5236_v36, 4  ;;  %v5306_v12 = vadd.f32 %v5305_v40, %v5275_v8 }
 0x24e   : > { %v5238_v21 = vadd.f32 %v5237_v47, %v5236_v36  ;;  %v5307_v51 = vrot.slane %v5306_v12, 4 }
 0x250   : > { %v5239_v32 = vrot.slane %v5238_v21, 2  ;;  %v5308_v37 = vadd.f32 %v5307_v51, %v5306_v12 }
 0x252   : > { %v5240_v5 = vadd.f32 %v5239_v32, %v5238_v21  ;;  %v5309_v62 = vrot.slane %v5308_v37, 2 }
 0x254   : > { %v5241_v41 = vrot.slane %v5240_v5, 1  ;;  %v5310_v6 = vadd.f32 %v5309_v62, %v5308_v37 }
 0x256   : > { %v5242_v9 = vadd.f32 %v5241_v41, %v5240_v5  ;;  %v5311_v26 = vrot.slane %v5310_v6, 1 }
 0x258   : > { %5243 = vst [vmem:[%s235_s19] sm:$0x1] %v5242_v9  ;;  %v5312_v18 = vadd.f32 %v5311_v26, %v5310_v6 }
 0x25a   : > { %5313 = vst [vmem:[%s235_s19 + $0x1] sm:$0x1] %v5312_v18 }
 0x25b PF: > { %s16_s18 = sadd.s32 1, %s7280_s18  }
 0x25c   : > { %p13_p4 = scmp.ge.s32.totalorder %s16_s18, 4  }
 0x25e   :  { %15 = sbr.rel (!%p13_p4) target bundleno = 1 (0x1), region = 88 }

// kernel: double_conv.4
= control target key start
LH: loop header
LB: loop body
LE: loop exit
PB: predicated region body
PF: predicated region fallthrough
CT: control target
= control target key end

     0   :  { %s7971_s18 = smov 0   ;;  %s9757_s0 = inlined_call_operand.vmem [shape: bf16[2,18,18,128], index: 0, kind: input, shape index: {}]   ;;  %s9758_s1 = inlined_call_operand.vmem [shape: bf16[3,3,128,128], index: 1, kind: input, shape index: {}]   ;;  %s9759_s2 = inlined_call_operand.vmem [shape: f32[1,128], index: 2, kind: input, shape index: {}]   ;;  %s9760_s3 = inlined_call_operand.vmem [shape: f32[1,128], index: 3, kind: input, shape index: {}]   ;;  %s9761_s4 = inlined_call_operand.vmem [shape: bf16[2,16,16,128], index: 4, kind: output, shape index: {0}]   ;;  %s9762_s5 = inlined_call_operand.vmem [shape: f32[2,2,128], index: 5, kind: output, shape index: {1}]  }
   0x1 LB: > { %s6048_s19 = sadd.s32 4294967295, %s7938_s18   ;;  %p6052_p0 = scmp.ge.s32.totalorder %s7938_s18, 1  ;;  %s7938_s18 = sphi %s7971_s18, %s16_s18  }
   0x2   : > { %p190_p1 = scmp.lt.s32.totalorder %s7938_s18, 3 }
   0x4   : > { %p191_p2 = pnand %p6052_p0, %p190_p1 }
   0x6   : > { %194 = sbr.rel (%p191_p2) target bundleno = 675 (0x2a3), region = 36 }
   0xd   : > { %v7733_v0 = vld [vmem:[%s9758_s1 + $0x40] sm:$0xff]   ;;  %v7940_v2 = vmov 0.0|0.0   ;;  %v7735_v5 = vld [vmem:[%s9758_s1 + $0x48] sm:$0xff]   ;;  %p222_p3 = scmp.lt.s32.totalorder %s6048_s19, 1  ;;  %v7737_v7 = vld [vmem:[%s9758_s1 + $0x50] sm:$0xff]   ;;  %v521_v11 = vlaneseq  ;;  %vm1979_vm5 = vcmask 1042432  }
   0xe   : > { %v7734_v1 = vld [vmem:[%s9758_s1 + $0x100] sm:$0xff]   ;;  %v6059_v3 = vcombine.low %v7940_v2, %v7940_v2  ;;  %v6060_v4 = vcombine.high %v7940_v2, %v7940_v2  ;;  %7019 = vmatprep.subr.bf16.mxu1 %v7733_v0  ;;  %v7736_v6 = vld [vmem:[%s9758_s1 + $0x108] sm:$0xff]   ;;  %v7738_v8 = vld [vmem:[%s9758_s1 + $0x110] sm:$0xff]   ;;  %vm949_vm0 = vsmask.f32 3328  ;;  %vm1980_vm6 = vcmask 1046532  }
   0xf   : > { %7211 = vmatprep.subr.bf16.mxu0 %v7734_v1  ;;  %7020 = vmatpush3.bf16.msra.mxu1 %v7733_v0  ;;  %s9816_s19 = smov (!%p222_p3, %s6048_s19), 1  ;;  %v7739_v9 = vld [vmem:[%s9758_s1 + $0x58] sm:$0xff]   ;;  %v7741_v12 = vld [vmem:[%s9758_s1 + $0x60] sm:$0xff]   ;;  %v8012_v14 = vshrl.u32 %v521_v11, 7  ;;  %v7743_v15 = vld [vmem:[%s9758_s1 + $0x68] sm:$0xff]  }
  0x10   : > { %831 = vst [vmem:[#allocation2] sm:$0xf] %v6059_v3  ;;  %832 = vst [vmem:[#allocation2 + $0x4] sm:$0xf] %v6060_v4  ;;  %7212 = vmatpush3.bf16.msra.mxu0 %v7734_v1  ;;  %7021 = vmatprep.subr.bf16.mxu1 %v7735_v5  ;;  %v7740_v10 = vld [vmem:[%s9758_s1 + $0x118] sm:$0xff]   ;;  %s7723_s11 = smul.u32 216, %s9816_s19 }
  0x11   : > { %833 = vst [vmem:[#allocation2 + $0x8] sm:$0x1] %v6059_v3  ;;  %882 = vst [vmem:[#allocation2 + $0xcc] sm:$0xf] %v6059_v3  ;;  %7213 = vmatprep.subr.bf16.mxu0 %v7736_v6  ;;  %v7742_v13 = vld [vmem:[%s9758_s1 + $0x120] sm:$0xff]   ;;  %v7744_v16 = vld [vmem:[%s9758_s1 + $0x128] sm:$0xff]  }
  0x12   : > { %883 = vst [vmem:[#allocation2 + $0xd0] sm:$0xf] %v6060_v4  ;;  %884 = vst [vmem:[#allocation2 + $0xd4] sm:$0x1] %v6059_v3  ;;  %s8023_s24 = scalar_lea.vmem %s9757_s0, %s7723_s11  ;;  %v8026_v17 = vadd.s32 16, %v8012_v14  ;;  %v7745_v23 = vld [vmem:[%s9758_s1 + $0x70] sm:$0xff]  }
  0x13   : > { %7022 = vmatpush3.bf16.msra.mxu1 %v7735_v5  ;;  %vm950_vm1 = vsmask.f32 7440  ;;  %v240_v27 = vld [vmem:[%s8023_s24 + $0xc] sm:$0xff]   ;;  %vm525_vm2 = vcmp.ge.s32.totalorder %v8012_v14, 1  ;;  %v242_v30 = vld [vmem:[%s8023_s24 + $0x14] sm:$0x1]  ;;  %vm8436_vm7 = vmor %vm1979_vm5, %vm1980_vm6 }
  0x14   : > { %7214 = vmatpush3.bf16.msra.mxu0 %v7736_v6  ;;  %7023 = vmatprep.subr.bf16.mxu1 %v7737_v7  ;;  %v294_v31 = vunpack.c.l.bf16 %v240_v27  ;;  %v295_v32 = vunpack.c.h.bf16 %v240_v27  ;;  %v8037_v33 = vld [vmem:[%s9759_s2] ss:$0 sm:$0xff]  ;;  %v7746_v34 = vld [vmem:[%s9758_s1 + $0x130] sm:$0xff]   ;;  %vm8044_vm3 = vmor %vm949_vm0, %vm950_vm1  ;;  %v296_v38 = vunpack.c.l.bf16 %v242_v30  ;;  %vm536_vm4 = vcmp.le.s32.totalorder %v8026_v17, 16  ;;  %s6539_s14 = sshll.u32 %s9816_s19, 7  ;;  %s6056_s20 = sshll.u32 %s9816_s19, 1 }
  0x15   : > { %7215 = vmatprep.subr.bf16.mxu0 %v7738_v8  ;;  %v8051_v39 = vld [vmem:[%s9760_s3] ss:$0 sm:$0xff]  ;;  %v6772_v46 = vld [vmem:[%s8023_s24 + $0x18] sm:$0xff]   ;;  %v246_v2 = vld [vmem:[%s8023_s24 + $0x24] sm:$0xff]   ;;  %s9728_s17 = scalar_lea.vmem %s9761_s4, %s6539_s14  ;;  %s235_s23 = scalar_lea.vmem %s9762_s5, %s6056_s20 }
  0x16   : > { %v355_v41 = vmul.f32 %v8037_v33, %v294_v31  ;;  %v356_v42 = vmul.f32 %v8037_v33, %v295_v32  ;;  %v357_v45 = vmul.f32 %v8037_v33, %v296_v38  ;;  %v245_v47 = vld [vmem:[%s8023_s24 + $0x20] sm:$0x1]  ;;  %v6622_v51 = vunpack.c.l.bf16 %v6772_v46  ;;  %v7747_v52 = vld [vmem:[%s9758_s1 + $0x78] sm:$0xff]  }
  0x17   : > { %7024 = vmatpush3.bf16.msra.mxu1 %v7737_v7  ;;  %v885_v18 = vld [vmem:[#allocation2] sm:$0xf]  ;;  %v886_v19 = vld [vmem:[#allocation2 + $0x4] sm:$0xf]  ;;  %v6623_v55 = vunpack.c.h.bf16 %v6772_v46  ;;  %v299_v56 = vunpack.c.l.bf16 %v245_v47  ;;  %v7748_v57 = vld [vmem:[%s9758_s1 + $0x138] sm:$0xff]  }
  0x18   : > { %7216 = vmatpush3.bf16.msra.mxu0 %v7738_v8  ;;  %7025 = vmatprep.subr.bf16.mxu1 %v7739_v9  ;;  %v933_v20 = vld [vmem:[#allocation2 + $0x8] sm:$0x1]  ;;  %v953_v21 = vshrl.u32 %v885_v18, 16  ;;  %v956_v22 = vshll.u32 %v885_v18, 16  ;;  %v962_v24 = vshll.u32 %v886_v19, 16  ;;  %v966_v25 = vshrl.u32 %v886_v19, 16 }
  0x19   : > { %7217 = vmatprep.subr.bf16.mxu0 %v7740_v10  ;;  %v972_v26 = vshll.u32 %v933_v20, 16  ;;  %v416_v49 = vadd.f32 %v8051_v39, %v355_v41  ;;  %v417_v50 = vadd.f32 %v8051_v39, %v356_v42  ;;  %v418_v54 = vadd.f32 %v8051_v39, %v357_v45  ;;  %v248_v7 = vld [vmem:[%s8023_s24 + $0x2c] sm:$0x1]  ;;  %v6773_v8 = vld [vmem:[%s8023_s24 + $0x30] sm:$0xff]   ;;  %v8086_v11 = vld [vmem:[%s9758_s1] sm:$0xff]  }
  0x1a   : > { %v955_v28 = vrot.slane %v953_v21, 4  ;;  %v958_v29 = vrot.slane %v956_v22, 5  ;;  %v964_v36 = vrot.slane %v962_v24, 5  ;;  %v968_v37 = vrot.slane %v966_v25, 4  ;;  %v8094_v18 = vld [vmem:[%s9758_s1 + $0x140] sm:$0xff]  }
  0x1b   : > { %7026 = vmatpush3.bf16.msra.mxu1 %v7739_v9  ;;  %v974_v44 = vrot.slane %v972_v26, 5  ;;  %v470_v59 = vmax.f32 %v416_v49, 0.0  ;;  %v471_v60 = vmax.f32 %v417_v50, 0.0  ;;  %v358_v61 = vmul.f32 %v6622_v51, %v8037_v33  ;;  %v252_v30 = vld [vmem:[%s8023_s24 + $0x3c] sm:$0xff]   ;;  %v254_v42 = vld [vmem:[%s8023_s24 + $0x44] sm:$0x1] }
  0x1c   : > { %7218 = vmatpush3.bf16.msra.mxu0 %v7740_v10  ;;  %7027 = vmatprep.subr.bf16.mxu1 %v7741_v12  ;;  %v959_v40 = vor.u32 %v958_v29, %v955_v28  ;;  %v969_v43 = vor.u32 %v968_v37, %v964_v36  ;;  %v472_v63 = vmax.f32 %v418_v54, 0.0  ;;  %v359_v0 = vmul.f32 %v6623_v55, %v8037_v33  ;;  %v7787_v14 = vld [vmem:[%s9758_s1 + $0xa0] sm:$0xff]  }
  0x1d   : > { %7219 = vmatprep.subr.bf16.mxu0 %v7742_v13  ;;  %v360_v1 = vmul.f32 %v8037_v33, %v299_v56  ;;  %v546_v4 = vsel %vm525_vm2, %v470_v59, 0.0  ;;  %v6541_v5 = vpack.c.bf16 %v471_v60, %v471_v60  ;;  %v419_v6 = vadd.f32 %v8051_v39, %v358_v61 }
  0x1e   : > { %v960_v48 = vrot.slane %v959_v40, 4  ;;  %v970_v53 = vrot.slane %v969_v43, 4  ;;  %v548_v9 = vsel %vm536_vm4, %v472_v63, 0.0  ;;  %v6540_v10 = vpack.c.bf16 %v546_v4, %v546_v4 }
  0x1f   : > { %7028 = vmatpush3.bf16.msra.mxu1 %v7741_v12  ;;  %v420_v12 = vadd.f32 %v8051_v39, %v359_v0  ;;  %835 = vst [vmem:[#allocation2 + $0x10] sm:$0xf] %v6541_v5  ;;  %v473_v19 = vmax.f32 %v419_v6, 0.0  ;;  %v300_v20 = vunpack.c.l.bf16 %v246_v2  ;;  %v301_v21 = vunpack.c.h.bf16 %v246_v2 }
  0x20   : > { %7220 = vmatpush3.bf16.msra.mxu0 %v7742_v13  ;;  %7029 = vmatprep.subr.bf16.mxu1 %v7743_v15  ;;  %v965_v58 = vsel %vm8044_vm3, %v960_v48, %v964_v36  ;;  %v975_v62 = vsel %vm8044_vm3, %v970_v53, %v974_v44  ;;  %v421_v13 = vadd.f32 %v8051_v39, %v360_v1  ;;  %v302_v24 = vunpack.c.l.bf16 %v248_v7 }
  0x21   : > { %7221 = vmatprep.subr.bf16.mxu0 %v7744_v16  ;;  %v6129_v3 = vcombine.low %v965_v58, %v975_v62  ;;  %834 = vst [vmem:[#allocation2 + $0xc] sm:$0xf] %v6540_v10  ;;  %v474_v22 = vmax.f32 %v420_v12, 0.0  ;;  %v6626_v25 = vunpack.c.l.bf16 %v6773_v8  ;;  %v549_v26 = vsel %vm525_vm2, %v473_v19, 0.0 }
  0x22   : > { %v361_v27 = vmul.f32 %v8037_v33, %v300_v20  ;;  %v362_v28 = vmul.f32 %v8037_v33, %v301_v21  ;;  %v6627_v29 = vunpack.c.h.bf16 %v6773_v8  ;;  %v306_v46 = vunpack.c.l.bf16 %v252_v30 }
  0x23   : > { %7030 = vmatpush3.bf16.msra.mxu1 %v7743_v15  ;;  %v251_v15 = vld [vmem:[%s8023_s24 + $0x38] sm:$0x1]  ;;  %7035 = vmatprep.mubr.bf16.mxu1 %v6129_v3  ;;  %v6655_v32 = vpack.c.bf16 %v474_v22, %v549_v26  ;;  %v364_v41 = vmul.f32 %v6626_v25, %v8037_v33  ;;  %v307_v49 = vunpack.c.h.bf16 %v252_v30  ;;  %v308_v54 = vunpack.c.l.bf16 %v254_v42 }
  0x24   : > { %7222 = vmatpush3.bf16.msra.mxu0 %v7744_v16  ;;  %7031 = vmatprep.subr.bf16.mxu1 %v7745_v23  ;;  %v6542_v16 = vpack.c.bf16 %v548_v9, %v548_v9  ;;  %v305_v36 = vunpack.c.l.bf16 %v251_v15  ;;  %v8107_v38 = vadd.f32 %v8051_v39, %v361_v27  ;;  %v423_v40 = vadd.f32 %v8051_v39, %v362_v28 }
  0x25   : > { %7223 = vmatprep.subr.bf16.mxu0 %v7746_v34  ;;  %6780 = vst [vmem:[#allocation2 + $0x18] sm:$0xff] %v6655_v32   ;;  %v365_v44 = vmul.f32 %v6627_v29, %v8037_v33  ;;  %v8129_v1 = vmul.f32 %v8037_v33, %v306_v46  ;;  %v8132_v2 = vmul.f32 %v8037_v33, %v307_v49 }
  0x26   : > { %836 = vst [vmem:[#allocation2 + $0x14] sm:$0x1] %v6542_v16  ;;  %v366_v45 = vmul.f32 %v8037_v33, %v305_v36  ;;  %v476_v47 = vmax.f32 %v8107_v38, 0.0  ;;  %v477_v48 = vmax.f32 %v423_v40, 0.0  ;;  %v888_v50 = vld [vmem:[#allocation2 + $0x10] sm:$0xf]  ;;  %v8137_v7 = vmul.f32 %v8037_v33, %v308_v54 }
  0x27   : > { %7032 = vmatpush3.bf16.msra.mxu1 %v7745_v23  ;;  %v475_v23 = vmax.f32 %v421_v13, 0.0  ;;  %v8123_v53 = vadd.f32 %v8051_v39, %v365_v44  ;;  %v986_v56 = vshll.u32 %v888_v50, 16  ;;  %v2804_v0 = vld [vmem:[#allocation2 + $0x10] sm:$0xf]  ;;  %v7751_v38 = vld [vmem:[%s9758_s1 + $0x148] sm:$0xff]  }
  0x28   : > { %7224 = vmatpush3.bf16.msra.mxu0 %v7746_v34  ;;  %7033 = vmatprep.subr.bf16.mxu1 %v7747_v52  ;;  %v363_v34 = vmul.f32 %v8037_v33, %v302_v24  ;;  %v887_v55 = vld [vmem:[#allocation2 + $0xc] sm:$0xf]  ;;  %v6547_v59 = vpack.c.bf16 %v477_v48, %v477_v48  ;;  %v8126_v60 = vadd.f32 %v8051_v39, %v366_v45  ;;  %v2861_v16 = vshll.u32 %v2804_v0, 16 }
  0x29   : > { %7225 = vmatprep.subr.bf16.mxu0 %v7748_v57  ;;  %v551_v31 = vsel %vm536_vm4, %v475_v23, 0.0  ;;  %v2803_v58 = vld [vmem:[#allocation2 + $0xc] sm:$0xf]  ;;  %v977_v62 = vshrl.u32 %v887_v55, 16  ;;  %v980_v63 = vshll.u32 %v887_v55, 16  ;;  %v988_v3 = vrot.slane %v986_v56, 5 }
  0x2a   : > { %v6545_v37 = vpack.c.bf16 %v551_v31, %v551_v31  ;;  %v8113_v43 = vadd.f32 %v8051_v39, %v363_v34  ;;  %841 = vst [vmem:[#allocation2 + $0x28] sm:$0xf] %v6547_v59  ;;  %v2852_v10 = vshrl.u32 %v2803_v58, 16  ;;  %v2855_v12 = vshll.u32 %v2803_v58, 16  ;;  %v7752_v58 = vld [vmem:[%s9758_s1 + $0x8] sm:$0xff]  }
  0x2b   : > { %7034 = vmatpush3.bf16.msra.mxu1 %v7747_v52  ;;  %v8120_v52 = vadd.f32 %v8051_v39, %v364_v41  ;;  %v979_v8 = vrot.slane %v977_v62, 4  ;;  %v982_v9 = vrot.slane %v980_v63, 5  ;;  %v2865_v19 = vshrl.u32 %v2804_v0, 16 }
  0x2c   : > { %7226 = vmatpush3.bf16.msra.mxu0 %v7748_v57  ;;  %7067 = vmatprep.subr.bf16.mxu1 %v8086_v11  ;;  %839 = vst [vmem:[#allocation2 + $0x20] sm:$0x1] %v6545_v37  ;;  %v478_v51 = vmax.f32 %v8113_v43, 0.0  ;;  %v990_v57 = vshrl.u32 %v888_v50, 16  ;;  %v2806_v20 = vld [vmem:[#allocation2 + $0x18] sm:$0xf] }
  0x2d   : > { %7259 = vmatprep.subr.bf16.mxu0 %v8094_v18  ;;  %v934_v61 = vld [vmem:[#allocation2 + $0x14] sm:$0x1]  ;;  %v983_v21 = vor.u32 %v982_v9, %v979_v8  ;;  %v2854_v22 = vrot.slane %v2852_v10, 4  ;;  %v2857_v23 = vrot.slane %v2855_v12, 5  ;;  %v8140_v25 = vld [vmem:[#allocation2 + $0x1c] sm:$0xf] }
  0x2e   : > { %v992_v4 = vrot.slane %v990_v57, 4  ;;  %v996_v5 = vshll.u32 %v934_v61, 16  ;;  %v8134_v6 = vld [vmem:[#allocation2 + $0x14] sm:$0x1]  ;;  %v2863_v27 = vrot.slane %v2861_v16, 5  ;;  %v2867_v28 = vrot.slane %v2865_v19, 4 }
  0x2f   : > { %v2871_v24 = vshll.u32 %v8134_v6, 16  ;;  %v3626_v29 = vrot.slane %v8134_v6, 5  ;;  %v984_v30 = vrot.slane %v983_v21, 4  ;;  %v2858_v31 = vor.u32 %v2857_v23, %v2854_v22  ;;  %v889_v49 = vld [vmem:[#allocation2 + $0x18] sm:$0xf]  ;;  %v7755_v9 = vld [vmem:[%s9758_s1 + $0x10] sm:$0xff]  }
  0x30   : > { %v993_v13 = vor.u32 %v992_v4, %v988_v3  ;;  %v998_v15 = vrot.slane %v996_v5, 5  ;;  %v2876_v34 = vshrl.u32 %v2806_v20, 16  ;;  %v2868_v37 = vor.u32 %v2867_v28, %v2863_v27  ;;  %v890_v57 = vld [vmem:[#allocation2 + $0x1c] sm:$0xf] }
  0x31   : > { %v2873_v32 = vrot.slane %v2871_v24, 5  ;;  %v2879_v41 = vshll.u32 %v2806_v20, 16  ;;  %v2885_v42 = vshll.u32 %v8140_v25, 16  ;;  %v989_v44 = vsel %vm8044_vm3, %v984_v30, %v988_v3  ;;  %v892_v16 = vld [vmem:[#allocation2 + $0x28] sm:$0xf]  ;;  %v7758_v43 = vld [vmem:[%s9758_s1 + $0x18] sm:$0xff]  }
  0x32   : > { %v994_v26 = vrot.slane %v993_v13, 4  ;;  %v2859_v45 = vrot.slane %v2858_v31, 4  ;;  %v2878_v46 = vrot.slane %v2876_v34, 4  ;;  %v2889_v48 = vshrl.u32 %v8140_v25, 16 }
  0x33   : > { %v8145_v40 = vld [vmem:[#allocation2 + $0x20] sm:$0x1]  ;;  %v2869_v54 = vrot.slane %v2868_v37, 4  ;;  %v2881_v55 = vrot.slane %v2879_v41, 5  ;;  %v2887_v56 = vrot.slane %v2885_v42, 5  ;;  %v3630_v63 = vrot.slane %v8140_v25, 5 }
  0x34   : > { %v999_v36 = vsel %vm8044_vm3, %v994_v26, %v998_v15  ;;  %v2864_v59 = vsel %vm8044_vm3, %v2859_v45, %v2863_v27  ;;  %v2891_v61 = vrot.slane %v2889_v48, 4  ;;  %v2895_v62 = vshll.u32 %v8145_v40, 16  ;;  %v935_v5 = vld [vmem:[#allocation2 + $0x20] sm:$0x1] }
  0x35   : > { %v6130_v50 = vcombine.low %v989_v44, %v999_v36  ;;  %v2874_v0 = vsel %vm8044_vm3, %v2869_v54, %v2873_v32  ;;  %v2882_v3 = vor.u32 %v2881_v55, %v2878_v46  ;;  %v3633_v4 = vrot.slane %v8145_v40, 5  ;;  %v2810_v32 = vld [vmem:[#allocation2 + $0x28] sm:$0xf] }
  0x36   : > { %v1001_v8 = vshrl.u32 %v889_v49, 16  ;;  %v6289_v10 = vcombine.low %v2864_v59, %v2874_v0  ;;  %v2892_v12 = vor.u32 %v2891_v61, %v2887_v56  ;;  %v2897_v13 = vrot.slane %v2895_v62, 5  ;;  %v7753_v0 = vld [vmem:[%s9758_s1 + $0x150] sm:$0xff]  }
  0x37   : > { %7036 = vmatmul.mubr.bf16.vlgmr.msra.gmra.mrb[0].mxu1 %v6130_v50  ;;  %v8167_v15 = vrot.slane %v3630_v63, 4  ;;  %v2883_v19 = vrot.slane %v2882_v3, 4  ;;  %v1004_v21 = vshll.u32 %v889_v49, 16  ;;  %v1010_v22 = vshll.u32 %v890_v57, 16  ;;  %v8205_v3 = vld [vmem:[%s8023_s24 + $0x48] sm:$0xff]  }
  0x38   : > { %7068 = vmatpush3.bf16.msra.mxu1 %v8086_v11  ;;  %v1003_v20 = vrot.slane %v1001_v8, 4  ;;  %7227 = vmatprep.mubr.bf16.mxu0 %v6289_v10  ;;  %v2893_v23 = vrot.slane %v2892_v12, 4  ;;  %v1014_v24 = vshrl.u32 %v890_v57, 16  ;;  %v1020_v26 = vshll.u32 %v935_v5, 16 }
  0x39   : > { %7069 = vmatprep.subr.bf16.mxu1 %v7752_v58  ;;  %v552_v11 = vsel %vm525_vm2, %v476_v47, 0.0  ;;  %v2888_v27 = vsel %vm8044_vm3, %v2883_v19, %v2887_v56  ;;  %v1006_v28 = vrot.slane %v1004_v21, 5  ;;  %v1012_v30 = vrot.slane %v1010_v22, 5  ;;  %v8221_v19 = vld [vmem:[%s8023_s24 + $0x50] sm:$0x1] }
  0x3a   : > { %v554_v31 = vsel %vm536_vm4, %v478_v51, 0.0  ;;  %v2898_v34 = vsel %vm8044_vm3, %v2893_v23, %v2897_v13  ;;  %v1016_v36 = vrot.slane %v1014_v24, 4  ;;  %v1022_v47 = vrot.slane %v1020_v26, 5  ;;  %v7754_v24 = vld [vmem:[%s9758_s1 + $0x158] sm:$0xff]  }
  0x3b   : > { %v6546_v37 = vpack.c.bf16 %v552_v11, %v552_v11  ;;  %v6290_v41 = vcombine.low %v2888_v27, %v2898_v34  ;;  %v1007_v42 = vor.u32 %v1006_v28, %v1003_v20  ;;  %v6548_v44 = vpack.c.bf16 %v554_v31, %v554_v31  ;;  %v8224_v20 = vld [vmem:[%s8023_s24 + $0x54] sm:$0xff]  }
  0x3c   : > { %7070 = vmatpush3.bf16.msra.mxu1 %v7752_v58  ;;  %v1034_v45 = vshll.u32 %v892_v16, 16  ;;  %v1017_v51 = vor.u32 %v1016_v36, %v1012_v30  ;;  %v1038_v46 = vshrl.u32 %v892_v16, 16  ;;  %v2909_v48 = vshll.u32 %v2810_v32, 16 }
  0x3d   : > { %7071 = vmatprep.subr.bf16.mxu1 %v7755_v9  ;;  %840 = vst [vmem:[#allocation2 + $0x24] sm:$0xf] %v6546_v37  ;;  %v2913_v49 = vshrl.u32 %v2810_v32, 16  ;;  %7228 = vmatmul.mubr.bf16.vlgmr.msra.gmra.mrb[0].mxu0 %v6290_v41  ;;  %v1008_v50 = vrot.slane %v1007_v42, 4  ;;  %842 = vst [vmem:[#allocation2 + $0x2c] sm:$0x1] %v6548_v44  ;;  %v430_v16 = vadd.f32 %v8051_v39, %v8137_v7  ;;  %v6631_v31 = vunpack.c.h.bf16 %v8205_v3 }
  0x3e   : > { %v8187_v54 = vrot.slane %v1034_v45, 5  ;;  %v479_v55 = vmax.f32 %v8120_v52, 0.0  ;;  %v480_v56 = vmax.f32 %v8123_v53, 0.0  ;;  %7260 = vmatpush3.bf16.msra.mxu0 %v8094_v18  ;;  %v1018_v57 = vrot.slane %v1017_v51, 4 }
  0x3f   : > { %v1040_v58 = vrot.slane %v1038_v46, 4  ;;  %v8192_v59 = vrot.slane %v2909_v48, 5  ;;  %v2915_v61 = vrot.slane %v2913_v49, 4  ;;  %7261 = vmatprep.subr.bf16.mxu0 %v7751_v38  ;;  %v1013_v62 = vsel %vm8044_vm3, %v1008_v50, %v1012_v30  ;;  %v7756_v49 = vld [vmem:[%s9758_s1 + $0x160] sm:$0xff]   ;;  %v7765_v50 = vld [vmem:[%s9758_s1 + $0x30] sm:$0xff]  }
  0x40   : > { %7072 = vmatpush3.bf16.msra.mxu1 %v7755_v9  ;;  %v481_v52 = vmax.f32 %v8126_v60, 0.0  ;;  %v555_v18 = vsel %vm525_vm2, %v479_v55, 0.0  ;;  %v428_v53 = vadd.f32 %v8051_v39, %v8129_v1  ;;  %v1023_v5 = vsel %vm8044_vm3, %v1018_v57, %v1022_v47  ;;  %v7761_v60 = vld [vmem:[%s9758_s1 + $0x20] sm:$0xff]  }
  0x41   : > { %7073 = vmatprep.subr.bf16.mxu1 %v7758_v43  ;;  %v1041_v8 = vor.u32 %v1040_v58, %v8187_v54  ;;  %v2916_v9 = vor.u32 %v2915_v61, %v8192_v59  ;;  %v6660_v10 = vpack.c.bf16 %v480_v56, %v555_v18  ;;  %v6131_v12 = vcombine.low %v1013_v62, %v1023_v5 }
  0x42   : > { %v557_v13 = vsel %vm536_vm4, %v481_v52, 0.0  ;;  %v429_v1 = vadd.f32 %v8051_v39, %v8132_v2  ;;  %7262 = vmatpush3.bf16.msra.mxu0 %v7751_v38  ;;  %v482_v26 = vmax.f32 %v428_v53, 0.0  ;;  %v7763_v2 = vld [vmem:[%s9758_s1 + $0x28] sm:$0xff]   ;;  %v484_v28 = vmax.f32 %v430_v16, 0.0 }
  0x43   : > { %v8226_v21 = vrot.slane %v1041_v8, 4  ;;  %v8228_v22 = vrot.slane %v2916_v9, 4  ;;  %v6551_v23 = vpack.c.bf16 %v557_v13, %v557_v13  ;;  %6781 = vst [vmem:[#allocation2 + $0x30] sm:$0xff] %v6660_v10   ;;  %7039 = vmatprep.mubr.bf16.mxu1 %v6131_v12  ;;  %7263 = vmatprep.subr.bf16.mxu0 %v7753_v0  ;;  %v6630_v30 = vunpack.c.l.bf16 %v8205_v3  ;;  %v7757_v10 = vld [vmem:[%s9758_s1 + $0x168] sm:$0xff]  }
  0x44   : > { %7074 = vmatpush3.bf16.msra.mxu1 %v7758_v43  ;;  %v891_v7 = vld [vmem:[#allocation2 + $0x24] sm:$0xf]  ;;  %v483_v27 = vmax.f32 %v429_v1, 0.0  ;;  %v936_v32 = vld [vmem:[#allocation2 + $0x2c] sm:$0x1]  ;;  %v311_v47 = vunpack.c.l.bf16 %v8221_v19  ;;  %v312_v37 = vunpack.c.l.bf16 %v8224_v20  ;;  %v558_v46 = vsel %vm525_vm2, %v482_v26, 0.0 }
  0x45   : > { %v2809_v11 = vld [vmem:[#allocation2 + $0x24] sm:$0xf]  ;;  %v1025_v34 = vshrl.u32 %v891_v7, 16  ;;  %v1028_v38 = vshll.u32 %v891_v7, 16  ;;  %v8238_v36 = vld [vmem:[#allocation2 + $0x2c] sm:$0x1]  ;;  %7075 = vmatprep.subr.bf16.mxu1 %v7761_v60  ;;  %v6552_v62 = vpack.c.bf16 %v558_v46, %v558_v46  ;;  %v370_v9 = vmul.f32 %v6630_v30, %v8037_v33 }
  0x46   : > { %845 = vst [vmem:[#allocation2 + $0x38] sm:$0x1] %v6551_v23  ;;  %v1044_v41 = vshll.u32 %v936_v32, 16  ;;  %v2900_v42 = vshrl.u32 %v2809_v11, 16  ;;  %v2903_v44 = vshll.u32 %v2809_v11, 16  ;;  %v2919_v45 = vshll.u32 %v8238_v36, 16  ;;  %7264 = vmatpush3.bf16.msra.mxu0 %v7753_v0 }
  0x47   : > { %v1027_v43 = vrot.slane %v1025_v34, 4  ;;  %v1030_v51 = vrot.slane %v1028_v38, 5  ;;  %v560_v48 = vsel %vm536_vm4, %v484_v28, 0.0  ;;  %7265 = vmatprep.subr.bf16.mxu0 %v7754_v24  ;;  %v6553_v0 = vpack.c.bf16 %v483_v27, %v483_v27  ;;  %846 = vst [vmem:[#allocation2 + $0x3c] sm:$0xf] %v6552_v62 }
  0x48   : > { %7076 = vmatpush3.bf16.msra.mxu1 %v7761_v60  ;;  %v1046_v55 = vrot.slane %v1044_v41, 5  ;;  %v2902_v56 = vrot.slane %v2900_v42, 4  ;;  %v2905_v57 = vrot.slane %v2903_v44, 5  ;;  %v2921_v58 = vrot.slane %v2919_v45, 5 }
  0x49   : > { %7077 = vmatprep.subr.bf16.mxu1 %v7763_v2  ;;  %v1031_v61 = vor.u32 %v1030_v51, %v1027_v43  ;;  %v6554_v52 = vpack.c.bf16 %v560_v48, %v560_v48  ;;  %847 = vst [vmem:[#allocation2 + $0x40] sm:$0xf] %v6553_v0  ;;  %v8270_v26 = vmul.f32 %v6631_v31, %v8037_v33  ;;  %v7759_v51 = vld [vmem:[%s9758_s1 + $0x170] sm:$0xff]  }
  0x4a   : > { %v1047_v18 = vsel %vm8044_vm3, %v8226_v21, %v1046_v55  ;;  %v2906_v53 = vor.u32 %v2905_v57, %v2902_v56  ;;  %v2922_v3 = vsel %vm8044_vm3, %v8228_v22, %v2921_v58  ;;  %v2812_v5 = vld [vmem:[#allocation2 + $0x30] sm:$0xf]  ;;  %v8259_v8 = vld [vmem:[#allocation2 + $0x34] sm:$0xf]  ;;  %7266 = vmatpush3.bf16.msra.mxu0 %v7754_v24  ;;  %v8273_v7 = vmul.f32 %v8037_v33, %v311_v47 }
  0x4b   : > { %v1032_v60 = vrot.slane %v1031_v61, 4  ;;  %v2924_v12 = vshrl.u32 %v2812_v5, 16  ;;  %v2927_v13 = vshll.u32 %v2812_v5, 16  ;;  %v2933_v1 = vshll.u32 %v8259_v8, 16  ;;  %v893_v16 = vld [vmem:[#allocation2 + $0x30] sm:$0xf]  ;;  %7267 = vmatprep.subr.bf16.mxu0 %v7756_v49 }
  0x4c   : > { %848 = vst [vmem:[#allocation2 + $0x44] sm:$0x1] %v6554_v52  ;;  %7078 = vmatpush3.bf16.msra.mxu1 %v7763_v2  ;;  %v2907_v19 = vrot.slane %v2906_v53, 4  ;;  %v2937_v22 = vshrl.u32 %v8259_v8, 16  ;;  %v894_v23 = vld [vmem:[#allocation2 + $0x34] sm:$0xf] }
  0x4d   : > { %v8266_v21 = vld [vmem:[#allocation2 + $0x38] sm:$0x1]  ;;  %7079 = vmatprep.subr.bf16.mxu1 %v7765_v50  ;;  %v1037_v24 = vsel %vm8044_vm3, %v1032_v60, %v8187_v54  ;;  %v2926_v11 = vrot.slane %v2924_v12, 4  ;;  %v2929_v2 = vrot.slane %v2927_v13, 5  ;;  %v2935_v27 = vrot.slane %v2933_v1, 5 }
  0x4e   : > { %v937_v28 = vld [vmem:[#allocation2 + $0x38] sm:$0x1]  ;;  %v6132_v30 = vcombine.low %v1037_v24, %v1047_v18  ;;  %v2912_v32 = vsel %vm8044_vm3, %v2907_v19, %v8192_v59  ;;  %v2939_v34 = vrot.slane %v2937_v22, 4  ;;  %v2943_v31 = vshll.u32 %v8266_v21, 16  ;;  %7268 = vmatpush3.bf16.msra.mxu0 %v7756_v49  ;;  %v895_v49 = vld [vmem:[#allocation2 + $0x3c] sm:$0xf] }
  0x4f   : > { %v6291_v38 = vcombine.low %v2912_v32, %v2922_v3  ;;  %v2930_v47 = vor.u32 %v2929_v2, %v2926_v11  ;;  %v1049_v41 = vshrl.u32 %v893_v16, 16  ;;  %v1052_v42 = vshll.u32 %v893_v16, 16  ;;  %7269 = vmatprep.subr.bf16.mxu0 %v7757_v10  ;;  %v2815_v13 = vld [vmem:[#allocation2 + $0x3c] sm:$0xf] }
  0x50   : > { %7080 = vmatpush3.bf16.msra.mxu1 %v7765_v50  ;;  %v2940_v54 = vor.u32 %v2939_v34, %v2935_v27  ;;  %v2945_v44 = vrot.slane %v2943_v31, 5  ;;  %v1058_v45 = vshll.u32 %v894_v23, 16  ;;  %v1062_v43 = vshrl.u32 %v894_v23, 16  ;;  %v896_v52 = vld [vmem:[#allocation2 + $0x40] sm:$0xf] }
  0x51   : > { %7040 = vmatmul.mubr.bf16.gmra.mrb[4].mxu1 %v6132_v30  ;;  %7231 = vmatprep.mubr.bf16.mxu0 %v6291_v38  ;;  %v2931_v59 = vrot.slane %v2930_v47, 4  ;;  %v1051_v46 = vrot.slane %v1049_v41, 4  ;;  %v1054_v48 = vrot.slane %v1052_v42, 5  ;;  %v1068_v55 = vshll.u32 %v937_v28, 16  ;;  %v8295_v23 = vld [vmem:[#allocation2 + $0x40] sm:$0xf] }
  0x52   : > { %v2941_v56 = vrot.slane %v2940_v54, 4  ;;  %v1060_v57 = vrot.slane %v1058_v45, 5  ;;  %v1064_v58 = vrot.slane %v1062_v43, 4  ;;  %v8286_v50 = vadd.f32 %v8051_v39, %v370_v9  ;;  %7270 = vmatpush3.bf16.msra.mxu0 %v7757_v10  ;;  %v7760_v9 = vld [vmem:[%s9758_s1 + $0x178] sm:$0xff]   ;;  %v8307_v38 = vld [vmem:[%s9758_s1 + $0x180] sm:$0xff]  }
  0x53   : > { %v2936_v61 = vsel %vm8044_vm3, %v2931_v59, %v2935_v27  ;;  %v1055_v62 = vor.u32 %v1054_v48, %v1051_v46  ;;  %v1070_v0 = vrot.slane %v1068_v55, 5  ;;  %v938_v18 = vld [vmem:[#allocation2 + $0x44] sm:$0x1]  ;;  %v1073_v53 = vshrl.u32 %v895_v49, 16  ;;  %7271 = vmatprep.subr.bf16.mxu0 %v7759_v51  ;;  %v7767_v10 = vld [vmem:[%s9758_s1 + $0x38] sm:$0xff]  }
  0x54   : > { %v2946_v3 = vsel %vm8044_vm3, %v2941_v56, %v2945_v44  ;;  %v1065_v5 = vor.u32 %v1064_v58, %v1060_v57  ;;  %v1076_v60 = vshll.u32 %v895_v49, 16  ;;  %v1082_v12 = vshll.u32 %v896_v52, 16  ;;  %v8300_v28 = vld [vmem:[#allocation2 + $0x44] sm:$0x1]  ;;  %7081 = vmatprep.subr.bf16.mxu1 %v7767_v10  ;;  %v7870_v17 = vld [vmem:[#allocation2 + $0x3c] sm:$0xf] }
  0x55   : > { %v6292_v1 = vcombine.low %v2936_v61, %v2946_v3  ;;  %v1056_v16 = vrot.slane %v1055_v62, 4  ;;  %v1075_v19 = vrot.slane %v1073_v53, 4  ;;  %v1086_v22 = vshrl.u32 %v896_v52, 16  ;;  %7082 = vmatpush3.bf16.msra.mxu1 %v7767_v10  ;;  %v7771_v53 = vld [vmem:[%s9758_s1 + $0x80] sm:$0xff]  }
  0x56   : > { %v1066_v24 = vrot.slane %v1065_v5, 4  ;;  %v1078_v11 = vrot.slane %v1076_v60, 5  ;;  %v1084_v2 = vrot.slane %v1082_v12, 5  ;;  %v1092_v27 = vshll.u32 %v938_v18, 16  ;;  %7272 = vmatpush3.bf16.msra.mxu0 %v7759_v51  ;;  %v260_v18 = vld [vmem:[%s8023_s24 + $0x5c] sm:$0x1]  ;;  %7115 = vmatprep.subr.bf16.mxu1 %v7771_v53 }
  0x57   : > { %7232 = vmatmul.mubr.bf16.gmra.mrb[4].mxu0 %v6292_v1  ;;  %v1061_v30 = vsel %vm8044_vm3, %v1056_v16, %v1060_v57  ;;  %v1088_v32 = vrot.slane %v1086_v22, 4  ;;  %v2948_v34 = vshrl.u32 %v2815_v13, 16  ;;  %v2951_v31 = vshll.u32 %v2815_v13, 16  ;;  %7273 = vmatprep.subr.bf16.mxu0 %v7760_v9  ;;  %v263_v1 = vld [vmem:[%s8023_s24 + $0x68] sm:$0x1] }
  0x58   : > { %v1071_v47 = vsel %vm8044_vm3, %v1066_v24, %v1070_v0  ;;  %v1079_v41 = vor.u32 %v1078_v11, %v1075_v19  ;;  %v1094_v42 = vrot.slane %v1092_v27, 5  ;;  %v2957_v54 = vshll.u32 %v8295_v23, 16  ;;  %v264_v24 = vld [vmem:[%s8023_s24 + $0x6c] sm:$0xff]  }
  0x59   : > { %v6133_v44 = vcombine.low %v1061_v30, %v1071_v47  ;;  %v1089_v45 = vor.u32 %v1088_v32, %v1084_v2  ;;  %v2950_v43 = vrot.slane %v2948_v34, 4  ;;  %v2953_v59 = vrot.slane %v2951_v31, 5  ;;  %v266_v32 = vld [vmem:[%s8023_s24 + $0x74] sm:$0x1] }
  0x5a   : > { %v1080_v46 = vrot.slane %v1079_v41, 4  ;;  %v2959_v48 = vrot.slane %v2957_v54, 5  ;;  %v2961_v55 = vshrl.u32 %v8295_v23, 16  ;;  %v2967_v56 = vshll.u32 %v8300_v28, 16  ;;  %7274 = vmatpush3.bf16.msra.mxu0 %v7760_v9  ;;  %v6775_v9 = vld [vmem:[%s8023_s24 + $0x60] sm:$0xff]  }
  0x5b   : > { %7043 = vmatprep.mubr.bf16.mxu1 %v6133_v44  ;;  %v1090_v57 = vrot.slane %v1089_v45, 4  ;;  %v2954_v58 = vor.u32 %v2953_v59, %v2950_v43  ;;  %v432_v49 = vadd.f32 %v8051_v39, %v8270_v26  ;;  %v433_v51 = vadd.f32 %v8051_v39, %v8273_v7  ;;  %7307 = vmatprep.subr.bf16.mxu0 %v8307_v38 }
  0x5c   : > { %v1085_v61 = vsel %vm8044_vm3, %v1080_v46, %v1084_v2  ;;  %v2963_v62 = vrot.slane %v2961_v55, 4  ;;  %v2969_v0 = vrot.slane %v2967_v56, 5  ;;  %v485_v52 = vmax.f32 %v8286_v50, 0.0 }
  0x5d   : > { %v1095_v26 = vsel %vm8044_vm3, %v1090_v57, %v1094_v42  ;;  %v2955_v7 = vrot.slane %v2954_v58, 4  ;;  %v486_v3 = vmax.f32 %v432_v49, 0.0  ;;  %v487_v5 = vmax.f32 %v433_v51, 0.0 }
  0x5e   : > { %v6134_v60 = vcombine.low %v1085_v61, %v1095_v26  ;;  %v2964_v12 = vor.u32 %v2963_v62, %v2959_v48  ;;  %v561_v50 = vsel %vm525_vm2, %v485_v52, 0.0  ;;  %v313_v13 = vunpack.c.h.bf16 %v8224_v20 }
  0x5f   : > { %v2960_v16 = vsel %vm8044_vm3, %v2955_v7, %v2959_v48  ;;  %v563_v19 = vsel %vm536_vm4, %v487_v5, 0.0  ;;  %v6665_v22 = vpack.c.bf16 %v486_v3, %v561_v50  ;;  %v314_v10 = vunpack.c.l.bf16 %v260_v18 }
  0x60   : > { %7044 = vmatmul.mubr.bf16.gmra.mrb[8].mxu1 %v6134_v60  ;;  %v2965_v11 = vrot.slane %v2964_v12, 4  ;;  %v6557_v2 = vpack.c.bf16 %v563_v19, %v563_v19  ;;  %v373_v27 = vmul.f32 %v8037_v33, %v312_v37  ;;  %v374_v30 = vmul.f32 %v8037_v33, %v313_v13 }
  0x61   : > { %6782 = vst [vmem:[#allocation2 + $0x48] sm:$0xff] %v6665_v22   ;;  %v375_v34 = vmul.f32 %v8037_v33, %v314_v10  ;;  %v6634_v31 = vunpack.c.l.bf16 %v6775_v9  ;;  %v6635_v47 = vunpack.c.h.bf16 %v6775_v9  ;;  %v317_v41 = vunpack.c.l.bf16 %v263_v1 }
  0x62   : > { %v2970_v42 = vsel %vm8044_vm3, %v2965_v11, %v2969_v0  ;;  %851 = vst [vmem:[#allocation2 + $0x50] sm:$0x1] %v6557_v2  ;;  %v434_v54 = vadd.f32 %v8051_v39, %v373_v27  ;;  %v435_v44 = vadd.f32 %v8051_v39, %v374_v30  ;;  %v318_v20 = vunpack.c.l.bf16 %v264_v24  ;;  %v8359_v0 = vld [vmem:[%s9760_s3] ss:$0 sm:$0xff] }
  0x63   : > { %v6293_v45 = vcombine.low %v2960_v16, %v2970_v42  ;;  %v436_v37 = vadd.f32 %v8051_v39, %v375_v34  ;;  %v376_v43 = vmul.f32 %v6634_v31, %v8037_v33  ;;  %v377_v59 = vmul.f32 %v6635_v47, %v8037_v33 }
  0x64   : > { %v488_v46 = vmax.f32 %v434_v54, 0.0  ;;  %v489_v48 = vmax.f32 %v435_v44, 0.0  ;;  %v378_v55 = vmul.f32 %v8037_v33, %v317_v41  ;;  %v319_v56 = vunpack.c.h.bf16 %v264_v24  ;;  %v8367_v33 = vld [vmem:[%s9759_s2] ss:$0 sm:$0xff] }
  0x65   : > { %7235 = vmatprep.mubr.bf16.mxu0 %v6293_v45  ;;  %v490_v57 = vmax.f32 %v436_v37, 0.0  ;;  %v437_v58 = vadd.f32 %v8051_v39, %v376_v43  ;;  %v438_v49 = vadd.f32 %v8051_v39, %v377_v59  ;;  %v320_v51 = vunpack.c.l.bf16 %v266_v32 }
  0x66   : > { %v564_v61 = vsel %vm525_vm2, %v488_v46, 0.0  ;;  %v6559_v62 = vpack.c.bf16 %v489_v48, %v489_v48  ;;  %v8362_v52 = vadd.f32 %v8359_v0, %v378_v55  ;;  %v379_v39 = vmul.f32 %v8367_v33, %v318_v20 }
  0x67   : > { %v566_v18 = vsel %vm536_vm4, %v490_v57, 0.0  ;;  %v6558_v53 = vpack.c.bf16 %v564_v61, %v564_v61  ;;  %v491_v26 = vmax.f32 %v437_v58, 0.0  ;;  %v492_v7 = vmax.f32 %v438_v49, 0.0 }
  0x68   : > { %v2818_v3 = vld [vmem:[#allocation2 + $0x48] sm:$0xf]  ;;  %v8372_v5 = vld [vmem:[#allocation2 + $0x4c] sm:$0xf]  ;;  %v6560_v12 = vpack.c.bf16 %v566_v18, %v566_v18  ;;  %853 = vst [vmem:[#allocation2 + $0x58] sm:$0xf] %v6559_v62  ;;  %v380_v50 = vmul.f32 %v8367_v33, %v319_v56  ;;  %v381_v13 = vmul.f32 %v8367_v33, %v320_v51  ;;  %v8377_v9 = vadd.f32 %v8359_v0, %v379_v39 }
  0x69   : > { %v897_v60 = vld [vmem:[#allocation2 + $0x48] sm:$0xf]  ;;  %v8379_v1 = vld [vmem:[#allocation2 + $0x50] sm:$0x1]  ;;  %v2972_v16 = vshrl.u32 %v2818_v3, 16  ;;  %v2975_v19 = vshll.u32 %v2818_v3, 16 }
  0x6a   : > { %v2981_v22 = vshll.u32 %v8372_v5, 16  ;;  %v2985_v10 = vshrl.u32 %v8372_v5, 16  ;;  %852 = vst [vmem:[#allocation2 + $0x54] sm:$0xf] %v6558_v53  ;;  %v2991_v24 = vshll.u32 %v8379_v1, 16  ;;  %v1097_v27 = vshrl.u32 %v897_v60, 16 }
  0x6b   : > { %v898_v11 = vld [vmem:[#allocation2 + $0x4c] sm:$0xf]  ;;  %v939_v2 = vld [vmem:[#allocation2 + $0x50] sm:$0x1]  ;;  %854 = vst [vmem:[#allocation2 + $0x5c] sm:$0x1] %v6560_v12  ;;  %v8385_v30 = vadd.f32 %v8359_v0, %v380_v50  ;;  %v8388_v32 = vadd.f32 %v8359_v0, %v381_v13 }
  0x6c   : > { %v2974_v34 = vrot.slane %v2972_v16, 4  ;;  %v2977_v31 = vrot.slane %v2975_v19, 5  ;;  %v2983_v47 = vrot.slane %v2981_v22, 5  ;;  %v2987_v41 = vrot.slane %v2985_v10, 4 }
  0x6d   : > { %v2993_v42 = vrot.slane %v2991_v24, 5  ;;  %v1099_v54 = vrot.slane %v1097_v27, 4  ;;  %v1100_v44 = vshll.u32 %v897_v60, 16  ;;  %v1106_v20 = vshll.u32 %v898_v11, 16 }
  0x6e   : > { %v2978_v45 = vor.u32 %v2977_v31, %v2974_v34  ;;  %v2988_v37 = vor.u32 %v2987_v41, %v2983_v47  ;;  %v1110_v43 = vshrl.u32 %v898_v11, 16  ;;  %v1116_v59 = vshll.u32 %v939_v2, 16 }
  0x6f   : > { %v1102_v46 = vrot.slane %v1100_v44, 5  ;;  %v1108_v48 = vrot.slane %v1106_v20, 5  ;;  %v493_v55 = vmax.f32 %v8362_v52, 0.0  ;;  %v567_v56 = vsel %vm525_vm2, %v491_v26, 0.0  ;;  %v900_v61 = vld [vmem:[#allocation2 + $0x58] sm:$0xf] }
  0x70   : > { %v2979_v57 = vrot.slane %v2978_v45, 4  ;;  %v2989_v58 = vrot.slane %v2988_v37, 4  ;;  %v1112_v49 = vrot.slane %v1110_v43, 4  ;;  %v1118_v51 = vrot.slane %v1116_v59, 5  ;;  %v8397_v24 = vld [vmem:[#allocation2 + $0x58] sm:$0xf] }
  0x71   : > { %v1103_v62 = vor.u32 %v1102_v46, %v1099_v54  ;;  %v899_v39 = vld [vmem:[#allocation2 + $0x54] sm:$0xf]  ;;  %v1130_v18 = vshll.u32 %v900_v61, 16  ;;  %v1134_v53 = vshrl.u32 %v900_v61, 16  ;;  %v6670_v3 = vpack.c.bf16 %v492_v7, %v567_v56 }
  0x72   : > { %v2984_v60 = vsel %vm8044_vm3, %v2979_v57, %v2983_v47  ;;  %v2994_v12 = vsel %vm8044_vm3, %v2989_v58, %v2993_v42  ;;  %v1113_v52 = vor.u32 %v1112_v49, %v1108_v48  ;;  %v940_v50 = vld [vmem:[#allocation2 + $0x5c] sm:$0x1]  ;;  %v1121_v13 = vshrl.u32 %v899_v39, 16  ;;  %v2821_v26 = vld [vmem:[#allocation2 + $0x54] sm:$0xf] }
  0x73   : > { %v6294_v16 = vcombine.low %v2984_v60, %v2994_v12  ;;  %v1104_v19 = vrot.slane %v1103_v62, 4  ;;  %v1124_v22 = vshll.u32 %v899_v39, 16  ;;  %v1132_v10 = vrot.slane %v1130_v18, 5  ;;  %6783 = vst [vmem:[#allocation2 + $0x60] sm:$0xff] %v6670_v3   ;;  %v8401_v47 = vld [vmem:[#allocation2 + $0x5c] sm:$0x1] }
  0x74   : > { %v1114_v11 = vrot.slane %v1113_v52, 4  ;;  %v1123_v2 = vrot.slane %v1121_v13, 4  ;;  %v1136_v7 = vrot.slane %v1134_v53, 4  ;;  %v1140_v27 = vshll.u32 %v940_v50, 16 }
  0x75   : > { %7236 = vmatmul.mubr.bf16.gmra.mrb[8].mxu0 %v6294_v16  ;;  %v1109_v34 = vsel %vm8044_vm3, %v1104_v19, %v1108_v48  ;;  %v1126_v31 = vrot.slane %v1124_v22, 5  ;;  %v2996_v41 = vshrl.u32 %v2821_v26, 16  ;;  %v2999_v42 = vshll.u32 %v2821_v26, 16 }
  0x76   : > { %v1119_v54 = vsel %vm8044_vm3, %v1114_v11, %v1118_v51  ;;  %v1137_v44 = vor.u32 %v1136_v7, %v1132_v10  ;;  %v1142_v20 = vrot.slane %v1140_v27, 5  ;;  %v3005_v45 = vshll.u32 %v8397_v24, 16 }
  0x77   : > { %v6135_v37 = vcombine.low %v1109_v34, %v1119_v54  ;;  %v1127_v43 = vor.u32 %v1126_v31, %v1123_v2  ;;  %v2998_v59 = vrot.slane %v2996_v41, 4  ;;  %v3001_v46 = vrot.slane %v2999_v42, 5 }
  0x78   : > { %v1138_v56 = vrot.slane %v1137_v44, 4  ;;  %v3007_v57 = vrot.slane %v3005_v45, 5  ;;  %v3009_v48 = vshrl.u32 %v8397_v24, 16  ;;  %v3015_v58 = vshll.u32 %v8401_v47, 16 }
  0x79   : > { %7047 = vmatprep.mubr.bf16.mxu1 %v6135_v37  ;;  %v1128_v49 = vrot.slane %v1127_v43, 4  ;;  %v3002_v61 = vor.u32 %v3001_v46, %v2998_v59  ;;  %v569_v51 = vsel %vm536_vm4, %v493_v55, 0.0  ;;  %v494_v62 = vmax.f32 %v8377_v9, 0.0 }
  0x7a   : > { %v1143_v39 = vsel %vm8044_vm3, %v1138_v56, %v1142_v20  ;;  %v3011_v18 = vrot.slane %v3009_v48, 4  ;;  %v3017_v53 = vrot.slane %v3015_v58, 5  ;;  %v6563_v3 = vpack.c.bf16 %v569_v51, %v569_v51  ;;  %v2824_v60 = vld [vmem:[#allocation2 + $0x60] sm:$0xf]  ;;  %v8413_v12 = vld [vmem:[#allocation2 + $0x64] sm:$0xf] }
  0x7b   : > { %v1133_v52 = vsel %vm8044_vm3, %v1128_v49, %v1132_v10  ;;  %v3003_v50 = vrot.slane %v3002_v61, 4  ;;  %v3020_v13 = vshrl.u32 %v2824_v60, 16  ;;  %v3023_v26 = vshll.u32 %v2824_v60, 16  ;;  %v901_v55 = vld [vmem:[#allocation2 + $0x60] sm:$0xf] }
  0x7c   : > { %v6136_v16 = vcombine.low %v1133_v52, %v1143_v39  ;;  %v3012_v9 = vor.u32 %v3011_v18, %v3007_v57  ;;  %857 = vst [vmem:[#allocation2 + $0x68] sm:$0x1] %v6563_v3  ;;  %v3029_v19 = vshll.u32 %v8413_v12, 16  ;;  %v3033_v22 = vshrl.u32 %v8413_v12, 16  ;;  %v902_v11 = vld [vmem:[#allocation2 + $0x64] sm:$0xf] }
  0x7d   : > { %v3008_v2 = vsel %vm8044_vm3, %v3003_v50, %v3007_v57  ;;  %v3022_v7 = vrot.slane %v3020_v13, 4  ;;  %v3025_v27 = vrot.slane %v3023_v26, 5  ;;  %v1145_v34 = vshrl.u32 %v901_v55, 16  ;;  %v3557_v56 = vld [vmem:[#allocation2 + $0xc] sm:$0xe] }
  0x7e   : > { %7048 = vmatmul.mubr.bf16.gmra.mrb[12].mxu1 %v6136_v16  ;;  %v3013_v10 = vrot.slane %v3012_v9, 4  ;;  %v3031_v31 = vrot.slane %v3029_v19, 5  ;;  %v3035_v41 = vrot.slane %v3033_v22, 4  ;;  %v1148_v42 = vshll.u32 %v901_v55, 16  ;;  %v3558_v13 = vld [vmem:[#allocation2 + $0x18] sm:$0xe] }
  0x7f   : > { %v3026_v54 = vor.u32 %v3025_v27, %v3022_v7  ;;  %v1147_v44 = vrot.slane %v1145_v34, 4  ;;  %v1154_v20 = vshll.u32 %v902_v11, 16  ;;  %v1158_v45 = vshrl.u32 %v902_v11, 16  ;;  %v6776_v9 = vld [vmem:[%s8023_s24 + $0x78] sm:$0xff]   ;;  %v269_v27 = vld [vmem:[%s8023_s24 + $0x80] sm:$0x1] }
  0x80   : > { %v3018_v37 = vsel %vm8044_vm3, %v3013_v10, %v3017_v53  ;;  %v3036_v43 = vor.u32 %v3035_v41, %v3031_v31  ;;  %v1150_v59 = vrot.slane %v1148_v42, 5  ;;  %v495_v46 = vmax.f32 %v8385_v30, 0.0  ;;  %v272_v42 = vld [vmem:[%s8023_s24 + $0x8c] sm:$0x1] }
  0x81   : > { %v6295_v57 = vcombine.low %v3008_v2, %v3018_v37  ;;  %v3027_v48 = vrot.slane %v3026_v54, 4  ;;  %v1156_v58 = vrot.slane %v1154_v20, 5  ;;  %v1160_v49 = vrot.slane %v1158_v45, 4  ;;  %v7855_v2 = vld [vmem:[#allocation2 + $0x10] sm:$0xf] }
  0x82   : > { %v3037_v61 = vrot.slane %v3036_v43, 4  ;;  %v1151_v51 = vor.u32 %v1150_v59, %v1147_v44  ;;  %v496_v39 = vmax.f32 %v8388_v32, 0.0  ;;  %v570_v18 = vsel %vm525_vm2, %v494_v62, 0.0  ;;  %v8445_v54 = vld [vmem:[#allocation2 + $0x24] sm:$0xe] }
  0x83   : > { %7239 = vmatprep.mubr.bf16.mxu0 %v6295_v57  ;;  %v8427_v3 = vld [vmem:[#allocation2 + $0x68] sm:$0x1]  ;;  %v3032_v53 = vsel %vm8044_vm3, %v3027_v48, %v3031_v31  ;;  %v1161_v60 = vor.u32 %v1160_v49, %v1156_v58  ;;  %v6564_v52 = vpack.c.bf16 %v570_v18, %v570_v18  ;;  %v6565_v50 = vpack.c.bf16 %v495_v46, %v495_v46 }
  0x84   : > { %v941_v30 = vld [vmem:[#allocation2 + $0x68] sm:$0x1]  ;;  %v3039_v26 = vshll.u32 %v8427_v3, 16  ;;  %v1152_v55 = vrot.slane %v1151_v51, 4  ;;  %v572_v32 = vsel %vm536_vm4, %v496_v39, 0.0  ;;  %v6313_v11 = vrot.slane %v3557_v56, 9 }
  0x85   : > { %v1164_v16 = vshll.u32 %v941_v30, 16  ;;  %v1162_v19 = vrot.slane %v1161_v60, 4  ;;  %v6566_v22 = vpack.c.bf16 %v572_v32, %v572_v32  ;;  %858 = vst [vmem:[#allocation2 + $0x6c] sm:$0xf] %v6564_v52  ;;  %859 = vst [vmem:[#allocation2 + $0x70] sm:$0xf] %v6565_v50  ;;  %v3634_v45 = vsel %vm8436_vm7, %v8167_v15, %v3633_v4 }
  0x86   : > { %v3623_v7 = vrot.slane %v7855_v2, 5  ;;  %v3041_v34 = vrot.slane %v3039_v26, 5  ;;  %v1157_v10 = vsel %vm8044_vm3, %v1152_v55, %v1156_v58  ;;  %v6314_v41 = vrot.slane %v3558_v13, 9  ;;  %v270_v43 = vld [vmem:[%s8023_s24 + $0x84] sm:$0xff]  }
  0x87   : > { %v1166_v31 = vrot.slane %v1164_v16, 5  ;;  %860 = vst [vmem:[#allocation2 + $0x74] sm:$0x1] %v6566_v22  ;;  %v6638_v37 = vunpack.c.l.bf16 %v6776_v9  ;;  %v6639_v57 = vunpack.c.h.bf16 %v6776_v9  ;;  %v323_v49 = vunpack.c.l.bf16 %v269_v27  ;;  %v7856_v52 = vld [vmem:[#allocation2 + $0x28] sm:$0xf] }
  0x88   : > { %v3624_v44 = vsel %vm8436_vm7, %v6313_v11, %v3623_v7  ;;  %v3625_v20 = vrot.slane %v3623_v7, 4  ;;  %v3042_v59 = vsel %vm8044_vm3, %v3037_v61, %v3041_v34  ;;  %v3631_v56 = vsel %vm8436_vm7, %v6314_v41, %v3630_v63 }
  0x89   : > { %v1167_v46 = vsel %vm8044_vm3, %v1162_v19, %v1166_v31  ;;  %v6296_v48 = vcombine.low %v3032_v53, %v3042_v59  ;;  %v6346_v15 = vcombine.low %v3631_v56, %v3634_v45  ;;  %v382_v61 = vmul.f32 %v8367_v33, %v6638_v37 }
  0x8a   : > { %v6137_v40 = vcombine.low %v1157_v10, %v1167_v46  ;;  %v3627_v4 = vsel %vm8436_vm7, %v3625_v20, %v3626_v29  ;;  %v383_v51 = vmul.f32 %v8367_v33, %v6639_v57  ;;  %v324_v25 = vunpack.c.l.bf16 %v270_v43 }
  0x8b   : > { %v6345_v58 = vcombine.low %v3624_v44, %v3627_v4  ;;  %7240 = vmatmul.mubr.bf16.gmra.mrb[12].mxu0 %v6296_v48  ;;  %v325_v39 = vunpack.c.h.bf16 %v270_v43  ;;  %v326_v63 = vunpack.c.l.bf16 %v272_v42  ;;  %v6315_v18 = vrot.slane %v8445_v54, 9  ;;  %v7764_v54 = vld [vmem:[%s9758_s1 + $0x188] sm:$0xff]  }
  0x8c   : > { %7051 = vmatprep.mubr.bf16.mxu1 %v6137_v40  ;;  %v903_v53 = vld [vmem:[#allocation2 + $0x6c] sm:$0xf]  ;;  %v904_v30 = vld [vmem:[#allocation2 + $0x70] sm:$0xf]  ;;  %v384_v6 = vmul.f32 %v8367_v33, %v323_v49  ;;  %v443_v29 = vadd.f32 %v8359_v0, %v382_v61  ;;  %v444_v60 = vadd.f32 %v8359_v0, %v383_v51  ;;  %v3637_v50 = vrot.slane %v7856_v52, 5 }
  0x8d   : > { %7275 = vmatprep.mubr.bf16.mxu0 %v6345_v58  ;;  %v1169_v13 = vshrl.u32 %v903_v53, 16  ;;  %v1172_v26 = vshll.u32 %v903_v53, 16  ;;  %v1178_v55 = vshll.u32 %v904_v30, 16  ;;  %v1182_v16 = vshrl.u32 %v904_v30, 16  ;;  %v3560_v58 = vld [vmem:[#allocation2 + $0x30] sm:$0xe] }
  0x8e   : > { %v942_v32 = vld [vmem:[#allocation2 + $0x74] sm:$0x1]  ;;  %v445_v9 = vadd.f32 %v8359_v0, %v384_v6  ;;  %v497_v19 = vmax.f32 %v443_v29, 0.0  ;;  %v498_v22 = vmax.f32 %v444_v60, 0.0  ;;  %v385_v11 = vmul.f32 %v8367_v33, %v324_v25  ;;  %v8498_v6 = vld [vmem:[%s8023_s24 + $0x9c] sm:$0xff]  }
  0x8f   : > { %v1171_v2 = vrot.slane %v1169_v13, 4  ;;  %v1174_v7 = vrot.slane %v1172_v26, 5  ;;  %v1180_v27 = vrot.slane %v1178_v55, 5  ;;  %v1184_v34 = vrot.slane %v1182_v16, 4  ;;  %v8506_v13 = vld [vmem:[%s8023_s24 + $0xa4] sm:$0x1] }
  0x90   : > { %v1188_v10 = vshll.u32 %v942_v32, 16  ;;  %v499_v31 = vmax.f32 %v445_v9, 0.0  ;;  %v573_v41 = vsel %vm525_vm2, %v497_v19, 0.0  ;;  %v386_v42 = vmul.f32 %v8367_v33, %v325_v39  ;;  %v6777_v39 = vld [vmem:[%s8023_s24 + $0x90] sm:$0xff]  }
  0x91   : > { %v1175_v44 = vor.u32 %v1174_v7, %v1171_v2  ;;  %v1185_v20 = vor.u32 %v1184_v34, %v1180_v27  ;;  %v6675_v45 = vpack.c.bf16 %v498_v22, %v573_v41  ;;  %v387_v37 = vmul.f32 %v8367_v33, %v326_v63 }
  0x92   : > { %v1190_v43 = vrot.slane %v1188_v10, 5  ;;  %v575_v59 = vsel %vm536_vm4, %v499_v31, 0.0  ;;  %v446_v46 = vadd.f32 %v8359_v0, %v385_v11  ;;  %v447_v56 = vadd.f32 %v8359_v0, %v386_v42 }
  0x93   : > { %v1176_v57 = vrot.slane %v1175_v44, 4  ;;  %v1186_v48 = vrot.slane %v1185_v20, 4  ;;  %7276 = vmatmul.mubr.bf16.vlgmr.msra.gmra.mrb[0].mxu0 %v6346_v15  ;;  %v6569_v40 = vpack.c.bf16 %v575_v59, %v575_v59  ;;  %6784 = vst [vmem:[#allocation2 + $0x78] sm:$0xff] %v6675_v45   ;;  %v448_v4 = vadd.f32 %v8359_v0, %v387_v37 }
  0x94   : > { %7308 = vmatpush3.bf16.msra.mxu0 %v8307_v38  ;;  %v500_v49 = vmax.f32 %v446_v46, 0.0  ;;  %v501_v61 = vmax.f32 %v447_v56, 0.0  ;;  %v3638_v51 = vsel %vm8436_vm7, %v6315_v18, %v3637_v50  ;;  %v3639_v25 = vrot.slane %v3637_v50, 4  ;;  %v275_v38 = vld [vmem:[%s8023_s24 + $0x98] sm:$0x1]  ;;  %v7766_v18 = vld [vmem:[%s9758_s1 + $0x190] sm:$0xff]  }
  0x95   : > { %v1181_v15 = vsel %vm8044_vm3, %v1176_v57, %v1180_v27  ;;  %v1191_v63 = vsel %vm8044_vm3, %v1186_v48, %v1190_v43  ;;  %863 = vst [vmem:[#allocation2 + $0x80] sm:$0x1] %v6569_v40  ;;  %v502_v53 = vmax.f32 %v448_v4, 0.0  ;;  %v3640_v30 = vrot.slane %v8238_v36, 5  ;;  %7309 = vmatprep.subr.bf16.mxu0 %v7764_v54 }
  0x96   : > { %v6138_v29 = vcombine.low %v1181_v15, %v1191_v63  ;;  %v576_v60 = vsel %vm525_vm2, %v500_v49, 0.0  ;;  %v6571_v52 = vpack.c.bf16 %v501_v61, %v501_v61  ;;  %v6316_v50 = vrot.slane %v3560_v58, 9 }
  0x97   : > { %v578_v26 = vsel %vm536_vm4, %v502_v53, 0.0  ;;  %v6570_v36 = vpack.c.bf16 %v576_v60, %v576_v60  ;;  %v3641_v55 = vsel %vm8436_vm7, %v3639_v25, %v3640_v30  ;;  %v3644_v16 = vrot.slane %v8259_v8, 5  ;;  %v7768_v8 = vld [vmem:[%s9758_s1 + $0x198] sm:$0xff]   ;;  %v7772_v25 = vld [vmem:[%s9758_s1 + $0x1a0] sm:$0xff]  }
  0x98   : > { %7052 = vmatmul.mubr.bf16.gmra.mrb[16].mxu1 %v6138_v29  ;;  %v6572_v32 = vpack.c.bf16 %v578_v26, %v578_v26  ;;  %865 = vst [vmem:[#allocation2 + $0x88] sm:$0xf] %v6571_v52  ;;  %v6347_v9 = vcombine.low %v3638_v51, %v3641_v55  ;;  %v3647_v19 = vrot.slane %v8266_v21, 5  ;;  %7310 = vmatpush3.bf16.msra.mxu0 %v7764_v54  ;;  %v6642_v22 = vunpack.c.l.bf16 %v6777_v39 }
  0x99   : > { %864 = vst [vmem:[#allocation2 + $0x84] sm:$0xf] %v6570_v36  ;;  %v3645_v11 = vsel %vm8436_vm7, %v6316_v50, %v3644_v16  ;;  %v3646_v2 = vrot.slane %v3644_v16, 4  ;;  %v6643_v7 = vunpack.c.h.bf16 %v6777_v39  ;;  %v329_v27 = vunpack.c.l.bf16 %v275_v38  ;;  %7311 = vmatprep.subr.bf16.mxu0 %v7766_v18 }
  0x9a   : > { %v8519_v34 = vld [vmem:[#allocation2 + $0x78] sm:$0xf]  ;;  %v8521_v10 = vld [vmem:[#allocation2 + $0x7c] sm:$0xf]  ;;  %866 = vst [vmem:[#allocation2 + $0x8c] sm:$0x1] %v6572_v32  ;;  %7279 = vmatprep.mubr.bf16.mxu0 %v6347_v9  ;;  %v388_v21 = vmul.f32 %v8367_v33, %v6642_v22  ;;  %v330_v31 = vunpack.c.l.bf16 %v8498_v6  ;;  %v331_v41 = vunpack.c.h.bf16 %v8498_v6  ;;  %v332_v42 = vunpack.c.l.bf16 %v8506_v13 }
  0x9b   : > { %v1193_v54 = vshrl.u32 %v8519_v34, 16  ;;  %v1196_v44 = vshll.u32 %v8519_v34, 16  ;;  %v1202_v20 = vshll.u32 %v8521_v10, 16  ;;  %v1206_v45 = vshrl.u32 %v8521_v10, 16 }
  0x9c   : > { %v943_v37 = vld [vmem:[#allocation2 + $0x80] sm:$0x1]  ;;  %v3648_v43 = vsel %vm8436_vm7, %v3646_v2, %v3647_v19  ;;  %v389_v59 = vmul.f32 %v8367_v33, %v6643_v7  ;;  %v390_v46 = vmul.f32 %v8367_v33, %v329_v27  ;;  %v449_v56 = vadd.f32 %v8359_v0, %v388_v21  ;;  %7312 = vmatpush3.bf16.msra.mxu0 %v7766_v18  ;;  %v7776_v19 = vld [vmem:[%s9758_s1 + $0x1a8] sm:$0xff]  }
  0x9d   : > { %v1195_v57 = vrot.slane %v1193_v54, 4  ;;  %v1198_v48 = vrot.slane %v1196_v44, 5  ;;  %v1204_v40 = vrot.slane %v1202_v20, 5  ;;  %v1208_v4 = vrot.slane %v1206_v45, 4  ;;  %7313 = vmatprep.subr.bf16.mxu0 %v7768_v8  ;;  %v3561_v54 = vld [vmem:[#allocation2 + $0x3c] sm:$0xe] }
  0x9e   : > { %v1212_v58 = vshll.u32 %v943_v37, 16  ;;  %v6348_v49 = vcombine.low %v3645_v11, %v3648_v43  ;;  %v450_v61 = vadd.f32 %v8359_v0, %v389_v59  ;;  %v451_v51 = vadd.f32 %v8359_v0, %v390_v46 }
  0x9f   : > { %v1199_v39 = vor.u32 %v1198_v48, %v1195_v57  ;;  %v1209_v15 = vor.u32 %v1208_v4, %v1204_v40  ;;  %v8541_v63 = vld [vmem:[#allocation2 + $0x88] sm:$0xf]  ;;  %v503_v53 = vmax.f32 %v449_v56, 0.0  ;;  %v391_v30 = vmul.f32 %v8367_v33, %v330_v31  ;;  %v7780_v48 = vld [vmem:[%s9758_s1 + $0x1b0] sm:$0xff]  }
  0xa0   : > { %v1214_v38 = vrot.slane %v1212_v58, 5  ;;  %v8544_v6 = vld [vmem:[#allocation2 + $0x84] sm:$0xf]  ;;  %v1226_v18 = vshll.u32 %v8541_v63, 16  ;;  %v1230_v29 = vshrl.u32 %v8541_v63, 16  ;;  %7280 = vmatmul.mubr.bf16.gmra.mrb[4].mxu0 %v6348_v49  ;;  %v504_v60 = vmax.f32 %v450_v61, 0.0 }
  0xa1   : > { %v1200_v52 = vrot.slane %v1199_v39, 4  ;;  %v1210_v50 = vrot.slane %v1209_v15, 4  ;;  %v944_v13 = vld [vmem:[#allocation2 + $0x8c] sm:$0x1]  ;;  %v1217_v26 = vshrl.u32 %v8544_v6, 16  ;;  %v1220_v36 = vshll.u32 %v8544_v6, 16  ;;  %7314 = vmatpush3.bf16.msra.mxu0 %v7768_v8 }
  0xa2   : > { %v1228_v55 = vrot.slane %v1226_v18, 5  ;;  %v1232_v16 = vrot.slane %v1230_v29, 4  ;;  %v1236_v32 = vshll.u32 %v944_v13, 16  ;;  %v505_v9 = vmax.f32 %v451_v51, 0.0  ;;  %7315 = vmatprep.subr.bf16.mxu0 %v7772_v25  ;;  %v3562_v57 = vld [vmem:[#allocation2 + $0x48] sm:$0xe] }
  0xa3   : > { %v1205_v22 = vsel %vm8044_vm3, %v1200_v52, %v1204_v40  ;;  %v1215_v11 = vsel %vm8044_vm3, %v1210_v50, %v1214_v38  ;;  %v1219_v2 = vrot.slane %v1217_v26, 4  ;;  %v1222_v7 = vrot.slane %v1220_v36, 5  ;;  %v6778_v49 = vld [vmem:[%s8023_s24 + $0xa8] sm:$0xff]   ;;  %v282_v36 = vld [vmem:[%s8023_s24 + $0xb4] sm:$0xff]  }
  0xa4   : > { %v6139_v27 = vcombine.low %v1205_v22, %v1215_v11  ;;  %v1233_v21 = vor.u32 %v1232_v16, %v1228_v55  ;;  %v1238_v8 = vrot.slane %v1236_v32, 5  ;;  %v579_v31 = vsel %vm525_vm2, %v503_v53, 0.0 }
  0xa5   : > { %v1223_v44 = vor.u32 %v1222_v7, %v1219_v2  ;;  %v581_v20 = vsel %vm536_vm4, %v505_v9, 0.0  ;;  %v6680_v45 = vpack.c.bf16 %v504_v60, %v579_v31  ;;  %v392_v37 = vmul.f32 %v8367_v33, %v331_v41  ;;  %7316 = vmatpush3.bf16.msra.mxu0 %v7772_v25  ;;  %v8601_v31 = vld [vmem:[%s9758_s1 + $0x1c0] sm:$0xff]  }
  0xa6   : > { %7055 = vmatprep.mubr.bf16.mxu1 %v6139_v27  ;;  %v1234_v43 = vrot.slane %v1233_v21, 4  ;;  %v6575_v59 = vpack.c.bf16 %v581_v20, %v581_v20  ;;  %v393_v46 = vmul.f32 %v8367_v33, %v332_v42  ;;  %v452_v56 = vadd.f32 %v8359_v0, %v391_v30  ;;  %7317 = vmatprep.subr.bf16.mxu0 %v7776_v19 }
  0xa7   : > { %v1224_v40 = vrot.slane %v1223_v44, 4  ;;  %6785 = vst [vmem:[#allocation2 + $0x90] sm:$0xff] %v6680_v45   ;;  %v453_v4 = vadd.f32 %v8359_v0, %v392_v37  ;;  %v6317_v41 = vrot.slane %v3561_v54, 9  ;;  %v3651_v58 = vrot.slane %v8295_v23, 5  ;;  %v281_v23 = vld [vmem:[%s8023_s24 + $0xb0] sm:$0x1] }
  0xa8   : > { %v1239_v42 = vsel %vm8044_vm3, %v1234_v43, %v1238_v8  ;;  %869 = vst [vmem:[#allocation2 + $0x98] sm:$0x1] %v6575_v59  ;;  %v454_v61 = vadd.f32 %v8359_v0, %v393_v46  ;;  %v506_v51 = vmax.f32 %v452_v56, 0.0  ;;  %v3654_v25 = vrot.slane %v8300_v28, 5  ;;  %v7784_v28 = vld [vmem:[%s9758_s1 + $0x1b8] sm:$0xff]  }
  0xa9   : > { %v1229_v39 = vsel %vm8044_vm3, %v1224_v40, %v1228_v55  ;;  %v507_v15 = vmax.f32 %v453_v4, 0.0  ;;  %v3652_v53 = vsel %vm8436_vm7, %v6317_v41, %v3651_v58  ;;  %v3653_v30 = vrot.slane %v3651_v58, 4  ;;  %7318 = vmatpush3.bf16.msra.mxu0 %v7776_v19 }
  0xaa   : > { %v6140_v38 = vcombine.low %v1229_v39, %v1239_v42  ;;  %v508_v18 = vmax.f32 %v454_v61, 0.0  ;;  %v582_v29 = vsel %vm525_vm2, %v506_v51, 0.0  ;;  %v6318_v60 = vrot.slane %v3562_v57, 9  ;;  %7319 = vmatprep.subr.bf16.mxu0 %v7780_v48  ;;  %v284_v57 = vld [vmem:[%s8023_s24 + $0xbc] sm:$0x1] }
  0xab   : > { %v6576_v52 = vpack.c.bf16 %v582_v29, %v582_v29  ;;  %v6577_v50 = vpack.c.bf16 %v507_v15, %v507_v15  ;;  %v3655_v13 = vsel %vm8436_vm7, %v3653_v30, %v3654_v25  ;;  %v3658_v26 = vrot.slane %v8372_v5, 5 }
  0xac   : > { %7056 = vmatmul.mubr.bf16.gmra.mrb[20].mxu1 %v6140_v38  ;;  %v584_v55 = vsel %vm536_vm4, %v508_v18, 0.0  ;;  %v6349_v16 = vcombine.low %v3652_v53, %v3655_v13  ;;  %v3661_v32 = vrot.slane %v8379_v1, 5  ;;  %v6646_v9 = vunpack.c.l.bf16 %v6778_v49 }
  0xad   : > { %v6578_v19 = vpack.c.bf16 %v584_v55, %v584_v55  ;;  %870 = vst [vmem:[#allocation2 + $0x9c] sm:$0xf] %v6576_v52  ;;  %871 = vst [vmem:[#allocation2 + $0xa0] sm:$0xf] %v6577_v50  ;;  %v3659_v22 = vsel %vm8436_vm7, %v6318_v60, %v3658_v26  ;;  %v3660_v11 = vrot.slane %v3658_v26, 4  ;;  %v6647_v2 = vunpack.c.h.bf16 %v6778_v49  ;;  %7320 = vmatpush3.bf16.msra.mxu0 %v7780_v48 }
  0xae   : > { %v8593_v7 = vld [vmem:[#allocation2 + $0x90] sm:$0xf]  ;;  %v8595_v5 = vld [vmem:[#allocation2 + $0x94] sm:$0xf]  ;;  %7283 = vmatprep.mubr.bf16.mxu0 %v6349_v16  ;;  %v335_v27 = vunpack.c.l.bf16 %v281_v23  ;;  %v394_v21 = vmul.f32 %v8367_v33, %v6646_v9  ;;  %v336_v1 = vunpack.c.l.bf16 %v282_v36  ;;  %v337_v8 = vunpack.c.h.bf16 %v282_v36  ;;  %7321 = vmatprep.subr.bf16.mxu0 %v7784_v28 }
  0xaf   : > { %v945_v54 = vld [vmem:[#allocation2 + $0x98] sm:$0x1]  ;;  %v1241_v44 = vshrl.u32 %v8593_v7, 16  ;;  %v1244_v20 = vshll.u32 %v8593_v7, 16  ;;  %v1250_v45 = vshll.u32 %v8595_v5, 16  ;;  %v1254_v37 = vshrl.u32 %v8595_v5, 16 }
  0xb0   : > { %872 = vst [vmem:[#allocation2 + $0xa4] sm:$0x1] %v6578_v19  ;;  %v1260_v43 = vshll.u32 %v945_v54, 16  ;;  %v3662_v59 = vsel %vm8436_vm7, %v3660_v11, %v3661_v32  ;;  %v395_v46 = vmul.f32 %v8367_v33, %v6647_v2  ;;  %v396_v56 = vmul.f32 %v8367_v33, %v335_v27  ;;  %v3563_v11 = vld [vmem:[#allocation2 + $0x54] sm:$0xe] }
  0xb1   : > { %v1243_v48 = vrot.slane %v1241_v44, 4  ;;  %v1246_v40 = vrot.slane %v1244_v20, 5  ;;  %v1252_v4 = vrot.slane %v1250_v45, 5  ;;  %v1256_v41 = vrot.slane %v1254_v37, 4  ;;  %7322 = vmatpush3.bf16.msra.mxu0 %v7784_v28 }
  0xb2   : > { %v1262_v58 = vrot.slane %v1260_v43, 5  ;;  %v6350_v49 = vcombine.low %v3659_v22, %v3662_v59  ;;  %v455_v42 = vadd.f32 %v8359_v0, %v394_v21  ;;  %v456_v61 = vadd.f32 %v8359_v0, %v395_v46  ;;  %7355 = vmatprep.subr.bf16.mxu0 %v8601_v31  ;;  %v3564_v46 = vld [vmem:[#allocation2 + $0x60] sm:$0xe] }
  0xb3   : > { %v1247_v51 = vor.u32 %v1246_v40, %v1243_v48  ;;  %v1257_v25 = vor.u32 %v1256_v41, %v1252_v4  ;;  %v457_v39 = vadd.f32 %v8359_v0, %v396_v56  ;;  %v338_v15 = vunpack.c.l.bf16 %v284_v57  ;;  %v8639_v57 = vld [vmem:[%s9760_s3] ss:$0 sm:$0xff] }
  0xb4   : > { %v8616_v53 = vld [vmem:[#allocation2 + $0x9c] sm:$0xf]  ;;  %v8618_v30 = vld [vmem:[#allocation2 + $0xa0] sm:$0xf]  ;;  %7284 = vmatmul.mubr.bf16.gmra.mrb[8].mxu0 %v6350_v49  ;;  %v509_v23 = vmax.f32 %v455_v42, 0.0  ;;  %v510_v38 = vmax.f32 %v456_v61, 0.0  ;;  %v397_v18 = vmul.f32 %v8367_v33, %v336_v1  ;;  %v398_v29 = vmul.f32 %v8367_v33, %v337_v8 }
  0xb5   : > { %v1248_v60 = vrot.slane %v1247_v51, 4  ;;  %v1258_v28 = vrot.slane %v1257_v25, 4  ;;  %v1265_v52 = vshrl.u32 %v8616_v53, 16  ;;  %v1268_v50 = vshll.u32 %v8616_v53, 16 }
  0xb6   : > { %v1274_v26 = vshll.u32 %v8618_v30, 16  ;;  %v1278_v36 = vshrl.u32 %v8618_v30, 16  ;;  %v511_v55 = vmax.f32 %v457_v39, 0.0  ;;  %v585_v16 = vsel %vm525_vm2, %v509_v23, 0.0 }
  0xb7   : > { %v946_v13 = vld [vmem:[#allocation2 + $0xa4] sm:$0x1]  ;;  %v1253_v32 = vsel %vm8044_vm3, %v1248_v60, %v1252_v4  ;;  %v1263_v9 = vsel %vm8044_vm3, %v1258_v28, %v1262_v58  ;;  %v1267_v19 = vrot.slane %v1265_v52, 4  ;;  %v1270_v22 = vrot.slane %v1268_v50, 5  ;;  %v2828_v60 = vld [vmem:[#allocation2 + $0x70] sm:$0xf] }
  0xb8   : > { %v6141_v2 = vcombine.low %v1253_v32, %v1263_v9  ;;  %v1276_v27 = vrot.slane %v1274_v26, 5  ;;  %v1280_v21 = vrot.slane %v1278_v36, 4  ;;  %v1284_v1 = vshll.u32 %v946_v13, 16  ;;  %v2829_v36 = vld [vmem:[#allocation2 + $0x74] sm:$0x1] }
  0xb9   : > { %v1271_v8 = vor.u32 %v1270_v22, %v1267_v19  ;;  %v587_v54 = vsel %vm536_vm4, %v511_v55, 0.0  ;;  %v6685_v44 = vpack.c.bf16 %v510_v38, %v585_v16  ;;  %v399_v20 = vmul.f32 %v8367_v33, %v338_v15  ;;  %v3565_v38 = vld [vmem:[#allocation2 + $0x6c] sm:$0xe] }
  0xba   : > { %7059 = vmatprep.mubr.bf16.mxu1 %v6141_v2  ;;  %v1281_v45 = vor.u32 %v1280_v21, %v1276_v27  ;;  %v1286_v37 = vrot.slane %v1284_v1, 5  ;;  %v6581_v43 = vpack.c.bf16 %v587_v54, %v587_v54  ;;  %v458_v59 = vadd.f32 %v8359_v0, %v397_v18 }
  0xbb   : > { %v1272_v56 = vrot.slane %v1271_v8, 4  ;;  %6786 = vst [vmem:[#allocation2 + $0xa8] sm:$0xff] %v6685_v44   ;;  %v459_v48 = vadd.f32 %v8639_v57, %v398_v29  ;;  %v460_v40 = vadd.f32 %v8639_v57, %v399_v20  ;;  %v6319_v4 = vrot.slane %v3563_v11, 9 }
  0xbc   : > { %v1282_v33 = vrot.slane %v1281_v45, 4  ;;  %875 = vst [vmem:[#allocation2 + $0xb0] sm:$0x1] %v6581_v43  ;;  %v512_v41 = vmax.f32 %v458_v59, 0.0  ;;  %v3665_v58 = vrot.slane %v8397_v24, 5  ;;  %v3668_v0 = vrot.slane %v8401_v47, 5 }
  0xbd   : > { %v1277_v49 = vsel %vm8044_vm3, %v1272_v56, %v1276_v27  ;;  %v513_v42 = vmax.f32 %v459_v48, 0.0  ;;  %v514_v61 = vmax.f32 %v460_v40, 0.0  ;;  %v6320_v51 = vrot.slane %v3564_v46, 9 }
  0xbe   : > { %v1287_v25 = vsel %vm8044_vm3, %v1282_v33, %v1286_v37  ;;  %v588_v39 = vsel %vm525_vm2, %v512_v41, 0.0  ;;  %v3666_v15 = vsel %vm8436_vm7, %v6319_v4, %v3665_v58  ;;  %v3667_v23 = vrot.slane %v3665_v58, 4  ;;  %v3566_v37 = vld [vmem:[#allocation2 + $0x78] sm:$0xe]  ;;  %v8679_v58 = vld [vmem:[#allocation2 + $0x7c] sm:$0xf] }
  0xbf   : > { %v6142_v24 = vcombine.low %v1277_v49, %v1287_v25  ;;  %v590_v47 = vsel %vm536_vm4, %v514_v61, 0.0  ;;  %v6582_v18 = vpack.c.bf16 %v588_v39, %v588_v39  ;;  %v6583_v29 = vpack.c.bf16 %v513_v42, %v513_v42 }
  0xc0   : > { %v6584_v28 = vpack.c.bf16 %v590_v47, %v590_v47  ;;  %v3669_v52 = vsel %vm8436_vm7, %v3667_v23, %v3668_v0  ;;  %v3672_v50 = vrot.slane %v8413_v12, 5  ;;  %v3675_v13 = vrot.slane %v8427_v3, 5 }
  0xc1   : > { %7060 = vmatmul.mubr.bf16.gmra.mrb[24].mxu1 %v6142_v24  ;;  %876 = vst [vmem:[#allocation2 + $0xb4] sm:$0xf] %v6582_v18  ;;  %877 = vst [vmem:[#allocation2 + $0xb8] sm:$0xf] %v6583_v29  ;;  %v6351_v26 = vcombine.low %v3666_v15, %v3669_v52  ;;  %v6321_v55 = vrot.slane %v3565_v38, 9  ;;  %v3679_v22 = vrot.slane %v2828_v60, 5 }
  0xc2   : > { %v8659_v16 = vld [vmem:[#allocation2 + $0xa8] sm:$0xf]  ;;  %v8661_v32 = vld [vmem:[#allocation2 + $0xac] sm:$0xf]  ;;  %878 = vst [vmem:[#allocation2 + $0xbc] sm:$0x1] %v6584_v28  ;;  %v3673_v9 = vsel %vm8436_vm7, %v6320_v51, %v3672_v50 }
  0xc3   : > { %v3674_v19 = vrot.slane %v3672_v50, 4  ;;  %v947_v11 = vld [vmem:[#allocation2 + $0xb0] sm:$0x1]  ;;  %v1289_v12 = vshrl.u32 %v8659_v16, 16  ;;  %v1292_v3 = vshll.u32 %v8659_v16, 16  ;;  %v1298_v2 = vshll.u32 %v8661_v32, 16  ;;  %7287 = vmatprep.mubr.bf16.mxu0 %v6351_v26 }
  0xc4   : > { %v1302_v27 = vshrl.u32 %v8661_v32, 16  ;;  %v1308_v21 = vshll.u32 %v947_v11, 16  ;;  %v3681_v8 = vrot.slane %v3679_v22, 4  ;;  %v3682_v59 = vrot.slane %v2829_v36, 5  ;;  %v8685_v24 = vld [vmem:[#allocation2 + $0x80] sm:$0x1] }
  0xc5   : > { %v3676_v1 = vsel %vm8436_vm7, %v3674_v19, %v3675_v13  ;;  %v1291_v54 = vrot.slane %v1289_v12, 4  ;;  %v1294_v44 = vrot.slane %v1292_v3, 5  ;;  %v1300_v20 = vrot.slane %v1298_v2, 5  ;;  %v2834_v28 = vld [vmem:[#allocation2 + $0x88] sm:$0xf] }
  0xc6   : > { %v1304_v45 = vrot.slane %v1302_v27, 4  ;;  %v6352_v43 = vcombine.low %v3673_v9, %v3676_v1  ;;  %v1310_v48 = vrot.slane %v1308_v21, 5  ;;  %v3680_v40 = vsel %vm8436_vm7, %v6321_v55, %v3679_v22  ;;  %v3567_v52 = vld [vmem:[#allocation2 + $0x84] sm:$0xe]  ;;  %v2835_v19 = vld [vmem:[#allocation2 + $0x8c] sm:$0x1] }
  0xc7   : > { %v1295_v46 = vor.u32 %v1294_v44, %v1291_v54  ;;  %v3683_v41 = vsel %vm8436_vm7, %v3681_v8, %v3682_v59  ;;  %v6322_v0 = vrot.slane %v3566_v37, 9  ;;  %v3686_v9 = vrot.slane %v8679_v58, 5  ;;  %v3568_v2 = vld [vmem:[#allocation2 + $0x90] sm:$0xe]  ;;  %v2837_v8 = vld [vmem:[#allocation2 + $0x94] sm:$0xf] }
  0xc8   : > { %v1305_v56 = vor.u32 %v1304_v45, %v1300_v20  ;;  %v8673_v4 = vld [vmem:[#allocation2 + $0xb4] sm:$0xf]  ;;  %v8675_v33 = vld [vmem:[#allocation2 + $0xb8] sm:$0xf]  ;;  %7288 = vmatmul.mubr.bf16.gmra.mrb[12].mxu0 %v6352_v43  ;;  %v6353_v38 = vcombine.low %v3680_v40, %v3683_v41  ;;  %v3689_v11 = vrot.slane %v8685_v24, 5  ;;  %v6323_v12 = vrot.slane %v3567_v52, 9 }
  0xc9   : > { %v1296_v49 = vrot.slane %v1295_v46, 4  ;;  %v948_v61 = vld [vmem:[#allocation2 + $0xbc] sm:$0x1]  ;;  %v1313_v51 = vshrl.u32 %v8673_v4, 16  ;;  %v1316_v25 = vshll.u32 %v8673_v4, 16  ;;  %v1322_v39 = vshll.u32 %v8675_v33, 16 }
  0xca   : > { %v1306_v42 = vrot.slane %v1305_v56, 4  ;;  %v1326_v15 = vshrl.u32 %v8675_v33, 16  ;;  %v1332_v23 = vshll.u32 %v948_v61, 16  ;;  %7291 = vmatprep.mubr.bf16.mxu0 %v6353_v38  ;;  %v3693_v3 = vrot.slane %v2834_v28, 5  ;;  %v2838_v37 = vld [vmem:[#allocation2 + $0x98] sm:$0x1] }
  0xcb   : > { %v1301_v47 = vsel %vm8044_vm3, %v1296_v49, %v1300_v20  ;;  %v1315_v29 = vrot.slane %v1313_v51, 4  ;;  %v1318_v60 = vrot.slane %v1316_v25, 5  ;;  %v1324_v13 = vrot.slane %v1322_v39, 5  ;;  %v7858_v59 = vld [vmem:[#allocation2] sm:$0xf] }
  0xcc   : > { %v1311_v18 = vsel %vm8044_vm3, %v1306_v42, %v1310_v48  ;;  %v1328_v26 = vrot.slane %v1326_v15, 4  ;;  %v1334_v55 = vrot.slane %v1332_v23, 5  ;;  %v3687_v21 = vsel %vm8436_vm7, %v6322_v0, %v3686_v9  ;;  %v8699_v46 = vld [vmem:[#allocation2 + $0x4] sm:$0xf]  ;;  %v2840_v41 = vld [vmem:[#allocation2 + $0xa0] sm:$0xf] }
  0xcd   : > { %v6143_v50 = vcombine.low %v1301_v47, %v1311_v18  ;;  %v1319_v36 = vor.u32 %v1318_v60, %v1315_v29  ;;  %v3688_v1 = vrot.slane %v3686_v9, 4  ;;  %v3694_v44 = vsel %vm8436_vm7, %v6323_v12, %v3693_v3  ;;  %v3569_v0 = vld [vmem:[#allocation2 + $0x9c] sm:$0xe]  ;;  %v2841_v25 = vld [vmem:[#allocation2 + $0xa4] sm:$0x1] }
  0xce   : > { %v1329_v22 = vor.u32 %v1328_v26, %v1324_v13  ;;  %v3695_v20 = vrot.slane %v3693_v3, 4  ;;  %v3696_v45 = vrot.slane %v2835_v19, 5  ;;  %v6153_v56 = vcombine.low %v7858_v59, %v8699_v46  ;;  %v2843_v39 = vld [vmem:[#allocation2 + $0xac] sm:$0xf]  ;;  %v2844_v29 = vld [vmem:[#allocation2 + $0xb0] sm:$0x1] }
  0xcf   : > { %7063 = vmatprep.mubr.bf16.mxu1 %v6143_v50  ;;  %v1320_v27 = vrot.slane %v1319_v36, 4  ;;  %v3690_v48 = vsel %vm8436_vm7, %v3688_v1, %v3689_v11  ;;  %v6324_v40 = vrot.slane %v3568_v2, 9  ;;  %v3700_v51 = vrot.slane %v2837_v8, 5  ;;  %v3570_v60 = vld [vmem:[#allocation2 + $0xa8] sm:$0xe] }
  0xd0   : > { %v1330_v54 = vrot.slane %v1329_v22, 4  ;;  %v6354_v42 = vcombine.low %v3687_v21, %v3690_v48  ;;  %v3697_v61 = vsel %vm8436_vm7, %v3695_v20, %v3696_v45  ;;  %v3703_v38 = vrot.slane %v2838_v37, 5  ;;  %v2846_v26 = vld [vmem:[#allocation2 + $0xb8] sm:$0xf]  ;;  %v8710_v36 = vld [vmem:[#allocation2 + $0x10] sm:$0xf] }
  0xd1   : > { %v1325_v43 = vsel %vm8044_vm3, %v1320_v27, %v1324_v13  ;;  %v6355_v23 = vcombine.low %v3694_v44, %v3697_v61  ;;  %v3702_v47 = vrot.slane %v3700_v51, 4  ;;  %v6325_v18 = vrot.slane %v3569_v0, 9  ;;  %v6779_v22 = vld [vmem:[%s8023_s24 + $0xc0] sm:$0xff]   ;;  %v287_v11 = vld [vmem:[%s8023_s24 + $0xc8] sm:$0x1] }
  0xd2   : > { %v1335_v49 = vsel %vm8044_vm3, %v1330_v54, %v1334_v55  ;;  %7292 = vmatmul.mubr.bf16.gmra.mrb[16].mxu0 %v6354_v42  ;;  %v3701_v28 = vsel %vm8436_vm7, %v6324_v40, %v3700_v51  ;;  %v3707_v52 = vrot.slane %v2840_v41, 5  ;;  %v3710_v50 = vrot.slane %v2841_v25, 5  ;;  %v7861_v55 = vld [vmem:[#allocation2 + $0xc] sm:$0xf]  ;;  %v7862_v12 = vld [vmem:[#allocation2 + $0x18] sm:$0xf] }
  0xd3   : > { %v6144_v15 = vcombine.low %v1325_v43, %v1335_v49  ;;  %7295 = vmatprep.mubr.bf16.mxu0 %v6355_v23  ;;  %v3714_v13 = vrot.slane %v2843_v39, 5  ;;  %v6154_v9 = vcombine.low %v7861_v55, %v8710_v36  ;;  %v3704_v19 = vsel %vm8436_vm7, %v3702_v47, %v3703_v38  ;;  %v8717_v3 = vld [vmem:[#allocation2 + $0x1c] sm:$0xf]  ;;  %v3571_v54 = vld [vmem:[#allocation2 + $0xb4] sm:$0xe]  ;;  %v7775_v40 = vld [vmem:[%s9758_s1 + $0x88] sm:$0xff]  }
  0xd4   : > { %v6155_v2 = vcombine.low %v7862_v12, %v8717_v3  ;;  %v3708_v27 = vsel %vm8436_vm7, %v6325_v18, %v3707_v52  ;;  %v3709_v21 = vrot.slane %v3707_v52, 4  ;;  %v6326_v1 = vrot.slane %v3570_v60, 9  ;;  %v2847_v8 = vld [vmem:[#allocation2 + $0xbc] sm:$0x1]  ;;  %v7864_v61 = vld [vmem:[%s9759_s2] ss:$0 sm:$0xff] }
  0xd5   : > { %7064 = vmatmul.mubr.bf16.gmra.mrb[28].mxu1 %v6144_v15  ;;  %v6356_v44 = vcombine.low %v3701_v28, %v3704_v19  ;;  %v3716_v20 = vrot.slane %v3714_v13, 4  ;;  %v3717_v45 = vrot.slane %v2844_v29, 5  ;;  %v3721_v37 = vrot.slane %v2846_v26, 5  ;;  %v7865_v18 = vld [vmem:[%s9758_s1 + $0x80] sm:$0xff]   ;;  %v7779_v52 = vld [vmem:[%s9758_s1 + $0x90] sm:$0xff]  }
  0xd6   : > { %7083 = vmatprep.mubr.bf16.mxu1 %v6153_v56  ;;  %v3711_v43 = vsel %vm8436_vm7, %v3709_v21, %v3710_v50  ;;  %v6650_v59 = vunpack.c.l.bf16 %v6779_v22  ;;  %v6651_v56 = vunpack.c.h.bf16 %v6779_v22  ;;  %v341_v48 = vunpack.c.l.bf16 %v287_v11  ;;  %v7867_v19 = vld [vmem:[#allocation2 + $0x24] sm:$0xf] }
  0xd7   : > { %v6357_v41 = vcombine.low %v3708_v27, %v3711_v43  ;;  %v6327_v0 = vrot.slane %v3571_v54, 9  ;;  %v3723_v49 = vrot.slane %v3721_v37, 4  ;;  %v3724_v42 = vrot.slane %v2847_v8, 5  ;;  %v7783_v8 = vld [vmem:[%s9758_s1 + $0x98] sm:$0xff]  }
  0xd8   : > { %v400_v51 = vmul.f32 %v7864_v61, %v6650_v59  ;;  %v401_v25 = vmul.f32 %v7864_v61, %v6651_v56  ;;  %v402_v39 = vmul.f32 %v7864_v61, %v341_v48  ;;  %v3715_v15 = vsel %vm8436_vm7, %v6326_v1, %v3714_v13  ;;  %v7793_v48 = vld [vmem:[%s9758_s1 + $0xa8] sm:$0xff]  }
  0xd9   : > { %v3718_v23 = vsel %vm8436_vm7, %v3716_v20, %v3717_v45  ;;  %v3722_v29 = vsel %vm8436_vm7, %v6327_v0, %v3721_v37  ;;  %v3725_v60 = vsel %vm8436_vm7, %v3723_v49, %v3724_v42  ;;  %v7872_v45 = vld [vmem:[#allocation2 + $0x48] sm:$0xf]  ;;  %v8766_v37 = vld [vmem:[#allocation2 + $0x4c] sm:$0xf] }
  0xda   : > { %7296 = vmatmul.mubr.bf16.gmra.mrb[20].mxu0 %v6356_v44  ;;  %v461_v38 = vadd.f32 %v8639_v57, %v400_v51  ;;  %v462_v47 = vadd.f32 %v8639_v57, %v401_v25  ;;  %v463_v28 = vadd.f32 %v8639_v57, %v402_v39  ;;  %v6358_v26 = vcombine.low %v3715_v15, %v3718_v23  ;;  %v7868_v57 = vld [vmem:[#allocation2 + $0x30] sm:$0xf]  ;;  %v8763_v44 = vld [vmem:[#allocation2 + $0x40] sm:$0xf] }
  0xdb   : > { %7299 = vmatprep.mubr.bf16.mxu0 %v6357_v41  ;;  %v6359_v11 = vcombine.low %v3722_v29, %v3725_v60  ;;  %v6158_v20 = vcombine.low %v7870_v17, %v8763_v44  ;;  %v6159_v43 = vcombine.low %v7872_v45, %v8766_v37  ;;  %v3081_v41 = vshrl.u32 %v8679_v58, 16  ;;  %v7799_v39 = vld [vmem:[%s9758_s1 + $0xb0] sm:$0xff]  }
  0xdc   : > { %v515_v50 = vmax.f32 %v461_v38, 0.0  ;;  %v516_v13 = vmax.f32 %v462_v47, 0.0  ;;  %v517_v55 = vmax.f32 %v463_v28, 0.0  ;;  %v7788_v38 = vld [vmem:[#allocation2 + $0x18] sm:$0xff]   ;;  %v1931_v28 = vld [vmem:[#allocation2] sm:$0xe] }
  0xdd   : > { %7084 = vmatmul.mubr.bf16.vlgmr.msra.gmra.mrb[0].mxu1 %v6154_v9  ;;  %v8747_v9 = vld [vmem:[#allocation2 + $0x28] sm:$0xf]  ;;  %v3083_v23 = vrot.slane %v3081_v41, 4  ;;  %v8783_v47 = vld [vmem:[#allocation2 + $0x58] sm:$0xf]  ;;  %v7794_v17 = vld [vmem:[#allocation2 + $0x30] sm:$0xff]  }
  0xde   : > { %7116 = vmatpush3.bf16.msra.mxu1 %v7865_v18  ;;  %7087 = vmatprep.mubr.bf16.mxu1 %v6155_v2  ;;  %v6156_v22 = vcombine.low %v7867_v19, %v8747_v9  ;;  %v591_v12 = vsel %vm525_vm2, %v515_v50, 0.0  ;;  %v8752_v2 = vld [vmem:[#allocation2 + $0x34] sm:$0xf]  ;;  %v593_v21 = vsel %vm536_vm4, %v517_v55, 0.0  ;;  %v7876_v50 = vld [vmem:[#allocation2 + $0x60] sm:$0xf] }
  0xdf   : > { %7117 = vmatprep.subr.bf16.mxu1 %v7775_v40  ;;  %v6157_v27 = vcombine.low %v7868_v57, %v8752_v2  ;;  %v6690_v1 = vpack.c.bf16 %v516_v13, %v591_v12  ;;  %v6587_v54 = vpack.c.bf16 %v593_v21, %v593_v21  ;;  %v7875_v18 = vld [vmem:[#allocation2 + $0x54] sm:$0xf]  ;;  %v8787_v13 = vld [vmem:[#allocation2 + $0x64] sm:$0xf]  ;;  %v1991_v55 = vrot.slane %v8710_v36, 5  ;;  %v7805_v19 = vld [vmem:[%s9758_s1 + $0xb8] sm:$0xff]  }
  0xe0   : > { %v6160_v29 = vcombine.low %v7875_v18, %v8783_v47  ;;  %v7878_v12 = vld [vmem:[#allocation2 + $0x8] sm:$0x1]  ;;  %v1933_v21 = vld [vmem:[#allocation2 + $0x18] sm:$0xe] }
  0xe1   : > { %6787 = vst [vmem:[#allocation2 + $0xc0] sm:$0xff] %v6690_v1   ;;  %881 = vst [vmem:[#allocation2 + $0xc8] sm:$0x1] %v6587_v54  ;;  %v1987_v57 = vrot.slane %v7878_v12, 5  ;;  %v7879_v1 = vld [vmem:[#allocation2 + $0x14] sm:$0x1] }
  0xe2   : > { %7118 = vmatpush3.bf16.msra.mxu1 %v7775_v40  ;;  %7300 = vmatmul.mubr.bf16.gmra.mrb[24].mxu0 %v6358_v26  ;;  %v3077_v40 = vshll.u32 %v8679_v58, 16  ;;  %v6161_v26 = vcombine.low %v7876_v50, %v8787_v13  ;;  %v7790_v36 = vld [vmem:[#allocation2 + $0x24] sm:$0xff]   ;;  %v6177_v54 = vrot.slane %v1931_v28, 9  ;;  %v1993_v45 = vrot.slane %v1991_v55, 4  ;;  %v4442_v12 = vld [vmem:[#allocation2 + $0x18] sm:$0xf] }
  0xe3   : > { %7119 = vmatprep.subr.bf16.mxu1 %v7779_v52  ;;  %7303 = vmatprep.mubr.bf16.mxu0 %v6359_v11  ;;  %v1998_v11 = vrot.slane %v8717_v3, 5  ;;  %v1934_v3 = vld [vmem:[#allocation2 + $0x24] sm:$0xe]  ;;  %v1937_v28 = vld [vmem:[#allocation2 + $0x48] sm:$0xe] }
  0xe4   : > { %v8779_v15 = vrot.slane %v3077_v40, 5  ;;  %v6180_v18 = vrot.slane %v1934_v3, 9  ;;  %v7807_v3 = vld [vmem:[%s9758_s1 + $0x1d8] sm:$0xff]  }
  0xe5   : > { %7088 = vmatmul.mubr.bf16.gmra.mrb[4].mxu1 %v6156_v22  ;;  %v1932_v22 = vld [vmem:[#allocation2 + $0xc] sm:$0xe] }
  0xe6   : > { %7091 = vmatprep.mubr.bf16.mxu1 %v6157_v27  ;;  %7120 = vmatpush3.bf16.msra.mxu1 %v7779_v52  ;;  %9775 = vst [vmem:[#allocation3_spill] sm:$0xff] %v8779_v15  ;;  %v1984_v52 = vrot.slane %v8699_v46, 5  ;;  %v3084_v46 = vor.u32 %v3083_v23, %v8779_v15  ;;  %v3087_v27 = vshll.u32 %v8685_v24, 16  ;;  %v6179_v24 = vrot.slane %v1933_v21, 9  ;;  %v7883_v21 = vld [vmem:[#allocation2 + $0x2c] sm:$0x1] }
  0xe7   : > { %7121 = vmatprep.subr.bf16.mxu1 %v7783_v8  ;;  %v6165_v23 = vcombine.low %v8593_v7, %v8595_v5  ;;  %v1939_v7 = vld [vmem:[#allocation2 + $0x60] sm:$0xe] }
  0xe8   : > { %v2849_v59 = vld [vmem:[#allocation2 + $0xc4] sm:$0xf]  ;;  %v3572_v56 = vld [vmem:[#allocation2 + $0xc0] sm:$0xe]  ;;  %v2850_v0 = vld [vmem:[#allocation2 + $0xc8] sm:$0x1] }
  0xe9   : > { %v6328_v49 = vrot.slane %v3572_v56, 9  ;;  %v3728_v42 = vrot.slane %v2849_v59, 5  ;;  %v3731_v61 = vrot.slane %v2850_v0, 5  ;;  %v2000_v59 = vrot.slane %v1998_v11, 4  ;;  %v7880_v56 = vld [vmem:[#allocation2 + $0x20] sm:$0x1] }
  0xea   : > { %7122 = vmatpush3.bf16.msra.mxu1 %v7783_v8  ;;  %v1994_v8 = vrot.slane %v7879_v1, 5  ;;  %v8802_v40 = vrot.slane %v3084_v46, 4  ;;  %v8804_v41 = vrot.slane %v3087_v27, 5  ;;  %v7881_v0 = vld [vmem:[#allocation2 + $0x6c] sm:$0xf]  ;;  %v7796_v46 = vld [vmem:[#allocation2 + $0x3c] sm:$0xff]  }
  0xeb   : > { %7123 = vmatprep.subr.bf16.mxu1 %v7787_v14  ;;  %v3729_v51 = vsel %vm8436_vm7, %v6328_v49, %v3728_v42  ;;  %v3730_v25 = vrot.slane %v3728_v42, 4  ;;  %v8806_v49 = vld [vmem:[#allocation2 + $0x70] sm:$0xf]  ;;  %v4445_v1 = vld [vmem:[#allocation2 + $0x24] sm:$0xf] }
  0xec   : > { %9776 = vst [vmem:[#allocation4_spill] sm:$0xff] %v8802_v40  ;;  %9777 = vst [vmem:[#allocation5_spill] sm:$0xff] %v8804_v41  ;;  %v6162_v42 = vcombine.low %v7881_v0, %v8806_v49  ;;  %v1938_v0 = vld [vmem:[#allocation2 + $0x54] sm:$0xe]  ;;  %v7806_v5 = vld [vmem:[#allocation2 + $0x60] sm:$0xff]  }
  0xed   : > { %7092 = vmatmul.mubr.bf16.gmra.mrb[8].mxu1 %v6158_v20  ;;  %v3732_v58 = vsel %vm8436_vm7, %v3730_v25, %v3731_v61  ;;  %v6178_v20 = vrot.slane %v1932_v22, 9  ;;  %v6163_v61 = vcombine.low %v8519_v34, %v8521_v10  ;;  %v6164_v25 = vcombine.low %v8544_v6, %v8541_v63  ;;  %v7892_v6 = vld [vmem:[#allocation2 + $0x80] sm:$0x1]  ;;  %v7808_v63 = vld [vmem:[#allocation2 + $0x6c] sm:$0xff]  }
  0xee   : > { %7095 = vmatprep.mubr.bf16.mxu1 %v6159_v43  ;;  %7124 = vmatpush3.bf16.msra.mxu1 %v7787_v14  ;;  %v6360_v60 = vcombine.low %v3729_v51, %v3732_v58  ;;  %v1986_v14 = vrot.slane %v1984_v52, 4  ;;  %v8800_v43 = vld [vmem:[%s9758_s1 + $0xc0] sm:$0xff]   ;;  %v1935_v51 = vld [vmem:[#allocation2 + $0x30] sm:$0xe]  ;;  %v8820_v58 = vsel %vm8436_vm7, %v6177_v54, %v1984_v52  ;;  %v8832_v10 = vsel %vm8436_vm7, %v1993_v45, %v1994_v8  ;;  %v7800_v8 = vld [vmem:[#allocation2 + $0x48] sm:$0xff]  }
  0xef   : > { %7125 = vmatprep.subr.bf16.mxu1 %v7793_v48  ;;  %v8828_v34 = vsel %vm8436_vm7, %v6178_v20, %v1991_v55  ;;  %v8838_v52 = vsel %vm8436_vm7, %v6179_v24, %v1998_v11  ;;  %v2012_v55 = vrot.slane %v8752_v2, 5  ;;  %v2019_v22 = vrot.slane %v8763_v44, 5  ;;  %v4446_v45 = vld [vmem:[#allocation2 + $0x28] sm:$0xf] }
  0xf0   : > { %7304 = vmatmul.mubr.bf16.gmra.mrb[28].mxu0 %v6360_v60  ;;  %v1936_v60 = vld [vmem:[#allocation2 + $0x3c] sm:$0xe]  ;;  %v2026_v11 = vrot.slane %v8766_v37, 5  ;;  %v2008_v37 = vrot.slane %v7883_v21, 5  ;;  %v4515_v2 = vshrl.u32 %v4445_v1, 16 }
  0xf1   : > { %7323 = vmatprep.mubr.bf16.mxu0 %v7788_v38  ;;  %v8824_v38 = vsel %vm8436_vm7, %v1986_v14, %v1987_v57  ;;  %v4443_v57 = vld [vmem:[#allocation2 + $0x1c] sm:$0xf] }
  0xf2   : > { %7126 = vmatpush3.bf16.msra.mxu1 %v7793_v48  ;;  %v2001_v48 = vrot.slane %v7880_v56, 5  ;;  %v6182_v56 = vrot.slane %v1936_v60, 9  ;;  %v4500_v44 = vshll.u32 %v4443_v57, 16  ;;  %v4504_v27 = vshrl.u32 %v4443_v57, 16 }
  0xf3   : > { %7127 = vmatprep.subr.bf16.mxu1 %v7799_v39 }
  0xf4   : > { %v8842_v50 = vsel %vm8436_vm7, %v2000_v59, %v2001_v48  ;;  %v2014_v59 = vrot.slane %v2012_v55, 4  ;;  %v6183_v48 = vrot.slane %v1937_v28, 9  ;;  %v8884_v28 = vsel %vm8436_vm7, %v6182_v56, %v2019_v22 }
  0xf5   : > { %7096 = vmatmul.mubr.bf16.gmra.mrb[12].mxu1 %v6160_v29  ;;  %v2005_v29 = vrot.slane %v8747_v9, 5  ;;  %v4528_v9 = vshrl.u32 %v4446_v45, 16 }
  0xf6   : > { %7099 = vmatprep.mubr.bf16.mxu1 %v6161_v26  ;;  %7128 = vmatpush3.bf16.msra.mxu1 %v7799_v39  ;;  %v7795_v39 = vld [vmem:[%s9758_s1 + $0x1c8] sm:$0xff]   ;;  %v6181_v26 = vrot.slane %v1935_v51, 9 }
  0xf7   : > { %7129 = vmatprep.subr.bf16.mxu1 %v7805_v19  ;;  %v8865_v54 = vsel %vm8436_vm7, %v6180_v18, %v2005_v29  ;;  %v2007_v14 = vrot.slane %v2005_v29, 4  ;;  %v2028_v18 = vrot.slane %v2026_v11, 4  ;;  %v7886_v29 = vld [vmem:[#allocation2 + $0x50] sm:$0x1] }
  0xf8   : > { %7324 = vmatmul.mubr.bf16.vlgmr.msra.gmra.mrb[0].mxu0 %v7790_v36  ;;  %v8872_v24 = vsel %vm8436_vm7, %v6181_v26, %v2012_v55  ;;  %v2029_v21 = vrot.slane %v7886_v29, 5  ;;  %v4494_v36 = vshll.u32 %v4442_v12, 16  ;;  %v4524_v26 = vshll.u32 %v4446_v45, 16 }
  0xf9   : > { %7356 = vmatpush3.bf16.msra.mxu0 %v8601_v31  ;;  %7327 = vmatprep.mubr.bf16.mxu0 %v7794_v17  ;;  %v7801_v31 = vld [vmem:[%s9758_s1 + $0x1d0] sm:$0xff]   ;;  %v7884_v17 = vld [vmem:[#allocation2 + $0x38] sm:$0x1]  ;;  %v8876_v60 = vsel %vm8436_vm7, %v2007_v14, %v2008_v37  ;;  %v8888_v55 = vsel %vm8436_vm7, %v6183_v48, %v2026_v11  ;;  %v2033_v37 = vrot.slane %v8783_v47, 5  ;;  %v4444_v11 = vld [vmem:[#allocation2 + $0x20] sm:$0x1] }
  0xfa   : > { %7130 = vmatpush3.bf16.msra.mxu1 %v7805_v19  ;;  %7357 = vmatprep.subr.bf16.mxu0 %v7795_v39  ;;  %v2015_v20 = vrot.slane %v7884_v17, 5  ;;  %v4491_v17 = vshrl.u32 %v4442_v12, 16  ;;  %v4518_v19 = vshll.u32 %v4445_v1, 16  ;;  %v7811_v12 = vld [vmem:[%s9758_s1 + $0x1e0] sm:$0xff]   ;;  %v4496_v1 = vrot.slane %v4494_v36, 5  ;;  %v7802_v48 = vld [vmem:[#allocation2 + $0x54] sm:$0xff]  }
  0xfb   : > { %7163 = vmatprep.subr.bf16.mxu1 %v8800_v43  ;;  %v4506_v14 = vrot.slane %v4504_v27, 4  ;;  %v4517_v45 = vrot.slane %v4515_v2, 4  ;;  %v8910_v56 = vrot.slane %v4524_v26, 5  ;;  %v4530_v47 = vrot.slane %v4528_v9, 4  ;;  %v7887_v27 = vld [vmem:[#allocation2 + $0x5c] sm:$0x1] }
  0xfc   : > { %v2040_v9 = vrot.slane %v8787_v13, 5  ;;  %v2047_v2 = vrot.slane %v8806_v49, 5  ;;  %v4510_v36 = vshll.u32 %v4444_v11, 16  ;;  %v7888_v49 = vld [vmem:[#allocation2 + $0x7c] sm:$0xf]  ;;  %v7819_v26 = vld [vmem:[%s9758_s1 + $0x1f0] sm:$0xff]  }
  0xfd   : > { %7100 = vmatmul.mubr.bf16.gmra.mrb[16].mxu1 %v6162_v42  ;;  %7358 = vmatpush3.bf16.msra.mxu0 %v7795_v39  ;;  %v2021_v42 = vrot.slane %v2019_v22, 4  ;;  %v8880_v39 = vsel %vm8436_vm7, %v2014_v59, %v2015_v20  ;;  %v6184_v22 = vrot.slane %v1938_v0, 9  ;;  %v4447_v20 = vld [vmem:[#allocation2 + $0x2c] sm:$0x1]  ;;  %v4520_v59 = vrot.slane %v4518_v19, 5 }
  0xfe   : > { %7103 = vmatprep.mubr.bf16.mxu1 %v6163_v61  ;;  %v7885_v61 = vld [vmem:[#allocation2 + $0x44] sm:$0x1]  ;;  %7359 = vmatprep.subr.bf16.mxu0 %v7801_v31  ;;  %v1940_v19 = vld [vmem:[#allocation2 + $0x6c] sm:$0xe]  ;;  %v4531_v13 = vor.u32 %v4530_v47, %v8910_v56  ;;  %v6185_v11 = vrot.slane %v1939_v7, 9 }
  0xff   : > { %v2022_v51 = vrot.slane %v7885_v61, 5  ;;  %v7815_v0 = vld [vmem:[%s9758_s1 + $0x1e8] sm:$0xff]   ;;  %v4521_v29 = vor.u32 %v4520_v59, %v4517_v45  ;;  %v4448_v47 = vld [vmem:[#allocation2 + $0x30] sm:$0xf] }
 0x100   : > { %7328 = vmatmul.mubr.bf16.gmra.mrb[4].mxu0 %v7796_v46  ;;  %v8899_v46 = vsel %vm8436_vm7, %v2028_v18, %v2029_v21  ;;  %v2035_v18 = vrot.slane %v2033_v37, 4  ;;  %v1941_v21 = vld [vmem:[#allocation2 + $0x78] sm:$0xe]  ;;  %v7891_v45 = vld [vmem:[#allocation2 + $0x88] sm:$0xf] }
 0x101   : > { %7331 = vmatprep.mubr.bf16.mxu0 %v7800_v8  ;;  %7360 = vmatpush3.bf16.msra.mxu0 %v7801_v31  ;;  %v8895_v57 = vsel %vm8436_vm7, %v2021_v42, %v2022_v51  ;;  %v4493_v31 = vrot.slane %v4491_v17, 4  ;;  %v8905_v8 = vrot.slane %v4500_v44, 5  ;;  %v2036_v44 = vrot.slane %v7887_v27, 5  ;;  %v7889_v27 = vld [vmem:[#allocation2 + $0x68] sm:$0x1] }
 0x102   : > { %7361 = vmatprep.subr.bf16.mxu0 %v7807_v3  ;;  %v8927_v42 = vsel %vm8436_vm7, %v6184_v22, %v2033_v37  ;;  %v4534_v51 = vshll.u32 %v4447_v20, 16  ;;  %v2054_v17 = vrot.slane %v7888_v49, 5  ;;  %v2043_v22 = vrot.slane %v7889_v27, 5 }
 0x103   : > { %v4497_v61 = vor.u32 %v4496_v1, %v4493_v31  ;;  %v7890_v31 = vld [vmem:[#allocation2 + $0x74] sm:$0x1]  ;;  %v2042_v37 = vrot.slane %v2040_v9, 4  ;;  %v4512_v20 = vrot.slane %v4510_v36, 5  ;;  %v2061_v59 = vrot.slane %v7891_v45, 5 }
 0x104   : > { %v2050_v1 = vrot.slane %v7890_v31, 5  ;;  %v6187_v27 = vrot.slane %v1941_v21, 9  ;;  %v4532_v31 = vrot.slane %v4531_v13, 4  ;;  %v2056_v36 = vrot.slane %v2054_v17, 4  ;;  %v4449_v21 = vld [vmem:[#allocation2 + $0x34] sm:$0xf] }
 0x105   : > { %7104 = vmatmul.mubr.bf16.gmra.mrb[20].mxu1 %v6164_v25  ;;  %7362 = vmatpush3.bf16.msra.mxu0 %v7807_v3  ;;  %v4507_v3 = vor.u32 %v4506_v14, %v8905_v8  ;;  %v2049_v14 = vrot.slane %v2047_v2, 4  ;;  %v4498_v49 = vrot.slane %v4497_v61, 4  ;;  %v4536_v25 = vrot.slane %v4534_v51, 5  ;;  %v7810_v51 = vld [vmem:[#allocation2 + $0x78] sm:$0xff]  }
 0x106   : > { %7107 = vmatprep.mubr.bf16.mxu1 %v6165_v23  ;;  %7363 = vmatprep.subr.bf16.mxu0 %v7811_v12  ;;  %v6186_v23 = vrot.slane %v1940_v19, 9  ;;  %v1942_v19 = vld [vmem:[#allocation2 + $0x84] sm:$0xe]  ;;  %v2057_v45 = vrot.slane %v7892_v6, 5  ;;  %v4539_v61 = vshrl.u32 %v4448_v47, 16 }
 0x107   : > { %v4508_v7 = vrot.slane %v4507_v3, 4  ;;  %v4542_v3 = vshll.u32 %v4448_v47, 16  ;;  %v7893_v6 = vld [vmem:[#allocation2 + $0x8c] sm:$0x1]  ;;  %v4552_v47 = vshrl.u32 %v4449_v21, 16 }
 0x108   : > { %7332 = vmatmul.mubr.bf16.gmra.mrb[8].mxu0 %v7802_v48  ;;  %v9778_v48 = vcombine.low %v8616_v53, %v8618_v30  ;;  %v8942_v53 = vsel %vm8436_vm7, %v2035_v18, %v2036_v44  ;;  %v8946_v30 = vsel %vm8436_vm7, %v6185_v11, %v2040_v9  ;;  %v2064_v13 = vrot.slane %v7893_v6, 5  ;;  %v7823_v44 = vld [vmem:[%s9758_s1 + $0x1f8] sm:$0xff]  }
 0x109   : > { %7335 = vmatprep.mubr.bf16.mxu0 %v7806_v5  ;;  %7364 = vmatpush3.bf16.msra.mxu0 %v7811_v12  ;;  %v9779_v5 = vcombine.low %v8659_v16, %v8661_v32  ;;  %v4522_v12 = vrot.slane %v4521_v29, 4  ;;  %v8950_v16 = vsel %vm8436_vm7, %v6186_v23, %v2047_v2  ;;  %v6188_v32 = vrot.slane %v1942_v19, 9  ;;  %v4451_v18 = vld [vmem:[#allocation2 + $0x3c] sm:$0xf]  ;;  %v4450_v19 = vld [vmem:[#allocation2 + $0x38] sm:$0x1] }
 0x10a   : > { %7365 = vmatprep.subr.bf16.mxu0 %v7815_v0  ;;  %v2063_v29 = vrot.slane %v2061_v59, 4  ;;  %v8957_v9 = vsel %vm8436_vm7, %v2042_v37, %v2043_v22  ;;  %v4503_v23 = vsel %vm8044_vm3, %v4498_v49, %v8905_v8  ;;  %v4513_v2 = vsel %vm8044_vm3, %v4508_v7, %v4512_v20 }
 0x10b   : > { %v4527_v11 = vsel %vm8044_vm3, %v4522_v12, %v8910_v56  ;;  %v4537_v22 = vsel %vm8044_vm3, %v4532_v31, %v4536_v25  ;;  %v8975_v37 = vsel %vm8436_vm7, %v6187_v27, %v2054_v17  ;;  %v4541_v8 = vrot.slane %v4539_v61, 4  ;;  %v4454_v12 = vld [vmem:[#allocation2 + $0x48] sm:$0xf] }
 0x10c   : > { %v4548_v20 = vshll.u32 %v4449_v21, 16  ;;  %v8985_v25 = vsel %vm8436_vm7, %v6188_v32, %v2061_v59  ;;  %v8989_v17 = vsel %vm8436_vm7, %v2063_v29, %v2064_v13  ;;  %v4563_v49 = vshrl.u32 %v4451_v18, 16  ;;  %v9003_v59 = vld [vmem:[%s9758_s1 + $0x200] sm:$0xff]   ;;  %v7814_v32 = vld [vmem:[#allocation2 + $0x90] sm:$0xff]  }
 0x10d   : > { %7108 = vmatmul.mubr.bf16.gmra.mrb[24].mxu1 %v9778_v48  ;;  %7366 = vmatpush3.bf16.msra.mxu0 %v7815_v0  ;;  %v8961_v0 = vsel %vm8436_vm7, %v2049_v14, %v2050_v1  ;;  %v8979_v1 = vsel %vm8436_vm7, %v2056_v36, %v2057_v45  ;;  %v4544_v14 = vrot.slane %v4542_v3, 5  ;;  %v4452_v48 = vld [vmem:[#allocation2 + $0x40] sm:$0xf]  ;;  %v8998_v27 = vcombine.low %v4503_v23, %v4513_v2  ;;  %v4453_v36 = vld [vmem:[#allocation2 + $0x44] sm:$0x1] }
 0x10e   : > { %7111 = vmatprep.mubr.bf16.mxu1 %v9779_v5  ;;  %7367 = vmatprep.subr.bf16.mxu0 %v7819_v26  ;;  %v4566_v5 = vshll.u32 %v4451_v18, 16  ;;  %v4572_v45 = vshll.u32 %v4452_v48, 16  ;;  %v4576_v61 = vshrl.u32 %v4452_v48, 16  ;;  %v9012_v3 = vld [vmem:[#allocation2 + $0x4c] sm:$0xf]  ;;  %v9016_v13 = vrot.slane %v4548_v20, 5 }
 0x10f   : > { %v4545_v6 = vor.u32 %v4544_v14, %v4541_v8  ;;  %v4558_v21 = vshll.u32 %v4450_v19, 16  ;;  %v4565_v23 = vrot.slane %v4563_v49, 4  ;;  %v4587_v2 = vshrl.u32 %v4454_v12, 16  ;;  %v1943_v20 = vld [vmem:[#allocation2 + $0x90] sm:$0xe]  ;;  %v7813_v49 = vld [vmem:[%s9758_s1 + $0xc8] sm:$0xff]  }
 0x110   : > { %7336 = vmatmul.mubr.bf16.gmra.mrb[12].mxu0 %v7808_v63  ;;  %v9780_v63 = vcombine.low %v8673_v4, %v8675_v33  ;;  %v9781_v4 = vcombine.low %v8820_v58, %v8824_v38  ;;  %v9008_v33 = vcombine.low %v4527_v11, %v4537_v22  ;;  %v4554_v58 = vrot.slane %v4552_v47, 4  ;;  %v4457_v38 = vld [vmem:[#allocation2 + $0x54] sm:$0xf]  ;;  %v9018_v11 = vld [vmem:[#allocation2 + $0x58] sm:$0xf] }
 0x111   : > { %7339 = vmatprep.mubr.bf16.mxu0 %v7810_v51  ;;  %7368 = vmatpush3.bf16.msra.mxu0 %v7819_v26  ;;  %v7812_v51 = vld [vmem:[#allocation2 + $0x84] sm:$0xff]   ;;  %v4590_v18 = vshll.u32 %v4454_v12, 16  ;;  %v4568_v22 = vrot.slane %v4566_v5, 5  ;;  %v4582_v48 = vshll.u32 %v4453_v36, 16  ;;  %v9023_v8 = vrot.slane %v4572_v45, 5 }
 0x112   : > { %7369 = vmatprep.subr.bf16.mxu0 %v7823_v44  ;;  %v4578_v14 = vrot.slane %v4576_v61, 4  ;;  %v4611_v47 = vshrl.u32 %v4457_v38, 16  ;;  %v9028_v19 = vrot.slane %v4545_v6, 4  ;;  %v4555_v5 = vor.u32 %v4554_v58, %v9016_v13  ;;  %v7894_v61 = vld [vmem:[#allocation2 + $0x94] sm:$0xf] }
 0x113   : > { %v4620_v12 = vshll.u32 %v9018_v11, 16  ;;  %v4624_v36 = vshrl.u32 %v9018_v11, 16  ;;  %v9033_v45 = vrot.slane %v4558_v21, 5  ;;  %v2068_v29 = vrot.slane %v7894_v61, 5  ;;  %v7817_v21 = vld [vmem:[%s9758_s1 + $0xd0] sm:$0xff]   ;;  %v7818_v61 = vld [vmem:[#allocation2 + $0xa8] sm:$0xff]  }
 0x114   : > { %v4589_v31 = vrot.slane %v4587_v2, 4  ;;  %v9038_v7 = vrot.slane %v4582_v48, 5  ;;  %v6189_v6 = vrot.slane %v1943_v20, 9  ;;  %v4569_v2 = vor.u32 %v4568_v22, %v4565_v23  ;;  %v7895_v22 = vld [vmem:[#allocation2 + $0x98] sm:$0x1] }
 0x115   : > { %7112 = vmatmul.mubr.bf16.gmra.mrb[28].mxu1 %v9780_v63  ;;  %7370 = vmatpush3.bf16.msra.mxu0 %v7823_v44  ;;  %v4596_v63 = vshll.u32 %v9012_v3, 16  ;;  %v4614_v44 = vshll.u32 %v4457_v38, 16  ;;  %v4592_v38 = vrot.slane %v4590_v18, 5  ;;  %v4613_v18 = vrot.slane %v4611_v47, 4 }
 0x116   : > { %7131 = vmatprep.mubr.bf16.mxu1 %v9781_v4  ;;  %7403 = vmatprep.subr.bf16.mxu0 %v9003_v59  ;;  %v4600_v4 = vshrl.u32 %v9012_v3, 16  ;;  %v4626_v20 = vrot.slane %v4624_v36, 4  ;;  %v2070_v23 = vrot.slane %v2068_v29, 4  ;;  %v9062_v56 = vsel %vm8436_vm7, %v6189_v6, %v2068_v29  ;;  %v7821_v29 = vld [vmem:[%s9758_s1 + $0xd8] sm:$0xff]   ;;  %v7898_v6 = vld [vmem:[#allocation2 + $0xa4] sm:$0x1] }
 0x117   : > { %v9040_v26 = vrot.slane %v4596_v63, 5  ;;  %v4616_v48 = vrot.slane %v4614_v44, 5  ;;  %v7816_v63 = vld [vmem:[#allocation2 + $0x9c] sm:$0xff]   ;;  %v4593_v47 = vor.u32 %v4592_v38, %v4589_v31  ;;  %v9066_v15 = vrot.slane %v4569_v2, 4 }
 0x118   : > { %7340 = vmatmul.mubr.bf16.gmra.mrb[16].mxu0 %v7812_v51  ;;  %v9782_v51 = vcombine.low %v8828_v34, %v8832_v10  ;;  %v4602_v58 = vrot.slane %v4600_v4, 4  ;;  %v4579_v34 = vor.u32 %v4578_v14, %v9023_v8  ;;  %v9050_v10 = vld [vmem:[#allocation2 + $0x50] sm:$0x1]  ;;  %v9056_v4 = vrot.slane %v4620_v12, 5  ;;  %v9058_v44 = vld [vmem:[#allocation2 + $0x5c] sm:$0x1] }
 0x119   : > { %7343 = vmatprep.mubr.bf16.mxu0 %v7814_v32  ;;  %v9783_v32 = vcombine.low %v8838_v52, %v8842_v50  ;;  %v4556_v52 = vrot.slane %v4555_v5, 4  ;;  %v1944_v50 = vld [vmem:[#allocation2 + $0x9c] sm:$0xe]  ;;  %v2071_v14 = vrot.slane %v7895_v22, 5  ;;  %v1945_v5 = vld [vmem:[#allocation2 + $0xa8] sm:$0xe]  ;;  %v4617_v31 = vor.u32 %v4616_v48, %v4613_v18 }
 0x11a   : > { %v7897_v12 = vld [vmem:[#allocation2 + $0xac] sm:$0xf]  ;;  %v9068_v22 = vrot.slane %v4579_v34, 4  ;;  %v4630_v2 = vshll.u32 %v9058_v44, 16  ;;  %v4594_v48 = vrot.slane %v4593_v47, 4 }
 0x11b   : > { %v2082_v36 = vrot.slane %v7897_v12, 5  ;;  %v4561_v38 = vsel %vm8044_vm3, %v4556_v52, %v9033_v45  ;;  %v9080_v34 = vsel %vm8436_vm7, %v2070_v23, %v2071_v14  ;;  %v4575_v23 = vsel %vm8044_vm3, %v9066_v15, %v9023_v8  ;;  %v4460_v8 = vld [vmem:[#allocation2 + $0x60] sm:$0xf] }
 0x11c   : > { %v4618_v14 = vrot.slane %v4617_v31, 4  ;;  %v4632_v15 = vrot.slane %v4630_v2, 5  ;;  %v7901_v2 = vld [vmem:[#allocation2 + $0xbc] sm:$0x1] }
 0x11d   : > { %7132 = vmatmul.mubr.bf16.vlgmr.msra.gmra.mrb[0].mxu1 %v9782_v51  ;;  %v7896_v51 = vld [vmem:[#allocation2 + $0xa0] sm:$0xf]  ;;  %v2084_v52 = vrot.slane %v2082_v36, 4 }
 0x11e   : > { %7164 = vmatpush3.bf16.msra.mxu1 %v8800_v43  ;;  %7135 = vmatprep.mubr.bf16.mxu1 %v9783_v32  ;;  %v4551_v43 = vsel %vm8044_vm3, %v9028_v19, %v9016_v13  ;;  %v2075_v32 = vrot.slane %v7896_v51, 5  ;;  %v4603_v13 = vor.u32 %v4602_v58, %v9040_v26  ;;  %v4606_v19 = vshll.u32 %v9050_v10, 16 }
 0x11f   : > { %7165 = vmatprep.subr.bf16.mxu1 %v7813_v49  ;;  %v6190_v51 = vrot.slane %v1944_v50, 9  ;;  %v2078_v58 = vrot.slane %v7898_v6, 5  ;;  %v9784_v50 = vcombine.low %v8865_v54, %v8876_v60  ;;  %v7899_v6 = vld [vmem:[#allocation2 + $0xb0] sm:$0x1]  ;;  %v1946_v54 = vld [vmem:[#allocation2 + $0xb4] sm:$0xe] }
 0x120   : > { %7344 = vmatmul.mubr.bf16.gmra.mrb[20].mxu0 %v7816_v63  ;;  %v2077_v18 = vrot.slane %v2075_v32, 4  ;;  %v6191_v63 = vrot.slane %v1945_v5, 9  ;;  %v4604_v12 = vrot.slane %v4603_v13, 4  ;;  %v4608_v45 = vrot.slane %v4606_v19, 5  ;;  %v7900_v60 = vld [vmem:[#allocation2 + $0xb8] sm:$0xf] }
 0x121   : > { %7347 = vmatprep.mubr.bf16.mxu0 %v7818_v61  ;;  %v2085_v40 = vrot.slane %v7899_v6, 5  ;;  %v9088_v61 = vcombine.low %v4551_v43, %v4561_v38  ;;  %v2089_v47 = vrot.slane %v7900_v60, 5  ;;  %v7820_v13 = vld [vmem:[#allocation2 + $0xb4] sm:$0xff]   ;;  %v7825_v19 = vld [vmem:[%s9758_s1 + $0xe0] sm:$0xff]   ;;  %v9105_v5 = vsel %vm8436_vm7, %v6190_v51, %v2075_v32  ;;  %v9131_v6 = vld [vmem:[#allocation2 + $0x70] sm:$0xf] }
 0x122   : > { %7166 = vmatpush3.bf16.msra.mxu1 %v7813_v49  ;;  %v4627_v49 = vor.u32 %v4626_v20, %v9056_v4  ;;  %v9785_v20 = vcombine.low %v8872_v24, %v8880_v39  ;;  %v4585_v24 = vsel %vm8044_vm3, %v9068_v22, %v9038_v7  ;;  %v7822_v43 = vld [vmem:[#allocation2 + $0xc0] sm:$0xff]   ;;  %9786 = vst [vmem:[#allocation6_spill] sm:$0xff] %v9105_v5  ;;  %9790 = vst [vmem:[#allocation10_spill] sm:$0xff] %v9131_v6  ;;  %v4466_v60 = vld [vmem:[#allocation2 + $0x78] sm:$0xf] }
 0x123   : > { %7167 = vmatprep.subr.bf16.mxu1 %v7817_v21  ;;  %v9109_v31 = vsel %vm8436_vm7, %v2077_v18, %v2078_v58  ;;  %v4599_v38 = vsel %vm8044_vm3, %v4594_v48, %v9040_v26  ;;  %v9116_v7 = vsel %vm8436_vm7, %v6191_v63, %v2082_v36  ;;  %v9118_v22 = vld [vmem:[#allocation2 + $0x64] sm:$0xf]  ;;  %v4609_v32 = vsel %vm8044_vm3, %v4604_v12, %v4608_v45  ;;  %v9203_v5 = vld [vmem:[#allocation2 + $0x80] sm:$0x1] }
 0x124   : > { %9787 = vst [vmem:[#allocation7_spill] sm:$0xff] %v9109_v31  ;;  %9788 = vst [vmem:[#allocation8_spill] sm:$0xff] %v9116_v7  ;;  %v9126_v51 = vsel %vm8436_vm7, %v2084_v52, %v2085_v40  ;;  %v6192_v58 = vrot.slane %v1946_v54, 9  ;;  %v2092_v18 = vrot.slane %v7901_v2, 5  ;;  %v4623_v26 = vsel %vm8044_vm3, %v4618_v14, %v9056_v4  ;;  %v7827_v40 = vld [vmem:[%s9758_s1 + $0xe8] sm:$0xff]  }
 0x125   : > { %7136 = vmatmul.mubr.bf16.gmra.mrb[4].mxu1 %v9784_v50  ;;  %9789 = vst [vmem:[#allocation9_spill] sm:$0xff] %v9126_v51  ;;  %v4463_v50 = vld [vmem:[#allocation2 + $0x6c] sm:$0xf]  ;;  %v2091_v36 = vrot.slane %v2089_v47, 4  ;;  %v4635_v48 = vshrl.u32 %v4460_v8, 16  ;;  %v4638_v63 = vshll.u32 %v4460_v8, 16  ;;  %v9141_v52 = vcombine.low %v4575_v23, %v4585_v24 }
 0x126   : > { %7139 = vmatprep.mubr.bf16.mxu1 %v9785_v20  ;;  %7168 = vmatpush3.bf16.msra.mxu1 %v7817_v21  ;;  %v4628_v21 = vrot.slane %v4627_v49, 4  ;;  %v9120_v49 = vld [vmem:[#allocation2 + $0x68] sm:$0x1]  ;;  %v4648_v45 = vshrl.u32 %v9118_v22, 16  ;;  %v9145_v14 = vcombine.low %v4599_v38, %v4609_v32  ;;  %v4662_v8 = vshll.u32 %v4463_v50, 16  ;;  %v7829_v32 = vld [vmem:[%s9758_s1 + $0xf0] sm:$0xff]  }
 0x127   : > { %7169 = vmatprep.subr.bf16.mxu1 %v7821_v29  ;;  %v4654_v4 = vshll.u32 %v9120_v49, 16  ;;  %v4672_v23 = vshrl.u32 %v9131_v6, 16  ;;  %v9154_v24 = vld [vmem:[#allocation2 + $0x7c] sm:$0xf]  ;;  %v9793_v38 = vcombine.low %v8888_v55, %v8899_v46  ;;  %v9170_v2 = vsel %vm8436_vm7, %v2091_v36, %v2092_v18  ;;  %v9172_v54 = vld [vmem:[#allocation2 + $0x88] sm:$0xf] }
 0x128   : > { %7348 = vmatmul.mubr.bf16.gmra.mrb[24].mxu0 %v7820_v13  ;;  %v4633_v12 = vsel %vm8044_vm3, %v4628_v21, %v4632_v15  ;;  %v9791_v13 = vcombine.low %v8884_v28, %v8895_v57  ;;  %v7824_v21 = vld [vmem:[#allocation2 + $0xcc] sm:$0xff]   ;;  %v4659_v15 = vshrl.u32 %v4463_v50, 16  ;;  %9792 = vst [vmem:[#allocation11_spill] sm:$0xff] %v9154_v24  ;;  %v9166_v57 = vsel %vm8436_vm7, %v6192_v58, %v2089_v47  ;;  %v9180_v18 = vld [vmem:[#allocation2 + $0x94] sm:$0xf] }
 0x129   : > { %7351 = vmatprep.mubr.bf16.mxu0 %v7822_v43  ;;  %v4668_v43 = vshll.u32 %v9131_v6, 16  ;;  %v9162_v28 = vcombine.low %v4623_v26, %v4633_v12  ;;  %v4637_v50 = vrot.slane %v4635_v48, 4  ;;  %9794 = vst [vmem:[#allocation12_spill] sm:$0xff] %v9172_v54  ;;  %v4640_v55 = vrot.slane %v4638_v63, 5  ;;  %v4472_v26 = vld [vmem:[#allocation2 + $0x90] sm:$0xf] }
 0x12a   : > { %7170 = vmatpush3.bf16.msra.mxu1 %v7821_v29  ;;  %v4644_v29 = vshll.u32 %v9118_v22, 16  ;;  %v4683_v12 = vshrl.u32 %v4466_v60, 16  ;;  %v4686_v20 = vshll.u32 %v4466_v60, 16  ;;  %v4692_v47 = vshll.u32 %v9154_v24, 16  ;;  %v9186_v63 = vld [vmem:[#allocation2 + $0x74] sm:$0x1] }
 0x12b   : > { %7171 = vmatprep.subr.bf16.mxu1 %v7825_v19  ;;  %v4696_v58 = vshrl.u32 %v9154_v24, 16  ;;  %v4661_v36 = vrot.slane %v4659_v15, 4  ;;  %v4664_v48 = vrot.slane %v4662_v8, 5  ;;  %v9182_v39 = vrot.slane %v4668_v43, 5  ;;  %v7831_v15 = vld [vmem:[%s9758_s1 + $0xf8] sm:$0xff]  }
 0x12c   : > { %v9174_v46 = vrot.slane %v4644_v29, 5  ;;  %v9184_v41 = vrot.slane %v4672_v23, 4  ;;  %v4720_v60 = vshrl.u32 %v9172_v54, 16  ;;  %v4731_v8 = vshrl.u32 %v4472_v26, 16 }
 0x12d   : > { %7140 = vmatmul.mubr.bf16.gmra.mrb[8].mxu1 %v9791_v13  ;;  %v4469_v13 = vld [vmem:[#allocation2 + $0x84] sm:$0xf]  ;;  %v4734_v43 = vshll.u32 %v4472_v26, 16  ;;  %v4740_v23 = vshll.u32 %v9180_v18, 16  ;;  %v4685_v24 = vrot.slane %v4683_v12, 4  ;;  %v9196_v6 = vrot.slane %v4692_v47, 5 }
 0x12e   : > { %7143 = vmatprep.mubr.bf16.mxu1 %v9793_v38  ;;  %7172 = vmatpush3.bf16.msra.mxu1 %v7825_v19  ;;  %v4650_v19 = vrot.slane %v4648_v45, 4  ;;  %v9176_v38 = vrot.slane %v4654_v4, 5  ;;  %v4707_v29 = vshrl.u32 %v4469_v13, 16  ;;  %v4710_v45 = vshll.u32 %v4469_v13, 16 }
 0x12f   : > { %7173 = vmatprep.subr.bf16.mxu1 %v7827_v40  ;;  %v4716_v4 = vshll.u32 %v9172_v54, 16  ;;  %v4688_v13 = vrot.slane %v4686_v20, 5  ;;  %v4698_v51 = vrot.slane %v4696_v58, 4  ;;  %v4641_v54 = vor.u32 %v4640_v55, %v4637_v50  ;;  %v9208_v20 = vld [vmem:[#allocation2 + $0x8c] sm:$0x1] }
 0x130   : > { %7352 = vmatmul.mubr.bf16.gmra.mrb[28].mxu0 %v7824_v21  ;;  %v9795_v21 = vcombine.low %v8927_v42, %v8942_v53  ;;  %v4651_v7 = vor.u32 %v4650_v19, %v9174_v46  ;;  %v4665_v31 = vor.u32 %v4664_v48, %v4661_v36  ;;  %v4678_v26 = vshll.u32 %v9186_v63, 16  ;;  %v4475_v36 = vld [vmem:[#allocation2 + $0x9c] sm:$0xf] }
 0x131   : > { %7371 = vmatprep.mubr.bf16.mxu0 %v8998_v27  ;;  %v9796_v27 = vcombine.low %v8946_v30, %v8957_v9  ;;  %v4709_v12 = vrot.slane %v4707_v29, 4  ;;  %v4712_v47 = vrot.slane %v4710_v45, 5  ;;  %v9210_v58 = vrot.slane %v4716_v4, 5  ;;  %v9218_v29 = vld [vmem:[#allocation2 + $0x98] sm:$0x1]  ;;  %v7828_v45 = vld [vmem:[%s9758_s1 + $0x208] sm:$0xff]  }
 0x132   : > { %7174 = vmatpush3.bf16.msra.mxu1 %v7827_v40  ;;  %v4744_v40 = vshrl.u32 %v9180_v18, 16  ;;  %v4722_v42 = vrot.slane %v4720_v60, 4  ;;  %v4733_v53 = vrot.slane %v4731_v8, 4  ;;  %v4736_v50 = vrot.slane %v4734_v43, 5 }
 0x133   : > { %7175 = vmatprep.subr.bf16.mxu1 %v7829_v32  ;;  %v9212_v55 = vrot.slane %v4740_v23, 5  ;;  %v4675_v48 = vor.u32 %v9184_v41, %v9182_v39  ;;  %v4689_v30 = vor.u32 %v4688_v13, %v4685_v24  ;;  %v4699_v9 = vor.u32 %v4698_v51, %v9196_v6  ;;  %v9232_v24 = vld [vmem:[#allocation2 + $0xa0] sm:$0xf] }
 0x134   : > { %v4746_v19 = vrot.slane %v4744_v40, 4  ;;  %v9223_v4 = vrot.slane %v4641_v54, 4  ;;  %v9225_v60 = vrot.slane %v4651_v7, 4  ;;  %v9227_v8 = vrot.slane %v4665_v31, 4  ;;  %v9238_v54 = vld [vmem:[%s9758_s1 + $0x100] sm:$0xff]  }
 0x135   : > { %7144 = vmatmul.mubr.bf16.gmra.mrb[12].mxu1 %v9795_v21  ;;  %v9229_v43 = vrot.slane %v4678_v26, 5  ;;  %v4713_v41 = vor.u32 %v4712_v47, %v4709_v12  ;;  %v4726_v51 = vshll.u32 %v9208_v20, 16  ;;  %v4755_v23 = vshrl.u32 %v4475_v36, 16  ;;  %v7830_v47 = vld [vmem:[%s9758_s1 + $0x210] sm:$0xff]  }
 0x136   : > { %7147 = vmatprep.mubr.bf16.mxu1 %v9796_v27  ;;  %7176 = vmatpush3.bf16.msra.mxu1 %v7829_v32  ;;  %v4702_v32 = vshll.u32 %v9203_v5, 16  ;;  %v4758_v40 = vshll.u32 %v4475_v36, 16  ;;  %v4723_v31 = vor.u32 %v4722_v42, %v9210_v58  ;;  %v4737_v7 = vor.u32 %v4736_v50, %v4733_v53 }
 0x137   : > { %7177 = vmatprep.subr.bf16.mxu1 %v7831_v15  ;;  %v4750_v13 = vshll.u32 %v9218_v29, 16  ;;  %v4676_v21 = vrot.slane %v4675_v48, 4  ;;  %v4700_v26 = vrot.slane %v4699_v9, 4  ;;  %v9797_v12 = vcombine.low %v8950_v16, %v8961_v0  ;;  %v4478_v48 = vld [vmem:[#allocation2 + $0xa8] sm:$0xf] }
 0x138   : > { %7372 = vmatmul.mubr.bf16.vlgmr.msra.gmra.mrb[0].mxu0 %v9008_v33  ;;  %v4690_v33 = vrot.slane %v4689_v30, 4  ;;  %v4704_v27 = vrot.slane %v4702_v32, 5  ;;  %v4764_v42 = vshll.u32 %v9232_v24, 16  ;;  %v4768_v16 = vshrl.u32 %v9232_v24, 16 }
 0x139   : > { %7404 = vmatpush3.bf16.msra.mxu0 %v9003_v59  ;;  %7375 = vmatprep.mubr.bf16.mxu0 %v9088_v61  ;;  %v4647_v59 = vsel %vm8044_vm3, %v9223_v4, %v9174_v46  ;;  %v4657_v61 = vsel %vm8044_vm3, %v9225_v60, %v9176_v38  ;;  %v9798_v0 = vcombine.low %v8975_v37, %v8979_v1  ;;  %v4714_v53 = vrot.slane %v4713_v41, 4  ;;  %v9265_v4 = vld [vmem:[#allocation2 + $0xa4] sm:$0x1]  ;;  %v9279_v41 = vld [vmem:[#allocation2 + $0xac] sm:$0xf] }
 0x13a   : > { %7178 = vmatpush3.bf16.msra.mxu1 %v7831_v15  ;;  %v4747_v15 = vor.u32 %v4746_v19, %v9212_v55  ;;  %7405 = vmatprep.subr.bf16.mxu0 %v7828_v45  ;;  %v4728_v50 = vrot.slane %v4726_v51, 5  ;;  %v4757_v19 = vrot.slane %v4755_v23, 4  ;;  %v4760_v36 = vrot.slane %v4758_v40, 5 }
 0x13b   : > { %7451 = vmatprep.subr.bf16.mxu1 %v9238_v54  ;;  %v4724_v30 = vrot.slane %v4723_v31, 4  ;;  %v4738_v46 = vrot.slane %v4737_v7, 4  ;;  %v4752_v32 = vrot.slane %v4750_v13, 5  ;;  %v4671_v38 = vsel %vm8044_vm3, %v9227_v8, %v9182_v39 }
 0x13c   : > { %v4748_v9 = vrot.slane %v4747_v15, 4  ;;  %v4681_v37 = vsel %vm8044_vm3, %v4676_v21, %v9229_v43  ;;  %v4695_v1 = vsel %vm8044_vm3, %v4690_v33, %v9196_v6  ;;  %v4705_v60 = vsel %vm8044_vm3, %v4700_v26, %v4704_v27  ;;  %v4481_v27 = vld [vmem:[#allocation2 + $0xb4] sm:$0xf] }
 0x13d   : > { %7148 = vmatmul.mubr.bf16.gmra.mrb[16].mxu1 %v9797_v12  ;;  %7406 = vmatpush3.bf16.msra.mxu0 %v7828_v45  ;;  %v7832_v45 = vld [vmem:[%s9758_s1 + $0x218] sm:$0xff]   ;;  %v9284_v51 = vrot.slane %v4764_v42, 5  ;;  %v4770_v39 = vrot.slane %v4768_v16, 4  ;;  %v4779_v8 = vshrl.u32 %v4478_v48, 16  ;;  %v4782_v23 = vshll.u32 %v4478_v48, 16  ;;  %v7835_v42 = vld [vmem:[%s9758_s1 + $0x220] sm:$0xff]  }
 0x13e   : > { %7151 = vmatprep.mubr.bf16.mxu1 %v9798_v0  ;;  %7407 = vmatprep.subr.bf16.mxu0 %v7830_v47  ;;  %v6224_v43 = vcombine.low %v9166_v57, %v9170_v2  ;;  %v4719_v6 = vsel %vm8044_vm3, %v4714_v53, %v9210_v58  ;;  %v4761_v40 = vor.u32 %v4760_v36, %v4757_v19  ;;  %v4774_v31 = vshll.u32 %v9265_v4, 16  ;;  %v5200_v12 = vld [vmem:[#allocation2 + $0x48] sm:$0xe]  ;;  %v5201_v16 = vld [vmem:[#allocation2 + $0x54] sm:$0xe] }
 0x13f   : > { %v4729_v7 = vsel %vm8044_vm3, %v4724_v30, %v4728_v50  ;;  %v4743_v15 = vsel %vm8044_vm3, %v4738_v46, %v9212_v55  ;;  %v4753_v13 = vsel %vm8044_vm3, %v4748_v9, %v4752_v32  ;;  %v4788_v21 = vshll.u32 %v9279_v41, 16  ;;  %v5202_v46 = vld [vmem:[#allocation2 + $0x60] sm:$0xe]  ;;  %v9334_v9 = vld [vmem:[#allocation2 + $0xb8] sm:$0xf] }
 0x140   : > { %7376 = vmatmul.mubr.bf16.gmra.mrb[4].mxu0 %v9141_v52  ;;  %v6431_v58 = vcombine.low %v4647_v59, %v4657_v61  ;;  %v9302_v33 = vcombine.low %v4671_v38, %v4681_v37  ;;  %v9304_v26 = vcombine.low %v4695_v1, %v4705_v60  ;;  %v9306_v52 = vld [vmem:[#allocation2 + $0xb0] sm:$0x1]  ;;  %v9799_v55 = vcombine.low %v8985_v25, %v8989_v17  ;;  %v7838_v37 = vld [vmem:[%s9758_s1 + $0x228] sm:$0xff]  }
 0x141   : > { %7379 = vmatprep.mubr.bf16.mxu0 %v9145_v14  ;;  %7408 = vmatpush3.bf16.msra.mxu0 %v7830_v47  ;;  %v4771_v14 = vor.u32 %v4770_v39, %v9284_v51  ;;  %v9315_v47 = vrot.slane %v4779_v8, 4  ;;  %v9317_v59 = vrot.slane %v4782_v23, 5  ;;  %v4792_v61 = vshrl.u32 %v9279_v41, 16  ;;  %v5203_v8 = vld [vmem:[#allocation2 + $0x6c] sm:$0xe] }
 0x142   : > { %7409 = vmatprep.subr.bf16.mxu0 %v7832_v45  ;;  %v9800_v0 = vcombine.low %v9062_v56, %v9080_v34  ;;  %v9323_v25 = vcombine.low %v4719_v6, %v4729_v7  ;;  %v9325_v17 = vcombine.low %v4743_v15, %v4753_v13  ;;  %v9327_v53 = vrot.slane %v4761_v40, 4 }
 0x143   : > { %v9329_v50 = vrot.slane %v4774_v31, 5  ;;  %v9331_v19 = vrot.slane %v4788_v21, 5  ;;  %v4798_v36 = vshll.u32 %v9306_v52, 16  ;;  %v4803_v48 = vshrl.u32 %v4481_v27, 16  ;;  %v9801_v21 = vld [vmem:[#allocation6_spill] sm:$0xff] }
 0x144   : > { %v6453_v30 = vrot.slane %v5200_v12, 9  ;;  %v4806_v56 = vshll.u32 %v4481_v27, 16  ;;  %v5290_v34 = vrot.slane %v9012_v3, 5  ;;  %v5293_v32 = vrot.slane %v9050_v10, 5  ;;  %v9802_v27 = vld [vmem:[#allocation7_spill] sm:$0xff] }
 0x145   : > { %7152 = vmatmul.mubr.bf16.gmra.mrb[20].mxu1 %v9799_v55  ;;  %7410 = vmatpush3.bf16.msra.mxu0 %v7832_v45  ;;  %v6454_v38 = vrot.slane %v5201_v16, 9  ;;  %v9341_v1 = vrot.slane %v4771_v14, 4  ;;  %v4785_v60 = vor.u32 %v9317_v59, %v9315_v47  ;;  %v9345_v39 = vrot.slane %v4792_v61, 4  ;;  %v9804_v14 = vld [vmem:[#allocation8_spill] sm:$0xff]  ;;  %v9805_v47 = vld [vmem:[#allocation9_spill] sm:$0xff] }
 0x146   : > { %7155 = vmatprep.mubr.bf16.mxu1 %v9800_v0  ;;  %7411 = vmatprep.subr.bf16.mxu0 %v7835_v42  ;;  %v5297_v45 = vrot.slane %v9018_v11, 5  ;;  %v9350_v3 = vsel %vm8436_vm7, %v6453_v30, %v5290_v34  ;;  %v5292_v10 = vrot.slane %v5290_v34, 4  ;;  %v5300_v23 = vrot.slane %v9058_v44, 5  ;;  %v9807_v0 = vld [vmem:[#allocation10_spill] sm:$0xff] }
 0x147   : > { %v6455_v6 = vrot.slane %v5202_v46, 9  ;;  %v4812_v40 = vshll.u32 %v9334_v9, 16  ;;  %v5304_v11 = vrot.slane %v9118_v22, 5  ;;  %v4816_v15 = vshrl.u32 %v9334_v9, 16  ;;  %v7841_v22 = vld [vmem:[%s9758_s1 + $0x230] sm:$0xff]  }
 0x148   : > { %7380 = vmatmul.mubr.bf16.gmra.mrb[8].mxu0 %v9162_v28  ;;  %v9357_v31 = vsel %vm8436_vm7, %v6454_v38, %v5297_v45  ;;  %v5299_v7 = vrot.slane %v5297_v45, 4  ;;  %v9363_v13 = vsel %vm8436_vm7, %v5292_v10, %v5293_v32  ;;  %v5307_v44 = vrot.slane %v9120_v49, 5 }
 0x149   : > { %7383 = vmatprep.mubr.bf16.mxu0 %v6431_v58  ;;  %7412 = vmatpush3.bf16.msra.mxu0 %v7835_v42  ;;  %v6456_v28 = vrot.slane %v5203_v8, 9  ;;  %v9803_v12 = vcombine.low %v9801_v21, %v9802_v27  ;;  %v6485_v58 = vcombine.low %v9350_v3, %v9363_v13  ;;  %v9380_v49 = vsel %vm8436_vm7, %v6455_v6, %v5304_v11  ;;  %v2830_v8 = vld [vmem:[#allocation2 + $0x78] sm:$0xf]  ;;  %v9407_v6 = vld [vmem:[#allocation2 + $0xc4] sm:$0xf]  ;;  %v7833_v27 = vld [vmem:[#allocation2 + $0xc] sm:$0xff]  }
 0x14a   : > { %7413 = vmatprep.subr.bf16.mxu0 %v7838_v37  ;;  %v9376_v55 = vsel %vm8436_vm7, %v5299_v7, %v5300_v23  ;;  %v5306_v42 = vrot.slane %v5304_v11, 4  ;;  %v9806_v59 = vcombine.low %v9804_v14, %v9805_v47  ;;  %v4767_v61 = vsel %vm8044_vm3, %v9327_v53, %v9284_v51  ;;  %v4484_v23 = vld [vmem:[#allocation2 + $0xc0] sm:$0xf]  ;;  %v5204_v21 = vld [vmem:[#allocation2 + $0x78] sm:$0xe] }
 0x14b   : > { %v6486_v16 = vcombine.low %v9357_v31, %v9376_v55  ;;  %v5311_v30 = vrot.slane %v9807_v0, 5  ;;  %v5314_v46 = vrot.slane %v9186_v63, 5  ;;  %v9393_v34 = vrot.slane %v4798_v36, 5  ;;  %v9809_v14 = vld [vmem:[#allocation4_spill] sm:$0xff]  ;;  %v9810_v63 = vld [vmem:[#allocation11_spill] sm:$0xff] }
 0x14c   : > { %v9395_v32 = vrot.slane %v4803_v48, 4  ;;  %v9397_v38 = vrot.slane %v4806_v56, 5  ;;  %v9401_v45 = vsel %vm8436_vm7, %v5306_v42, %v5307_v44  ;;  %v4777_v10 = vsel %vm8044_vm3, %v9341_v1, %v9329_v50  ;;  %v7844_v44 = vld [vmem:[%s9758_s1 + $0x238] sm:$0xff]   ;;  %v9808_v42 = vld [vmem:[#allocation5_spill] sm:$0xff]  ;;  %v7923_v31 = vld [vmem:[#allocation2 + $0xa0] sm:$0xf] }
 0x14d   : > { %7156 = vmatmul.mubr.bf16.gmra.mrb[24].mxu1 %v9803_v12  ;;  %7414 = vmatpush3.bf16.msra.mxu0 %v7838_v37  ;;  %v9413_v36 = vsel %vm8436_vm7, %v6456_v28, %v5311_v30  ;;  %v5313_v48 = vrot.slane %v5311_v30, 4  ;;  %v9415_v56 = vrot.slane %v4785_v60, 4  ;;  %v4795_v7 = vor.u32 %v9345_v39, %v9331_v19  ;;  %v9439_v30 = vld [vmem:[#allocation2 + $0xbc] sm:$0x1]  ;;  %v7903_v50 = vld [vmem:[%s9758_s1 + $0x108] sm:$0xff]   ;;  %v7851_v3 = vld [vmem:[#allocation2 + $0xb4] sm:$0xff]  }
 0x14e   : > { %7159 = vmatprep.mubr.bf16.mxu1 %v9806_v59  ;;  %7415 = vmatprep.subr.bf16.mxu0 %v7841_v22  ;;  %v9419_v11 = vrot.slane %v4812_v40, 5  ;;  %v9421_v37 = vrot.slane %v4816_v15, 4  ;;  %v3068_v60 = vshrl.u32 %v2830_v8, 16  ;;  %v3071_v12 = vshll.u32 %v2830_v8, 16  ;;  %v5205_v40 = vld [vmem:[#allocation2 + $0x84] sm:$0xe] }
 0x14f   : > { %v9428_v28 = vsel %vm8436_vm7, %v5313_v48, %v5314_v46  ;;  %v3090_v39 = vsel %vm8044_vm3, %v9809_v14, %v9808_v42  ;;  %v4827_v15 = vshrl.u32 %v4484_v23, 16  ;;  %v4830_v47 = vshll.u32 %v4484_v23, 16 }
 0x150   : > { %7384 = vmatmul.mubr.bf16.gmra.mrb[12].mxu0 %v9302_v33  ;;  %v4836_v59 = vshll.u32 %v9407_v6, 16  ;;  %v3070_v46 = vrot.slane %v3068_v60, 4  ;;  %v3073_v8 = vrot.slane %v3071_v12, 5  ;;  %v6457_v48 = vrot.slane %v5204_v21, 9  ;;  %v9811_v60 = vld [vmem:[#allocation12_spill] sm:$0xff] }
 0x151   : > { %7387 = vmatprep.mubr.bf16.mxu0 %v9304_v26  ;;  %7416 = vmatpush3.bf16.msra.mxu0 %v7841_v22  ;;  %v5318_v42 = vrot.slane %v9810_v63, 5  ;;  %v4796_v33 = vrot.slane %v4795_v7, 4  ;;  %v4840_v23 = vshrl.u32 %v9407_v6, 16  ;;  %v5321_v14 = vrot.slane %v9203_v5, 5 }
 0x152   : > { %7417 = vmatprep.subr.bf16.mxu0 %v7844_v44  ;;  %v6458_v0 = vrot.slane %v5205_v40, 9  ;;  %v3074_v26 = vor.u32 %v3073_v8, %v3070_v46  ;;  %v5325_v63 = vrot.slane %v9811_v60, 5  ;;  %v4809_v57 = vor.u32 %v9397_v38, %v9395_v32  ;;  %v7834_v8 = vld [vmem:[#allocation2 + $0x18] sm:$0xff]  }
 0x153   : > { %v9449_v22 = vsel %vm8436_vm7, %v6457_v48, %v5318_v42  ;;  %v5320_v21 = vrot.slane %v5318_v42, 4  ;;  %v4822_v2 = vshll.u32 %v9439_v30, 16  ;;  %v5328_v7 = vrot.slane %v9208_v20, 5  ;;  %v9462_v42 = vld [vmem:[#allocation2 + $0xd0] sm:$0xf] }
 0x154   : > { %v4832_v12 = vrot.slane %v4830_v47, 5  ;;  %v9456_v5 = vrot.slane %v4836_v59, 5  ;;  %v3075_v40 = vrot.slane %v3074_v26, 4  ;;  %v4842_v48 = vrot.slane %v4840_v23, 4  ;;  %v9479_v23 = vld [vmem:[#allocation2 + $0xc8] sm:$0x1] }
 0x155   : > { %7160 = vmatmul.mubr.bf16.gmra.mrb[28].mxu1 %v6224_v43  ;;  %v4829_v43 = vrot.slane %v4827_v15, 4  ;;  %7418 = vmatpush3.bf16.msra.mxu0 %v7844_v44  ;;  %v9460_v46 = vsel %vm8436_vm7, %v5320_v21, %v5321_v14  ;;  %v9468_v20 = vsel %vm8436_vm7, %v6458_v0, %v5325_v63  ;;  %v5327_v38 = vrot.slane %v5325_v63, 4  ;;  %v7836_v15 = vld [vmem:[#allocation2 + $0x24] sm:$0xff]   ;;  %v9812_v14 = vld [vmem:[#allocation3_spill] sm:$0xff] }
 0x156   : > { %7179 = vmatprep.mubr.bf16.mxu1 %v7833_v27  ;;  %v4487_v27 = vld [vmem:[#allocation2 + $0xcc] sm:$0xf]  ;;  %v6489_v32 = vcombine.low %v9449_v22, %v9460_v46  ;;  %v4791_v44 = vsel %vm8044_vm3, %v9415_v56, %v9331_v19  ;;  %v4801_v47 = vsel %vm8044_vm3, %v4796_v33, %v9393_v34  ;;  %v4819_v59 = vor.u32 %v9421_v37, %v9419_v11  ;;  %v5206_v34 = vld [vmem:[#allocation2 + $0x90] sm:$0xe] }
 0x157   : > { %v3080_v0 = vsel %vm8044_vm3, %v3075_v40, %v9812_v14  ;;  %v4851_v26 = vshrl.u32 %v4487_v27, 16  ;;  %v4854_v21 = vshll.u32 %v4487_v27, 16  ;;  %v9489_v19 = vsel %vm8436_vm7, %v5327_v38, %v5328_v7 }
 0x158   : > { %7388 = vmatmul.mubr.bf16.gmra.mrb[16].mxu0 %v9323_v25  ;;  %v9485_v60 = vcombine.low %v3080_v0, %v3090_v39  ;;  %v4833_v56 = vor.u32 %v4832_v12, %v4829_v43  ;;  %v4860_v37 = vshll.u32 %v9462_v42, 16  ;;  %v4864_v33 = vshrl.u32 %v9462_v42, 16 }
 0x159   : > { %7391 = vmatprep.mubr.bf16.mxu0 %v9325_v17  ;;  %v6490_v63 = vcombine.low %v9468_v20, %v9489_v19  ;;  %v6436_v25 = vcombine.low %v4767_v61, %v4777_v10  ;;  %v4843_v17 = vor.u32 %v4842_v48, %v9456_v5  ;;  %v4846_v39 = vshll.u32 %v9479_v23, 16  ;;  %v5207_v61 = vld [vmem:[#allocation2 + $0x9c] sm:$0xe]  ;;  %v7837_v48 = vld [vmem:[#allocation2 + $0x30] sm:$0xff]  }
 0x15a   : > { %v4810_v43 = vrot.slane %v4809_v57, 4  ;;  %v4820_v7 = vrot.slane %v4819_v59, 4  ;;  %v4824_v12 = vrot.slane %v4822_v2, 5  ;;  %v6459_v27 = vrot.slane %v5206_v34, 9 }
 0x15b   : > { %v6437_v1 = vcombine.low %v4791_v44, %v4801_v47  ;;  %v4853_v40 = vrot.slane %v4851_v26, 4  ;;  %v4856_v51 = vrot.slane %v4854_v21, 5  ;;  %v5332_v53 = vrot.slane %v9180_v18, 5  ;;  %v7839_v47 = vld [vmem:[#allocation2 + $0x3c] sm:$0xff]   ;;  %v7904_v26 = vld [vmem:[%s9758_s1 + $0x110] sm:$0xff]  }
 0x15c   : > { %v4834_v10 = vrot.slane %v4833_v56, 4  ;;  %v4866_v57 = vrot.slane %v4864_v33, 4  ;;  %v5335_v2 = vrot.slane %v9218_v29, 5  ;;  %v4844_v38 = vrot.slane %v4843_v17, 4 }
 0x15d   : > { %7180 = vmatmul.mubr.bf16.vlgmr.msra.gmra.mrb[0].mxu1 %v7834_v8  ;;  %v9513_v8 = vld [vmem:[#allocation2 + $0xd4] sm:$0x1]  ;;  %v9520_v59 = vsel %vm8436_vm7, %v6459_v27, %v5332_v53  ;;  %v5334_v44 = vrot.slane %v5332_v53, 4  ;;  %v4815_v18 = vsel %vm8044_vm3, %v4810_v43, %v9419_v11  ;;  %v4825_v14 = vsel %vm8044_vm3, %v4820_v7, %v4824_v12  ;;  %v5196_v7 = vld [vmem:[#allocation2 + $0x18] sm:$0xe] }
 0x15e   : > { %7459 = vmatpush3.bf16.msra.mxu1 %v9238_v54  ;;  %7183 = vmatprep.mubr.bf16.mxu1 %v7836_v15  ;;  %v9515_v54 = vrot.slane %v4860_v37, 5  ;;  %v4848_v15 = vrot.slane %v4846_v39, 5  ;;  %v6460_v0 = vrot.slane %v5207_v61, 9  ;;  %v5339_v29 = vrot.slane %v9232_v24, 5 }
 0x15f   : > { %7452 = vmatprep.subr.bf16.mxu1 %v7903_v50  ;;  %v4857_v21 = vor.u32 %v4856_v51, %v4853_v40  ;;  %v4870_v34 = vshll.u32 %v9513_v8, 16  ;;  %v9534_v56 = vsel %vm8436_vm7, %v5334_v44, %v5335_v2  ;;  %v5342_v11 = vrot.slane %v9265_v4, 5  ;;  %v7905_v4 = vld [vmem:[#allocation2 + $0x1c] sm:$0xf] }
 0x160   : > { %7392 = vmatmul.mubr.bf16.gmra.mrb[20].mxu0 %v6436_v25  ;;  %v4867_v37 = vor.u32 %v4866_v57, %v9515_v54  ;;  %v6491_v24 = vcombine.low %v9520_v59, %v9534_v56  ;;  %v9542_v33 = vsel %vm8436_vm7, %v6460_v0, %v5339_v29  ;;  %v5341_v25 = vrot.slane %v5339_v29, 4  ;;  %v7909_v0 = vld [vmem:[#allocation2 + $0x28] sm:$0xf] }
 0x161   : > { %7395 = vmatprep.mubr.bf16.mxu0 %v6437_v1  ;;  %v4839_v17 = vsel %vm8044_vm3, %v4834_v10, %v9456_v5  ;;  %v4849_v39 = vsel %vm8044_vm3, %v4844_v38, %v4848_v15  ;;  %v5262_v43 = vrot.slane %v7905_v4, 5  ;;  %v6438_v27 = vcombine.low %v4815_v18, %v4825_v14  ;;  %v5208_v1 = vld [vmem:[#allocation2 + $0xa8] sm:$0xe]  ;;  %v7842_v15 = vld [vmem:[#allocation2 + $0x54] sm:$0xff]   ;;  %v7908_v18 = vld [vmem:[%s9758_s1 + $0x120] sm:$0xff]  }
 0x162   : > { %7460 = vmatpush3.bf16.msra.mxu1 %v7903_v50  ;;  %v9551_v12 = vsel %vm8436_vm7, %v5341_v25, %v5342_v11  ;;  %v7906_v50 = vld [vmem:[%s9758_s1 + $0x118] sm:$0xff]   ;;  %v6439_v40 = vcombine.low %v4839_v17, %v4849_v39  ;;  %v4858_v51 = vrot.slane %v4857_v21, 4  ;;  %v4868_v53 = vrot.slane %v4867_v37, 4  ;;  %v7840_v10 = vld [vmem:[#allocation2 + $0x48] sm:$0xff]   ;;  %v5197_v14 = vld [vmem:[#allocation2 + $0x24] sm:$0xe] }
 0x163   : > { %7453 = vmatprep.subr.bf16.mxu1 %v7904_v26  ;;  %v6492_v5 = vcombine.low %v9542_v33, %v9551_v12  ;;  %v4872_v61 = vrot.slane %v4870_v34, 5  ;;  %v6449_v57 = vrot.slane %v5196_v7, 9  ;;  %v5264_v2 = vrot.slane %v5262_v43, 4  ;;  %v7910_v17 = vld [vmem:[#allocation2 + $0x34] sm:$0xf] }
 0x164   : > { %v6461_v44 = vrot.slane %v5208_v1, 9  ;;  %v5269_v29 = vrot.slane %v7909_v0, 5  ;;  %v5346_v34 = vrot.slane %v9279_v41, 5  ;;  %v5349_v11 = vrot.slane %v9306_v52, 5  ;;  %v5198_v7 = vld [vmem:[#allocation2 + $0x30] sm:$0xe] }
 0x165   : > { %7184 = vmatmul.mubr.bf16.gmra.mrb[4].mxu1 %v7837_v48  ;;  %v7907_v48 = vld [vmem:[#allocation2 + $0x20] sm:$0x1]  ;;  %v4873_v21 = vsel %vm8044_vm3, %v4868_v53, %v4872_v61  ;;  %v5263_v37 = vsel %vm8436_vm7, %v6449_v57, %v5262_v43  ;;  %v5276_v39 = vrot.slane %v7910_v17, 5  ;;  %v5353_v52 = vrot.slane %v9334_v9, 5  ;;  %v7911_v43 = vld [vmem:[#allocation2 + $0x2c] sm:$0x1] }
 0x166   : > { %7187 = vmatprep.mubr.bf16.mxu1 %v7839_v47  ;;  %7461 = vmatpush3.bf16.msra.mxu1 %v7904_v26  ;;  %v5265_v38 = vrot.slane %v7907_v48, 5  ;;  %v5209_v47 = vld [vmem:[#allocation2 + $0xb4] sm:$0xe]  ;;  %v4863_v26 = vsel %vm8044_vm3, %v4858_v51, %v9515_v54  ;;  %v6450_v54 = vrot.slane %v5197_v14, 9  ;;  %v5348_v41 = vrot.slane %v5346_v34, 4  ;;  %v7912_v51 = vld [vmem:[%s9758_s1 + $0x128] sm:$0xff]  }
 0x167   : > { %7454 = vmatprep.subr.bf16.mxu1 %v7906_v50  ;;  %v6462_v4 = vrot.slane %v5209_v47, 9  ;;  %v5271_v1 = vrot.slane %v5269_v29, 4  ;;  %v5356_v53 = vrot.slane %v9439_v30, 5  ;;  %v5355_v9 = vrot.slane %v5353_v52, 4  ;;  %v7914_v14 = vld [vmem:[%s9758_s1 + $0x130] sm:$0xff]  }
 0x168   : > { %7396 = vmatmul.mubr.bf16.gmra.mrb[24].mxu0 %v6438_v27  ;;  %v5266_v25 = vsel %vm8436_vm7, %v5264_v2, %v5265_v38  ;;  %v9574_v27 = vsel %vm8436_vm7, %v6461_v44, %v5346_v34  ;;  %v7843_v2 = vld [vmem:[#allocation2 + $0x60] sm:$0xff]   ;;  %v6451_v48 = vrot.slane %v5198_v7, 9  ;;  %v5278_v38 = vrot.slane %v5276_v39, 4  ;;  %v5199_v34 = vld [vmem:[#allocation2 + $0x3c] sm:$0xe] }
 0x169   : > { %7399 = vmatprep.mubr.bf16.mxu0 %v6439_v40  ;;  %v5272_v40 = vrot.slane %v7911_v43, 5  ;;  %v6481_v61 = vcombine.low %v5263_v37, %v5266_v25  ;;  %v9587_v57 = vsel %vm8436_vm7, %v6462_v4, %v5353_v52  ;;  %v9593_v30 = vsel %vm8436_vm7, %v5355_v9, %v5356_v53  ;;  %v5210_v25 = vld [vmem:[#allocation2 + $0xc0] sm:$0xe]  ;;  %v5211_v7 = vld [vmem:[#allocation2 + $0xcc] sm:$0xe] }
 0x16a   : > { %7462 = vmatpush3.bf16.msra.mxu1 %v7906_v50  ;;  %v6440_v50 = vcombine.low %v4863_v26, %v4873_v21  ;;  %v6494_v0 = vcombine.low %v9587_v57, %v9593_v30  ;;  %v5270_v26 = vsel %vm8436_vm7, %v6450_v54, %v5269_v29  ;;  %v5277_v17 = vsel %vm8436_vm7, %v6451_v48, %v5276_v39  ;;  %v7916_v29 = vld [vmem:[#allocation2 + $0x44] sm:$0x1] }
 0x16b   : > { %7455 = vmatprep.subr.bf16.mxu1 %v7908_v18  ;;  %v5273_v21 = vsel %vm8436_vm7, %v5271_v1, %v5272_v40  ;;  %v6452_v52 = vrot.slane %v5199_v34, 9  ;;  %v5286_v54 = vrot.slane %v7916_v29, 5  ;;  %v6463_v1 = vrot.slane %v5210_v25, 9 }
 0x16c   : > { %v5360_v39 = vrot.slane %v9407_v6, 5  ;;  %v5363_v53 = vrot.slane %v9479_v23, 5  ;;  %v6464_v9 = vrot.slane %v5211_v7, 9  ;;  %v3149_v55 = vshll.u32 %v7923_v31, 16 }
 0x16d   : > { %7188 = vmatmul.mubr.bf16.gmra.mrb[8].mxu1 %v7840_v10  ;;  %v9583_v10 = vsel %vm8436_vm7, %v5348_v41, %v5349_v11  ;;  %v7915_v11 = vld [vmem:[#allocation2 + $0x40] sm:$0xf]  ;;  %v6482_v41 = vcombine.low %v5270_v26, %v5273_v21  ;;  %v7918_v26 = vld [vmem:[#allocation2 + $0x70] sm:$0xf] }
 0x16e   : > { %7191 = vmatprep.mubr.bf16.mxu1 %v7842_v15  ;;  %7463 = vmatpush3.bf16.msra.mxu1 %v7908_v18  ;;  %v7913_v15 = vld [vmem:[#allocation2 + $0x38] sm:$0x1]  ;;  %v6493_v47 = vcombine.low %v9574_v27, %v9583_v10  ;;  %v7845_v18 = vld [vmem:[#allocation2 + $0x6c] sm:$0xff]   ;;  %v5283_v37 = vrot.slane %v7915_v11, 5  ;;  %v9615_v48 = vsel %vm8436_vm7, %v6463_v1, %v5360_v39  ;;  %v3053_v21 = vshll.u32 %v7918_v26, 16 }
 0x16f   : > { %7456 = vmatprep.subr.bf16.mxu1 %v7912_v51  ;;  %v5279_v44 = vrot.slane %v7913_v15, 5  ;;  %v5367_v15 = vrot.slane %v9462_v42, 5  ;;  %v3057_v42 = vshrl.u32 %v7918_v26, 16  ;;  %v2833_v1 = vld [vmem:[#allocation2 + $0x84] sm:$0xf] }
 0x170   : > { %7400 = vmatmul.mubr.bf16.gmra.mrb[28].mxu0 %v6440_v50  ;;  %v7917_v50 = vld [vmem:[%s9758_s1 + $0x138] sm:$0xff]   ;;  %v5285_v40 = vrot.slane %v5283_v37, 4  ;;  %v5284_v6 = vsel %vm8436_vm7, %v6452_v52, %v5283_v37  ;;  %v7848_v52 = vld [vmem:[#allocation2 + $0x90] sm:$0xff]   ;;  %v3055_v29 = vrot.slane %v3053_v21, 5 }
 0x171   : > { %7419 = vmatprep.mubr.bf16.mxu0 %v6481_v61  ;;  %v5280_v4 = vsel %vm8436_vm7, %v5278_v38, %v5279_v44  ;;  %v7846_v61 = vld [vmem:[#allocation2 + $0x78] sm:$0xff]   ;;  %v5362_v38 = vrot.slane %v5360_v39, 4  ;;  %v5369_v25 = vrot.slane %v5367_v15, 4  ;;  %v3092_v39 = vshrl.u32 %v2833_v1, 16 }
 0x172   : > { %7464 = vmatpush3.bf16.msra.mxu1 %v7912_v51  ;;  %v6483_v43 = vcombine.low %v5277_v17, %v5280_v4  ;;  %v2827_v51 = vld [vmem:[#allocation2 + $0x6c] sm:$0xf]  ;;  %v5287_v23 = vsel %vm8436_vm7, %v5285_v40, %v5286_v54  ;;  %v3059_v54 = vrot.slane %v3057_v42, 4  ;;  %v2839_v26 = vld [vmem:[#allocation2 + $0x9c] sm:$0xf] }
 0x173   : > { %7457 = vmatprep.subr.bf16.mxu1 %v7914_v14  ;;  %v3044_v44 = vshrl.u32 %v2827_v51, 16  ;;  %v9625_v34 = vsel %vm8436_vm7, %v5362_v38, %v5363_v53  ;;  %v6484_v37 = vcombine.low %v5284_v6, %v5287_v23  ;;  %v3095_v53 = vshll.u32 %v2833_v1, 16 }
 0x174   : > { %v6495_v11 = vcombine.low %v9615_v48, %v9625_v34  ;;  %v3060_v40 = vor.u32 %v3059_v54, %v3055_v29  ;;  %v3094_v6 = vrot.slane %v3092_v39, 4  ;;  %v3140_v54 = vshrl.u32 %v2839_v26, 16 }
 0x175   : > { %7192 = vmatmul.mubr.bf16.gmra.mrb[12].mxu1 %v7843_v2  ;;  %v7847_v2 = vld [vmem:[#allocation2 + $0x84] sm:$0xff]   ;;  %v3046_v17 = vrot.slane %v3044_v44, 4  ;;  %v3097_v23 = vrot.slane %v3095_v53, 5 }
 0x176   : > { %7195 = vmatprep.mubr.bf16.mxu1 %v7845_v18  ;;  %7465 = vmatpush3.bf16.msra.mxu1 %v7914_v14  ;;  %v3047_v18 = vshll.u32 %v2827_v51, 16  ;;  %v5370_v14 = vrot.slane %v9513_v8, 5  ;;  %v9631_v8 = vsel %vm8436_vm7, %v6464_v9, %v5367_v15  ;;  %v7919_v51 = vld [vmem:[#allocation2 + $0x74] sm:$0x1]  ;;  %v2836_v15 = vld [vmem:[#allocation2 + $0x90] sm:$0xf] }
 0x177   : > { %7458 = vmatprep.subr.bf16.mxu1 %v7917_v50  ;;  %v3063_v62 = vshll.u32 %v7919_v51, 16  ;;  %v7850_v44 = vld [vmem:[#allocation2 + $0xa8] sm:$0xff]   ;;  %v3116_v21 = vshrl.u32 %v2836_v15, 16  ;;  %v3119_v42 = vshll.u32 %v2836_v15, 16  ;;  %v3142_v53 = vrot.slane %v3140_v54, 4 }
 0x178   : > { %7420 = vmatmul.mubr.bf16.vlgmr.msra.gmra.mrb[0].mxu0 %v6482_v41  ;;  %v3049_v4 = vrot.slane %v3047_v18, 5  ;;  %v9635_v7 = vsel %vm8436_vm7, %v5369_v25, %v5370_v14  ;;  %v3061_v18 = vrot.slane %v3060_v40, 4  ;;  %v9657_v15 = vrot.slane %v3149_v55, 5 }
 0x179   : > { %7423 = vmatprep.mubr.bf16.mxu0 %v6483_v43  ;;  %v6496_v41 = vcombine.low %v9631_v8, %v9635_v7  ;;  %v3065_v14 = vrot.slane %v3063_v62, 5 }
 0x17a   : > { %7466 = vmatpush3.bf16.msra.mxu1 %v7917_v50  ;;  %v7849_v50 = vld [vmem:[#allocation2 + $0x9c] sm:$0xff]   ;;  %v3050_v43 = vor.u32 %v3049_v4, %v3046_v17  ;;  %v7921_v17 = vld [vmem:[#allocation2 + $0x94] sm:$0xf] }
 0x17b   : > { %v3125_v4 = vshll.u32 %v7921_v17, 16  ;;  %v3066_v1 = vsel %vm8044_vm3, %v3061_v18, %v3065_v14  ;;  %v2842_v18 = vld [vmem:[#allocation2 + $0xa8] sm:$0xf] }
 0x17c   : > { %v3051_v38 = vrot.slane %v3050_v43, 4  ;;  %v7922_v43 = vld [vmem:[#allocation2 + $0x8c] sm:$0x1]  ;;  %v3167_v54 = vshll.u32 %v2842_v18, 16 }
 0x17d   : > { %7196 = vmatmul.mubr.bf16.gmra.mrb[16].mxu1 %v7846_v61  ;;  %v7920_v61 = vld [vmem:[#allocation2 + $0x88] sm:$0xf]  ;;  %v3111_v40 = vshll.u32 %v7922_v43, 16  ;;  %v9655_v62 = vrot.slane %v3125_v4, 5  ;;  %v2845_v4 = vld [vmem:[#allocation2 + $0xb4] sm:$0xf] }
 0x17e   : > { %7199 = vmatprep.mubr.bf16.mxu1 %v7847_v2  ;;  %v3101_v9 = vshll.u32 %v7920_v61, 16  ;;  %v3105_v2 = vshrl.u32 %v7920_v61, 16  ;;  %v3056_v25 = vsel %vm8044_vm3, %v3051_v38, %v3055_v29  ;;  %v3098_v29 = vor.u32 %v3097_v23, %v3094_v6  ;;  %v7924_v6 = vld [vmem:[#allocation2 + $0x98] sm:$0x1] }
 0x17f   : > { %v3113_v38 = vrot.slane %v3111_v40, 5  ;;  %v3135_v23 = vshll.u32 %v7924_v6, 16  ;;  %v3191_v40 = vshll.u32 %v2845_v4, 16  ;;  %v7928_v6 = vld [vmem:[#allocation2 + $0xb0] sm:$0x1] }
 0x180   : > { %7424 = vmatmul.mubr.bf16.gmra.mrb[4].mxu0 %v6484_v37  ;;  %v9642_v13 = vrot.slane %v3101_v9, 5  ;;  %v9813_v37 = vcombine.low %v9380_v49, %v9401_v45  ;;  %v3118_v49 = vrot.slane %v3116_v21, 4  ;;  %v3121_v45 = vrot.slane %v3119_v42, 5  ;;  %v7852_v9 = vld [vmem:[#allocation2 + $0xc0] sm:$0xff]  }
 0x181   : > { %7427 = vmatprep.mubr.bf16.mxu0 %v6485_v58  ;;  %v3107_v58 = vrot.slane %v3105_v2, 4  ;;  %v6297_v2 = vcombine.low %v3056_v25, %v3066_v1  ;;  %v3099_v14 = vrot.slane %v3098_v29, 4  ;;  %v7925_v25 = vld [vmem:[#allocation2 + $0xa4] sm:$0x1]  ;;  %v3137_v46 = vrot.slane %v3135_v23, 5 }
 0x182   : > { %v3183_v23 = vshll.u32 %v7928_v6, 16 }
 0x183   : > { %v3108_v51 = vor.u32 %v3107_v58, %v9642_v13  ;;  %v9814_v58 = vcombine.low %v9413_v36, %v9428_v28  ;;  %v3104_v36 = vsel %vm8044_vm3, %v3099_v14, %v9642_v13  ;;  %v2848_v14 = vld [vmem:[#allocation2 + $0xc0] sm:$0xf] }
 0x185   : > { %7200 = vmatmul.mubr.bf16.gmra.mrb[20].mxu1 %v7848_v52  ;;  %v3129_v52 = vshrl.u32 %v7921_v17, 16  ;;  %v3164_v17 = vshrl.u32 %v2842_v18, 16 }
 0x186   : > { %7203 = vmatprep.mubr.bf16.mxu1 %v7849_v50  ;;  %v3143_v50 = vshll.u32 %v2839_v26, 16  ;;  %v3109_v26 = vrot.slane %v3108_v51, 4 }
 0x187   : > { %v3131_v39 = vrot.slane %v3129_v52, 4 }
 0x188   : > { %7428 = vmatmul.mubr.bf16.gmra.mrb[8].mxu0 %v6486_v16  ;;  %v3153_v16 = vshrl.u32 %v7923_v31, 16  ;;  %v3145_v61 = vrot.slane %v3143_v50, 5  ;;  %v7926_v50 = vld [vmem:[#allocation2 + $0xac] sm:$0xf]  ;;  %v3114_v28 = vsel %vm8044_vm3, %v3109_v26, %v3113_v38  ;;  %v7927_v31 = vld [vmem:[#allocation2 + $0xb8] sm:$0xf] }
 0x189   : > { %7431 = vmatprep.mubr.bf16.mxu0 %v9813_v37  ;;  %v3132_v21 = vor.u32 %v3131_v39, %v9655_v62  ;;  %v3159_v37 = vshll.u32 %v7925_v25, 16  ;;  %v3173_v1 = vshll.u32 %v7926_v50, 16  ;;  %v3177_v43 = vshrl.u32 %v7926_v50, 16 }
 0x18a   : > { %v3146_v42 = vor.u32 %v3145_v61, %v3142_v53  ;;  %v3197_v55 = vshll.u32 %v7927_v31, 16  ;;  %v3169_v53 = vrot.slane %v3167_v54, 5  ;;  %v3193_v38 = vrot.slane %v3191_v40, 5 }
 0x18b   : > { %v3133_v29 = vrot.slane %v3132_v21, 4  ;;  %v3175_v61 = vrot.slane %v3173_v1, 5  ;;  %v3215_v21 = vshll.u32 %v2848_v14, 16 }
 0x18c   : > { %v3147_v51 = vrot.slane %v3146_v42, 4  ;;  %v7929_v42 = vld [vmem:[#allocation2 + $0xc4] sm:$0xf] }
 0x18d   : > { %7204 = vmatmul.mubr.bf16.gmra.mrb[24].mxu1 %v7850_v44  ;;  %v3155_v44 = vrot.slane %v3153_v16, 4  ;;  %v3201_v16 = vshrl.u32 %v7927_v31, 16  ;;  %v3221_v25 = vshll.u32 %v7929_v42, 16  ;;  %v3225_v59 = vshrl.u32 %v7929_v42, 16 }
 0x18e   : > { %7207 = vmatprep.mubr.bf16.mxu1 %v7851_v3  ;;  %v3122_v3 = vor.u32 %v3121_v45, %v3118_v49  ;;  %v3161_v49 = vrot.slane %v3159_v37, 5  ;;  %v3166_v45 = vrot.slane %v3164_v17, 4  ;;  %v3152_v20 = vsel %vm8044_vm3, %v3147_v51, %v9657_v15  ;;  %v7930_v37 = vld [vmem:[#allocation2 + $0xbc] sm:$0x1] }
 0x18f   : > { %v3156_v52 = vor.u32 %v3155_v44, %v9657_v15  ;;  %v3199_v44 = vrot.slane %v3197_v55, 5  ;;  %v3203_v18 = vrot.slane %v3201_v16, 4  ;;  %v3207_v17 = vshll.u32 %v7930_v37, 16  ;;  %v7931_v16 = vld [vmem:[#allocation2 + $0xc8] sm:$0x1] }
 0x190   : > { %7432 = vmatmul.mubr.bf16.gmra.mrb[12].mxu0 %v9814_v58  ;;  %v3123_v22 = vrot.slane %v3122_v3, 4  ;;  %v3138_v3 = vsel %vm8044_vm3, %v3133_v29, %v3137_v46  ;;  %v3212_v58 = vshrl.u32 %v2848_v14, 16  ;;  %v3185_v15 = vrot.slane %v3183_v23, 5 }
 0x191   : > { %7435 = vmatprep.mubr.bf16.mxu0 %v6489_v32  ;;  %v3188_v32 = vshrl.u32 %v2845_v4, 16  ;;  %v3157_v39 = vrot.slane %v3156_v52, 4  ;;  %v3217_v1 = vrot.slane %v3215_v21, 5  ;;  %v3209_v46 = vrot.slane %v3207_v17, 5 }
 0x192   : > { %v3128_v26 = vsel %vm8044_vm3, %v3123_v22, %v9655_v62  ;;  %v3214_v50 = vrot.slane %v3212_v58, 4  ;;  %v3231_v33 = vshll.u32 %v7931_v16, 16 }
 0x193   : > { %v3190_v13 = vrot.slane %v3188_v32, 4  ;;  %v3162_v19 = vsel %vm8044_vm3, %v3157_v39, %v3161_v49 }
 0x194   : > { %v6301_v4 = vcombine.low %v3152_v20, %v3162_v19  ;;  %v3218_v31 = vor.u32 %v3217_v1, %v3214_v50  ;;  %v3233_v51 = vrot.slane %v3231_v33, 5 }
 0x195   : > { %7208 = vmatmul.mubr.bf16.gmra.mrb[28].mxu1 %v7852_v9  ;;  %v3179_v9 = vrot.slane %v3177_v43, 4  ;;  %v3194_v56 = vor.u32 %v3193_v38, %v3190_v13  ;;  %v3223_v43 = vrot.slane %v3221_v25, 5 }
 0x196   : > { %7243 = vmatprep.mubr.bf16.mxu1 %v6297_v2  ;;  %v6299_v2 = vcombine.low %v3104_v36, %v3114_v28  ;;  %v3227_v36 = vrot.slane %v3225_v59, 4 }
 0x197   : > { %v3180_v62 = vor.u32 %v3179_v9, %v3175_v61  ;;  %v3195_v28 = vrot.slane %v3194_v56, 4 }
 0x198   : > { %7436 = vmatmul.mubr.bf16.gmra.mrb[16].mxu0 %v6490_v63  ;;  %v3170_v63 = vor.u32 %v3169_v53, %v3166_v45  ;;  %v3228_v55 = vor.u32 %v3227_v36, %v3223_v43 }
 0x199   : > { %7439 = vmatprep.mubr.bf16.mxu0 %v6491_v24  ;;  %v3204_v24 = vor.u32 %v3203_v18, %v3199_v44  ;;  %v3181_v54 = vrot.slane %v3180_v62, 4  ;;  %v3200_v12 = vsel %vm8044_vm3, %v3195_v28, %v3199_v44 }
 0x19a   : > { %v3171_v52 = vrot.slane %v3170_v63, 4  ;;  %v3229_v29 = vrot.slane %v3228_v55, 4 }
 0x19b   : > { %v3205_v22 = vrot.slane %v3204_v24, 4  ;;  %v3186_v40 = vsel %vm8044_vm3, %v3181_v54, %v3185_v15 }
 0x19c   : > { %v3176_v32 = vsel %vm8044_vm3, %v3171_v52, %v3175_v61  ;;  %v3234_v45 = vsel %vm8044_vm3, %v3229_v29, %v3233_v51 }
 0x19d   : > { %7244 = vmatmul.mubr.bf16.vlgmr.msra.gmra.mrb[16].mxu1 %v9485_v60  ;;  %v6300_v60 = vcombine.low %v3128_v26, %v3138_v3  ;;  %v6302_v27 = vcombine.low %v3176_v32, %v3186_v40 }
 0x19e   : > { %7247 = vmatprep.mubr.bf16.mxu1 %v6299_v2 }
 0x1a0   : > { %7440 = vmatmul.mubr.bf16.gmra.mrb[20].mxu0 %v6492_v5  ;;  %v3210_v5 = vsel %vm8044_vm3, %v3205_v22, %v3209_v46 }
 0x1a1   : > { %7443 = vmatprep.mubr.bf16.mxu0 %v6493_v47  ;;  %v6303_v10 = vcombine.low %v3200_v12, %v3210_v5  ;;  %v3219_v47 = vrot.slane %v3218_v31, 4 }
 0x1a3   : > { %v3224_v49 = vsel %vm8044_vm3, %v3219_v47, %v3223_v43 }
 0x1a4   : > { %v6304_v39 = vcombine.low %v3224_v49, %v3234_v45 }
 0x1a5   : > { %7248 = vmatmul.mubr.bf16.gmra.mrb[20].mxu1 %v6300_v60 }
 0x1a6   : > { %7251 = vmatprep.mubr.bf16.mxu1 %v6301_v4 }
 0x1a8   : > { %7444 = vmatmul.mubr.bf16.gmra.mrb[24].mxu0 %v6494_v0 }
 0x1a9   : > { %7447 = vmatprep.mubr.bf16.mxu0 %v6495_v11 }
 0x1ad   : > { %7252 = vmatmul.mubr.bf16.gmra.mrb[24].mxu1 %v6302_v27 }
 0x1ae   : > { %7255 = vmatprep.mubr.bf16.mxu1 %v6303_v10 }
 0x1b0   : > { %7448 = vmatmul.mubr.bf16.gmra.mrb[28].mxu0 %v6496_v41 }
 0x1b5   : > { %7256 = vmatmul.mubr.bf16.gmra.mrb[28].mxu1 %v6304_v39 }
 0x230   : > { %v7181_v57 = vpop.f32.mrb[0].mxu1 }
 0x231   : > { %v2644_v30 = vpop.f32.mrb[1].mxu1 }
 0x232   : > { %v7182_v0 = vpop.f32.mrb[2].mxu1 }
 0x233   : > { %v2647_v53 = vpop.f32.mrb[3].mxu1 }
 0x238   : > { %v7185_v48 = vpop.f32.mrb[4].mxu1 }
 0x239   : > { %v2660_v34 = vpop.f32.mrb[5].mxu1 }
 0x23a   : > { %v7186_v11 = vpop.f32.mrb[6].mxu1 }
 0x23b   : > { %v2663_v61 = vpop.f32.mrb[7].mxu1 }
 0x240   : > { %v7189_v9 = vpop.f32.mrb[8].mxu1 }
 0x241   : > { %v2676_v2 = vpop.f32.mrb[9].mxu1 }
 0x242   : > { %v7190_v13 = vpop.f32.mrb[10].mxu1 }
 0x243   : > { %v2679_v35 = vpop.f32.mrb[11].mxu1 }
 0x248   : > { %v9716_v38 = vpop.f32.mrb[12].mxu1 }
 0x249   : > { %v9718_v44 = vpop.f32.mrb[13].mxu1 }
 0x24a   : > { %v9720_v8 = vpop.f32.mrb[14].mxu1 }
 0x24b   : > { %v9722_v7 = vpop.f32.mrb[15].mxu1  ;;  %v7421_v41 = vpop.f32.mrb[0].mxu0 }
 0x24c   : > { %v7467_v18 = vadd.f32 %v7421_v41, %v7181_v57  ;;  %v5535_v14 = vpop.f32.mrb[1].mxu0 }
 0x24d   : > { %v7468_v26 = vadd.f32 %v5535_v14, %v2644_v30  ;;  %v7422_v3 = vpop.f32.mrb[2].mxu0 }
 0x24e   : > { %v7469_v6 = vadd.f32 %v7422_v3, %v7182_v0  ;;  %v5538_v23 = vpop.f32.mrb[3].mxu0  ;;  %v5894_v42 = vmul.f32 %v7467_v18, %v7467_v18 }
 0x24f   : > { %v7470_v20 = vadd.f32 %v5538_v23, %v2647_v53  ;;  %v5892_v63 = vmul.f32 %v7468_v26, %v7468_v26 }
 0x250   : > { %v6700_v19 = vpack.c.bf16 %v7469_v6, %v7467_v18  ;;  %v5895_v17 = vmul.f32 %v7469_v6, %v7469_v6 }
 0x251   : > { %v6695_v62 = vpack.c.bf16 %v7470_v20, %v7468_v26  ;;  %v5854_v58 = vadd.f32 %v7470_v20, %v7468_v26  ;;  %v5893_v21 = vmul.f32 %v7470_v20, %v7470_v20 }
 0x252   : > { %6788 = vst [vmem:[%s9728_s17 + $0x8] sm:$0xff] %v6700_v19  }
 0x253   : > { %6696 = vst [vmem:[%s9728_s17] sm:$0xff] %v6695_v62   ;;  %v5855_v25 = vadd.f32 %v7467_v18, %v5854_v58  ;;  %v5924_v59 = vadd.f32 %v5893_v21, %v5892_v63  ;;  %v7425_v56 = vpop.f32.mrb[4].mxu0 }
 0x254   : > { %v7471_v24 = vadd.f32 %v7425_v56, %v7185_v48  ;;  %v5551_v37 = vpop.f32.mrb[5].mxu0 }
 0x255   : > { %v5925_v60 = vadd.f32 %v5924_v59, %v5894_v42  ;;  %v7472_v4 = vadd.f32 %v5551_v37, %v2660_v34  ;;  %v5856_v52 = vadd.f32 %v7469_v6, %v5855_v25  ;;  %v7426_v54 = vpop.f32.mrb[6].mxu0 }
 0x256   : > { %v7473_v15 = vadd.f32 %v7426_v54, %v7186_v11  ;;  %v5554_v50 = vpop.f32.mrb[7].mxu0  ;;  %v5898_v55 = vmul.f32 %v7471_v24, %v7471_v24 }
 0x257   : > { %v5857_v1 = vadd.f32 %v7472_v4, %v5856_v52  ;;  %v5896_v43 = vmul.f32 %v7472_v4, %v7472_v4  ;;  %v5926_v36 = vadd.f32 %v5925_v60, %v5895_v17  ;;  %v7474_v28 = vadd.f32 %v5554_v50, %v2663_v61 }
 0x258   : > { %v6710_v22 = vpack.c.bf16 %v7473_v15, %v7471_v24  ;;  %v5899_v10 = vmul.f32 %v7473_v15, %v7473_v15 }
 0x259   : > { %v5927_v46 = vadd.f32 %v5926_v36, %v5896_v43  ;;  %v6705_v32 = vpack.c.bf16 %v7474_v28, %v7472_v4  ;;  %v5858_v40 = vadd.f32 %v7474_v28, %v5857_v1  ;;  %v5897_v31 = vmul.f32 %v7474_v28, %v7474_v28 }
 0x25a   : > { %6790 = vst [vmem:[%s9728_s17 + $0x18] sm:$0xff] %v6710_v22  }
 0x25b   : > { %6789 = vst [vmem:[%s9728_s17 + $0x10] sm:$0xff] %v6705_v32   ;;  %v5859_v16 = vadd.f32 %v7471_v24, %v5858_v40  ;;  %v5928_v33 = vadd.f32 %v5927_v46, %v5897_v31  ;;  %v7429_v12 = vpop.f32.mrb[8].mxu0 }
 0x25c   : > { %v7475_v5 = vadd.f32 %v7429_v12, %v7189_v9  ;;  %v5567_v27 = vpop.f32.mrb[9].mxu0 }
 0x25d   : > { %v5929_v47 = vadd.f32 %v5928_v33, %v5898_v55  ;;  %v7476_v29 = vadd.f32 %v5567_v27, %v2676_v2  ;;  %v5860_v51 = vadd.f32 %v7473_v15, %v5859_v16  ;;  %v7430_v49 = vpop.f32.mrb[10].mxu0 }
 0x25e   : > { %v7477_v45 = vadd.f32 %v7430_v49, %v7190_v13  ;;  %v5570_v39 = vpop.f32.mrb[11].mxu0  ;;  %v5902_v9 = vmul.f32 %v7475_v5, %v7475_v5 }
 0x25f   : > { %v5861_v57 = vadd.f32 %v7476_v29, %v5860_v51  ;;  %v5900_v30 = vmul.f32 %v7476_v29, %v7476_v29  ;;  %v5930_v0 = vadd.f32 %v5929_v47, %v5899_v10  ;;  %v7478_v53 = vadd.f32 %v5570_v39, %v2679_v35 }
 0x260   : > { %v6720_v48 = vpack.c.bf16 %v7477_v45, %v7475_v5  ;;  %v5903_v13 = vmul.f32 %v7477_v45, %v7477_v45 }
 0x261   : > { %v5931_v34 = vadd.f32 %v5930_v0, %v5900_v30  ;;  %v6715_v11 = vpack.c.bf16 %v7478_v53, %v7476_v29  ;;  %v5862_v61 = vadd.f32 %v7478_v53, %v5861_v57  ;;  %v5901_v41 = vmul.f32 %v7478_v53, %v7478_v53 }
 0x262   : > { %6792 = vst [vmem:[%s9728_s17 + $0x28] sm:$0xff] %v6720_v48  }
 0x263   : > { %6791 = vst [vmem:[%s9728_s17 + $0x20] sm:$0xff] %v6715_v11   ;;  %v5863_v18 = vadd.f32 %v7475_v5, %v5862_v61  ;;  %v5932_v14 = vadd.f32 %v5931_v34, %v5901_v41  ;;  %v7433_v2 = vpop.f32.mrb[12].mxu0 }
 0x264   : > { %v7479_v26 = vadd.f32 %v7433_v2, %v9716_v38  ;;  %v5583_v3 = vpop.f32.mrb[13].mxu0 }
 0x265   : > { %v5933_v6 = vadd.f32 %v5932_v14, %v5902_v9  ;;  %v7480_v23 = vadd.f32 %v5583_v3, %v9718_v44  ;;  %v5864_v35 = vadd.f32 %v7477_v45, %v5863_v18  ;;  %v7434_v20 = vpop.f32.mrb[14].mxu0 }
 0x266   : > { %v7481_v19 = vadd.f32 %v7434_v20, %v9720_v8  ;;  %v5586_v63 = vpop.f32.mrb[15].mxu0  ;;  %v5906_v37 = vmul.f32 %v7479_v26, %v7479_v26 }
 0x267   : > { %v5865_v62 = vadd.f32 %v7480_v23, %v5864_v35  ;;  %v5904_v58 = vmul.f32 %v7480_v23, %v7480_v23  ;;  %v5934_v21 = vadd.f32 %v5933_v6, %v5903_v13  ;;  %v7482_v42 = vadd.f32 %v5586_v63, %v9722_v7 }
 0x268   : > { %v6730_v25 = vpack.c.bf16 %v7481_v19, %v7479_v26  ;;  %v5907_v52 = vmul.f32 %v7481_v19, %v7481_v19 }
 0x269   : > { %v5935_v59 = vadd.f32 %v5934_v21, %v5904_v58  ;;  %v6725_v38 = vpack.c.bf16 %v7482_v42, %v7480_v23  ;;  %v5866_v56 = vadd.f32 %v7482_v42, %v5865_v62  ;;  %v5905_v24 = vmul.f32 %v7482_v42, %v7482_v42 }
 0x26a   : > { %6794 = vst [vmem:[%s9728_s17 + $0x38] sm:$0xff] %v6730_v25  }
 0x26b   : > { %6793 = vst [vmem:[%s9728_s17 + $0x30] sm:$0xff] %v6725_v38   ;;  %v5867_v44 = vadd.f32 %v7479_v26, %v5866_v56  ;;  %v5936_v17 = vadd.f32 %v5935_v59, %v5905_v24  ;;  %v7437_v60 = vpop.f32.mrb[16].mxu0 }
 0x26c   : > { %v5599_v4 = vpop.f32.mrb[17].mxu0 }
 0x26d   : > { %v5937_v8 = vadd.f32 %v5936_v17, %v5906_v37  ;;  %v5868_v15 = vadd.f32 %v7481_v19, %v5867_v44  ;;  %v7438_v50 = vpop.f32.mrb[18].mxu0 }
 0x26e   : > { %v5602_v7 = vpop.f32.mrb[19].mxu0 }
 0x26f   : > { %v5938_v22 = vadd.f32 %v5937_v8, %v5907_v52 }
 0x270   : > { %v7245_v54 = vpop.f32.mrb[16].mxu1 }
 0x271   : > { %v3462_v1 = vpop.f32.mrb[17].mxu1  ;;  %v7483_v43 = vadd.f32 %v7437_v60, %v7245_v54 }
 0x272   : > { %v7246_v36 = vpop.f32.mrb[18].mxu1  ;;  %v7484_v28 = vadd.f32 %v5599_v4, %v3462_v1 }
 0x273   : > { %v3465_v46 = vpop.f32.mrb[19].mxu1  ;;  %v7485_v32 = vadd.f32 %v7438_v50, %v7246_v36  ;;  %v7441_v10 = vpop.f32.mrb[20].mxu0  ;;  %v5910_v29 = vmul.f32 %v7483_v43, %v7483_v43 }
 0x274   : > { %v5869_v40 = vadd.f32 %v7484_v28, %v5868_v15  ;;  %v5908_v31 = vmul.f32 %v7484_v28, %v7484_v28  ;;  %v7486_v55 = vadd.f32 %v5602_v7, %v3465_v46  ;;  %v5615_v47 = vpop.f32.mrb[21].mxu0 }
 0x275   : > { %v6740_v16 = vpack.c.bf16 %v7485_v32, %v7483_v43  ;;  %v7442_v39 = vpop.f32.mrb[22].mxu0  ;;  %v5911_v53 = vmul.f32 %v7485_v32, %v7485_v32 }
 0x276   : > { %v5939_v33 = vadd.f32 %v5938_v22, %v5908_v31  ;;  %v6735_v12 = vpack.c.bf16 %v7486_v55, %v7484_v28  ;;  %v5870_v5 = vadd.f32 %v7486_v55, %v5869_v40  ;;  %v5909_v27 = vmul.f32 %v7486_v55, %v7486_v55  ;;  %v5618_v0 = vpop.f32.mrb[23].mxu0 }
 0x277   : > { %6796 = vst [vmem:[%s9728_s17 + $0x48] sm:$0xff] %v6740_v16  }
 0x278   : > { %6795 = vst [vmem:[%s9728_s17 + $0x40] sm:$0xff] %v6735_v12   ;;  %v5871_v51 = vadd.f32 %v7483_v43, %v5870_v5  ;;  %v5940_v49 = vadd.f32 %v5939_v33, %v5909_v27  ;;  %v7249_v45 = vpop.f32.mrb[20].mxu1 }
 0x279   : > { %v3478_v57 = vpop.f32.mrb[21].mxu1  ;;  %v7487_v30 = vadd.f32 %v7441_v10, %v7249_v45 }
 0x27a   : > { %v5941_v48 = vadd.f32 %v5940_v49, %v5910_v29  ;;  %v7250_v34 = vpop.f32.mrb[22].mxu1  ;;  %v7488_v11 = vadd.f32 %v5615_v47, %v3478_v57  ;;  %v5872_v61 = vadd.f32 %v7485_v32, %v5871_v51 }
 0x27b   : > { %v3481_v41 = vpop.f32.mrb[23].mxu1  ;;  %v7489_v9 = vadd.f32 %v7442_v39, %v7250_v34  ;;  %v7445_v20 = vpop.f32.mrb[24].mxu0  ;;  %v5914_v63 = vmul.f32 %v7487_v30, %v7487_v30 }
 0x27c   : > { %v5873_v18 = vadd.f32 %v7488_v11, %v5872_v61  ;;  %v5912_v14 = vmul.f32 %v7488_v11, %v7488_v11  ;;  %v5942_v2 = vadd.f32 %v5941_v48, %v5911_v53  ;;  %v7490_v26 = vadd.f32 %v5618_v0, %v3481_v41  ;;  %v5631_v19 = vpop.f32.mrb[25].mxu0 }
 0x27d   : > { %v6750_v3 = vpack.c.bf16 %v7489_v9, %v7487_v30  ;;  %v7446_v42 = vpop.f32.mrb[26].mxu0  ;;  %v5915_v56 = vmul.f32 %v7489_v9, %v7489_v9 }
 0x27e   : > { %v5943_v13 = vadd.f32 %v5942_v2, %v5912_v14  ;;  %v6745_v6 = vpack.c.bf16 %v7490_v26, %v7488_v11  ;;  %v5874_v23 = vadd.f32 %v7490_v26, %v5873_v18  ;;  %v5913_v35 = vmul.f32 %v7490_v26, %v7490_v26  ;;  %v5634_v38 = vpop.f32.mrb[27].mxu0 }
 0x27f   : > { %6798 = vst [vmem:[%s9728_s17 + $0x58] sm:$0xff] %v6750_v3  }
 0x280   : > { %6797 = vst [vmem:[%s9728_s17 + $0x50] sm:$0xff] %v6745_v6   ;;  %v5875_v62 = vadd.f32 %v7487_v30, %v5874_v23  ;;  %v5944_v58 = vadd.f32 %v5943_v13, %v5913_v35  ;;  %v7253_v21 = vpop.f32.mrb[24].mxu1 }
 0x281   : > { %v3494_v25 = vpop.f32.mrb[25].mxu1  ;;  %v7491_v59 = vadd.f32 %v7445_v20, %v7253_v21 }
 0x282   : > { %v5945_v24 = vadd.f32 %v5944_v58, %v5914_v63  ;;  %v7254_v37 = vpop.f32.mrb[26].mxu1  ;;  %v7492_v44 = vadd.f32 %v5631_v19, %v3494_v25  ;;  %v5876_v17 = vadd.f32 %v7489_v9, %v5875_v62 }
 0x283   : > { %v3497_v60 = vpop.f32.mrb[27].mxu1  ;;  %v7493_v4 = vadd.f32 %v7446_v42, %v7254_v37  ;;  %v7449_v28 = vpop.f32.mrb[28].mxu0  ;;  %v5918_v46 = vmul.f32 %v7491_v59, %v7491_v59 }
 0x284   : > { %v5877_v52 = vadd.f32 %v7492_v44, %v5876_v17  ;;  %v5916_v8 = vmul.f32 %v7492_v44, %v7492_v44  ;;  %v5946_v54 = vadd.f32 %v5945_v24, %v5915_v56  ;;  %v7494_v15 = vadd.f32 %v5634_v38, %v3497_v60  ;;  %v5647_v22 = vpop.f32.mrb[29].mxu0 }
 0x285   : > { %v6760_v50 = vpack.c.bf16 %v7493_v4, %v7491_v59  ;;  %v7450_v55 = vpop.f32.mrb[30].mxu0  ;;  %v5919_v5 = vmul.f32 %v7493_v4, %v7493_v4 }
 0x286   : > { %v5947_v1 = vadd.f32 %v5946_v54, %v5916_v8  ;;  %v6755_v43 = vpack.c.bf16 %v7494_v15, %v7492_v44  ;;  %v5878_v7 = vadd.f32 %v7494_v15, %v5877_v52  ;;  %v5917_v36 = vmul.f32 %v7494_v15, %v7494_v15  ;;  %v5650_v12 = vpop.f32.mrb[31].mxu0 }
 0x287   : > { %6800 = vst [vmem:[%s9728_s17 + $0x68] sm:$0xff] %v6760_v50  }
 0x288   : > { %6799 = vst [vmem:[%s9728_s17 + $0x60] sm:$0xff] %v6755_v43   ;;  %v5879_v32 = vadd.f32 %v7491_v59, %v5878_v7  ;;  %v5948_v40 = vadd.f32 %v5947_v1, %v5917_v36  ;;  %v7257_v31 = vpop.f32.mrb[28].mxu1 }
 0x289   : > { %v3510_v16 = vpop.f32.mrb[29].mxu1  ;;  %v7495_v33 = vadd.f32 %v7449_v28, %v7257_v31 }
 0x28a   : > { %v5949_v27 = vadd.f32 %v5948_v40, %v5918_v46  ;;  %v7258_v10 = vpop.f32.mrb[30].mxu1  ;;  %v7496_v47 = vadd.f32 %v5647_v22, %v3510_v16  ;;  %v5880_v29 = vadd.f32 %v7493_v4, %v5879_v32 }
 0x28b   : > { %v3513_v51 = vpop.f32.mrb[31].mxu1  ;;  %v7497_v49 = vadd.f32 %v7450_v55, %v7258_v10  ;;  %v5922_v61 = vmul.f32 %v7495_v33, %v7495_v33 }
 0x28c   : > { %v5881_v45 = vadd.f32 %v7496_v47, %v5880_v29  ;;  %v5920_v39 = vmul.f32 %v7496_v47, %v7496_v47  ;;  %v5950_v57 = vadd.f32 %v5949_v27, %v5919_v5  ;;  %v7498_v30 = vadd.f32 %v5650_v12, %v3513_v51 }
 0x28d   : > { %v6770_v0 = vpack.c.bf16 %v7497_v49, %v7495_v33  ;;  %v5923_v18 = vmul.f32 %v7497_v49, %v7497_v49 }
 0x28e   : > { %v5951_v53 = vadd.f32 %v5950_v57, %v5920_v39  ;;  %v6765_v48 = vpack.c.bf16 %v7498_v30, %v7496_v47  ;;  %v5882_v34 = vadd.f32 %v7498_v30, %v5881_v45  ;;  %v5921_v11 = vmul.f32 %v7498_v30, %v7498_v30 }
 0x28f   : > { %6802 = vst [vmem:[%s9728_s17 + $0x78] sm:$0xff] %v6770_v0  }
 0x290   : > { %6801 = vst [vmem:[%s9728_s17 + $0x70] sm:$0xff] %v6765_v48   ;;  %v5883_v41 = vadd.f32 %v7495_v33, %v5882_v34  ;;  %v5952_v9 = vadd.f32 %v5951_v53, %v5921_v11 }
 0x292   : > { %v5884_v14 = vadd.f32 %v7497_v49, %v5883_v41  ;;  %v5953_v2 = vadd.f32 %v5952_v9, %v5922_v61 }
 0x294   : > { %v5885_v26 = vrot.slane %v5884_v14, 4  ;;  %v5954_v3 = vadd.f32 %v5953_v2, %v5923_v18 }
 0x296   : > { %v5886_v13 = vadd.f32 %v5885_v26, %v5884_v14  ;;  %v5955_v6 = vrot.slane %v5954_v3, 4 }
 0x298   : > { %v5887_v23 = vrot.slane %v5886_v13, 2  ;;  %v5956_v35 = vadd.f32 %v5955_v6, %v5954_v3 }
 0x29a   : > { %v5888_v20 = vadd.f32 %v5887_v23, %v5886_v13  ;;  %v5957_v19 = vrot.slane %v5956_v35, 2 }
 0x29c   : > { %v5889_v63 = vrot.slane %v5888_v20, 1  ;;  %v5958_v62 = vadd.f32 %v5957_v19, %v5956_v35 }
 0x29e   : > { %v5890_v58 = vadd.f32 %v5889_v63, %v5888_v20  ;;  %v5959_v21 = vrot.slane %v5958_v62, 1 }
 0x2a0   : > { %5891 = vst [vmem:[%s235_s23] sm:$0x1] %v5890_v58  ;;  %v5960_v42 = vadd.f32 %v5959_v21, %v5958_v62 }
 0x2a2   : > { %5961 = vst [vmem:[%s235_s23 + $0x1] sm:$0x1] %v5960_v42 }
 0x2a3 PF: > { %s16_s18 = sadd.s32 1, %s7938_s18  }
 0x2a4   : > { %p13_p4 = scmp.ge.s32.totalorder %s16_s18, 4  }
 0x2a6   :  { %15 = sbr.rel (!%p13_p4) target bundleno = 1 (0x1), region = 88 }

</bundles_post_ra>
